<compile_context>
chip_gen: v7x
topology: tpu7x:2x2x1
jax: 0.10.0
libtpu: 0.0.40
codegen_flags: <defaults>
</compile_context>

<pallas_src>
import jax
import jax.numpy as jnp
from jax import lax
from jax.experimental import pallas as pl
from jax.experimental.pallas import tpu as pltpu

EPS = 1e-5  # PyTorch BatchNorm2d default eps


# ----------------------------- fused Pallas kernel --------------------------

def _fused_kernel(x_ref, w0_ref, t0_ref,
                  w1a_ref, t1a_ref, w1b_ref, t1b_ref,
                  w2a_ref, t2a_ref, w2b_ref, t2b_ref,
                  fc1w_ref, fc1b_ref, fc2w_ref, fc2b_ref, fc3w_ref, fc3b_ref,
                  o_ref,
                  pad1a, pad1b, pad2a, pad2b):
    # Static dims derived from ref shapes.
    N = o_ref.shape[0]
    Hp1, Wp1, C0 = pad1a.shape[1] - 2, pad1a.shape[2] - 2, pad1a.shape[3]
    C1 = pad1b.shape[3]
    Hp2, Wp2 = pad2a.shape[1] - 2, pad2a.shape[2] - 2
    H, W = 2 * Hp1, 2 * Wp1

    def pool2x2(v2d, n, h, w):
        # v2d: (n*h*w, c), rows ordered (batch, row, col); channels on lanes.
        c = v2d.shape[1]
        # pool along W: adjacent row pairs (minor lane dim untouched)
        v = v2d.reshape(n * h * (w // 2), 2, c)
        v = jnp.maximum(v[:, 0, :], v[:, 1, :])              # (n*h*w/2, c)
        # pool along H: row pairs w//2 apart
        v = v.reshape(n * (h // 2), 2, w // 2, c)
        v = jnp.maximum(v[:, 0, :, :], v[:, 1, :, :])        # (n*h/2, w/2, c)
        return v.reshape(n, h // 2, w // 2, c)

    def conv3x3_bn_relu(pad_ref, x4d, w_ref, t_ref):
        # x4d: (n, hp, wp, cin); w_ref: (9, cin, cout) with BN scale pre-folded.
        n, hp, wp, cin = x4d.shape
        cout = w_ref.shape[2]
        m = n * hp * wp
        pad_ref[...] = jnp.zeros_like(pad_ref)               # zero border (once)
        pad_ref[:, 1:hp + 1, 1:wp + 1, :] = x4d              # single interior store
        # start the accumulator at the folded conv-bias/BN shift
        acc = jnp.broadcast_to(t_ref[...], (m, cout)).astype(jnp.float32)
        for k in range(9):                                    # 9 tap matmuls, M = m
            dy, dx = k // 3, k % 3
            patch = pad_ref[:, dy:dy + hp, dx:dx + wp, :].reshape(m, cin)
            acc = acc + jnp.dot(patch, w_ref[k],
                                preferred_element_type=jnp.float32)
        return jnp.maximum(acc, 0.0)                         # (m, cout)

    # ---- convfirst: 1x1 conv == per-pixel matmul (BN scale folded) + ReLU ----
    y0 = jnp.dot(x_ref[...], w0_ref[...], preferred_element_type=jnp.float32)
    y0 = jnp.maximum(y0 + t0_ref[...], 0.0)                  # (N*H*W, C0)

    # ---- down1: maxpool + double (3x3 conv + BN + ReLU) ----
    p1 = pool2x2(y0, N, H, W)                                # (N, Hp1, Wp1, C0)
    a1 = conv3x3_bn_relu(pad1a, p1, w1a_ref, t1a_ref)        # (N*Hp1*Wp1, C1)
    b1 = conv3x3_bn_relu(pad1b, a1.reshape(N, Hp1, Wp1, C1),
                         w1b_ref, t1b_ref)                   # (N*Hp1*Wp1, C1)

    # ---- down2 ----
    p2 = pool2x2(b1, N, Hp1, Wp1)                            # (N, Hp2, Wp2, C1)
    a2 = conv3x3_bn_relu(pad2a, p2, w2a_ref, t2a_ref)
    b2 = conv3x3_bn_relu(pad2b, a2.reshape(N, Hp2, Wp2, C1),
                         w2b_ref, t2b_ref)                   # (N*Hp2*Wp2, C1)

    # ---- head: fc1 -> fc2 -> fc3 -> sigmoid ----
    # fc1's weight rows were pre-permuted/reshaped to (npix, C1, 128) so the
    # NHWC pixel-major activation contracts directly (PyTorch view(-1, 512) is
    # NCHW-ordered); summing per-pixel matmuls avoids a lane-changing flatten.
    npix = Hp2 * Wp2
    d1 = fc1w_ref.shape[2]
    act3 = b2.reshape(N, npix, C1)
    h1 = jnp.broadcast_to(fc1b_ref[...], (N, d1)).astype(jnp.float32)
    for pix in range(npix):
        h1 = h1 + jnp.dot(act3[:, pix, :], fc1w_ref[pix],
                          preferred_element_type=jnp.float32)
    h2 = jnp.dot(h1, fc2w_ref[...], preferred_element_type=jnp.float32) + fc2b_ref[...]
    h3 = jnp.dot(h2, fc3w_ref[...], preferred_element_type=jnp.float32) + fc3b_ref[...]
    o_ref[...] = 1.0 / (1.0 + jnp.exp(-h3))


# ----------------------------- wrapper --------------------------------------

def _full_spec(shape):
    nd = len(shape)
    return pl.BlockSpec(shape, lambda *_: (0,) * nd)


def _fold_bn(layer):
    """Eval-mode BN folded into a per-out-channel scale s and shift t."""
    bn = layer['bn']
    s = bn['gamma'] / jnp.sqrt(bn['var'] + EPS)
    t = bn['beta'] + (layer['b'] - bn['mean']) * s
    return s, t.reshape(1, -1)


def cdisc_class32_forward(x_nchw, p):
    N, C, H, W = x_nchw.shape
    ic = C
    c0 = ic // 2
    Hp1, Wp1 = H // 2, W // 2
    Hp2, Wp2 = H // 4, W // 4
    npix = Hp2 * Wp2

    # NCHW -> NHWC, flattened to (pixels, channels) so channels sit on lanes.
    x2d = jnp.transpose(x_nchw, (0, 2, 3, 1)).reshape(N * H * W, C)

    # Fold eval-mode BatchNorm: scale into the conv weights, shift kept separate.
    s0, t0 = _fold_bn(p['cf'])
    s1a, t1a = _fold_bn(p['d1c1'])
    s1b, t1b = _fold_bn(p['d1c2'])
    s2a, t2a = _fold_bn(p['d2c1'])
    s2b, t2b = _fold_bn(p['d2c2'])

    # Conv weights as (9, Cin, Cout) tap matrices (scale folded); 1x1 as (Cin, Cout).
    w0 = p['cf']['w'].reshape(ic, c0) * s0[None, :]
    w1a = p['d1c1']['w'].reshape(9, c0, ic) * s1a[None, None, :]
    w1b = p['d1c2']['w'].reshape(9, ic, ic) * s1b[None, None, :]
    w2a = p['d2c1']['w'].reshape(9, ic, ic) * s2a[None, None, :]
    w2b = p['d2c2']['w'].reshape(9, ic, ic) * s2b[None, None, :]

    # Fold PyTorch's NCHW view(-1, 512) into fc1's weight: (512, 128) rows are
    # indexed by c*npix + pix; regroup to (pix, c, out) for the kernel.
    d1 = p['fc1']['w'].shape[1]
    fc1w = jnp.transpose(p['fc1']['w'].reshape(ic, npix, d1), (1, 0, 2))
    fc1b = p['fc1']['b'].reshape(1, -1)
    fc2w, fc2b = p['fc2']['w'], p['fc2']['b'].reshape(1, -1)
    fc3w, fc3b = p['fc3']['w'], p['fc3']['b'].reshape(1, -1)
    n_cls = fc3w.shape[1]

    args = (x2d, w0, t0,
            w1a, t1a, w1b, t1b,
            w2a, t2a, w2b, t2b,
            fc1w, fc1b, fc2w, fc2b, fc3w, fc3b)

    return pl.pallas_call(
        _fused_kernel,
        out_shape=jax.ShapeDtypeStruct((N, n_cls), jnp.float32),
        grid=(1,),
        in_specs=[_full_spec(a.shape) for a in args],
        out_specs=_full_spec((N, n_cls)),
        scratch_shapes=[
            pltpu.VMEM((N, Hp1 + 2, Wp1 + 2, c0), jnp.float32),  # down1 conv1 pad
            pltpu.VMEM((N, Hp1 + 2, Wp1 + 2, ic), jnp.float32),  # down1 conv2 pad
            pltpu.VMEM((N, Hp2 + 2, Wp2 + 2, ic), jnp.float32),  # down2 conv1 pad
            pltpu.VMEM((N, Hp2 + 2, Wp2 + 2, ic), jnp.float32),  # down2 conv2 pad
        ],
        compiler_params=pltpu.CompilerParams(
            dimension_semantics=("arbitrary",)),
    )(*args)


# ----------------------------- parameters -----------------------------------

def init_params(key, init_channels=32):
    ic = init_channels
    c0 = ic // 2
    ks = jax.random.split(key, 40)
    counter = iter(range(40))

    def nrm(shape, scale=0.1):
        return scale * jax.random.normal(ks[next(counter)], shape, jnp.float32)

    def bn(c):
        return dict(gamma=1.0 + nrm((c,)), beta=nrm((c,)),
                    mean=nrm((c,)), var=0.5 + jnp.abs(nrm((c,), 0.2)))

    # conv weights stored HWIO (kh, kw, Cin, Cout); linear weights (in, out)
    return dict(
        cf=dict(w=nrm((1, 1, ic, c0)), b=nrm((c0,)), bn=bn(c0)),
        d1c1=dict(w=nrm((3, 3, c0, ic)), b=nrm((ic,)), bn=bn(ic)),
        d1c2=dict(w=nrm((3, 3, ic, ic)), b=nrm((ic,)), bn=bn(ic)),
        d2c1=dict(w=nrm((3, 3, ic, ic)), b=nrm((ic,)), bn=bn(ic)),
        d2c2=dict(w=nrm((3, 3, ic, ic)), b=nrm((ic,)), bn=bn(ic)),
        fc1=dict(w=nrm((512, 128)), b=nrm((128,))),
        fc2=dict(w=nrm((128, 32)), b=nrm((32,))),
        fc3=dict(w=nrm((32, 2)), b=nrm((2,))),
    )


# ----------------------------- pure-JAX reference ---------------------------

def reference_forward(x, p):
    hp = lax.Precision.HIGHEST

    def cbr(z, layer, padding):
        y = lax.conv_general_dilated(z, layer['w'], (1, 1), padding,
                                     dimension_numbers=('NCHW', 'HWIO', 'NCHW'),
                                     precision=hp)
        y = y + layer['b'][None, :, None, None]
        bn = layer['bn']
        scale = bn['gamma'] / jnp.sqrt(bn['var'] + EPS)
        y = (y - bn['mean'][None, :, None, None]) * scale[None, :, None, None] \
            + bn['beta'][None, :, None, None]
        return jnp.maximum(y, 0.0)

    def pool(z):
        return lax.reduce_window(z, -jnp.inf, lax.max,
                                 (1, 1, 2, 2), (1, 1, 2, 2), 'VALID')

    y = cbr(x, p['cf'], 'VALID')
    y = cbr(cbr(pool(y), p['d1c1'], 'SAME'), p['d1c2'], 'SAME')
    y = cbr(cbr(pool(y), p['d2c1'], 'SAME'), p['d2c2'], 'SAME')
    y = y.reshape(x.shape[0], -1)
    y = jnp.dot(y, p['fc1']['w'], precision=hp) + p['fc1']['b']
    y = jnp.dot(y, p['fc2']['w'], precision=hp) + p['fc2']['b']
    y = jnp.dot(y, p['fc3']['w'], precision=hp) + p['fc3']['b']
    return 1.0 / (1.0 + jnp.exp(-y))


# ----------------------------- main ------------------------------------------

if __name__ == "__main__":
    # init_channels = 32 -> after convfirst + two Down blocks on a 16x16 input:
    # 32 channels * 4 * 4 spatial = 512 features, matching x1.view(-1, 512).
    N, IC, H, W = 2, 32, 16, 16
    key = jax.random.PRNGKey(0)
    kx, kp = jax.random.split(key)
    x = jax.random.normal(kx, (N, IC, H, W), jnp.float32)
    params = init_params(kp, IC)

    out = jax.jit(cdisc_class32_forward)(x, params)
    out = jax.block_until_ready(out)

    ref = reference_forward(x, params)
    assert out.shape == (N, 2), out.shape
    err = float(jnp.max(jnp.abs(out - ref)))
    assert err < 5e-3, f"max abs err vs reference: {err}"

    print("KERNEL_OK")
</pallas_src>

<mosaic_0001>
module attributes {stable_mosaic.version = 11 : i64} {
  func.func @_fused_kernel(%arg0: i32, %arg1: memref<512x32xf32, #tpu.memory_space<vmem>>, %arg2: memref<32x16xf32, #tpu.memory_space<vmem>>, %arg3: memref<1x16xf32, #tpu.memory_space<vmem>>, %arg4: memref<9x16x32xf32, #tpu.memory_space<vmem>>, %arg5: memref<1x32xf32, #tpu.memory_space<vmem>>, %arg6: memref<9x32x32xf32, #tpu.memory_space<vmem>>, %arg7: memref<1x32xf32, #tpu.memory_space<vmem>>, %arg8: memref<9x32x32xf32, #tpu.memory_space<vmem>>, %arg9: memref<1x32xf32, #tpu.memory_space<vmem>>, %arg10: memref<9x32x32xf32, #tpu.memory_space<vmem>>, %arg11: memref<1x32xf32, #tpu.memory_space<vmem>>, %arg12: memref<16x32x128xf32, #tpu.memory_space<vmem>>, %arg13: memref<1x128xf32, #tpu.memory_space<vmem>>, %arg14: memref<128x32xf32, #tpu.memory_space<vmem>>, %arg15: memref<1x32xf32, #tpu.memory_space<vmem>>, %arg16: memref<32x2xf32, #tpu.memory_space<vmem>>, %arg17: memref<1x2xf32, #tpu.memory_space<vmem>>, %arg18: memref<2x2xf32, #tpu.memory_space<vmem>>, %arg19: memref<2x10x10x16xf32, #tpu.memory_space<vmem>>, %arg20: memref<2x10x10x32xf32, #tpu.memory_space<vmem>>, %arg21: memref<2x6x6x32xf32, #tpu.memory_space<vmem>>, %arg22: memref<2x6x6x32xf32, #tpu.memory_space<vmem>>) attributes {dimension_semantics = [#tpu.dimension_semantics<arbitrary>], iteration_bounds = array<i64: 1>, scalar_prefetch = 0 : i64, scratch_operands = 4 : i64, tpu.core_type = #tpu.core_type<tc>, window_params = [{pipeline_mode = #tpu.pipeline_mode<synchronous>, transform_indices = @transform_0, window_bounds = array<i64: 512, 32>}, {pipeline_mode = #tpu.pipeline_mode<synchronous>, transform_indices = @transform_1, window_bounds = array<i64: 32, 16>}, {pipeline_mode = #tpu.pipeline_mode<synchronous>, transform_indices = @transform_2, window_bounds = array<i64: 1, 16>}, {pipeline_mode = #tpu.pipeline_mode<synchronous>, transform_indices = @transform_3, window_bounds = array<i64: 9, 16, 32>}, {pipeline_mode = #tpu.pipeline_mode<synchronous>, transform_indices = @transform_4, window_bounds = array<i64: 1, 32>}, {pipeline_mode = #tpu.pipeline_mode<synchronous>, transform_indices = @transform_5, window_bounds = array<i64: 9, 32, 32>}, {pipeline_mode = #tpu.pipeline_mode<synchronous>, transform_indices = @transform_6, window_bounds = array<i64: 1, 32>}, {pipeline_mode = #tpu.pipeline_mode<synchronous>, transform_indices = @transform_7, window_bounds = array<i64: 9, 32, 32>}, {pipeline_mode = #tpu.pipeline_mode<synchronous>, transform_indices = @transform_8, window_bounds = array<i64: 1, 32>}, {pipeline_mode = #tpu.pipeline_mode<synchronous>, transform_indices = @transform_9, window_bounds = array<i64: 9, 32, 32>}, {pipeline_mode = #tpu.pipeline_mode<synchronous>, transform_indices = @transform_10, window_bounds = array<i64: 1, 32>}, {pipeline_mode = #tpu.pipeline_mode<synchronous>, transform_indices = @transform_11, window_bounds = array<i64: 16, 32, 128>}, {pipeline_mode = #tpu.pipeline_mode<synchronous>, transform_indices = @transform_12, window_bounds = array<i64: 1, 128>}, {pipeline_mode = #tpu.pipeline_mode<synchronous>, transform_indices = @transform_13, window_bounds = array<i64: 128, 32>}, {pipeline_mode = #tpu.pipeline_mode<synchronous>, transform_indices = @transform_14, window_bounds = array<i64: 1, 32>}, {pipeline_mode = #tpu.pipeline_mode<synchronous>, transform_indices = @transform_15, window_bounds = array<i64: 32, 2>}, {pipeline_mode = #tpu.pipeline_mode<synchronous>, transform_indices = @transform_16, window_bounds = array<i64: 1, 2>}, {pipeline_mode = #tpu.pipeline_mode<synchronous>, transform_indices = @transform_17, window_bounds = array<i64: 2, 2>}]} {
    %c0 = arith.constant 0 : index
    %c0_0 = arith.constant 0 : index
    %0 = vector.load %arg1[%c0, %c0_0] : memref<512x32xf32, #tpu.memory_space<vmem>>, vector<512x32xf32>
    %c0_1 = arith.constant 0 : index
    %c0_2 = arith.constant 0 : index
    %1 = vector.load %arg2[%c0_1, %c0_2] : memref<32x16xf32, #tpu.memory_space<vmem>>, vector<32x16xf32>
    %cst = arith.constant dense<0.000000e+00> : vector<512x16xf32>
    %2 = tpu.matmul %0, %1, %cst {dimension_numbers = #tpu.dot_dimension_numbers<[1], [0], [0], [1], [0, 0, 1, 1], [], []>} : vector<512x32xf32>, vector<32x16xf32>, vector<512x16xf32> -> vector<512x16xf32>
    %c0_3 = arith.constant 0 : index
    %c0_4 = arith.constant 0 : index
    %3 = vector.load %arg3[%c0_3, %c0_4] : memref<1x16xf32, #tpu.memory_space<vmem>>, vector<1x16xf32>
    %4 = vector.broadcast %3 : vector<1x16xf32> to vector<512x16xf32>
    %5 = arith.addf %2, %4 : vector<512x16xf32>
    %cst_5 = arith.constant 0.000000e+00 : f32
    %6 = vector.broadcast %cst_5 : f32 to vector<512x16xf32>
    %7 = arith.maximumf %5, %6 : vector<512x16xf32>
    %8 = vector.shape_cast %7 : vector<512x16xf32> to vector<256x2x16xf32>
    %9 = vector.extract_strided_slice %8 {offsets = [0, 0, 0], sizes = [256, 1, 16], strides = [1, 1, 1]} : vector<256x2x16xf32> to vector<256x1x16xf32>
    %10 = vector.shape_cast %9 : vector<256x1x16xf32> to vector<256x16xf32>
    %11 = vector.extract_strided_slice %8 {offsets = [0, 1, 0], sizes = [256, 1, 16], strides = [1, 1, 1]} : vector<256x2x16xf32> to vector<256x1x16xf32>
    %12 = vector.shape_cast %11 : vector<256x1x16xf32> to vector<256x16xf32>
    %13 = arith.maximumf %10, %12 : vector<256x16xf32>
    %14 = vector.shape_cast %13 : vector<256x16xf32> to vector<16x2x8x16xf32>
    %15 = vector.extract_strided_slice %14 {offsets = [0, 0, 0, 0], sizes = [16, 1, 8, 16], strides = [1, 1, 1, 1]} : vector<16x2x8x16xf32> to vector<16x1x8x16xf32>
    %16 = vector.shape_cast %15 : vector<16x1x8x16xf32> to vector<16x8x16xf32>
    %17 = vector.extract_strided_slice %14 {offsets = [0, 1, 0, 0], sizes = [16, 1, 8, 16], strides = [1, 1, 1, 1]} : vector<16x2x8x16xf32> to vector<16x1x8x16xf32>
    %18 = vector.shape_cast %17 : vector<16x1x8x16xf32> to vector<16x8x16xf32>
    %19 = arith.maximumf %16, %18 : vector<16x8x16xf32>
    %20 = vector.shape_cast %19 : vector<16x8x16xf32> to vector<2x8x8x16xf32>
    %cst_6 = arith.constant 0.000000e+00 : f32
    %21 = vector.broadcast %cst_6 : f32 to vector<2x10x10x16xf32>
    %c0_7 = arith.constant 0 : index
    %c0_8 = arith.constant 0 : index
    %c0_9 = arith.constant 0 : index
    %c0_10 = arith.constant 0 : index
    %22 = vector.load %arg19[%c0_7, %c0_8, %c0_9, %c0_10] : memref<2x10x10x16xf32, #tpu.memory_space<vmem>>, vector<2x10x10x16xf32>
    tpu.vector_store %arg19[%c0_7, %c0_8, %c0_9, %c0_10], %21 {strides = array<i32>} : memref<2x10x10x16xf32, #tpu.memory_space<vmem>>, vector<2x10x10x16xf32>,
    %c0_11 = arith.constant 0 : index
    %c1 = arith.constant 1 : index
    %c1_12 = arith.constant 1 : index
    %c0_13 = arith.constant 0 : index
    %23 = vector.load %arg19[%c0_11, %c1, %c1_12, %c0_13] : memref<2x10x10x16xf32, #tpu.memory_space<vmem>>, vector<2x8x8x16xf32>
    tpu.vector_store %arg19[%c0_11, %c1, %c1_12, %c0_13], %20 {strides = array<i32>} : memref<2x10x10x16xf32, #tpu.memory_space<vmem>>, vector<2x8x8x16xf32>,
    %c0_14 = arith.constant 0 : index
    %c0_15 = arith.constant 0 : index
    %24 = vector.load %arg5[%c0_14, %c0_15] : memref<1x32xf32, #tpu.memory_space<vmem>>, vector<1x32xf32>
    %25 = vector.shape_cast %24 : vector<1x32xf32> to vector<1x32xf32>
    %26 = vector.broadcast %25 : vector<1x32xf32> to vector<128x32xf32>
    %c0_16 = arith.constant 0 : index
    %c0_17 = arith.constant 0 : index
    %c0_18 = arith.constant 0 : index
    %c0_19 = arith.constant 0 : index
    %27 = vector.load %arg19[%c0_16, %c0_17, %c0_18, %c0_19] : memref<2x10x10x16xf32, #tpu.memory_space<vmem>>, vector<2x8x8x16xf32>
    %28 = vector.shape_cast %27 : vector<2x8x8x16xf32> to vector<128x16xf32>
    %c0_20 = arith.constant 0 : index
    %c0_21 = arith.constant 0 : index
    %c0_22 = arith.constant 0 : index
    %29 = vector.load %arg4[%c0_20, %c0_21, %c0_22] : memref<9x16x32xf32, #tpu.memory_space<vmem>>, vector<1x16x32xf32>
    %30 = vector.shape_cast %29 : vector<1x16x32xf32> to vector<16x32xf32>
    %cst_23 = arith.constant dense<0.000000e+00> : vector<128x32xf32>
    %31 = tpu.matmul %28, %30, %cst_23 {dimension_numbers = #tpu.dot_dimension_numbers<[1], [0], [0], [1], [0, 0, 1, 1], [], []>} : vector<128x16xf32>, vector<16x32xf32>, vector<128x32xf32> -> vector<128x32xf32>
    %32 = arith.addf %26, %31 : vector<128x32xf32>
    %c0_24 = arith.constant 0 : index
    %c0_25 = arith.constant 0 : index
    %c1_26 = arith.constant 1 : index
    %c0_27 = arith.constant 0 : index
    %33 = vector.load %arg19[%c0_24, %c0_25, %c1_26, %c0_27] : memref<2x10x10x16xf32, #tpu.memory_space<vmem>>, vector<2x8x8x16xf32>
    %34 = vector.shape_cast %33 : vector<2x8x8x16xf32> to vector<128x16xf32>
    %c1_28 = arith.constant 1 : index
    %c0_29 = arith.constant 0 : index
    %c0_30 = arith.constant 0 : index
    %35 = vector.load %arg4[%c1_28, %c0_29, %c0_30] : memref<9x16x32xf32, #tpu.memory_space<vmem>>, vector<1x16x32xf32>
    %36 = vector.shape_cast %35 : vector<1x16x32xf32> to vector<16x32xf32>
    %cst_31 = arith.constant dense<0.000000e+00> : vector<128x32xf32>
    %37 = tpu.matmul %34, %36, %cst_31 {dimension_numbers = #tpu.dot_dimension_numbers<[1], [0], [0], [1], [0, 0, 1, 1], [], []>} : vector<128x16xf32>, vector<16x32xf32>, vector<128x32xf32> -> vector<128x32xf32>
    %38 = arith.addf %32, %37 : vector<128x32xf32>
    %c0_32 = arith.constant 0 : index
    %c0_33 = arith.constant 0 : index
    %c2 = arith.constant 2 : index
    %c0_34 = arith.constant 0 : index
    %39 = vector.load %arg19[%c0_32, %c0_33, %c2, %c0_34] : memref<2x10x10x16xf32, #tpu.memory_space<vmem>>, vector<2x8x8x16xf32>
    %40 = vector.shape_cast %39 : vector<2x8x8x16xf32> to vector<128x16xf32>
    %c2_35 = arith.constant 2 : index
    %c0_36 = arith.constant 0 : index
    %c0_37 = arith.constant 0 : index
    %41 = vector.load %arg4[%c2_35, %c0_36, %c0_37] : memref<9x16x32xf32, #tpu.memory_space<vmem>>, vector<1x16x32xf32>
    %42 = vector.shape_cast %41 : vector<1x16x32xf32> to vector<16x32xf32>
    %cst_38 = arith.constant dense<0.000000e+00> : vector<128x32xf32>
    %43 = tpu.matmul %40, %42, %cst_38 {dimension_numbers = #tpu.dot_dimension_numbers<[1], [0], [0], [1], [0, 0, 1, 1], [], []>} : vector<128x16xf32>, vector<16x32xf32>, vector<128x32xf32> -> vector<128x32xf32>
    %44 = arith.addf %38, %43 : vector<128x32xf32>
    %c0_39 = arith.constant 0 : index
    %c1_40 = arith.constant 1 : index
    %c0_41 = arith.constant 0 : index
    %c0_42 = arith.constant 0 : index
    %45 = vector.load %arg19[%c0_39, %c1_40, %c0_41, %c0_42] : memref<2x10x10x16xf32, #tpu.memory_space<vmem>>, vector<2x8x8x16xf32>
    %46 = vector.shape_cast %45 : vector<2x8x8x16xf32> to vector<128x16xf32>
    %c3 = arith.constant 3 : index
    %c0_43 = arith.constant 0 : index
    %c0_44 = arith.constant 0 : index
    %47 = vector.load %arg4[%c3, %c0_43, %c0_44] : memref<9x16x32xf32, #tpu.memory_space<vmem>>, vector<1x16x32xf32>
    %48 = vector.shape_cast %47 : vector<1x16x32xf32> to vector<16x32xf32>
    %cst_45 = arith.constant dense<0.000000e+00> : vector<128x32xf32>
    %49 = tpu.matmul %46, %48, %cst_45 {dimension_numbers = #tpu.dot_dimension_numbers<[1], [0], [0], [1], [0, 0, 1, 1], [], []>} : vector<128x16xf32>, vector<16x32xf32>, vector<128x32xf32> -> vector<128x32xf32>
    %50 = arith.addf %44, %49 : vector<128x32xf32>
    %c0_46 = arith.constant 0 : index
    %c1_47 = arith.constant 1 : index
    %c1_48 = arith.constant 1 : index
    %c0_49 = arith.constant 0 : index
    %51 = vector.load %arg19[%c0_46, %c1_47, %c1_48, %c0_49] : memref<2x10x10x16xf32, #tpu.memory_space<vmem>>, vector<2x8x8x16xf32>
    %52 = vector.shape_cast %51 : vector<2x8x8x16xf32> to vector<128x16xf32>
    %c4 = arith.constant 4 : index
    %c0_50 = arith.constant 0 : index
    %c0_51 = arith.constant 0 : index
    %53 = vector.load %arg4[%c4, %c0_50, %c0_51] : memref<9x16x32xf32, #tpu.memory_space<vmem>>, vector<1x16x32xf32>
    %54 = vector.shape_cast %53 : vector<1x16x32xf32> to vector<16x32xf32>
    %cst_52 = arith.constant dense<0.000000e+00> : vector<128x32xf32>
    %55 = tpu.matmul %52, %54, %cst_52 {dimension_numbers = #tpu.dot_dimension_numbers<[1], [0], [0], [1], [0, 0, 1, 1], [], []>} : vector<128x16xf32>, vector<16x32xf32>, vector<128x32xf32> -> vector<128x32xf32>
    %56 = arith.addf %50, %55 : vector<128x32xf32>
    %c0_53 = arith.constant 0 : index
    %c1_54 = arith.constant 1 : index
    %c2_55 = arith.constant 2 : index
    %c0_56 = arith.constant 0 : index
    %57 = vector.load %arg19[%c0_53, %c1_54, %c2_55, %c0_56] : memref<2x10x10x16xf32, #tpu.memory_space<vmem>>, vector<2x8x8x16xf32>
    %58 = vector.shape_cast %57 : vector<2x8x8x16xf32> to vector<128x16xf32>
    %c5 = arith.constant 5 : index
    %c0_57 = arith.constant 0 : index
    %c0_58 = arith.constant 0 : index
    %59 = vector.load %arg4[%c5, %c0_57, %c0_58] : memref<9x16x32xf32, #tpu.memory_space<vmem>>, vector<1x16x32xf32>
    %60 = vector.shape_cast %59 : vector<1x16x32xf32> to vector<16x32xf32>
    %cst_59 = arith.constant dense<0.000000e+00> : vector<128x32xf32>
    %61 = tpu.matmul %58, %60, %cst_59 {dimension_numbers = #tpu.dot_dimension_numbers<[1], [0], [0], [1], [0, 0, 1, 1], [], []>} : vector<128x16xf32>, vector<16x32xf32>, vector<128x32xf32> -> vector<128x32xf32>
    %62 = arith.addf %56, %61 : vector<128x32xf32>
    %c0_60 = arith.constant 0 : index
    %c2_61 = arith.constant 2 : index
    %c0_62 = arith.constant 0 : index
    %c0_63 = arith.constant 0 : index
    %63 = vector.load %arg19[%c0_60, %c2_61, %c0_62, %c0_63] : memref<2x10x10x16xf32, #tpu.memory_space<vmem>>, vector<2x8x8x16xf32>
    %64 = vector.shape_cast %63 : vector<2x8x8x16xf32> to vector<128x16xf32>
    %c6 = arith.constant 6 : index
    %c0_64 = arith.constant 0 : index
    %c0_65 = arith.constant 0 : index
    %65 = vector.load %arg4[%c6, %c0_64, %c0_65] : memref<9x16x32xf32, #tpu.memory_space<vmem>>, vector<1x16x32xf32>
    %66 = vector.shape_cast %65 : vector<1x16x32xf32> to vector<16x32xf32>
    %cst_66 = arith.constant dense<0.000000e+00> : vector<128x32xf32>
    %67 = tpu.matmul %64, %66, %cst_66 {dimension_numbers = #tpu.dot_dimension_numbers<[1], [0], [0], [1], [0, 0, 1, 1], [], []>} : vector<128x16xf32>, vector<16x32xf32>, vector<128x32xf32> -> vector<128x32xf32>
    %68 = arith.addf %62, %67 : vector<128x32xf32>
    %c0_67 = arith.constant 0 : index
    %c2_68 = arith.constant 2 : index
    %c1_69 = arith.constant 1 : index
    %c0_70 = arith.constant 0 : index
    %69 = vector.load %arg19[%c0_67, %c2_68, %c1_69, %c0_70] : memref<2x10x10x16xf32, #tpu.memory_space<vmem>>, vector<2x8x8x16xf32>
    %70 = vector.shape_cast %69 : vector<2x8x8x16xf32> to vector<128x16xf32>
    %c7 = arith.constant 7 : index
    %c0_71 = arith.constant 0 : index
    %c0_72 = arith.constant 0 : index
    %71 = vector.load %arg4[%c7, %c0_71, %c0_72] : memref<9x16x32xf32, #tpu.memory_space<vmem>>, vector<1x16x32xf32>
    %72 = vector.shape_cast %71 : vector<1x16x32xf32> to vector<16x32xf32>
    %cst_73 = arith.constant dense<0.000000e+00> : vector<128x32xf32>
    %73 = tpu.matmul %70, %72, %cst_73 {dimension_numbers = #tpu.dot_dimension_numbers<[1], [0], [0], [1], [0, 0, 1, 1], [], []>} : vector<128x16xf32>, vector<16x32xf32>, vector<128x32xf32> -> vector<128x32xf32>
    %74 = arith.addf %68, %73 : vector<128x32xf32>
    %c0_74 = arith.constant 0 : index
    %c2_75 = arith.constant 2 : index
    %c2_76 = arith.constant 2 : index
    %c0_77 = arith.constant 0 : index
    %75 = vector.load %arg19[%c0_74, %c2_75, %c2_76, %c0_77] : memref<2x10x10x16xf32, #tpu.memory_space<vmem>>, vector<2x8x8x16xf32>
    %76 = vector.shape_cast %75 : vector<2x8x8x16xf32> to vector<128x16xf32>
    %c8 = arith.constant 8 : index
    %c0_78 = arith.constant 0 : index
    %c0_79 = arith.constant 0 : index
    %77 = vector.load %arg4[%c8, %c0_78, %c0_79] : memref<9x16x32xf32, #tpu.memory_space<vmem>>, vector<1x16x32xf32>
    %78 = vector.shape_cast %77 : vector<1x16x32xf32> to vector<16x32xf32>
    %cst_80 = arith.constant dense<0.000000e+00> : vector<128x32xf32>
    %79 = tpu.matmul %76, %78, %cst_80 {dimension_numbers = #tpu.dot_dimension_numbers<[1], [0], [0], [1], [0, 0, 1, 1], [], []>} : vector<128x16xf32>, vector<16x32xf32>, vector<128x32xf32> -> vector<128x32xf32>
    %80 = arith.addf %74, %79 : vector<128x32xf32>
    %cst_81 = arith.constant 0.000000e+00 : f32
    %81 = vector.broadcast %cst_81 : f32 to vector<128x32xf32>
    %82 = arith.maximumf %80, %81 : vector<128x32xf32>
    %83 = vector.shape_cast %82 : vector<128x32xf32> to vector<2x8x8x32xf32>
    %cst_82 = arith.constant 0.000000e+00 : f32
    %84 = vector.broadcast %cst_82 : f32 to vector<2x10x10x32xf32>
    %c0_83 = arith.constant 0 : index
    %c0_84 = arith.constant 0 : index
    %c0_85 = arith.constant 0 : index
    %c0_86 = arith.constant 0 : index
    %85 = vector.load %arg20[%c0_83, %c0_84, %c0_85, %c0_86] : memref<2x10x10x32xf32, #tpu.memory_space<vmem>>, vector<2x10x10x32xf32>
    tpu.vector_store %arg20[%c0_83, %c0_84, %c0_85, %c0_86], %84 {strides = array<i32>} : memref<2x10x10x32xf32, #tpu.memory_space<vmem>>, vector<2x10x10x32xf32>,
    %c0_87 = arith.constant 0 : index
    %c1_88 = arith.constant 1 : index
    %c1_89 = arith.constant 1 : index
    %c0_90 = arith.constant 0 : index
    %86 = vector.load %arg20[%c0_87, %c1_88, %c1_89, %c0_90] : memref<2x10x10x32xf32, #tpu.memory_space<vmem>>, vector<2x8x8x32xf32>
    tpu.vector_store %arg20[%c0_87, %c1_88, %c1_89, %c0_90], %83 {strides = array<i32>} : memref<2x10x10x32xf32, #tpu.memory_space<vmem>>, vector<2x8x8x32xf32>,
    %c0_91 = arith.constant 0 : index
    %c0_92 = arith.constant 0 : index
    %87 = vector.load %arg7[%c0_91, %c0_92] : memref<1x32xf32, #tpu.memory_space<vmem>>, vector<1x32xf32>
    %88 = vector.shape_cast %87 : vector<1x32xf32> to vector<1x32xf32>
    %89 = vector.broadcast %88 : vector<1x32xf32> to vector<128x32xf32>
    %c0_93 = arith.constant 0 : index
    %c0_94 = arith.constant 0 : index
    %c0_95 = arith.constant 0 : index
    %c0_96 = arith.constant 0 : index
    %90 = vector.load %arg20[%c0_93, %c0_94, %c0_95, %c0_96] : memref<2x10x10x32xf32, #tpu.memory_space<vmem>>, vector<2x8x8x32xf32>
    %91 = vector.shape_cast %90 : vector<2x8x8x32xf32> to vector<128x32xf32>
    %c0_97 = arith.constant 0 : index
    %c0_98 = arith.constant 0 : index
    %c0_99 = arith.constant 0 : index
    %92 = vector.load %arg6[%c0_97, %c0_98, %c0_99] : memref<9x32x32xf32, #tpu.memory_space<vmem>>, vector<1x32x32xf32>
    %93 = vector.shape_cast %92 : vector<1x32x32xf32> to vector<32x32xf32>
    %cst_100 = arith.constant dense<0.000000e+00> : vector<128x32xf32>
    %94 = tpu.matmul %91, %93, %cst_100 {dimension_numbers = #tpu.dot_dimension_numbers<[1], [0], [0], [1], [0, 0, 1, 1], [], []>} : vector<128x32xf32>, vector<32x32xf32>, vector<128x32xf32> -> vector<128x32xf32>
    %95 = arith.addf %89, %94 : vector<128x32xf32>
    %c0_101 = arith.constant 0 : index
    %c0_102 = arith.constant 0 : index
    %c1_103 = arith.constant 1 : index
    %c0_104 = arith.constant 0 : index
    %96 = vector.load %arg20[%c0_101, %c0_102, %c1_103, %c0_104] : memref<2x10x10x32xf32, #tpu.memory_space<vmem>>, vector<2x8x8x32xf32>
    %97 = vector.shape_cast %96 : vector<2x8x8x32xf32> to vector<128x32xf32>
    %c1_105 = arith.constant 1 : index
    %c0_106 = arith.constant 0 : index
    %c0_107 = arith.constant 0 : index
    %98 = vector.load %arg6[%c1_105, %c0_106, %c0_107] : memref<9x32x32xf32, #tpu.memory_space<vmem>>, vector<1x32x32xf32>
    %99 = vector.shape_cast %98 : vector<1x32x32xf32> to vector<32x32xf32>
    %cst_108 = arith.constant dense<0.000000e+00> : vector<128x32xf32>
    %100 = tpu.matmul %97, %99, %cst_108 {dimension_numbers = #tpu.dot_dimension_numbers<[1], [0], [0], [1], [0, 0, 1, 1], [], []>} : vector<128x32xf32>, vector<32x32xf32>, vector<128x32xf32> -> vector<128x32xf32>
    %101 = arith.addf %95, %100 : vector<128x32xf32>
    %c0_109 = arith.constant 0 : index
    %c0_110 = arith.constant 0 : index
    %c2_111 = arith.constant 2 : index
    %c0_112 = arith.constant 0 : index
    %102 = vector.load %arg20[%c0_109, %c0_110, %c2_111, %c0_112] : memref<2x10x10x32xf32, #tpu.memory_space<vmem>>, vector<2x8x8x32xf32>
    %103 = vector.shape_cast %102 : vector<2x8x8x32xf32> to vector<128x32xf32>
    %c2_113 = arith.constant 2 : index
    %c0_114 = arith.constant 0 : index
    %c0_115 = arith.constant 0 : index
    %104 = vector.load %arg6[%c2_113, %c0_114, %c0_115] : memref<9x32x32xf32, #tpu.memory_space<vmem>>, vector<1x32x32xf32>
    %105 = vector.shape_cast %104 : vector<1x32x32xf32> to vector<32x32xf32>
    %cst_116 = arith.constant dense<0.000000e+00> : vector<128x32xf32>
    %106 = tpu.matmul %103, %105, %cst_116 {dimension_numbers = #tpu.dot_dimension_numbers<[1], [0], [0], [1], [0, 0, 1, 1], [], []>} : vector<128x32xf32>, vector<32x32xf32>, vector<128x32xf32> -> vector<128x32xf32>
    %107 = arith.addf %101, %106 : vector<128x32xf32>
    %c0_117 = arith.constant 0 : index
    %c1_118 = arith.constant 1 : index
    %c0_119 = arith.constant 0 : index
    %c0_120 = arith.constant 0 : index
    %108 = vector.load %arg20[%c0_117, %c1_118, %c0_119, %c0_120] : memref<2x10x10x32xf32, #tpu.memory_space<vmem>>, vector<2x8x8x32xf32>
    %109 = vector.shape_cast %108 : vector<2x8x8x32xf32> to vector<128x32xf32>
    %c3_121 = arith.constant 3 : index
    %c0_122 = arith.constant 0 : index
    %c0_123 = arith.constant 0 : index
    %110 = vector.load %arg6[%c3_121, %c0_122, %c0_123] : memref<9x32x32xf32, #tpu.memory_space<vmem>>, vector<1x32x32xf32>
    %111 = vector.shape_cast %110 : vector<1x32x32xf32> to vector<32x32xf32>
    %cst_124 = arith.constant dense<0.000000e+00> : vector<128x32xf32>
    %112 = tpu.matmul %109, %111, %cst_124 {dimension_numbers = #tpu.dot_dimension_numbers<[1], [0], [0], [1], [0, 0, 1, 1], [], []>} : vector<128x32xf32>, vector<32x32xf32>, vector<128x32xf32> -> vector<128x32xf32>
    %113 = arith.addf %107, %112 : vector<128x32xf32>
    %c0_125 = arith.constant 0 : index
    %c1_126 = arith.constant 1 : index
    %c1_127 = arith.constant 1 : index
    %c0_128 = arith.constant 0 : index
    %114 = vector.load %arg20[%c0_125, %c1_126, %c1_127, %c0_128] : memref<2x10x10x32xf32, #tpu.memory_space<vmem>>, vector<2x8x8x32xf32>
    %115 = vector.shape_cast %114 : vector<2x8x8x32xf32> to vector<128x32xf32>
    %c4_129 = arith.constant 4 : index
    %c0_130 = arith.constant 0 : index
    %c0_131 = arith.constant 0 : index
    %116 = vector.load %arg6[%c4_129, %c0_130, %c0_131] : memref<9x32x32xf32, #tpu.memory_space<vmem>>, vector<1x32x32xf32>
    %117 = vector.shape_cast %116 : vector<1x32x32xf32> to vector<32x32xf32>
    %cst_132 = arith.constant dense<0.000000e+00> : vector<128x32xf32>
    %118 = tpu.matmul %115, %117, %cst_132 {dimension_numbers = #tpu.dot_dimension_numbers<[1], [0], [0], [1], [0, 0, 1, 1], [], []>} : vector<128x32xf32>, vector<32x32xf32>, vector<128x32xf32> -> vector<128x32xf32>
    %119 = arith.addf %113, %118 : vector<128x32xf32>
    %c0_133 = arith.constant 0 : index
    %c1_134 = arith.constant 1 : index
    %c2_135 = arith.constant 2 : index
    %c0_136 = arith.constant 0 : index
    %120 = vector.load %arg20[%c0_133, %c1_134, %c2_135, %c0_136] : memref<2x10x10x32xf32, #tpu.memory_space<vmem>>, vector<2x8x8x32xf32>
    %121 = vector.shape_cast %120 : vector<2x8x8x32xf32> to vector<128x32xf32>
    %c5_137 = arith.constant 5 : index
    %c0_138 = arith.constant 0 : index
    %c0_139 = arith.constant 0 : index
    %122 = vector.load %arg6[%c5_137, %c0_138, %c0_139] : memref<9x32x32xf32, #tpu.memory_space<vmem>>, vector<1x32x32xf32>
    %123 = vector.shape_cast %122 : vector<1x32x32xf32> to vector<32x32xf32>
    %cst_140 = arith.constant dense<0.000000e+00> : vector<128x32xf32>
    %124 = tpu.matmul %121, %123, %cst_140 {dimension_numbers = #tpu.dot_dimension_numbers<[1], [0], [0], [1], [0, 0, 1, 1], [], []>} : vector<128x32xf32>, vector<32x32xf32>, vector<128x32xf32> -> vector<128x32xf32>
    %125 = arith.addf %119, %124 : vector<128x32xf32>
    %c0_141 = arith.constant 0 : index
    %c2_142 = arith.constant 2 : index
    %c0_143 = arith.constant 0 : index
    %c0_144 = arith.constant 0 : index
    %126 = vector.load %arg20[%c0_141, %c2_142, %c0_143, %c0_144] : memref<2x10x10x32xf32, #tpu.memory_space<vmem>>, vector<2x8x8x32xf32>
    %127 = vector.shape_cast %126 : vector<2x8x8x32xf32> to vector<128x32xf32>
    %c6_145 = arith.constant 6 : index
    %c0_146 = arith.constant 0 : index
    %c0_147 = arith.constant 0 : index
    %128 = vector.load %arg6[%c6_145, %c0_146, %c0_147] : memref<9x32x32xf32, #tpu.memory_space<vmem>>, vector<1x32x32xf32>
    %129 = vector.shape_cast %128 : vector<1x32x32xf32> to vector<32x32xf32>
    %cst_148 = arith.constant dense<0.000000e+00> : vector<128x32xf32>
    %130 = tpu.matmul %127, %129, %cst_148 {dimension_numbers = #tpu.dot_dimension_numbers<[1], [0], [0], [1], [0, 0, 1, 1], [], []>} : vector<128x32xf32>, vector<32x32xf32>, vector<128x32xf32> -> vector<128x32xf32>
    %131 = arith.addf %125, %130 : vector<128x32xf32>
    %c0_149 = arith.constant 0 : index
    %c2_150 = arith.constant 2 : index
    %c1_151 = arith.constant 1 : index
    %c0_152 = arith.constant 0 : index
    %132 = vector.load %arg20[%c0_149, %c2_150, %c1_151, %c0_152] : memref<2x10x10x32xf32, #tpu.memory_space<vmem>>, vector<2x8x8x32xf32>
    %133 = vector.shape_cast %132 : vector<2x8x8x32xf32> to vector<128x32xf32>
    %c7_153 = arith.constant 7 : index
    %c0_154 = arith.constant 0 : index
    %c0_155 = arith.constant 0 : index
    %134 = vector.load %arg6[%c7_153, %c0_154, %c0_155] : memref<9x32x32xf32, #tpu.memory_space<vmem>>, vector<1x32x32xf32>
    %135 = vector.shape_cast %134 : vector<1x32x32xf32> to vector<32x32xf32>
    %cst_156 = arith.constant dense<0.000000e+00> : vector<128x32xf32>
    %136 = tpu.matmul %133, %135, %cst_156 {dimension_numbers = #tpu.dot_dimension_numbers<[1], [0], [0], [1], [0, 0, 1, 1], [], []>} : vector<128x32xf32>, vector<32x32xf32>, vector<128x32xf32> -> vector<128x32xf32>
    %137 = arith.addf %131, %136 : vector<128x32xf32>
    %c0_157 = arith.constant 0 : index
    %c2_158 = arith.constant 2 : index
    %c2_159 = arith.constant 2 : index
    %c0_160 = arith.constant 0 : index
    %138 = vector.load %arg20[%c0_157, %c2_158, %c2_159, %c0_160] : memref<2x10x10x32xf32, #tpu.memory_space<vmem>>, vector<2x8x8x32xf32>
    %139 = vector.shape_cast %138 : vector<2x8x8x32xf32> to vector<128x32xf32>
    %c8_161 = arith.constant 8 : index
    %c0_162 = arith.constant 0 : index
    %c0_163 = arith.constant 0 : index
    %140 = vector.load %arg6[%c8_161, %c0_162, %c0_163] : memref<9x32x32xf32, #tpu.memory_space<vmem>>, vector<1x32x32xf32>
    %141 = vector.shape_cast %140 : vector<1x32x32xf32> to vector<32x32xf32>
    %cst_164 = arith.constant dense<0.000000e+00> : vector<128x32xf32>
    %142 = tpu.matmul %139, %141, %cst_164 {dimension_numbers = #tpu.dot_dimension_numbers<[1], [0], [0], [1], [0, 0, 1, 1], [], []>} : vector<128x32xf32>, vector<32x32xf32>, vector<128x32xf32> -> vector<128x32xf32>
    %143 = arith.addf %137, %142 : vector<128x32xf32>
    %cst_165 = arith.constant 0.000000e+00 : f32
    %144 = vector.broadcast %cst_165 : f32 to vector<128x32xf32>
    %145 = arith.maximumf %143, %144 : vector<128x32xf32>
    %146 = vector.shape_cast %145 : vector<128x32xf32> to vector<64x2x32xf32>
    %147 = vector.extract_strided_slice %146 {offsets = [0, 0, 0], sizes = [64, 1, 32], strides = [1, 1, 1]} : vector<64x2x32xf32> to vector<64x1x32xf32>
    %148 = vector.shape_cast %147 : vector<64x1x32xf32> to vector<64x32xf32>
    %149 = vector.extract_strided_slice %146 {offsets = [0, 1, 0], sizes = [64, 1, 32], strides = [1, 1, 1]} : vector<64x2x32xf32> to vector<64x1x32xf32>
    %150 = vector.shape_cast %149 : vector<64x1x32xf32> to vector<64x32xf32>
    %151 = arith.maximumf %148, %150 : vector<64x32xf32>
    %152 = vector.shape_cast %151 : vector<64x32xf32> to vector<8x2x4x32xf32>
    %153 = vector.extract_strided_slice %152 {offsets = [0, 0, 0, 0], sizes = [8, 1, 4, 32], strides = [1, 1, 1, 1]} : vector<8x2x4x32xf32> to vector<8x1x4x32xf32>
    %154 = vector.shape_cast %153 : vector<8x1x4x32xf32> to vector<8x4x32xf32>
    %155 = vector.extract_strided_slice %152 {offsets = [0, 1, 0, 0], sizes = [8, 1, 4, 32], strides = [1, 1, 1, 1]} : vector<8x2x4x32xf32> to vector<8x1x4x32xf32>
    %156 = vector.shape_cast %155 : vector<8x1x4x32xf32> to vector<8x4x32xf32>
    %157 = arith.maximumf %154, %156 : vector<8x4x32xf32>
    %158 = vector.shape_cast %157 : vector<8x4x32xf32> to vector<2x4x4x32xf32>
    %cst_166 = arith.constant 0.000000e+00 : f32
    %159 = vector.broadcast %cst_166 : f32 to vector<2x6x6x32xf32>
    %c0_167 = arith.constant 0 : index
    %c0_168 = arith.constant 0 : index
    %c0_169 = arith.constant 0 : index
    %c0_170 = arith.constant 0 : index
    %160 = vector.load %arg21[%c0_167, %c0_168, %c0_169, %c0_170] : memref<2x6x6x32xf32, #tpu.memory_space<vmem>>, vector<2x6x6x32xf32>
    tpu.vector_store %arg21[%c0_167, %c0_168, %c0_169, %c0_170], %159 {strides = array<i32>} : memref<2x6x6x32xf32, #tpu.memory_space<vmem>>, vector<2x6x6x32xf32>,
    %c0_171 = arith.constant 0 : index
    %c1_172 = arith.constant 1 : index
    %c1_173 = arith.constant 1 : index
    %c0_174 = arith.constant 0 : index
    %161 = vector.load %arg21[%c0_171, %c1_172, %c1_173, %c0_174] : memref<2x6x6x32xf32, #tpu.memory_space<vmem>>, vector<2x4x4x32xf32>
    tpu.vector_store %arg21[%c0_171, %c1_172, %c1_173, %c0_174], %158 {strides = array<i32>} : memref<2x6x6x32xf32, #tpu.memory_space<vmem>>, vector<2x4x4x32xf32>,
    %c0_175 = arith.constant 0 : index
    %c0_176 = arith.constant 0 : index
    %162 = vector.load %arg9[%c0_175, %c0_176] : memref<1x32xf32, #tpu.memory_space<vmem>>, vector<1x32xf32>
    %163 = vector.shape_cast %162 : vector<1x32xf32> to vector<1x32xf32>
    %164 = vector.broadcast %163 : vector<1x32xf32> to vector<32x32xf32>
    %c0_177 = arith.constant 0 : index
    %c0_178 = arith.constant 0 : index
    %c0_179 = arith.constant 0 : index
    %c0_180 = arith.constant 0 : index
    %165 = vector.load %arg21[%c0_177, %c0_178, %c0_179, %c0_180] : memref<2x6x6x32xf32, #tpu.memory_space<vmem>>, vector<2x4x4x32xf32>
    %166 = vector.shape_cast %165 : vector<2x4x4x32xf32> to vector<32x32xf32>
    %c0_181 = arith.constant 0 : index
    %c0_182 = arith.constant 0 : index
    %c0_183 = arith.constant 0 : index
    %167 = vector.load %arg8[%c0_181, %c0_182, %c0_183] : memref<9x32x32xf32, #tpu.memory_space<vmem>>, vector<1x32x32xf32>
    %168 = vector.shape_cast %167 : vector<1x32x32xf32> to vector<32x32xf32>
    %cst_184 = arith.constant dense<0.000000e+00> : vector<32x32xf32>
    %169 = tpu.matmul %166, %168, %cst_184 {dimension_numbers = #tpu.dot_dimension_numbers<[1], [0], [0], [1], [0, 0, 1, 1], [], []>} : vector<32x32xf32>, vector<32x32xf32>, vector<32x32xf32> -> vector<32x32xf32>
    %170 = arith.addf %164, %169 : vector<32x32xf32>
    %c0_185 = arith.constant 0 : index
    %c0_186 = arith.constant 0 : index
    %c1_187 = arith.constant 1 : index
    %c0_188 = arith.constant 0 : index
    %171 = vector.load %arg21[%c0_185, %c0_186, %c1_187, %c0_188] : memref<2x6x6x32xf32, #tpu.memory_space<vmem>>, vector<2x4x4x32xf32>
    %172 = vector.shape_cast %171 : vector<2x4x4x32xf32> to vector<32x32xf32>
    %c1_189 = arith.constant 1 : index
    %c0_190 = arith.constant 0 : index
    %c0_191 = arith.constant 0 : index
    %173 = vector.load %arg8[%c1_189, %c0_190, %c0_191] : memref<9x32x32xf32, #tpu.memory_space<vmem>>, vector<1x32x32xf32>
    %174 = vector.shape_cast %173 : vector<1x32x32xf32> to vector<32x32xf32>
    %cst_192 = arith.constant dense<0.000000e+00> : vector<32x32xf32>
    %175 = tpu.matmul %172, %174, %cst_192 {dimension_numbers = #tpu.dot_dimension_numbers<[1], [0], [0], [1], [0, 0, 1, 1], [], []>} : vector<32x32xf32>, vector<32x32xf32>, vector<32x32xf32> -> vector<32x32xf32>
    %176 = arith.addf %170, %175 : vector<32x32xf32>
    %c0_193 = arith.constant 0 : index
    %c0_194 = arith.constant 0 : index
    %c2_195 = arith.constant 2 : index
    %c0_196 = arith.constant 0 : index
    %177 = vector.load %arg21[%c0_193, %c0_194, %c2_195, %c0_196] : memref<2x6x6x32xf32, #tpu.memory_space<vmem>>, vector<2x4x4x32xf32>
    %178 = vector.shape_cast %177 : vector<2x4x4x32xf32> to vector<32x32xf32>
    %c2_197 = arith.constant 2 : index
    %c0_198 = arith.constant 0 : index
    %c0_199 = arith.constant 0 : index
    %179 = vector.load %arg8[%c2_197, %c0_198, %c0_199] : memref<9x32x32xf32, #tpu.memory_space<vmem>>, vector<1x32x32xf32>
    %180 = vector.shape_cast %179 : vector<1x32x32xf32> to vector<32x32xf32>
    %cst_200 = arith.constant dense<0.000000e+00> : vector<32x32xf32>
    %181 = tpu.matmul %178, %180, %cst_200 {dimension_numbers = #tpu.dot_dimension_numbers<[1], [0], [0], [1], [0, 0, 1, 1], [], []>} : vector<32x32xf32>, vector<32x32xf32>, vector<32x32xf32> -> vector<32x32xf32>
    %182 = arith.addf %176, %181 : vector<32x32xf32>
    %c0_201 = arith.constant 0 : index
    %c1_202 = arith.constant 1 : index
    %c0_203 = arith.constant 0 : index
    %c0_204 = arith.constant 0 : index
    %183 = vector.load %arg21[%c0_201, %c1_202, %c0_203, %c0_204] : memref<2x6x6x32xf32, #tpu.memory_space<vmem>>, vector<2x4x4x32xf32>
    %184 = vector.shape_cast %183 : vector<2x4x4x32xf32> to vector<32x32xf32>
    %c3_205 = arith.constant 3 : index
    %c0_206 = arith.constant 0 : index
    %c0_207 = arith.constant 0 : index
    %185 = vector.load %arg8[%c3_205, %c0_206, %c0_207] : memref<9x32x32xf32, #tpu.memory_space<vmem>>, vector<1x32x32xf32>
    %186 = vector.shape_cast %185 : vector<1x32x32xf32> to vector<32x32xf32>
    %cst_208 = arith.constant dense<0.000000e+00> : vector<32x32xf32>
    %187 = tpu.matmul %184, %186, %cst_208 {dimension_numbers = #tpu.dot_dimension_numbers<[1], [0], [0], [1], [0, 0, 1, 1], [], []>} : vector<32x32xf32>, vector<32x32xf32>, vector<32x32xf32> -> vector<32x32xf32>
    %188 = arith.addf %182, %187 : vector<32x32xf32>
    %c0_209 = arith.constant 0 : index
    %c1_210 = arith.constant 1 : index
    %c1_211 = arith.constant 1 : index
    %c0_212 = arith.constant 0 : index
    %189 = vector.load %arg21[%c0_209, %c1_210, %c1_211, %c0_212] : memref<2x6x6x32xf32, #tpu.memory_space<vmem>>, vector<2x4x4x32xf32>
    %190 = vector.shape_cast %189 : vector<2x4x4x32xf32> to vector<32x32xf32>
    %c4_213 = arith.constant 4 : index
    %c0_214 = arith.constant 0 : index
    %c0_215 = arith.constant 0 : index
    %191 = vector.load %arg8[%c4_213, %c0_214, %c0_215] : memref<9x32x32xf32, #tpu.memory_space<vmem>>, vector<1x32x32xf32>
    %192 = vector.shape_cast %191 : vector<1x32x32xf32> to vector<32x32xf32>
    %cst_216 = arith.constant dense<0.000000e+00> : vector<32x32xf32>
    %193 = tpu.matmul %190, %192, %cst_216 {dimension_numbers = #tpu.dot_dimension_numbers<[1], [0], [0], [1], [0, 0, 1, 1], [], []>} : vector<32x32xf32>, vector<32x32xf32>, vector<32x32xf32> -> vector<32x32xf32>
    %194 = arith.addf %188, %193 : vector<32x32xf32>
    %c0_217 = arith.constant 0 : index
    %c1_218 = arith.constant 1 : index
    %c2_219 = arith.constant 2 : index
    %c0_220 = arith.constant 0 : index
    %195 = vector.load %arg21[%c0_217, %c1_218, %c2_219, %c0_220] : memref<2x6x6x32xf32, #tpu.memory_space<vmem>>, vector<2x4x4x32xf32>
    %196 = vector.shape_cast %195 : vector<2x4x4x32xf32> to vector<32x32xf32>
    %c5_221 = arith.constant 5 : index
    %c0_222 = arith.constant 0 : index
    %c0_223 = arith.constant 0 : index
    %197 = vector.load %arg8[%c5_221, %c0_222, %c0_223] : memref<9x32x32xf32, #tpu.memory_space<vmem>>, vector<1x32x32xf32>
    %198 = vector.shape_cast %197 : vector<1x32x32xf32> to vector<32x32xf32>
    %cst_224 = arith.constant dense<0.000000e+00> : vector<32x32xf32>
    %199 = tpu.matmul %196, %198, %cst_224 {dimension_numbers = #tpu.dot_dimension_numbers<[1], [0], [0], [1], [0, 0, 1, 1], [], []>} : vector<32x32xf32>, vector<32x32xf32>, vector<32x32xf32> -> vector<32x32xf32>
    %200 = arith.addf %194, %199 : vector<32x32xf32>
    %c0_225 = arith.constant 0 : index
    %c2_226 = arith.constant 2 : index
    %c0_227 = arith.constant 0 : index
    %c0_228 = arith.constant 0 : index
    %201 = vector.load %arg21[%c0_225, %c2_226, %c0_227, %c0_228] : memref<2x6x6x32xf32, #tpu.memory_space<vmem>>, vector<2x4x4x32xf32>
    %202 = vector.shape_cast %201 : vector<2x4x4x32xf32> to vector<32x32xf32>
    %c6_229 = arith.constant 6 : index
    %c0_230 = arith.constant 0 : index
    %c0_231 = arith.constant 0 : index
    %203 = vector.load %arg8[%c6_229, %c0_230, %c0_231] : memref<9x32x32xf32, #tpu.memory_space<vmem>>, vector<1x32x32xf32>
    %204 = vector.shape_cast %203 : vector<1x32x32xf32> to vector<32x32xf32>
    %cst_232 = arith.constant dense<0.000000e+00> : vector<32x32xf32>
    %205 = tpu.matmul %202, %204, %cst_232 {dimension_numbers = #tpu.dot_dimension_numbers<[1], [0], [0], [1], [0, 0, 1, 1], [], []>} : vector<32x32xf32>, vector<32x32xf32>, vector<32x32xf32> -> vector<32x32xf32>
    %206 = arith.addf %200, %205 : vector<32x32xf32>
    %c0_233 = arith.constant 0 : index
    %c2_234 = arith.constant 2 : index
    %c1_235 = arith.constant 1 : index
    %c0_236 = arith.constant 0 : index
    %207 = vector.load %arg21[%c0_233, %c2_234, %c1_235, %c0_236] : memref<2x6x6x32xf32, #tpu.memory_space<vmem>>, vector<2x4x4x32xf32>
    %208 = vector.shape_cast %207 : vector<2x4x4x32xf32> to vector<32x32xf32>
    %c7_237 = arith.constant 7 : index
    %c0_238 = arith.constant 0 : index
    %c0_239 = arith.constant 0 : index
    %209 = vector.load %arg8[%c7_237, %c0_238, %c0_239] : memref<9x32x32xf32, #tpu.memory_space<vmem>>, vector<1x32x32xf32>
    %210 = vector.shape_cast %209 : vector<1x32x32xf32> to vector<32x32xf32>
    %cst_240 = arith.constant dense<0.000000e+00> : vector<32x32xf32>
    %211 = tpu.matmul %208, %210, %cst_240 {dimension_numbers = #tpu.dot_dimension_numbers<[1], [0], [0], [1], [0, 0, 1, 1], [], []>} : vector<32x32xf32>, vector<32x32xf32>, vector<32x32xf32> -> vector<32x32xf32>
    %212 = arith.addf %206, %211 : vector<32x32xf32>
    %c0_241 = arith.constant 0 : index
    %c2_242 = arith.constant 2 : index
    %c2_243 = arith.constant 2 : index
    %c0_244 = arith.constant 0 : index
    %213 = vector.load %arg21[%c0_241, %c2_242, %c2_243, %c0_244] : memref<2x6x6x32xf32, #tpu.memory_space<vmem>>, vector<2x4x4x32xf32>
    %214 = vector.shape_cast %213 : vector<2x4x4x32xf32> to vector<32x32xf32>
    %c8_245 = arith.constant 8 : index
    %c0_246 = arith.constant 0 : index
    %c0_247 = arith.constant 0 : index
    %215 = vector.load %arg8[%c8_245, %c0_246, %c0_247] : memref<9x32x32xf32, #tpu.memory_space<vmem>>, vector<1x32x32xf32>
    %216 = vector.shape_cast %215 : vector<1x32x32xf32> to vector<32x32xf32>
    %cst_248 = arith.constant dense<0.000000e+00> : vector<32x32xf32>
    %217 = tpu.matmul %214, %216, %cst_248 {dimension_numbers = #tpu.dot_dimension_numbers<[1], [0], [0], [1], [0, 0, 1, 1], [], []>} : vector<32x32xf32>, vector<32x32xf32>, vector<32x32xf32> -> vector<32x32xf32>
    %218 = arith.addf %212, %217 : vector<32x32xf32>
    %cst_249 = arith.constant 0.000000e+00 : f32
    %219 = vector.broadcast %cst_249 : f32 to vector<32x32xf32>
    %220 = arith.maximumf %218, %219 : vector<32x32xf32>
    %221 = vector.shape_cast %220 : vector<32x32xf32> to vector<2x4x4x32xf32>
    %cst_250 = arith.constant 0.000000e+00 : f32
    %222 = vector.broadcast %cst_250 : f32 to vector<2x6x6x32xf32>
    %c0_251 = arith.constant 0 : index
    %c0_252 = arith.constant 0 : index
    %c0_253 = arith.constant 0 : index
    %c0_254 = arith.constant 0 : index
    %223 = vector.load %arg22[%c0_251, %c0_252, %c0_253, %c0_254] : memref<2x6x6x32xf32, #tpu.memory_space<vmem>>, vector<2x6x6x32xf32>
    tpu.vector_store %arg22[%c0_251, %c0_252, %c0_253, %c0_254], %222 {strides = array<i32>} : memref<2x6x6x32xf32, #tpu.memory_space<vmem>>, vector<2x6x6x32xf32>,
    %c0_255 = arith.constant 0 : index
    %c1_256 = arith.constant 1 : index
    %c1_257 = arith.constant 1 : index
    %c0_258 = arith.constant 0 : index
    %224 = vector.load %arg22[%c0_255, %c1_256, %c1_257, %c0_258] : memref<2x6x6x32xf32, #tpu.memory_space<vmem>>, vector<2x4x4x32xf32>
    tpu.vector_store %arg22[%c0_255, %c1_256, %c1_257, %c0_258], %221 {strides = array<i32>} : memref<2x6x6x32xf32, #tpu.memory_space<vmem>>, vector<2x4x4x32xf32>,
    %c0_259 = arith.constant 0 : index
    %c0_260 = arith.constant 0 : index
    %225 = vector.load %arg11[%c0_259, %c0_260] : memref<1x32xf32, #tpu.memory_space<vmem>>, vector<1x32xf32>
    %226 = vector.shape_cast %225 : vector<1x32xf32> to vector<1x32xf32>
    %227 = vector.broadcast %226 : vector<1x32xf32> to vector<32x32xf32>
    %c0_261 = arith.constant 0 : index
    %c0_262 = arith.constant 0 : index
    %c0_263 = arith.constant 0 : index
    %c0_264 = arith.constant 0 : index
    %228 = vector.load %arg22[%c0_261, %c0_262, %c0_263, %c0_264] : memref<2x6x6x32xf32, #tpu.memory_space<vmem>>, vector<2x4x4x32xf32>
    %229 = vector.shape_cast %228 : vector<2x4x4x32xf32> to vector<32x32xf32>
    %c0_265 = arith.constant 0 : index
    %c0_266 = arith.constant 0 : index
    %c0_267 = arith.constant 0 : index
    %230 = vector.load %arg10[%c0_265, %c0_266, %c0_267] : memref<9x32x32xf32, #tpu.memory_space<vmem>>, vector<1x32x32xf32>
    %231 = vector.shape_cast %230 : vector<1x32x32xf32> to vector<32x32xf32>
    %cst_268 = arith.constant dense<0.000000e+00> : vector<32x32xf32>
    %232 = tpu.matmul %229, %231, %cst_268 {dimension_numbers = #tpu.dot_dimension_numbers<[1], [0], [0], [1], [0, 0, 1, 1], [], []>} : vector<32x32xf32>, vector<32x32xf32>, vector<32x32xf32> -> vector<32x32xf32>
    %233 = arith.addf %227, %232 : vector<32x32xf32>
    %c0_269 = arith.constant 0 : index
    %c0_270 = arith.constant 0 : index
    %c1_271 = arith.constant 1 : index
    %c0_272 = arith.constant 0 : index
    %234 = vector.load %arg22[%c0_269, %c0_270, %c1_271, %c0_272] : memref<2x6x6x32xf32, #tpu.memory_space<vmem>>, vector<2x4x4x32xf32>
    %235 = vector.shape_cast %234 : vector<2x4x4x32xf32> to vector<32x32xf32>
    %c1_273 = arith.constant 1 : index
    %c0_274 = arith.constant 0 : index
    %c0_275 = arith.constant 0 : index
    %236 = vector.load %arg10[%c1_273, %c0_274, %c0_275] : memref<9x32x32xf32, #tpu.memory_space<vmem>>, vector<1x32x32xf32>
    %237 = vector.shape_cast %236 : vector<1x32x32xf32> to vector<32x32xf32>
    %cst_276 = arith.constant dense<0.000000e+00> : vector<32x32xf32>
    %238 = tpu.matmul %235, %237, %cst_276 {dimension_numbers = #tpu.dot_dimension_numbers<[1], [0], [0], [1], [0, 0, 1, 1], [], []>} : vector<32x32xf32>, vector<32x32xf32>, vector<32x32xf32> -> vector<32x32xf32>
    %239 = arith.addf %233, %238 : vector<32x32xf32>
    %c0_277 = arith.constant 0 : index
    %c0_278 = arith.constant 0 : index
    %c2_279 = arith.constant 2 : index
    %c0_280 = arith.constant 0 : index
    %240 = vector.load %arg22[%c0_277, %c0_278, %c2_279, %c0_280] : memref<2x6x6x32xf32, #tpu.memory_space<vmem>>, vector<2x4x4x32xf32>
    %241 = vector.shape_cast %240 : vector<2x4x4x32xf32> to vector<32x32xf32>
    %c2_281 = arith.constant 2 : index
    %c0_282 = arith.constant 0 : index
    %c0_283 = arith.constant 0 : index
    %242 = vector.load %arg10[%c2_281, %c0_282, %c0_283] : memref<9x32x32xf32, #tpu.memory_space<vmem>>, vector<1x32x32xf32>
    %243 = vector.shape_cast %242 : vector<1x32x32xf32> to vector<32x32xf32>
    %cst_284 = arith.constant dense<0.000000e+00> : vector<32x32xf32>
    %244 = tpu.matmul %241, %243, %cst_284 {dimension_numbers = #tpu.dot_dimension_numbers<[1], [0], [0], [1], [0, 0, 1, 1], [], []>} : vector<32x32xf32>, vector<32x32xf32>, vector<32x32xf32> -> vector<32x32xf32>
    %245 = arith.addf %239, %244 : vector<32x32xf32>
    %c0_285 = arith.constant 0 : index
    %c1_286 = arith.constant 1 : index
    %c0_287 = arith.constant 0 : index
    %c0_288 = arith.constant 0 : index
    %246 = vector.load %arg22[%c0_285, %c1_286, %c0_287, %c0_288] : memref<2x6x6x32xf32, #tpu.memory_space<vmem>>, vector<2x4x4x32xf32>
    %247 = vector.shape_cast %246 : vector<2x4x4x32xf32> to vector<32x32xf32>
    %c3_289 = arith.constant 3 : index
    %c0_290 = arith.constant 0 : index
    %c0_291 = arith.constant 0 : index
    %248 = vector.load %arg10[%c3_289, %c0_290, %c0_291] : memref<9x32x32xf32, #tpu.memory_space<vmem>>, vector<1x32x32xf32>
    %249 = vector.shape_cast %248 : vector<1x32x32xf32> to vector<32x32xf32>
    %cst_292 = arith.constant dense<0.000000e+00> : vector<32x32xf32>
    %250 = tpu.matmul %247, %249, %cst_292 {dimension_numbers = #tpu.dot_dimension_numbers<[1], [0], [0], [1], [0, 0, 1, 1], [], []>} : vector<32x32xf32>, vector<32x32xf32>, vector<32x32xf32> -> vector<32x32xf32>
    %251 = arith.addf %245, %250 : vector<32x32xf32>
    %c0_293 = arith.constant 0 : index
    %c1_294 = arith.constant 1 : index
    %c1_295 = arith.constant 1 : index
    %c0_296 = arith.constant 0 : index
    %252 = vector.load %arg22[%c0_293, %c1_294, %c1_295, %c0_296] : memref<2x6x6x32xf32, #tpu.memory_space<vmem>>, vector<2x4x4x32xf32>
    %253 = vector.shape_cast %252 : vector<2x4x4x32xf32> to vector<32x32xf32>
    %c4_297 = arith.constant 4 : index
    %c0_298 = arith.constant 0 : index
    %c0_299 = arith.constant 0 : index
    %254 = vector.load %arg10[%c4_297, %c0_298, %c0_299] : memref<9x32x32xf32, #tpu.memory_space<vmem>>, vector<1x32x32xf32>
    %255 = vector.shape_cast %254 : vector<1x32x32xf32> to vector<32x32xf32>
    %cst_300 = arith.constant dense<0.000000e+00> : vector<32x32xf32>
    %256 = tpu.matmul %253, %255, %cst_300 {dimension_numbers = #tpu.dot_dimension_numbers<[1], [0], [0], [1], [0, 0, 1, 1], [], []>} : vector<32x32xf32>, vector<32x32xf32>, vector<32x32xf32> -> vector<32x32xf32>
    %257 = arith.addf %251, %256 : vector<32x32xf32>
    %c0_301 = arith.constant 0 : index
    %c1_302 = arith.constant 1 : index
    %c2_303 = arith.constant 2 : index
    %c0_304 = arith.constant 0 : index
    %258 = vector.load %arg22[%c0_301, %c1_302, %c2_303, %c0_304] : memref<2x6x6x32xf32, #tpu.memory_space<vmem>>, vector<2x4x4x32xf32>
    %259 = vector.shape_cast %258 : vector<2x4x4x32xf32> to vector<32x32xf32>
    %c5_305 = arith.constant 5 : index
    %c0_306 = arith.constant 0 : index
    %c0_307 = arith.constant 0 : index
    %260 = vector.load %arg10[%c5_305, %c0_306, %c0_307] : memref<9x32x32xf32, #tpu.memory_space<vmem>>, vector<1x32x32xf32>
    %261 = vector.shape_cast %260 : vector<1x32x32xf32> to vector<32x32xf32>
    %cst_308 = arith.constant dense<0.000000e+00> : vector<32x32xf32>
    %262 = tpu.matmul %259, %261, %cst_308 {dimension_numbers = #tpu.dot_dimension_numbers<[1], [0], [0], [1], [0, 0, 1, 1], [], []>} : vector<32x32xf32>, vector<32x32xf32>, vector<32x32xf32> -> vector<32x32xf32>
    %263 = arith.addf %257, %262 : vector<32x32xf32>
    %c0_309 = arith.constant 0 : index
    %c2_310 = arith.constant 2 : index
    %c0_311 = arith.constant 0 : index
    %c0_312 = arith.constant 0 : index
    %264 = vector.load %arg22[%c0_309, %c2_310, %c0_311, %c0_312] : memref<2x6x6x32xf32, #tpu.memory_space<vmem>>, vector<2x4x4x32xf32>
    %265 = vector.shape_cast %264 : vector<2x4x4x32xf32> to vector<32x32xf32>
    %c6_313 = arith.constant 6 : index
    %c0_314 = arith.constant 0 : index
    %c0_315 = arith.constant 0 : index
    %266 = vector.load %arg10[%c6_313, %c0_314, %c0_315] : memref<9x32x32xf32, #tpu.memory_space<vmem>>, vector<1x32x32xf32>
    %267 = vector.shape_cast %266 : vector<1x32x32xf32> to vector<32x32xf32>
    %cst_316 = arith.constant dense<0.000000e+00> : vector<32x32xf32>
    %268 = tpu.matmul %265, %267, %cst_316 {dimension_numbers = #tpu.dot_dimension_numbers<[1], [0], [0], [1], [0, 0, 1, 1], [], []>} : vector<32x32xf32>, vector<32x32xf32>, vector<32x32xf32> -> vector<32x32xf32>
    %269 = arith.addf %263, %268 : vector<32x32xf32>
    %c0_317 = arith.constant 0 : index
    %c2_318 = arith.constant 2 : index
    %c1_319 = arith.constant 1 : index
    %c0_320 = arith.constant 0 : index
    %270 = vector.load %arg22[%c0_317, %c2_318, %c1_319, %c0_320] : memref<2x6x6x32xf32, #tpu.memory_space<vmem>>, vector<2x4x4x32xf32>
    %271 = vector.shape_cast %270 : vector<2x4x4x32xf32> to vector<32x32xf32>
    %c7_321 = arith.constant 7 : index
    %c0_322 = arith.constant 0 : index
    %c0_323 = arith.constant 0 : index
    %272 = vector.load %arg10[%c7_321, %c0_322, %c0_323] : memref<9x32x32xf32, #tpu.memory_space<vmem>>, vector<1x32x32xf32>
    %273 = vector.shape_cast %272 : vector<1x32x32xf32> to vector<32x32xf32>
    %cst_324 = arith.constant dense<0.000000e+00> : vector<32x32xf32>
    %274 = tpu.matmul %271, %273, %cst_324 {dimension_numbers = #tpu.dot_dimension_numbers<[1], [0], [0], [1], [0, 0, 1, 1], [], []>} : vector<32x32xf32>, vector<32x32xf32>, vector<32x32xf32> -> vector<32x32xf32>
    %275 = arith.addf %269, %274 : vector<32x32xf32>
    %c0_325 = arith.constant 0 : index
    %c2_326 = arith.constant 2 : index
    %c2_327 = arith.constant 2 : index
    %c0_328 = arith.constant 0 : index
    %276 = vector.load %arg22[%c0_325, %c2_326, %c2_327, %c0_328] : memref<2x6x6x32xf32, #tpu.memory_space<vmem>>, vector<2x4x4x32xf32>
    %277 = vector.shape_cast %276 : vector<2x4x4x32xf32> to vector<32x32xf32>
    %c8_329 = arith.constant 8 : index
    %c0_330 = arith.constant 0 : index
    %c0_331 = arith.constant 0 : index
    %278 = vector.load %arg10[%c8_329, %c0_330, %c0_331] : memref<9x32x32xf32, #tpu.memory_space<vmem>>, vector<1x32x32xf32>
    %279 = vector.shape_cast %278 : vector<1x32x32xf32> to vector<32x32xf32>
    %cst_332 = arith.constant dense<0.000000e+00> : vector<32x32xf32>
    %280 = tpu.matmul %277, %279, %cst_332 {dimension_numbers = #tpu.dot_dimension_numbers<[1], [0], [0], [1], [0, 0, 1, 1], [], []>} : vector<32x32xf32>, vector<32x32xf32>, vector<32x32xf32> -> vector<32x32xf32>
    %281 = arith.addf %275, %280 : vector<32x32xf32>
    %cst_333 = arith.constant 0.000000e+00 : f32
    %282 = vector.broadcast %cst_333 : f32 to vector<32x32xf32>
    %283 = arith.maximumf %281, %282 : vector<32x32xf32>
    %284 = vector.shape_cast %283 : vector<32x32xf32> to vector<2x16x32xf32>
    %c0_334 = arith.constant 0 : index
    %c0_335 = arith.constant 0 : index
    %285 = vector.load %arg13[%c0_334, %c0_335] : memref<1x128xf32, #tpu.memory_space<vmem>>, vector<1x128xf32>
    %286 = vector.shape_cast %285 : vector<1x128xf32> to vector<1x128xf32>
    %287 = vector.broadcast %286 : vector<1x128xf32> to vector<2x128xf32>
    %288 = vector.extract_strided_slice %284 {offsets = [0, 0, 0], sizes = [2, 1, 32], strides = [1, 1, 1]} : vector<2x16x32xf32> to vector<2x1x32xf32>
    %289 = vector.shape_cast %288 : vector<2x1x32xf32> to vector<2x32xf32>
    %c0_336 = arith.constant 0 : index
    %c0_337 = arith.constant 0 : index
    %c0_338 = arith.constant 0 : index
    %290 = vector.load %arg12[%c0_336, %c0_337, %c0_338] : memref<16x32x128xf32, #tpu.memory_space<vmem>>, vector<1x32x128xf32>
    %291 = vector.shape_cast %290 : vector<1x32x128xf32> to vector<32x128xf32>
    %cst_339 = arith.constant dense<0.000000e+00> : vector<2x128xf32>
    %292 = tpu.matmul %289, %291, %cst_339 {dimension_numbers = #tpu.dot_dimension_numbers<[1], [0], [0], [1], [0, 0, 1, 1], [], []>} : vector<2x32xf32>, vector<32x128xf32>, vector<2x128xf32> -> vector<2x128xf32>
    %293 = arith.addf %287, %292 : vector<2x128xf32>
    %294 = vector.extract_strided_slice %284 {offsets = [0, 1, 0], sizes = [2, 1, 32], strides = [1, 1, 1]} : vector<2x16x32xf32> to vector<2x1x32xf32>
    %295 = vector.shape_cast %294 : vector<2x1x32xf32> to vector<2x32xf32>
    %c1_340 = arith.constant 1 : index
    %c0_341 = arith.constant 0 : index
    %c0_342 = arith.constant 0 : index
    %296 = vector.load %arg12[%c1_340, %c0_341, %c0_342] : memref<16x32x128xf32, #tpu.memory_space<vmem>>, vector<1x32x128xf32>
    %297 = vector.shape_cast %296 : vector<1x32x128xf32> to vector<32x128xf32>
    %cst_343 = arith.constant dense<0.000000e+00> : vector<2x128xf32>
    %298 = tpu.matmul %295, %297, %cst_343 {dimension_numbers = #tpu.dot_dimension_numbers<[1], [0], [0], [1], [0, 0, 1, 1], [], []>} : vector<2x32xf32>, vector<32x128xf32>, vector<2x128xf32> -> vector<2x128xf32>
    %299 = arith.addf %293, %298 : vector<2x128xf32>
    %300 = vector.extract_strided_slice %284 {offsets = [0, 2, 0], sizes = [2, 1, 32], strides = [1, 1, 1]} : vector<2x16x32xf32> to vector<2x1x32xf32>
    %301 = vector.shape_cast %300 : vector<2x1x32xf32> to vector<2x32xf32>
    %c2_344 = arith.constant 2 : index
    %c0_345 = arith.constant 0 : index
    %c0_346 = arith.constant 0 : index
    %302 = vector.load %arg12[%c2_344, %c0_345, %c0_346] : memref<16x32x128xf32, #tpu.memory_space<vmem>>, vector<1x32x128xf32>
    %303 = vector.shape_cast %302 : vector<1x32x128xf32> to vector<32x128xf32>
    %cst_347 = arith.constant dense<0.000000e+00> : vector<2x128xf32>
    %304 = tpu.matmul %301, %303, %cst_347 {dimension_numbers = #tpu.dot_dimension_numbers<[1], [0], [0], [1], [0, 0, 1, 1], [], []>} : vector<2x32xf32>, vector<32x128xf32>, vector<2x128xf32> -> vector<2x128xf32>
    %305 = arith.addf %299, %304 : vector<2x128xf32>
    %306 = vector.extract_strided_slice %284 {offsets = [0, 3, 0], sizes = [2, 1, 32], strides = [1, 1, 1]} : vector<2x16x32xf32> to vector<2x1x32xf32>
    %307 = vector.shape_cast %306 : vector<2x1x32xf32> to vector<2x32xf32>
    %c3_348 = arith.constant 3 : index
    %c0_349 = arith.constant 0 : index
    %c0_350 = arith.constant 0 : index
    %308 = vector.load %arg12[%c3_348, %c0_349, %c0_350] : memref<16x32x128xf32, #tpu.memory_space<vmem>>, vector<1x32x128xf32>
    %309 = vector.shape_cast %308 : vector<1x32x128xf32> to vector<32x128xf32>
    %cst_351 = arith.constant dense<0.000000e+00> : vector<2x128xf32>
    %310 = tpu.matmul %307, %309, %cst_351 {dimension_numbers = #tpu.dot_dimension_numbers<[1], [0], [0], [1], [0, 0, 1, 1], [], []>} : vector<2x32xf32>, vector<32x128xf32>, vector<2x128xf32> -> vector<2x128xf32>
    %311 = arith.addf %305, %310 : vector<2x128xf32>
    %312 = vector.extract_strided_slice %284 {offsets = [0, 4, 0], sizes = [2, 1, 32], strides = [1, 1, 1]} : vector<2x16x32xf32> to vector<2x1x32xf32>
    %313 = vector.shape_cast %312 : vector<2x1x32xf32> to vector<2x32xf32>
    %c4_352 = arith.constant 4 : index
    %c0_353 = arith.constant 0 : index
    %c0_354 = arith.constant 0 : index
    %314 = vector.load %arg12[%c4_352, %c0_353, %c0_354] : memref<16x32x128xf32, #tpu.memory_space<vmem>>, vector<1x32x128xf32>
    %315 = vector.shape_cast %314 : vector<1x32x128xf32> to vector<32x128xf32>
    %cst_355 = arith.constant dense<0.000000e+00> : vector<2x128xf32>
    %316 = tpu.matmul %313, %315, %cst_355 {dimension_numbers = #tpu.dot_dimension_numbers<[1], [0], [0], [1], [0, 0, 1, 1], [], []>} : vector<2x32xf32>, vector<32x128xf32>, vector<2x128xf32> -> vector<2x128xf32>
    %317 = arith.addf %311, %316 : vector<2x128xf32>
    %318 = vector.extract_strided_slice %284 {offsets = [0, 5, 0], sizes = [2, 1, 32], strides = [1, 1, 1]} : vector<2x16x32xf32> to vector<2x1x32xf32>
    %319 = vector.shape_cast %318 : vector<2x1x32xf32> to vector<2x32xf32>
    %c5_356 = arith.constant 5 : index
    %c0_357 = arith.constant 0 : index
    %c0_358 = arith.constant 0 : index
    %320 = vector.load %arg12[%c5_356, %c0_357, %c0_358] : memref<16x32x128xf32, #tpu.memory_space<vmem>>, vector<1x32x128xf32>
    %321 = vector.shape_cast %320 : vector<1x32x128xf32> to vector<32x128xf32>
    %cst_359 = arith.constant dense<0.000000e+00> : vector<2x128xf32>
    %322 = tpu.matmul %319, %321, %cst_359 {dimension_numbers = #tpu.dot_dimension_numbers<[1], [0], [0], [1], [0, 0, 1, 1], [], []>} : vector<2x32xf32>, vector<32x128xf32>, vector<2x128xf32> -> vector<2x128xf32>
    %323 = arith.addf %317, %322 : vector<2x128xf32>
    %324 = vector.extract_strided_slice %284 {offsets = [0, 6, 0], sizes = [2, 1, 32], strides = [1, 1, 1]} : vector<2x16x32xf32> to vector<2x1x32xf32>
    %325 = vector.shape_cast %324 : vector<2x1x32xf32> to vector<2x32xf32>
    %c6_360 = arith.constant 6 : index
    %c0_361 = arith.constant 0 : index
    %c0_362 = arith.constant 0 : index
    %326 = vector.load %arg12[%c6_360, %c0_361, %c0_362] : memref<16x32x128xf32, #tpu.memory_space<vmem>>, vector<1x32x128xf32>
    %327 = vector.shape_cast %326 : vector<1x32x128xf32> to vector<32x128xf32>
    %cst_363 = arith.constant dense<0.000000e+00> : vector<2x128xf32>
    %328 = tpu.matmul %325, %327, %cst_363 {dimension_numbers = #tpu.dot_dimension_numbers<[1], [0], [0], [1], [0, 0, 1, 1], [], []>} : vector<2x32xf32>, vector<32x128xf32>, vector<2x128xf32> -> vector<2x128xf32>
    %329 = arith.addf %323, %328 : vector<2x128xf32>
    %330 = vector.extract_strided_slice %284 {offsets = [0, 7, 0], sizes = [2, 1, 32], strides = [1, 1, 1]} : vector<2x16x32xf32> to vector<2x1x32xf32>
    %331 = vector.shape_cast %330 : vector<2x1x32xf32> to vector<2x32xf32>
    %c7_364 = arith.constant 7 : index
    %c0_365 = arith.constant 0 : index
    %c0_366 = arith.constant 0 : index
    %332 = vector.load %arg12[%c7_364, %c0_365, %c0_366] : memref<16x32x128xf32, #tpu.memory_space<vmem>>, vector<1x32x128xf32>
    %333 = vector.shape_cast %332 : vector<1x32x128xf32> to vector<32x128xf32>
    %cst_367 = arith.constant dense<0.000000e+00> : vector<2x128xf32>
    %334 = tpu.matmul %331, %333, %cst_367 {dimension_numbers = #tpu.dot_dimension_numbers<[1], [0], [0], [1], [0, 0, 1, 1], [], []>} : vector<2x32xf32>, vector<32x128xf32>, vector<2x128xf32> -> vector<2x128xf32>
    %335 = arith.addf %329, %334 : vector<2x128xf32>
    %336 = vector.extract_strided_slice %284 {offsets = [0, 8, 0], sizes = [2, 1, 32], strides = [1, 1, 1]} : vector<2x16x32xf32> to vector<2x1x32xf32>
    %337 = vector.shape_cast %336 : vector<2x1x32xf32> to vector<2x32xf32>
    %c8_368 = arith.constant 8 : index
    %c0_369 = arith.constant 0 : index
    %c0_370 = arith.constant 0 : index
    %338 = vector.load %arg12[%c8_368, %c0_369, %c0_370] : memref<16x32x128xf32, #tpu.memory_space<vmem>>, vector<1x32x128xf32>
    %339 = vector.shape_cast %338 : vector<1x32x128xf32> to vector<32x128xf32>
    %cst_371 = arith.constant dense<0.000000e+00> : vector<2x128xf32>
    %340 = tpu.matmul %337, %339, %cst_371 {dimension_numbers = #tpu.dot_dimension_numbers<[1], [0], [0], [1], [0, 0, 1, 1], [], []>} : vector<2x32xf32>, vector<32x128xf32>, vector<2x128xf32> -> vector<2x128xf32>
    %341 = arith.addf %335, %340 : vector<2x128xf32>
    %342 = vector.extract_strided_slice %284 {offsets = [0, 9, 0], sizes = [2, 1, 32], strides = [1, 1, 1]} : vector<2x16x32xf32> to vector<2x1x32xf32>
    %343 = vector.shape_cast %342 : vector<2x1x32xf32> to vector<2x32xf32>
    %c9 = arith.constant 9 : index
    %c0_372 = arith.constant 0 : index
    %c0_373 = arith.constant 0 : index
    %344 = vector.load %arg12[%c9, %c0_372, %c0_373] : memref<16x32x128xf32, #tpu.memory_space<vmem>>, vector<1x32x128xf32>
    %345 = vector.shape_cast %344 : vector<1x32x128xf32> to vector<32x128xf32>
    %cst_374 = arith.constant dense<0.000000e+00> : vector<2x128xf32>
    %346 = tpu.matmul %343, %345, %cst_374 {dimension_numbers = #tpu.dot_dimension_numbers<[1], [0], [0], [1], [0, 0, 1, 1], [], []>} : vector<2x32xf32>, vector<32x128xf32>, vector<2x128xf32> -> vector<2x128xf32>
    %347 = arith.addf %341, %346 : vector<2x128xf32>
    %348 = vector.extract_strided_slice %284 {offsets = [0, 10, 0], sizes = [2, 1, 32], strides = [1, 1, 1]} : vector<2x16x32xf32> to vector<2x1x32xf32>
    %349 = vector.shape_cast %348 : vector<2x1x32xf32> to vector<2x32xf32>
    %c10 = arith.constant 10 : index
    %c0_375 = arith.constant 0 : index
    %c0_376 = arith.constant 0 : index
    %350 = vector.load %arg12[%c10, %c0_375, %c0_376] : memref<16x32x128xf32, #tpu.memory_space<vmem>>, vector<1x32x128xf32>
    %351 = vector.shape_cast %350 : vector<1x32x128xf32> to vector<32x128xf32>
    %cst_377 = arith.constant dense<0.000000e+00> : vector<2x128xf32>
    %352 = tpu.matmul %349, %351, %cst_377 {dimension_numbers = #tpu.dot_dimension_numbers<[1], [0], [0], [1], [0, 0, 1, 1], [], []>} : vector<2x32xf32>, vector<32x128xf32>, vector<2x128xf32> -> vector<2x128xf32>
    %353 = arith.addf %347, %352 : vector<2x128xf32>
    %354 = vector.extract_strided_slice %284 {offsets = [0, 11, 0], sizes = [2, 1, 32], strides = [1, 1, 1]} : vector<2x16x32xf32> to vector<2x1x32xf32>
    %355 = vector.shape_cast %354 : vector<2x1x32xf32> to vector<2x32xf32>
    %c11 = arith.constant 11 : index
    %c0_378 = arith.constant 0 : index
    %c0_379 = arith.constant 0 : index
    %356 = vector.load %arg12[%c11, %c0_378, %c0_379] : memref<16x32x128xf32, #tpu.memory_space<vmem>>, vector<1x32x128xf32>
    %357 = vector.shape_cast %356 : vector<1x32x128xf32> to vector<32x128xf32>
    %cst_380 = arith.constant dense<0.000000e+00> : vector<2x128xf32>
    %358 = tpu.matmul %355, %357, %cst_380 {dimension_numbers = #tpu.dot_dimension_numbers<[1], [0], [0], [1], [0, 0, 1, 1], [], []>} : vector<2x32xf32>, vector<32x128xf32>, vector<2x128xf32> -> vector<2x128xf32>
    %359 = arith.addf %353, %358 : vector<2x128xf32>
    %360 = vector.extract_strided_slice %284 {offsets = [0, 12, 0], sizes = [2, 1, 32], strides = [1, 1, 1]} : vector<2x16x32xf32> to vector<2x1x32xf32>
    %361 = vector.shape_cast %360 : vector<2x1x32xf32> to vector<2x32xf32>
    %c12 = arith.constant 12 : index
    %c0_381 = arith.constant 0 : index
    %c0_382 = arith.constant 0 : index
    %362 = vector.load %arg12[%c12, %c0_381, %c0_382] : memref<16x32x128xf32, #tpu.memory_space<vmem>>, vector<1x32x128xf32>
    %363 = vector.shape_cast %362 : vector<1x32x128xf32> to vector<32x128xf32>
    %cst_383 = arith.constant dense<0.000000e+00> : vector<2x128xf32>
    %364 = tpu.matmul %361, %363, %cst_383 {dimension_numbers = #tpu.dot_dimension_numbers<[1], [0], [0], [1], [0, 0, 1, 1], [], []>} : vector<2x32xf32>, vector<32x128xf32>, vector<2x128xf32> -> vector<2x128xf32>
    %365 = arith.addf %359, %364 : vector<2x128xf32>
    %366 = vector.extract_strided_slice %284 {offsets = [0, 13, 0], sizes = [2, 1, 32], strides = [1, 1, 1]} : vector<2x16x32xf32> to vector<2x1x32xf32>
    %367 = vector.shape_cast %366 : vector<2x1x32xf32> to vector<2x32xf32>
    %c13 = arith.constant 13 : index
    %c0_384 = arith.constant 0 : index
    %c0_385 = arith.constant 0 : index
    %368 = vector.load %arg12[%c13, %c0_384, %c0_385] : memref<16x32x128xf32, #tpu.memory_space<vmem>>, vector<1x32x128xf32>
    %369 = vector.shape_cast %368 : vector<1x32x128xf32> to vector<32x128xf32>
    %cst_386 = arith.constant dense<0.000000e+00> : vector<2x128xf32>
    %370 = tpu.matmul %367, %369, %cst_386 {dimension_numbers = #tpu.dot_dimension_numbers<[1], [0], [0], [1], [0, 0, 1, 1], [], []>} : vector<2x32xf32>, vector<32x128xf32>, vector<2x128xf32> -> vector<2x128xf32>
    %371 = arith.addf %365, %370 : vector<2x128xf32>
    %372 = vector.extract_strided_slice %284 {offsets = [0, 14, 0], sizes = [2, 1, 32], strides = [1, 1, 1]} : vector<2x16x32xf32> to vector<2x1x32xf32>
    %373 = vector.shape_cast %372 : vector<2x1x32xf32> to vector<2x32xf32>
    %c14 = arith.constant 14 : index
    %c0_387 = arith.constant 0 : index
    %c0_388 = arith.constant 0 : index
    %374 = vector.load %arg12[%c14, %c0_387, %c0_388] : memref<16x32x128xf32, #tpu.memory_space<vmem>>, vector<1x32x128xf32>
    %375 = vector.shape_cast %374 : vector<1x32x128xf32> to vector<32x128xf32>
    %cst_389 = arith.constant dense<0.000000e+00> : vector<2x128xf32>
    %376 = tpu.matmul %373, %375, %cst_389 {dimension_numbers = #tpu.dot_dimension_numbers<[1], [0], [0], [1], [0, 0, 1, 1], [], []>} : vector<2x32xf32>, vector<32x128xf32>, vector<2x128xf32> -> vector<2x128xf32>
    %377 = arith.addf %371, %376 : vector<2x128xf32>
    %378 = vector.extract_strided_slice %284 {offsets = [0, 15, 0], sizes = [2, 1, 32], strides = [1, 1, 1]} : vector<2x16x32xf32> to vector<2x1x32xf32>
    %379 = vector.shape_cast %378 : vector<2x1x32xf32> to vector<2x32xf32>
    %c15 = arith.constant 15 : index
    %c0_390 = arith.constant 0 : index
    %c0_391 = arith.constant 0 : index
    %380 = vector.load %arg12[%c15, %c0_390, %c0_391] : memref<16x32x128xf32, #tpu.memory_space<vmem>>, vector<1x32x128xf32>
    %381 = vector.shape_cast %380 : vector<1x32x128xf32> to vector<32x128xf32>
    %cst_392 = arith.constant dense<0.000000e+00> : vector<2x128xf32>
    %382 = tpu.matmul %379, %381, %cst_392 {dimension_numbers = #tpu.dot_dimension_numbers<[1], [0], [0], [1], [0, 0, 1, 1], [], []>} : vector<2x32xf32>, vector<32x128xf32>, vector<2x128xf32> -> vector<2x128xf32>
    %383 = arith.addf %377, %382 : vector<2x128xf32>
    %c0_393 = arith.constant 0 : index
    %c0_394 = arith.constant 0 : index
    %384 = vector.load %arg14[%c0_393, %c0_394] : memref<128x32xf32, #tpu.memory_space<vmem>>, vector<128x32xf32>
    %cst_395 = arith.constant dense<0.000000e+00> : vector<2x32xf32>
    %385 = tpu.matmul %383, %384, %cst_395 {dimension_numbers = #tpu.dot_dimension_numbers<[1], [0], [0], [1], [0, 0, 1, 1], [], []>} : vector<2x128xf32>, vector<128x32xf32>, vector<2x32xf32> -> vector<2x32xf32>
    %c0_396 = arith.constant 0 : index
    %c0_397 = arith.constant 0 : index
    %386 = vector.load %arg15[%c0_396, %c0_397] : memref<1x32xf32, #tpu.memory_space<vmem>>, vector<1x32xf32>
    %387 = vector.broadcast %386 : vector<1x32xf32> to vector<2x32xf32>
    %388 = arith.addf %385, %387 : vector<2x32xf32>
    %c0_398 = arith.constant 0 : index
    %c0_399 = arith.constant 0 : index
    %389 = vector.load %arg16[%c0_398, %c0_399] : memref<32x2xf32, #tpu.memory_space<vmem>>, vector<32x2xf32>
    %cst_400 = arith.constant dense<0.000000e+00> : vector<2x2xf32>
    %390 = tpu.matmul %388, %389, %cst_400 {dimension_numbers = #tpu.dot_dimension_numbers<[1], [0], [0], [1], [0, 0, 1, 1], [], []>} : vector<2x32xf32>, vector<32x2xf32>, vector<2x2xf32> -> vector<2x2xf32>
    %c0_401 = arith.constant 0 : index
    %c0_402 = arith.constant 0 : index
    %391 = vector.load %arg17[%c0_401, %c0_402] : memref<1x2xf32, #tpu.memory_space<vmem>>, vector<1x2xf32>
    %392 = vector.broadcast %391 : vector<1x2xf32> to vector<2x2xf32>
    %393 = arith.addf %390, %392 : vector<2x2xf32>
    %cst_403 = arith.constant 0.000000e+00 : f32
    %394 = vector.broadcast %cst_403 : f32 to vector<2x2xf32>
    %395 = arith.subf %394, %393 : vector<2x2xf32>
    %396 = math.exp %395 : vector<2x2xf32>
    %cst_404 = arith.constant 1.000000e+00 : f32
    %397 = vector.broadcast %cst_404 : f32 to vector<2x2xf32>
    %398 = arith.addf %397, %396 : vector<2x2xf32>
    %cst_405 = arith.constant 1.000000e+00 : f32
    %399 = vector.broadcast %cst_405 : f32 to vector<2x2xf32>
    %400 = arith.divf %399, %398 : vector<2x2xf32>
    %c0_406 = arith.constant 0 : index
    %c0_407 = arith.constant 0 : index
    %401 = vector.load %arg18[%c0_406, %c0_407] : memref<2x2xf32, #tpu.memory_space<vmem>>, vector<2x2xf32>
    tpu.vector_store %arg18[%c0_406, %c0_407], %400 {strides = array<i32>} : memref<2x2xf32, #tpu.memory_space<vmem>>, vector<2x2xf32>,
    return
  }
  func.func @transform_0(%arg0: i32) -> (i32, i32) {
    %c0_i32 = arith.constant 0 : i32
    %c0_i32_0 = arith.constant 0 : i32
    %c0_i32_1 = arith.constant 0 : i32
    return %c0_i32, %c0_i32_0 : i32, i32
  }
  func.func @transform_1(%arg0: i32) -> (i32, i32) {
    %c0_i32 = arith.constant 0 : i32
    %c0_i32_0 = arith.constant 0 : i32
    %c0_i32_1 = arith.constant 0 : i32
    return %c0_i32, %c0_i32_0 : i32, i32
  }
  func.func @transform_2(%arg0: i32) -> (i32, i32) {
    %c0_i32 = arith.constant 0 : i32
    %c0_i32_0 = arith.constant 0 : i32
    %c0_i32_1 = arith.constant 0 : i32
    return %c0_i32, %c0_i32_0 : i32, i32
  }
  func.func @transform_3(%arg0: i32) -> (i32, i32, i32) {
    %c0_i32 = arith.constant 0 : i32
    %c0_i32_0 = arith.constant 0 : i32
    %c0_i32_1 = arith.constant 0 : i32
    %c0_i32_2 = arith.constant 0 : i32
    return %c0_i32, %c0_i32_0, %c0_i32_1 : i32, i32, i32
  }
  func.func @transform_4(%arg0: i32) -> (i32, i32) {
    %c0_i32 = arith.constant 0 : i32
    %c0_i32_0 = arith.constant 0 : i32
    %c0_i32_1 = arith.constant 0 : i32
    return %c0_i32, %c0_i32_0 : i32, i32
  }
  func.func @transform_5(%arg0: i32) -> (i32, i32, i32) {
    %c0_i32 = arith.constant 0 : i32
    %c0_i32_0 = arith.constant 0 : i32
    %c0_i32_1 = arith.constant 0 : i32
    %c0_i32_2 = arith.constant 0 : i32
    return %c0_i32, %c0_i32_0, %c0_i32_1 : i32, i32, i32
  }
  func.func @transform_6(%arg0: i32) -> (i32, i32) {
    %c0_i32 = arith.constant 0 : i32
    %c0_i32_0 = arith.constant 0 : i32
    %c0_i32_1 = arith.constant 0 : i32
    return %c0_i32, %c0_i32_0 : i32, i32
  }
  func.func @transform_7(%arg0: i32) -> (i32, i32, i32) {
    %c0_i32 = arith.constant 0 : i32
    %c0_i32_0 = arith.constant 0 : i32
    %c0_i32_1 = arith.constant 0 : i32
    %c0_i32_2 = arith.constant 0 : i32
    return %c0_i32, %c0_i32_0, %c0_i32_1 : i32, i32, i32
  }
  func.func @transform_8(%arg0: i32) -> (i32, i32) {
    %c0_i32 = arith.constant 0 : i32
    %c0_i32_0 = arith.constant 0 : i32
    %c0_i32_1 = arith.constant 0 : i32
    return %c0_i32, %c0_i32_0 : i32, i32
  }
  func.func @transform_9(%arg0: i32) -> (i32, i32, i32) {
    %c0_i32 = arith.constant 0 : i32
    %c0_i32_0 = arith.constant 0 : i32
    %c0_i32_1 = arith.constant 0 : i32
    %c0_i32_2 = arith.constant 0 : i32
    return %c0_i32, %c0_i32_0, %c0_i32_1 : i32, i32, i32
  }
  func.func @transform_10(%arg0: i32) -> (i32, i32) {
    %c0_i32 = arith.constant 0 : i32
    %c0_i32_0 = arith.constant 0 : i32
    %c0_i32_1 = arith.constant 0 : i32
    return %c0_i32, %c0_i32_0 : i32, i32
  }
  func.func @transform_11(%arg0: i32) -> (i32, i32, i32) {
    %c0_i32 = arith.constant 0 : i32
    %c0_i32_0 = arith.constant 0 : i32
    %c0_i32_1 = arith.constant 0 : i32
    %c0_i32_2 = arith.constant 0 : i32
    return %c0_i32, %c0_i32_0, %c0_i32_1 : i32, i32, i32
  }
  func.func @transform_12(%arg0: i32) -> (i32, i32) {
    %c0_i32 = arith.constant 0 : i32
    %c0_i32_0 = arith.constant 0 : i32
    %c0_i32_1 = arith.constant 0 : i32
    return %c0_i32, %c0_i32_0 : i32, i32
  }
  func.func @transform_13(%arg0: i32) -> (i32, i32) {
    %c0_i32 = arith.constant 0 : i32
    %c0_i32_0 = arith.constant 0 : i32
    %c0_i32_1 = arith.constant 0 : i32
    return %c0_i32, %c0_i32_0 : i32, i32
  }
  func.func @transform_14(%arg0: i32) -> (i32, i32) {
    %c0_i32 = arith.constant 0 : i32
    %c0_i32_0 = arith.constant 0 : i32
    %c0_i32_1 = arith.constant 0 : i32
    return %c0_i32, %c0_i32_0 : i32, i32
  }
  func.func @transform_15(%arg0: i32) -> (i32, i32) {
    %c0_i32 = arith.constant 0 : i32
    %c0_i32_0 = arith.constant 0 : i32
    %c0_i32_1 = arith.constant 0 : i32
    return %c0_i32, %c0_i32_0 : i32, i32
  }
  func.func @transform_16(%arg0: i32) -> (i32, i32) {
    %c0_i32 = arith.constant 0 : i32
    %c0_i32_0 = arith.constant 0 : i32
    %c0_i32_1 = arith.constant 0 : i32
    return %c0_i32, %c0_i32_0 : i32, i32
  }
  func.func @transform_17(%arg0: i32) -> (i32, i32) {
    %c0_i32 = arith.constant 0 : i32
    %c0_i32_0 = arith.constant 0 : i32
    %c0_i32_1 = arith.constant 0 : i32
    return %c0_i32, %c0_i32_0 : i32, i32
  }
}

</mosaic_0001>

<bundles_post_ra>
// kernel: cdisc_class32_forward.1
= control target key start
LH: loop header
LB: loop body
LE: loop exit
PB: predicated region body
PF: predicated region fallthrough
CT: control target
= control target key end

     0   :  { %s19893_s0 = inlined_call_operand.vmem [shape: f32[512,32], index: 0, kind: input, shape index: {}]   ;;  %s19894_s1 = inlined_call_operand.vmem [shape: f32[32,16], index: 1, kind: input, shape index: {}]   ;;  %s19895_s2 = inlined_call_operand.vmem [shape: f32[1,16], index: 2, kind: input, shape index: {}]   ;;  %s19896_s3 = inlined_call_operand.vmem [shape: f32[9,16,32], index: 3, kind: input, shape index: {}]   ;;  %s19897_s4 = inlined_call_operand.vmem [shape: f32[1,32], index: 4, kind: input, shape index: {}]   ;;  %s19898_s5 = inlined_call_operand.vmem [shape: f32[9,32,32], index: 5, kind: input, shape index: {}]   ;;  %s19899_s6 = inlined_call_operand.vmem [shape: f32[1,32], index: 6, kind: input, shape index: {}]   ;;  %s19900_s7 = inlined_call_operand.vmem [shape: f32[9,32,32], index: 7, kind: input, shape index: {}]   ;;  %s19901_s8 = inlined_call_operand.vmem [shape: f32[1,32], index: 8, kind: input, shape index: {}]   ;;  %s19902_s9 = inlined_call_operand.vmem [shape: f32[9,32,32], index: 9, kind: input, shape index: {}]   ;;  %s19903_s10 = inlined_call_operand.vmem [shape: f32[1,32], index: 10, kind: input, shape index: {}]   ;;  %s19904_s11 = inlined_call_operand.vmem [shape: f32[16,32,128], index: 11, kind: input, shape index: {}]   ;;  %s19905_s12 = inlined_call_operand.vmem [shape: f32[1,128], index: 12, kind: input, shape index: {}]   ;;  %s19906_s13 = inlined_call_operand.vmem [shape: f32[128,32], index: 13, kind: input, shape index: {}]   ;;  %s19907_s14 = inlined_call_operand.vmem [shape: f32[1,32], index: 14, kind: input, shape index: {}]   ;;  %s19908_s15 = inlined_call_operand.vmem [shape: f32[32,2], index: 15, kind: input, shape index: {}]   ;;  %s19909_s16 = inlined_call_operand.vmem [shape: f32[1,2], index: 16, kind: input, shape index: {}]   ;;  %s19910_s17 = inlined_call_operand.hbm [shape: f32[2,2], index: 17, kind: output, shape index: {}]  }
   0x1   :  { %19915 = sst [smem:[#allocation18_spill]] %s19893_s0 }
   0x2   :  { %19916 = sst [smem:[#allocation19_spill]] %s19894_s1 }
   0x3   :  { %s19917_s26 = sld [smem:[#allocation19_spill]]  ;;  %vm132_vm0 = vcmask 261120   ;;  %s19918_s20 = sld [smem:[#allocation18_spill]] }
   0x9   :  { %v121_v0 = vld [vmem:[%s19917_s26] sm:$0xff]  ;;  %v122_v1 = vld [vmem:[%s19917_s26 + $0x8] sm:$0xff]  ;;  %v123_v2 = vld [vmem:[%s19917_s26 + $0x10] sm:$0xff] }
   0xa   :  { %v15716_v3 = vpack.c.bf16 %v122_v1, %v121_v0  ;;  %v124_v4 = vld [vmem:[%s19917_s26 + $0x18] sm:$0xff]  ;;  %v57_v5 = vld [vmem:[%s19918_s20] sm:$0xff]  ;;  %v58_v7 = vld [vmem:[%s19918_s20 + $0x8] sm:$0xff] }
   0xb   :  { %v15720_v6 = vpack.c.bf16 %v124_v4, %v123_v2  ;;  %14606 = vmatprep.mubr.msk.f32.mxu0 %vm132_vm0, %v57_v5  ;;  %v59_v8 = vld [vmem:[%s19918_s20 + $0x10] sm:$0xff]  ;;  %v104_v10 = vld [vmem:[%s19918_s20 + $0x178] sm:$0xff]  ;;  %v105_v12 = vld [vmem:[%s19918_s20 + $0x180] sm:$0xff] }
   0xc   :  { %15717 = vmatprep.subr.bf16.mxu0 %v15716_v3  ;;  %16102 = vmatprep.subr.bf16.mxu1 %v15716_v3  ;;  %v103_v9 = vld [vmem:[%s19918_s20 + $0x170] sm:$0xff]  ;;  %v60_v11 = vld [vmem:[%s19918_s20 + $0x18] sm:$0xff]  ;;  %v61_v13 = vld [vmem:[%s19918_s20 + $0x20] sm:$0xff] }
   0xd   :  { %15719 = vmatpush3.bf16.msra.mxu0 %v15716_v3  ;;  %16104 = vmatpush3.bf16.msra.mxu1 %v15716_v3  ;;  %v106_v14 = vld [vmem:[%s19918_s20 + $0x188] sm:$0xff]  ;;  %v107_v15 = vld [vmem:[%s19918_s20 + $0x190] sm:$0xff]  ;;  %v108_v18 = vld [vmem:[%s19918_s20 + $0x198] sm:$0xff] }
   0xe   :  { %15721 = vmatprep.subr.bf16.mxu0 %v15720_v6  ;;  %16103 = vmatprep.subr.bf16.mxu1 %v15720_v6  ;;  %v62_v16 = vld [vmem:[%s19918_s20 + $0x28] sm:$0xff]  ;;  %v63_v17 = vld [vmem:[%s19918_s20 + $0x30] sm:$0xff]  ;;  %v109_v19 = vld [vmem:[%s19918_s20 + $0x1a0] sm:$0xff] }
   0xf   :  { %14675 = vmatprep.mubr.msk.f32.mxu1 %vm132_vm0, %v103_v9  ;;  %v64_v20 = vld [vmem:[%s19918_s20 + $0x38] sm:$0xff]  ;;  %v65_v21 = vld [vmem:[%s19918_s20 + $0x40] sm:$0xff]  ;;  %v110_v22 = vld [vmem:[%s19918_s20 + $0x1a8] sm:$0xff] }
  0x11   :  { %15723 = vmatpush3.bf16.msra.mxu0 %v15720_v6  ;;  %16105 = vmatpush3.bf16.msra.mxu1 %v15720_v6 }
  0x14   :  { %14607 = vmatmul.mubr.msk.f32.vlgmr.msra.gmra.mrb[0].mxu0 %vm132_vm0, %v58_v7  ;;  %14676 = vmatmul.mubr.msk.f32.vlgmr.msra.gmra.mrb[0].mxu1 %vm132_vm0, %v104_v10 }
  0x15   :  { %14609 = vmatprep.mubr.msk.f32.mxu0 %vm132_vm0, %v59_v8  ;;  %14678 = vmatprep.mubr.msk.f32.mxu1 %vm132_vm0, %v105_v12 }
  0x18   :  { %14610 = vmatmul.mubr.msk.f32.gmra.mrb[2].mxu0 %vm132_vm0, %v60_v11  ;;  %14679 = vmatmul.mubr.msk.f32.gmra.mrb[2].mxu1 %vm132_vm0, %v106_v14 }
  0x19   :  { %14612 = vmatprep.mubr.msk.f32.mxu0 %vm132_vm0, %v61_v13  ;;  %14681 = vmatprep.mubr.msk.f32.mxu1 %vm132_vm0, %v107_v15 }
  0x1c   :  { %14613 = vmatmul.mubr.msk.f32.gmra.mrb[4].mxu0 %vm132_vm0, %v62_v16  ;;  %14682 = vmatmul.mubr.msk.f32.gmra.mrb[4].mxu1 %vm132_vm0, %v108_v18 }
  0x1d   :  { %14615 = vmatprep.mubr.msk.f32.mxu0 %vm132_vm0, %v63_v17  ;;  %14684 = vmatprep.mubr.msk.f32.mxu1 %vm132_vm0, %v109_v19 }
  0x1e   :  { %22 = vsyncpa [#allocation7], 0  ;;  %v111_v23 = vld [vmem:[%s19918_s20 + $0x1b0] sm:$0xff]  ;;  %v66_v24 = vld [vmem:[%s19918_s20 + $0x48] sm:$0xff]  ;;  %vm3334_vm1 = vcmask 130048   ;;  %vm3336_vm2 = vcmask 123904   ;;  %v842_v13 = vlaneseq }
  0x1f   :  { %v67_v25 = vld [vmem:[%s19918_s20 + $0x50] sm:$0xff]  ;;  %v112_v26 = vld [vmem:[%s19918_s20 + $0x1b8] sm:$0xff]  ;;  %v113_v27 = vld [vmem:[%s19918_s20 + $0x1c0] sm:$0xff]  ;;  %v19913_v6 = vmov 0.0   ;;  %v16608_v11 = vmov 1983009808  }
  0x20   :  { %14616 = vmatmul.mubr.msk.f32.gmra.mrb[6].mxu0 %vm132_vm0, %v64_v20  ;;  %14685 = vmatmul.mubr.msk.f32.gmra.mrb[6].mxu1 %vm132_vm0, %v110_v22  ;;  %v68_v28 = vld [vmem:[%s19918_s20 + $0x58] sm:$0xff]  ;;  %v69_v29 = vld [vmem:[%s19918_s20 + $0x60] sm:$0xff]  ;;  %v114_v30 = vld [vmem:[%s19918_s20 + $0x1c8] sm:$0xff]  ;;  %3338 = vst.msk [vmem:[#allocation2 + $0x10] sm:$0xff] %vm3334_vm1, %v19913_v6  ;;  %v840_v12 = vunpack.c.l.s4 %v16608_v11  ;;  %v843_v15 = vshrl.u32 %v842_v13, 7  ;;  %vm4016_vm3 = vcmask 1041409  }
  0x21   :  { %14618 = vmatprep.mubr.msk.f32.mxu0 %vm132_vm0, %v65_v21  ;;  %14687 = vmatprep.mubr.msk.f32.mxu1 %vm132_vm0, %v111_v23  ;;  %v115_v31 = vld [vmem:[%s19918_s20 + $0x1d0] sm:$0xff]  ;;  %v70_v32 = vld [vmem:[%s19918_s20 + $0x68] sm:$0xff]  ;;  %v116_v34 = vld [vmem:[%s19918_s20 + $0x1d8] sm:$0xff]  ;;  %3339 = vst.msk [vmem:[#allocation2 + $0x18] sm:$0x3] %vm3336_vm2, %v19913_v6  ;;  %vm4018_vm4 = vcmask 1042434  }
  0x22   :  { %v71_v33 = vld [vmem:[%s19918_s20 + $0x70] sm:$0xff]  ;;  %v117_v35 = vld [vmem:[%s19918_s20 + $0x1e0] sm:$0xff]  ;;  %v72_v36 = vld [vmem:[%s19918_s20 + $0x78] sm:$0xff]  ;;  %3335 = vst.msk [vmem:[#allocation2] sm:$0xff] %vm3334_vm1, %v19913_v6  ;;  %v841_v14 = vunpack.c.0.s8 %v840_v12  ;;  %vm4020_vm5 = vcmask 1043459   ;;  %vm4022_vm6 = vcmask 1044484  }
  0x23   :  { %v73_v37 = vld [vmem:[%s19918_s20 + $0x80] sm:$0xff]  ;;  %v118_v38 = vld [vmem:[%s19918_s20 + $0x1e8] sm:$0xff]  ;;  %v119_v39 = vld [vmem:[%s19918_s20 + $0x1f0] sm:$0xff]  ;;  %3337 = vst.msk [vmem:[#allocation2 + $0x8] sm:$0x3] %vm3336_vm2, %v19913_v6  ;;  %vm4024_vm7 = vcmask 1045509  }
  0x24   :  { %14619 = vmatmul.mubr.msk.f32.gmra.mrb[8].mxu0 %vm132_vm0, %v66_v24  ;;  %14688 = vmatmul.mubr.msk.f32.gmra.mrb[8].mxu1 %vm132_vm0, %v112_v26  ;;  %v74_v40 = vld [vmem:[%s19918_s20 + $0x88] sm:$0xff]  ;;  %v75_v41 = vld [vmem:[%s19918_s20 + $0x90] sm:$0xff]  ;;  %v120_v42 = vld [vmem:[%s19918_s20 + $0x1f8] sm:$0xff]  ;;  %3340 = vst.msk [vmem:[#allocation2 + $0x20] sm:$0xff] %vm3334_vm1, %v19913_v6  ;;  %v17103_v19 = vsub.s32 %v841_v14, %v843_v15  ;;  %vm4026_vm8 = vcmask 1046534   ;;  %vm4028_vm9 = vcmask 1047559  }
  0x25   :  { %14621 = vmatprep.mubr.msk.f32.mxu0 %vm132_vm0, %v67_v25  ;;  %14690 = vmatprep.mubr.msk.f32.mxu1 %vm132_vm0, %v113_v27  ;;  %v76_v43 = vld [vmem:[%s19918_s20 + $0x98] sm:$0xff]  ;;  %v77_v44 = vld [vmem:[%s19918_s20 + $0xa0] sm:$0xff]  ;;  %v78_v45 = vld [vmem:[%s19918_s20 + $0xa8] sm:$0xff]  ;;  %3341 = vst.msk [vmem:[#allocation2 + $0x28] sm:$0x3] %vm3336_vm2, %v19913_v6  ;;  %vm6244_vm10 = vcmask 254976  }
  0x26   :  { %v79_v46 = vld [vmem:[%s19918_s20 + $0xb0] sm:$0xff]  ;;  %v80_v47 = vld [vmem:[%s19918_s20 + $0xb8] sm:$0xff]  ;;  %v81_v48 = vld [vmem:[%s19918_s20 + $0xc0] sm:$0xff]  ;;  %3342 = vst.msk [vmem:[#allocation2 + $0x30] sm:$0xff] %vm3334_vm1, %v19913_v6  ;;  %vm9034_vm11 = vcmask 259072   ;;  %vm9240_vm12 = vcmask 257024  }
  0x27   :  { %v82_v49 = vld [vmem:[%s19918_s20 + $0xc8] sm:$0xff]  ;;  %v83_v50 = vld [vmem:[%s19918_s20 + $0xd0] sm:$0xff]  ;;  %v84_v51 = vld [vmem:[%s19918_s20 + $0xd8] sm:$0xff]  ;;  %3343 = vst.msk [vmem:[#allocation2 + $0x38] sm:$0x3] %vm3336_vm2, %v19913_v6  ;;  %vm16610_vm13 = vmmov 0  }
  0x28   :  { %14622 = vmatmul.mubr.msk.f32.gmra.mrb[10].mxu0 %vm132_vm0, %v68_v28  ;;  %14691 = vmatmul.mubr.msk.f32.gmra.mrb[10].mxu1 %vm132_vm0, %v114_v30  ;;  %v85_v52 = vld [vmem:[%s19918_s20 + $0xe0] sm:$0xff]  ;;  %v86_v53 = vld [vmem:[%s19918_s20 + $0xe8] sm:$0xff]  ;;  %v87_v54 = vld [vmem:[%s19918_s20 + $0xf0] sm:$0xff]  ;;  %3344 = vst.msk [vmem:[#allocation2 + $0x40] sm:$0xff] %vm3334_vm1, %v19913_v6  ;;  %vm12985_vm14 = vcmask 9216  }
  0x29   :  { %14624 = vmatprep.mubr.msk.f32.mxu0 %vm132_vm0, %v69_v29  ;;  %14693 = vmatprep.mubr.msk.f32.mxu1 %vm132_vm0, %v115_v31  ;;  %v88_v55 = vld [vmem:[%s19918_s20 + $0xf8] sm:$0xff]  ;;  %v89_v56 = vld [vmem:[%s19918_s20 + $0x100] sm:$0xff]  ;;  %v90_v57 = vld [vmem:[%s19918_s20 + $0x108] sm:$0xff]  ;;  %3345 = vst.msk [vmem:[#allocation2 + $0x48] sm:$0x3] %vm3336_vm2, %v19913_v6 }
  0x2a   :  { %v91_v58 = vld [vmem:[%s19918_s20 + $0x110] sm:$0xff]  ;;  %v92_v59 = vld [vmem:[%s19918_s20 + $0x118] sm:$0xff]  ;;  %v93_v60 = vld [vmem:[%s19918_s20 + $0x120] sm:$0xff]  ;;  %3346 = vst.msk [vmem:[#allocation2 + $0x50] sm:$0xff] %vm3334_vm1, %v19913_v6 }
  0x2b   :  { %v94_v61 = vld [vmem:[%s19918_s20 + $0x128] sm:$0xff]  ;;  %v95_v62 = vld [vmem:[%s19918_s20 + $0x130] sm:$0xff]  ;;  %v96_v63 = vld [vmem:[%s19918_s20 + $0x138] sm:$0xff]  ;;  %3347 = vst.msk [vmem:[#allocation2 + $0x58] sm:$0x3] %vm3336_vm2, %v19913_v6 }
  0x2c   :  { %14625 = vmatmul.mubr.msk.f32.gmra.mrb[12].mxu0 %vm132_vm0, %v70_v32  ;;  %14694 = vmatmul.mubr.msk.f32.gmra.mrb[12].mxu1 %vm132_vm0, %v116_v34  ;;  %v97_v0 = vld [vmem:[%s19918_s20 + $0x140] sm:$0xff]  ;;  %v98_v1 = vld [vmem:[%s19918_s20 + $0x148] sm:$0xff]  ;;  %v99_v2 = vld [vmem:[%s19918_s20 + $0x150] sm:$0xff]  ;;  %3348 = vst.msk [vmem:[#allocation2 + $0x60] sm:$0xff] %vm3334_vm1, %v19913_v6 }
  0x2d   :  { %14627 = vmatprep.mubr.msk.f32.mxu0 %vm132_vm0, %v71_v33  ;;  %14696 = vmatprep.mubr.msk.f32.mxu1 %vm132_vm0, %v117_v35  ;;  %v100_v3 = vld [vmem:[%s19918_s20 + $0x158] sm:$0xff]  ;;  %v101_v4 = vld [vmem:[%s19918_s20 + $0x160] sm:$0xff]  ;;  %v102_v5 = vld [vmem:[%s19918_s20 + $0x168] sm:$0xff]  ;;  %3349 = vst.msk [vmem:[#allocation2 + $0x68] sm:$0x3] %vm3336_vm2, %v19913_v6 }
  0x2e   :  { %3350 = vst.msk [vmem:[#allocation2 + $0x70] sm:$0xff] %vm3334_vm1, %v19913_v6  ;;  %3352 = vst.msk [vmem:[#allocation2 + $0x80] sm:$0xff] %vm3334_vm1, %v19913_v6  ;;  %v4191_v7 = vld [vmem:[%s19896_s3] sm:$0xff]  ;;  %v4192_v8 = vld [vmem:[%s19896_s3 + $0x8] sm:$0xff] }
  0x2f   :  { %3351 = vst.msk [vmem:[#allocation2 + $0x78] sm:$0x3] %vm3336_vm2, %v19913_v6  ;;  %3353 = vst.msk [vmem:[#allocation2 + $0x88] sm:$0x3] %vm3336_vm2, %v19913_v6  ;;  %v15724_v9 = vpack.c.bf16 %v4192_v8, %v4191_v7  ;;  %v4175_v10 = vld [vmem:[#allocation2] sm:$0xff] }
  0x30   :  { %14628 = vmatmul.mubr.msk.f32.gmra.mrb[14].mxu0 %vm132_vm0, %v72_v36  ;;  %14697 = vmatmul.mubr.msk.f32.gmra.mrb[14].mxu1 %vm132_vm0, %v118_v38  ;;  %3354 = vst.msk [vmem:[#allocation2 + $0x90] sm:$0xff] %vm3334_vm1, %v19913_v6  ;;  %3356 = vst.msk [vmem:[#allocation2 + $0xa0] sm:$0xff] %vm3334_vm1, %v19913_v6  ;;  %v17100_v16 = vld [vmem:[%s19895_s2] ss:$0 sm:$0xff] }
  0x31   :  { %14630 = vmatprep.mubr.msk.f32.mxu0 %vm132_vm0, %v73_v37  ;;  %14699 = vmatprep.mubr.msk.f32.mxu1 %vm132_vm0, %v119_v39  ;;  %3355 = vst.msk [vmem:[#allocation2 + $0x98] sm:$0x3] %vm3336_vm2, %v19913_v6  ;;  %3357 = vst.msk [vmem:[#allocation2 + $0xa8] sm:$0x3] %vm3336_vm2, %v19913_v6  ;;  %v17112_v39 = vsub.s32 0, %v843_v15 }
  0x32   :  { %3358 = vst.msk [vmem:[#allocation2 + $0xb0] sm:$0xff] %vm3334_vm1, %v19913_v6  ;;  %3360 = vst.msk [vmem:[#allocation2 + $0xc0] sm:$0xff] %vm3334_vm1, %v19913_v6  ;;  %15725 = vmatprep.subr.bf16.mxu1 %v15724_v9 }
  0x33   :  { %3359 = vst.msk [vmem:[#allocation2 + $0xb8] sm:$0x3] %vm3336_vm2, %v19913_v6  ;;  %3361 = vst.msk [vmem:[#allocation2 + $0xc8] sm:$0x3] %vm3336_vm2, %v19913_v6  ;;  %15727 = vmatpush3.bf16.msra.mxu1 %v15724_v9 }
  0x34   :  { %14631 = vmatmul.mubr.msk.f32.gmra.mrb[16].mxu0 %vm132_vm0, %v74_v40  ;;  %14700 = vmatmul.mubr.msk.f32.gmra.mrb[16].mxu1 %vm132_vm0, %v120_v42  ;;  %3362 = vst.msk [vmem:[#allocation2 + $0xd0] sm:$0xff] %vm3334_vm1, %v19913_v6  ;;  %3364 = vst.msk [vmem:[#allocation2 + $0xe0] sm:$0xff] %vm3334_vm1, %v19913_v6 }
  0x35   :  { %14633 = vmatprep.mubr.msk.f32.mxu0 %vm132_vm0, %v75_v41  ;;  %3363 = vst.msk [vmem:[#allocation2 + $0xd8] sm:$0x3] %vm3336_vm2, %v19913_v6  ;;  %3365 = vst.msk [vmem:[#allocation2 + $0xe8] sm:$0x3] %vm3336_vm2, %v19913_v6  ;;  %14706 = vmatprep.mubr.msk.f32.mxu1 %vm3334_vm1, %v4175_v10 }
  0x36   :  { %3366 = vst.msk [vmem:[#allocation2 + $0xf0] sm:$0xff] %vm3334_vm1, %v19913_v6  ;;  %3368 = vst.msk [vmem:[#allocation2 + $0x100] sm:$0xff] %vm3334_vm1, %v19913_v6 }
  0x37   :  { %3367 = vst.msk [vmem:[#allocation2 + $0xf8] sm:$0x3] %vm3336_vm2, %v19913_v6  ;;  %3369 = vst.msk [vmem:[#allocation2 + $0x108] sm:$0x3] %vm3336_vm2, %v19913_v6 }
  0x38   :  { %14634 = vmatmul.mubr.msk.f32.gmra.mrb[18].mxu0 %vm132_vm0, %v76_v43  ;;  %3370 = vst.msk [vmem:[#allocation2 + $0x110] sm:$0xff] %vm3334_vm1, %v19913_v6  ;;  %3372 = vst.msk [vmem:[#allocation2 + $0x120] sm:$0xff] %vm3334_vm1, %v19913_v6 }
  0x39   :  { %14636 = vmatprep.mubr.msk.f32.mxu0 %vm132_vm0, %v77_v44  ;;  %3371 = vst.msk [vmem:[#allocation2 + $0x118] sm:$0x3] %vm3336_vm2, %v19913_v6  ;;  %3373 = vst.msk [vmem:[#allocation2 + $0x128] sm:$0x3] %vm3336_vm2, %v19913_v6 }
  0x3a   :  { %3374 = vst.msk [vmem:[#allocation2 + $0x130] sm:$0xff] %vm3334_vm1, %v19913_v6 }
  0x3b   :  { %3375 = vst.msk [vmem:[#allocation2 + $0x138] sm:$0x3] %vm3336_vm2, %v19913_v6 }
  0x3c   :  { %14637 = vmatmul.mubr.msk.f32.gmra.mrb[20].mxu0 %vm132_vm0, %v78_v45  ;;  %6243 = vst.msk [vmem:[#allocation3] sm:$0xff] %vm132_vm0, %v19913_v6  ;;  %6246 = vst.msk [vmem:[#allocation3 + $0x10] sm:$0xff] %vm132_vm0, %v19913_v6 }
  0x3d   :  { %14639 = vmatprep.mubr.msk.f32.mxu0 %vm132_vm0, %v79_v46  ;;  %6248 = vst.msk [vmem:[#allocation3 + $0x20] sm:$0xff] %vm132_vm0, %v19913_v6  ;;  %6250 = vst.msk [vmem:[#allocation3 + $0x30] sm:$0xff] %vm132_vm0, %v19913_v6 }
  0x3e   :  { %6252 = vst.msk [vmem:[#allocation3 + $0x40] sm:$0xff] %vm132_vm0, %v19913_v6  ;;  %6254 = vst.msk [vmem:[#allocation3 + $0x50] sm:$0xff] %vm132_vm0, %v19913_v6 }
  0x3f   :  { %6256 = vst.msk [vmem:[#allocation3 + $0x60] sm:$0xff] %vm132_vm0, %v19913_v6  ;;  %6258 = vst.msk [vmem:[#allocation3 + $0x70] sm:$0xff] %vm132_vm0, %v19913_v6 }
  0x40   :  { %14640 = vmatmul.mubr.msk.f32.gmra.mrb[22].mxu0 %vm132_vm0, %v80_v47  ;;  %6260 = vst.msk [vmem:[#allocation3 + $0x80] sm:$0xff] %vm132_vm0, %v19913_v6  ;;  %6262 = vst.msk [vmem:[#allocation3 + $0x90] sm:$0xff] %vm132_vm0, %v19913_v6 }
  0x41   :  { %14642 = vmatprep.mubr.msk.f32.mxu0 %vm132_vm0, %v81_v48  ;;  %6264 = vst.msk [vmem:[#allocation3 + $0xa0] sm:$0xff] %vm132_vm0, %v19913_v6  ;;  %6266 = vst.msk [vmem:[#allocation3 + $0xb0] sm:$0xff] %vm132_vm0, %v19913_v6 }
  0x42   :  { %6268 = vst.msk [vmem:[#allocation3 + $0xc0] sm:$0xff] %vm132_vm0, %v19913_v6  ;;  %6270 = vst.msk [vmem:[#allocation3 + $0xd0] sm:$0xff] %vm132_vm0, %v19913_v6 }
  0x43   :  { %6272 = vst.msk [vmem:[#allocation3 + $0xe0] sm:$0xff] %vm132_vm0, %v19913_v6  ;;  %6274 = vst.msk [vmem:[#allocation3 + $0xf0] sm:$0xff] %vm132_vm0, %v19913_v6 }
  0x44   :  { %14643 = vmatmul.mubr.msk.f32.gmra.mrb[24].mxu0 %vm132_vm0, %v82_v49  ;;  %6276 = vst.msk [vmem:[#allocation3 + $0x100] sm:$0xff] %vm132_vm0, %v19913_v6  ;;  %6278 = vst.msk [vmem:[#allocation3 + $0x110] sm:$0xff] %vm132_vm0, %v19913_v6 }
  0x45   :  { %14645 = vmatprep.mubr.msk.f32.mxu0 %vm132_vm0, %v83_v50  ;;  %6280 = vst.msk [vmem:[#allocation3 + $0x120] sm:$0xff] %vm132_vm0, %v19913_v6  ;;  %6282 = vst.msk [vmem:[#allocation3 + $0x130] sm:$0xff] %vm132_vm0, %v19913_v6 }
  0x48   :  { %14646 = vmatmul.mubr.msk.f32.gmra.mrb[26].mxu0 %vm132_vm0, %v84_v51 }
  0x49   :  { %14648 = vmatprep.mubr.msk.f32.mxu0 %vm132_vm0, %v85_v52 }
  0x4c   :  { %14649 = vmatmul.mubr.msk.f32.gmra.mrb[28].mxu0 %vm132_vm0, %v86_v53 }
  0x4d   :  { %14651 = vmatprep.mubr.msk.f32.mxu0 %vm132_vm0, %v87_v54 }
  0x50   :  { %14652 = vmatmul.mubr.msk.f32.gmra.mrb[30].mxu0 %vm132_vm0, %v88_v55 }
  0x51   :  { %14654 = vmatprep.mubr.msk.f32.mxu0 %vm132_vm0, %v89_v56 }
  0x54   :  { %14655 = vmatmul.mubr.msk.f32.gmra.mrb[32].mxu0 %vm132_vm0, %v90_v57 }
  0x55   :  { %14657 = vmatprep.mubr.msk.f32.mxu0 %vm132_vm0, %v91_v58 }
  0x58   :  { %14658 = vmatmul.mubr.msk.f32.gmra.mrb[34].mxu0 %vm132_vm0, %v92_v59 }
  0x59   :  { %14660 = vmatprep.mubr.msk.f32.mxu0 %vm132_vm0, %v93_v60 }
  0x5c   :  { %14661 = vmatmul.mubr.msk.f32.gmra.mrb[36].mxu0 %vm132_vm0, %v94_v61 }
  0x5d   :  { %14663 = vmatprep.mubr.msk.f32.mxu0 %vm132_vm0, %v95_v62 }
  0x60   :  { %14664 = vmatmul.mubr.msk.f32.gmra.mrb[38].mxu0 %vm132_vm0, %v96_v63 }
  0x61   :  { %14666 = vmatprep.mubr.msk.f32.mxu0 %vm132_vm0, %v97_v0 }
  0x64   :  { %14667 = vmatmul.mubr.msk.f32.gmra.mrb[40].mxu0 %vm132_vm0, %v98_v1 }
  0x65   :  { %14669 = vmatprep.mubr.msk.f32.mxu0 %vm132_vm0, %v99_v2 }
  0x68   :  { %14670 = vmatmul.mubr.msk.f32.gmra.mrb[42].mxu0 %vm132_vm0, %v100_v3 }
  0x69   :  { %14672 = vmatprep.mubr.msk.f32.mxu0 %vm132_vm0, %v101_v4 }
  0x6c   :  { %14673 = vmatmul.mubr.msk.f32.gmra.mrb[44].mxu0 %vm132_vm0, %v102_v5 }
  0xe7   :  { %v14608_v17 = vpop.f32.mrb[0].mxu0 }
  0xe8   :  { %v397_v18 = vadd.f32 %v14608_v17, %v17100_v16  ;;  %v391_v20 = vpop.f32.mrb[1].mxu0 }
  0xe9   :  { %v392_v21 = vadd.f32 %v17100_v16, %v391_v20 }
  0xea   :  { %v711_v22 = vmax.f32 %v397_v18, 0.0 }
  0xeb   :  { %v710_v23 = vmax.f32 %v392_v21, 0.0  ;;  %v14611_v24 = vpop.f32.mrb[2].mxu0 }
  0xec   :  { %v855_v25 = vcombine.high %v711_v22, %v711_v22  ;;  %v862_v26 = vrot.slane %v711_v22, %v17103_v19  ;;  %v407_v27 = vadd.f32 %v14611_v24, %v17100_v16  ;;  %v401_v28 = vpop.f32.mrb[3].mxu0 }
  0xed   :  { %v838_v29 = vcombine.high %v710_v23, %v710_v23  ;;  %v845_v30 = vrot.slane %v710_v23, %v17103_v19  ;;  %v402_v31 = vadd.f32 %v17100_v16, %v401_v28 }
  0xee   :  { %v869_v32 = vrot.slane %v855_v25, %v17103_v19  ;;  %v870_v33 = vcombine.high %v862_v26, %v862_v26  ;;  %v13070_v34 = vrot.slane %v862_v26, 9  ;;  %v713_v35 = vmax.f32 %v407_v27, 0.0 }
  0xef   :  { %v852_v36 = vrot.slane %v838_v29, %v17103_v19  ;;  %v853_v37 = vcombine.high %v845_v30, %v845_v30  ;;  %v13066_v38 = vrot.slane %v845_v30, 9  ;;  %v14614_v40 = vpop.f32.mrb[4].mxu0  ;;  %v712_v44 = vmax.f32 %v402_v31, 0.0 }
  0xf0   :  { %v871_v41 = vcombine.high %v869_v32, %v869_v32  ;;  %v13071_v42 = vrot.slane %v870_v33, 9  ;;  %v13072_v43 = vrot.slane %v869_v32, 9  ;;  %v17114_v45 = vpop.f32.mrb[5].mxu0  ;;  %v2954_v46 = vmax.f32 %v862_v26, %v13070_v34 }
  0xf1   :  { %v854_v47 = vcombine.high %v852_v36, %v852_v36  ;;  %v13067_v48 = vrot.slane %v853_v37, 9  ;;  %v13068_v49 = vrot.slane %v852_v36, 9  ;;  %v2950_v52 = vmax.f32 %v845_v30, %v13066_v38 }
  0xf2   :  { %v13073_v50 = vrot.slane %v871_v41, 9  ;;  %v2955_v51 = vmax.f32 %v870_v33, %v13071_v42  ;;  %v889_v53 = vcombine.high %v713_v35, %v713_v35  ;;  %v2956_v54 = vmax.f32 %v869_v32, %v13072_v43 }
  0xf3   :  { %v13069_v55 = vrot.slane %v854_v47, 9  ;;  %v2951_v56 = vmax.f32 %v853_v37, %v13067_v48  ;;  %v896_v57 = vrot.slane %v713_v35, %v17103_v19  ;;  %v14617_v58 = vpop.f32.mrb[6].mxu0  ;;  %v2952_v59 = vmax.f32 %v852_v36, %v13068_v49 }
  0xf4   :  { %v903_v60 = vrot.slane %v889_v53, %v17103_v19  ;;  %v872_v61 = vcombine.high %v712_v44, %v712_v44  ;;  %v879_v62 = vrot.slane %v712_v44, %v17103_v19  ;;  %v17119_v63 = vpop.f32.mrb[7].mxu0  ;;  %v17121_v0 = vmax.f32 %v871_v41, %v13073_v50 }
  0xf5   :  { %v904_v1 = vcombine.high %v896_v57, %v896_v57  ;;  %v13078_v2 = vrot.slane %v896_v57, 9  ;;  %v417_v3 = vadd.f32 %v14614_v40, %v17100_v16  ;;  %v2953_v29 = vmax.f32 %v854_v47, %v13069_v55 }
  0xf6   :  { %v905_v4 = vcombine.high %v903_v60, %v903_v60  ;;  %v13080_v5 = vrot.slane %v903_v60, 9  ;;  %v886_v7 = vrot.slane %v872_v61, %v17103_v19  ;;  %v887_v8 = vcombine.high %v879_v62, %v879_v62 }
  0xf7   :  { %v13079_v9 = vrot.slane %v904_v1, 9  ;;  %v2962_v10 = vmax.f32 %v896_v57, %v13078_v2  ;;  %v13074_v11 = vrot.slane %v879_v62, 9  ;;  %v715_v12 = vmax.f32 %v417_v3, 0.0  ;;  %v17125_v13 = vpop.f32.mrb[8].mxu0 }
  0xf8   :  { %v13081_v14 = vrot.slane %v905_v4, 9  ;;  %v2964_v15 = vmax.f32 %v903_v60, %v13080_v5  ;;  %v888_v17 = vcombine.high %v886_v7, %v886_v7  ;;  %v13075_v18 = vrot.slane %v887_v8, 9  ;;  %v17127_v20 = vpop.f32.mrb[9].mxu0 }
  0xf9   :  { %v2963_v21 = vmax.f32 %v904_v1, %v13079_v9  ;;  %v3210_v22 = vmax.f32 %v2954_v46, %v2962_v10  ;;  %v13076_v23 = vrot.slane %v886_v7, 9  ;;  %v2958_v24 = vmax.f32 %v879_v62, %v13074_v11  ;;  %v17152_v1 = vpop.f32.mrb[0].mxu1 }
  0xfa   :  { %v2965_v25 = vmax.f32 %v905_v4, %v13081_v14  ;;  %v3212_v26 = vmax.f32 %v2956_v54, %v2964_v15  ;;  %v13077_v27 = vrot.slane %v888_v17, 9  ;;  %v2959_v28 = vmax.f32 %v887_v8, %v13075_v18 }
  0xfb   :  { %v3211_v30 = vmax.f32 %v2955_v51, %v2963_v21  ;;  %v2960_v31 = vmax.f32 %v886_v7, %v13076_v23  ;;  %v3206_v32 = vmax.f32 %v2950_v52, %v2958_v24  ;;  %v17129_v33 = vpop.f32.mrb[10].mxu0  ;;  %v3523_v35 = vrot.slane %v3210_v22, %v17112_v39 }
  0xfc   :  { %v3213_v34 = vmax.f32 %v17121_v0, %v2965_v25  ;;  %v2961_v36 = vmax.f32 %v888_v17, %v13077_v27  ;;  %v3207_v37 = vmax.f32 %v2951_v56, %v2959_v28  ;;  %v17133_v38 = vpop.f32.mrb[11].mxu0  ;;  %v3531_v41 = vrot.slane %v3212_v26, %v17112_v39  ;;  %v17168_v27 = vpop.f32.mrb[1].mxu1 }
  0xfd   :  { %v3527_v40 = vrot.slane %v3211_v30, %v17112_v39  ;;  %v3208_v42 = vmax.f32 %v2952_v59, %v2960_v31  ;;  %v923_v43 = vcombine.high %v715_v12, %v715_v12  ;;  %v3507_v46 = vrot.slane %v3206_v32, %v17112_v39 }
  0xfe   :  { %v3209_v44 = vmax.f32 %v2953_v29, %v2961_v36  ;;  %v3511_v47 = vrot.slane %v3207_v37, %v17112_v39  ;;  %v930_v48 = vrot.slane %v715_v12, %v17103_v19  ;;  %v412_v51 = vadd.f32 %v17100_v16, %v17114_v45 }
  0xff   :  { %v3515_v49 = vrot.slane %v3208_v42, %v17112_v39  ;;  %v937_v50 = vrot.slane %v923_v43, %v17103_v19  ;;  %v427_v52 = vadd.f32 %v14617_v58, %v17100_v16  ;;  %v17145_v53 = vpop.f32.mrb[12].mxu0  ;;  %v3535_v45 = vrot.slane %v3213_v34, %v17112_v39 }
 0x100   :  { %v3519_v54 = vrot.slane %v3209_v44, %v17112_v39  ;;  %v4017_v55 = vsel %vm4016_vm3, %v3511_v47, %v3507_v46  ;;  %v938_v56 = vcombine.high %v930_v48, %v930_v48  ;;  %v13086_v57 = vrot.slane %v930_v48, 9  ;;  %v17149_v59 = vpop.f32.mrb[13].mxu0 }
 0x101   :  { %v4019_v60 = vsel %vm4018_vm4, %v3515_v49, %v4017_v55  ;;  %v939_v61 = vcombine.high %v937_v50, %v937_v50  ;;  %v13088_v62 = vrot.slane %v937_v50, 9  ;;  %v714_v0 = vmax.f32 %v412_v51, 0.0 }
 0x102   :  { %v4021_v58 = vsel %vm4020_vm5, %v3519_v54, %v4019_v60  ;;  %v13087_v2 = vrot.slane %v938_v56, 9  ;;  %v717_v3 = vmax.f32 %v427_v52, 0.0  ;;  %v2970_v7 = vmax.f32 %v930_v48, %v13086_v57 }
 0x103   :  { %v4023_v4 = vsel %vm4022_vm6, %v3523_v35, %v4021_v58  ;;  %v13089_v5 = vrot.slane %v939_v61, 9  ;;  %v906_v8 = vcombine.high %v714_v0, %v714_v0  ;;  %v17157_v9 = vpop.f32.mrb[14].mxu0  ;;  %v2972_v11 = vmax.f32 %v937_v50, %v13088_v62 }
 0x104   :  { %v4025_v10 = vsel %vm4024_vm7, %v3527_v40, %v4023_v4  ;;  %v913_v12 = vrot.slane %v714_v0, %v17103_v19  ;;  %v957_v14 = vcombine.high %v717_v3, %v717_v3  ;;  %v17161_v15 = vpop.f32.mrb[15].mxu0  ;;  %v2971_v18 = vmax.f32 %v938_v56, %v13087_v2  ;;  %v17187_v56 = vpop.f32.mrb[2].mxu1 }
 0x105   :  { %v4027_v17 = vsel %vm4026_vm8, %v3531_v41, %v4025_v10  ;;  %v920_v21 = vrot.slane %v906_v8, %v17103_v19  ;;  %v964_v22 = vrot.slane %v717_v3, %v17103_v19  ;;  %v2973_v34 = vmax.f32 %v939_v61, %v13089_v5 }
 0x106   :  { %v4029_v23 = vsel %vm4028_vm9, %v3535_v45, %v4027_v17  ;;  %v921_v24 = vcombine.high %v913_v12, %v913_v12  ;;  %v13082_v25 = vrot.slane %v913_v12, 9  ;;  %v971_v26 = vrot.slane %v957_v14, %v17103_v19 }
 0x107   :  { %4152 = vst.msk [vmem:[#allocation2 + $0x11] sm:$0xff] %vm3334_vm1, %v4029_v23  ;;  %v922_v28 = vcombine.high %v920_v21, %v920_v21  ;;  %v13084_v29 = vrot.slane %v920_v21, 9  ;;  %v972_v30 = vcombine.high %v964_v22, %v964_v22  ;;  %v13094_v31 = vrot.slane %v964_v22, 9  ;;  %v17171_v32 = vpop.f32.mrb[16].mxu0 }
 0x108   :  { %v13083_v35 = vrot.slane %v921_v24, 9  ;;  %v973_v36 = vcombine.high %v971_v26, %v971_v26  ;;  %v13096_v37 = vrot.slane %v971_v26, 9  ;;  %v17173_v40 = vpop.f32.mrb[17].mxu0  ;;  %v17175_v42 = vmax.f32 %v913_v12, %v13082_v25 }
 0x109   :  { %v13085_v41 = vrot.slane %v922_v28, 9  ;;  %v13095_v43 = vrot.slane %v972_v30, 9  ;;  %v2978_v44 = vmax.f32 %v964_v22, %v13094_v31  ;;  %v17177_v46 = vmax.f32 %v920_v21, %v13084_v29 }
 0x10a   :  { %v13097_v47 = vrot.slane %v973_v36, 9  ;;  %v2980_v48 = vmax.f32 %v971_v26, %v13096_v37  ;;  %v422_v49 = vadd.f32 %v17100_v16, %v17119_v63  ;;  %v17181_v50 = vmax.f32 %v921_v24, %v13083_v35 }
 0x10b   :  { %v2979_v51 = vmax.f32 %v972_v30, %v13095_v43  ;;  %v3218_v52 = vmax.f32 %v2970_v7, %v2978_v44  ;;  %v437_v54 = vadd.f32 %v17125_v13, %v17100_v16  ;;  %v17185_v55 = vpop.f32.mrb[18].mxu0  ;;  %v432_v62 = vadd.f32 %v17100_v16, %v17127_v20 }
 0x10c   :  { %v2981_v57 = vmax.f32 %v973_v36, %v13097_v47  ;;  %v3220_v60 = vmax.f32 %v2972_v11, %v2980_v48  ;;  %v716_v61 = vmax.f32 %v422_v49, 0.0  ;;  %v17191_v0 = vpop.f32.mrb[19].mxu0  ;;  %v2969_v63 = vmax.f32 %v922_v28, %v13085_v41 }
 0x10d   :  { %v3219_v45 = vmax.f32 %v2971_v18, %v2979_v51  ;;  %v17194_v58 = vrot.slane %v3218_v52, %v17112_v39  ;;  %v719_v2 = vmax.f32 %v437_v54, 0.0  ;;  %v447_v5 = vadd.f32 %v17129_v33, %v17100_v16 }
 0x10e   :  { %v3221_v3 = vmax.f32 %v2973_v34, %v2981_v57  ;;  %v940_v13 = vcombine.high %v716_v61, %v716_v61  ;;  %v947_v4 = vrot.slane %v716_v61, %v17103_v19  ;;  %v4176_v7 = vld [vmem:[#allocation2 + $0x10] sm:$0xff]  ;;  %v17200_v8 = vrot.slane %v3220_v60, %v17112_v39 }
 0x10f   :  { %v991_v20 = vcombine.high %v719_v2, %v719_v2  ;;  %v998_v10 = vrot.slane %v719_v2, %v17103_v19  ;;  %v718_v11 = vmax.f32 %v432_v62, 0.0  ;;  %14707 = vmatmul.mubr.msk.f32.vlgmr.msra.gmra.mrb[18].mxu1 %vm3334_vm1, %v4176_v7  ;;  %v17204_v12 = vpop.f32.mrb[20].mxu0  ;;  %v17207_v14 = vrot.slane %v3219_v45, %v17112_v39 }
 0x110   :  { %v954_v17 = vrot.slane %v940_v13, %v17103_v19  ;;  %v955_v18 = vcombine.high %v947_v4, %v947_v4  ;;  %v13090_v21 = vrot.slane %v947_v4, 9  ;;  %v17210_v33 = vpop.f32.mrb[21].mxu0  ;;  %v17213_v22 = vrot.slane %v3221_v3, %v17112_v39 }
 0x111   :  { %v1005_v23 = vrot.slane %v991_v20, %v17103_v19  ;;  %v1006_v24 = vcombine.high %v998_v10, %v998_v10  ;;  %v13102_v25 = vrot.slane %v998_v10, 9  ;;  %v974_v36 = vcombine.high %v718_v11, %v718_v11 }
 0x112   :  { %v956_v26 = vcombine.high %v954_v17, %v954_v17  ;;  %v13091_v28 = vrot.slane %v955_v18, 9  ;;  %v13092_v29 = vrot.slane %v954_v17, 9  ;;  %v2974_v30 = vmax.f32 %v947_v4, %v13090_v21  ;;  %v17240_v21 = vpop.f32.mrb[3].mxu1 }
 0x113   :  { %v1007_v31 = vcombine.high %v1005_v23, %v1005_v23  ;;  %v13103_v34 = vrot.slane %v1006_v24, 9  ;;  %v13104_v35 = vrot.slane %v1005_v23, 9  ;;  %v17216_v37 = vpop.f32.mrb[22].mxu0  ;;  %v17221_v51 = vmax.f32 %v998_v10, %v13102_v25 }
 0x114   :  { %v13093_v41 = vrot.slane %v956_v26, 9  ;;  %v2975_v43 = vmax.f32 %v955_v18, %v13091_v28  ;;  %v2976_v44 = vmax.f32 %v954_v17, %v13092_v29  ;;  %v3214_v47 = vmax.f32 %v17175_v42, %v2974_v30  ;;  %v17219_v48 = vpop.f32.mrb[23].mxu0 }
 0x115   :  { %v13105_v49 = vrot.slane %v1007_v31, 9  ;;  %v17223_v52 = vmax.f32 %v1006_v24, %v13103_v34  ;;  %v981_v54 = vrot.slane %v718_v11, %v17103_v19  ;;  %v17228_v62 = vmax.f32 %v1005_v23, %v13104_v35 }
 0x116   :  { %v2977_v57 = vmax.f32 %v956_v26, %v13093_v41  ;;  %v3215_v60 = vmax.f32 %v17181_v50, %v2975_v43  ;;  %v3216_v61 = vmax.f32 %v17177_v46, %v2976_v44  ;;  %v3539_v45 = vrot.slane %v3214_v47, %v17112_v39 }
 0x117   :  { %v988_v42 = vrot.slane %v974_v36, %v17103_v19  ;;  %v989_v2 = vcombine.high %v981_v54, %v981_v54  ;;  %v13098_v3 = vrot.slane %v981_v54, 9  ;;  %v17232_v13 = vpop.f32.mrb[24].mxu0  ;;  %v721_v10 = vmax.f32 %v447_v5, 0.0 }
 0x118   :  { %v3217_v4 = vmax.f32 %v2969_v63, %v2977_v57  ;;  %v3543_v7 = vrot.slane %v3215_v60, %v17112_v39  ;;  %v3547_v20 = vrot.slane %v3216_v61, %v17112_v39  ;;  %v17236_v11 = vpop.f32.mrb[25].mxu0  ;;  %v17238_v50 = vmax.f32 %v1007_v31, %v13105_v49 }
 0x119   :  { %v990_v46 = vcombine.high %v988_v42, %v988_v42  ;;  %v13099_v17 = vrot.slane %v989_v2, 9  ;;  %v13100_v18 = vrot.slane %v988_v42, 9  ;;  %v1025_v25 = vcombine.high %v721_v10, %v721_v10 }
 0x11a   :  { %v3551_v23 = vrot.slane %v3217_v4, %v17112_v39  ;;  %v4030_v24 = vsel %vm4016_vm3, %v3543_v7, %v3539_v45  ;;  %v1032_v63 = vrot.slane %v721_v10, %v17103_v19  ;;  %v17246_v5 = vmax.f32 %v981_v54, %v13098_v3  ;;  %v17270_v4 = vpop.f32.mrb[4].mxu1 }
 0x11b   :  { %v4031_v26 = vsel %vm4018_vm4, %v3547_v20, %v4030_v24  ;;  %v13101_v28 = vrot.slane %v990_v46, 9  ;;  %v17248_v29 = vmax.f32 %v989_v2, %v13099_v17  ;;  %v17250_v30 = vpop.f32.mrb[26].mxu0  ;;  %v1039_v34 = vrot.slane %v1025_v25, %v17103_v19  ;;  %v17276_v10 = vpop.f32.mrb[5].mxu1 }
 0x11c   :  { %v4032_v31 = vsel %vm4020_vm5, %v3551_v23, %v4031_v26  ;;  %v1040_v35 = vcombine.high %v1032_v63, %v1032_v63  ;;  %v13110_v36 = vrot.slane %v1032_v63, 9  ;;  %v17254_v41 = vpop.f32.mrb[27].mxu0  ;;  %v17258_v44 = vmax.f32 %v988_v42, %v13100_v18  ;;  %v17349_v6 = vpop.f32.mrb[6].mxu1 }
 0x11d   :  { %v4033_v43 = vsel %vm4022_vm6, %v17194_v58, %v4032_v31  ;;  %v442_v47 = vadd.f32 %v17100_v16, %v17133_v38  ;;  %v457_v49 = vadd.f32 %v17145_v53, %v17100_v16  ;;  %v1041_v57 = vcombine.high %v1039_v34, %v1039_v34 }
 0x11e   :  { %v4034_v54 = vsel %vm4024_vm7, %v17207_v14, %v4033_v43  ;;  %v13111_v60 = vrot.slane %v1040_v35, 9  ;;  %v13112_v61 = vrot.slane %v1039_v34, 9  ;;  %v2994_v2 = vmax.f32 %v1032_v63, %v13110_v36 }
 0x11f   :  { %v4035_v45 = vsel %vm4026_vm8, %v17200_v8, %v4034_v54  ;;  %v720_v3 = vmax.f32 %v442_v47, 0.0  ;;  %v723_v58 = vmax.f32 %v457_v49, 0.0  ;;  %v17268_v42 = vpop.f32.mrb[28].mxu0  ;;  %v13113_v53 = vrot.slane %v1041_v57, 9 }
 0x120   :  { %v4036_v38 = vsel %vm4028_vm9, %v17213_v22, %v4035_v45  ;;  %v2995_v7 = vmax.f32 %v1040_v35, %v13111_v60  ;;  %v2996_v20 = vmax.f32 %v1039_v34, %v13112_v61  ;;  %v17274_v14 = vpop.f32.mrb[29].mxu0  ;;  %v3226_v8 = vmax.f32 %v17221_v51, %v2994_v2 }
 0x121   :  { %4153 = vst.msk [vmem:[#allocation2 + $0x21] sm:$0xff] %vm3334_vm1, %v4036_v38  ;;  %v1008_v17 = vcombine.high %v720_v3, %v720_v3  ;;  %v1015_v18 = vrot.slane %v720_v3, %v17103_v19  ;;  %v1059_v23 = vcombine.high %v723_v58, %v723_v58  ;;  %v2997_v24 = vmax.f32 %v1041_v57, %v13113_v53 }
 0x122   :  { %v3227_v25 = vmax.f32 %v17223_v52, %v2995_v7  ;;  %v3228_v22 = vmax.f32 %v17228_v62, %v2996_v20  ;;  %v1066_v63 = vrot.slane %v723_v58, %v17103_v19  ;;  %v2985_v26 = vmax.f32 %v990_v46, %v13101_v28 }
 0x123   :  { %v1022_v31 = vrot.slane %v1008_v17, %v17103_v19  ;;  %v1023_v34 = vcombine.high %v1015_v18, %v1015_v18  ;;  %v13106_v35 = vrot.slane %v1015_v18, 9  ;;  %v17285_v36 = vpop.f32.mrb[30].mxu0  ;;  %v3229_v51 = vmax.f32 %v17238_v50, %v2997_v24 }
 0x124   :  { %v3587_v43 = vrot.slane %v3226_v8, %v17112_v39  ;;  %v3591_v47 = vrot.slane %v3227_v25, %v17112_v39  ;;  %v1073_v49 = vrot.slane %v1059_v23, %v17103_v19  ;;  %v17291_v52 = vpop.f32.mrb[31].mxu0  ;;  %v3595_v28 = vrot.slane %v3228_v22, %v17112_v39 }
 0x125   :  { %v1024_v62 = vcombine.high %v1022_v31, %v1022_v31  ;;  %v13107_v54 = vrot.slane %v1023_v34, 9  ;;  %v13108_v57 = vrot.slane %v1022_v31, 9  ;;  %v2990_v46 = vmax.f32 %v1015_v18, %v13106_v35 }
 0x126   :  { %v1074_v60 = vcombine.high %v1066_v63, %v1066_v63  ;;  %v1075_v61 = vcombine.high %v1073_v49, %v1073_v49  ;;  %v13118_v45 = vrot.slane %v1066_v63, 9  ;;  %v3599_v53 = vrot.slane %v3229_v51, %v17112_v39 }
 0x127   :  { %v13109_v2 = vrot.slane %v1024_v62, 9  ;;  %v2991_v3 = vmax.f32 %v1023_v34, %v13107_v54  ;;  %v2992_v50 = vmax.f32 %v1022_v31, %v13108_v57  ;;  %v3222_v58 = vmax.f32 %v17246_v5, %v2990_v46  ;;  %v17295_v38 = vpop.f32.mrb[32].mxu0 }
 0x128   :  { %v13119_v7 = vrot.slane %v1074_v60, 9  ;;  %v13120_v20 = vrot.slane %v1073_v49, 9  ;;  %v13121_v8 = vrot.slane %v1075_v61, 9  ;;  %v4177_v17 = vld [vmem:[#allocation2 + $0x20] sm:$0xff]  ;;  %v17298_v23 = vpop.f32.mrb[33].mxu0  ;;  %v17302_v22 = vmax.f32 %v1066_v63, %v13118_v45 }
 0x129   :  { %v2993_v18 = vmax.f32 %v1024_v62, %v13109_v2  ;;  %v3223_v24 = vmax.f32 %v17248_v29, %v2991_v3  ;;  %v3224_v25 = vmax.f32 %v17258_v44, %v2992_v50  ;;  %14709 = vmatprep.mubr.msk.f32.mxu1 %vm3334_vm1, %v4177_v17  ;;  %v3571_v5 = vrot.slane %v3222_v58, %v17112_v39 }
 0x12a   :  { %v17306_v31 = vmax.f32 %v1074_v60, %v13119_v7  ;;  %v17308_v34 = vmax.f32 %v1073_v49, %v13120_v20  ;;  %v452_v35 = vadd.f32 %v17100_v16, %v17149_v59  ;;  %v467_v44 = vadd.f32 %v17157_v9, %v17100_v16 }
 0x12b   :  { %v3225_v51 = vmax.f32 %v2985_v26, %v2993_v18  ;;  %v3575_v62 = vrot.slane %v3223_v24, %v17112_v39  ;;  %v3579_v29 = vrot.slane %v3224_v25, %v17112_v39  ;;  %v17316_v63 = vpop.f32.mrb[34].mxu0  ;;  %v17318_v54 = vmax.f32 %v1075_v61, %v13121_v8 }
 0x12c   :  { %v722_v57 = vmax.f32 %v452_v35, 0.0  ;;  %v462_v49 = vadd.f32 %v17100_v16, %v17161_v15  ;;  %v477_v46 = vadd.f32 %v17171_v32, %v17100_v16  ;;  %v725_v60 = vmax.f32 %v467_v44, 0.0  ;;  %v17334_v7 = vpop.f32.mrb[35].mxu0 }
 0x12d   :  { %v3583_v59 = vrot.slane %v3225_v51, %v17112_v39  ;;  %v4037_v26 = vsel %vm4016_vm3, %v3575_v62, %v3571_v5  ;;  %v17328_v45 = vadd.f32 %v17100_v16, %v17173_v40 }
 0x12e   :  { %v4038_v9 = vsel %vm4018_vm4, %v3579_v29, %v4037_v26  ;;  %v1042_v61 = vcombine.high %v722_v57, %v722_v57  ;;  %v1049_v2 = vrot.slane %v722_v57, %v17103_v19  ;;  %v724_v3 = vmax.f32 %v462_v49, 0.0 }
 0x12f   :  { %v4039_v15 = vsel %vm4020_vm5, %v3583_v59, %v4038_v9  ;;  %v1093_v50 = vcombine.high %v725_v60, %v725_v60  ;;  %v1100_v32 = vrot.slane %v725_v60, %v17103_v19  ;;  %v727_v58 = vmax.f32 %v477_v46, 0.0 }
 0x130   :  { %v4040_v20 = vsel %vm4022_vm6, %v3587_v43, %v4039_v15  ;;  %v1056_v8 = vrot.slane %v1042_v61, %v17103_v19  ;;  %v1057_v40 = vcombine.high %v1049_v2, %v1049_v2  ;;  %v13114_v17 = vrot.slane %v1049_v2, 9 }
 0x131   :  { %v4041_v18 = vsel %vm4024_vm7, %v3591_v47, %v4040_v20  ;;  %v1107_v24 = vrot.slane %v1093_v50, %v17103_v19  ;;  %v1108_v25 = vcombine.high %v1100_v32, %v1100_v32  ;;  %v13126_v5 = vrot.slane %v1100_v32, 9 }
 0x132   :  { %v4042_v35 = vsel %vm4026_vm8, %v3595_v28, %v4041_v18  ;;  %v1058_v51 = vcombine.high %v1056_v8, %v1056_v8  ;;  %v13115_v62 = vrot.slane %v1057_v40, 9  ;;  %v13116_v29 = vrot.slane %v1056_v8, 9 }
 0x133   :  { %v4043_v44 = vsel %vm4028_vm9, %v3599_v53, %v4042_v35  ;;  %v1109_v57 = vcombine.high %v1107_v24, %v1107_v24  ;;  %v13127_v49 = vrot.slane %v1108_v25, 9  ;;  %v487_v43 = vadd.f32 %v17185_v55, %v17100_v16 }
 0x134   :  { %4154 = vst.msk [vmem:[#allocation2 + $0x31] sm:$0xff] %vm3334_vm1, %v4043_v44  ;;  %v13117_v46 = vrot.slane %v1058_v51, 9  ;;  %v2998_v47 = vmax.f32 %v1049_v2, %v13114_v17  ;;  %v2999_v59 = vmax.f32 %v1057_v40, %v13115_v62  ;;  %v13128_v26 = vrot.slane %v1107_v24, 9 }
 0x135   :  { %v13129_v60 = vrot.slane %v1109_v57, 9  ;;  %v3010_v9 = vmax.f32 %v1100_v32, %v13126_v5  ;;  %v3011_v61 = vmax.f32 %v1108_v25, %v13127_v49  ;;  %v1076_v28 = vcombine.high %v724_v3, %v724_v3 }
 0x136   :  { %v3000_v15 = vmax.f32 %v1056_v8, %v13116_v29  ;;  %v3012_v50 = vmax.f32 %v1107_v24, %v13128_v26  ;;  %v1083_v20 = vrot.slane %v724_v3, %v17103_v19  ;;  %v1127_v53 = vcombine.high %v727_v58, %v727_v58  ;;  %v17353_v8 = vpop.f32.mrb[36].mxu0 }
 0x137   :  { %v3013_v18 = vmax.f32 %v1109_v57, %v13129_v60  ;;  %v3234_v35 = vmax.f32 %v17302_v22, %v3010_v9  ;;  %v3235_v55 = vmax.f32 %v17306_v31, %v3011_v61  ;;  %v1090_v44 = vrot.slane %v1076_v28, %v17103_v19 }
 0x138   :  { %v3236_v2 = vmax.f32 %v17308_v34, %v3012_v50  ;;  %v1091_v40 = vcombine.high %v1083_v20, %v1083_v20  ;;  %v13122_v32 = vrot.slane %v1083_v20, 9  ;;  %v1134_v17 = vrot.slane %v727_v58, %v17103_v19 }
 0x139   :  { %v3001_v24 = vmax.f32 %v1058_v51, %v13117_v46  ;;  %v3237_v3 = vmax.f32 %v17318_v54, %v3013_v18  ;;  %v3619_v25 = vrot.slane %v3234_v35, %v17112_v39  ;;  %v1092_v22 = vcombine.high %v1090_v44, %v1090_v44 }
 0x13a   :  { %v3623_v31 = vrot.slane %v3235_v55, %v17112_v39  ;;  %v13123_v5 = vrot.slane %v1091_v40, 9  ;;  %v13124_v62 = vrot.slane %v1090_v44, 9  ;;  %v3006_v29 = vmax.f32 %v1083_v20, %v13122_v32 }
 0x13b   :  { %v3627_v57 = vrot.slane %v3236_v2, %v17112_v39  ;;  %v13125_v34 = vrot.slane %v1092_v22, 9  ;;  %v1141_v49 = vrot.slane %v1127_v53, %v17103_v19  ;;  %v1142_v26 = vcombine.high %v1134_v17, %v1134_v17  ;;  %v4178_v58 = vld [vmem:[#allocation2 + $0x30] sm:$0xff] }
 0x13c   :  { %v3007_v60 = vmax.f32 %v1091_v40, %v13123_v5  ;;  %v3008_v9 = vmax.f32 %v1090_v44, %v13124_v62  ;;  %v3230_v51 = vmax.f32 %v2998_v47, %v3006_v29  ;;  %v13134_v46 = vrot.slane %v1134_v17, 9  ;;  %14710 = vmatmul.mubr.msk.f32.gmra.mrb[20].mxu1 %vm3334_vm1, %v4178_v58  ;;  %v17370_v62 = vpop.f32.mrb[7].mxu1  ;;  %v17379_v58 = vpop.f32.mrb[37].mxu0 }
 0x13d   :  { %v3009_v54 = vmax.f32 %v1092_v22, %v13125_v34  ;;  %v1143_v61 = vcombine.high %v1141_v49, %v1141_v49  ;;  %v13135_v28 = vrot.slane %v1142_v26, 9  ;;  %v13136_v50 = vrot.slane %v1141_v49, 9 }
 0x13e   :  { %v3631_v18 = vrot.slane %v3237_v3, %v17112_v39  ;;  %v3231_v20 = vmax.f32 %v2999_v59, %v3007_v60  ;;  %v3232_v35 = vmax.f32 %v3000_v15, %v3008_v9  ;;  %v3603_v55 = vrot.slane %v3230_v51, %v17112_v39 }
 0x13f   :  { %v3233_v2 = vmax.f32 %v3001_v24, %v3009_v54  ;;  %v13137_v53 = vrot.slane %v1143_v61, 9  ;;  %v17363_v32 = vmax.f32 %v1134_v17, %v13134_v46  ;;  %v17365_v40 = vmax.f32 %v1142_v26, %v13135_v28 }
 0x140   :  { %v3607_v47 = vrot.slane %v3231_v20, %v17112_v39  ;;  %v3611_v44 = vrot.slane %v3232_v35, %v17112_v39  ;;  %v726_v22 = vmax.f32 %v17328_v45, 0.0  ;;  %v729_v5 = vmax.f32 %v487_v43, 0.0 }
 0x141   :  { %v3615_v59 = vrot.slane %v3233_v2, %v17112_v39  ;;  %v3020_v15 = vmax.f32 %v1141_v49, %v13136_v50  ;;  %v482_v24 = vadd.f32 %v17100_v16, %v17191_v0  ;;  %v497_v17 = vadd.f32 %v17204_v12, %v17100_v16 }
 0x142   :  { %v4044_v3 = vsel %vm4016_vm3, %v3607_v47, %v3603_v55  ;;  %v1110_v29 = vcombine.high %v726_v22, %v726_v22  ;;  %v1117_v34 = vrot.slane %v726_v22, %v17103_v19  ;;  %v1161_v26 = vcombine.high %v729_v5, %v729_v5 }
 0x143   :  { %v4045_v45 = vsel %vm4018_vm4, %v3611_v44, %v4044_v3  ;;  %v1168_v43 = vrot.slane %v729_v5, %v17103_v19  ;;  %v728_v60 = vmax.f32 %v482_v24, 0.0  ;;  %v731_v49 = vmax.f32 %v497_v17, 0.0 }
 0x144   :  { %v4046_v9 = vsel %vm4020_vm5, %v3615_v59, %v4045_v45  ;;  %v1124_v0 = vrot.slane %v1110_v29, %v17103_v19  ;;  %v1125_v51 = vcombine.high %v1117_v34, %v1117_v34  ;;  %v13130_v12 = vrot.slane %v1117_v34, 9 }
 0x145   :  { %v4047_v46 = vsel %vm4022_vm6, %v3619_v25, %v4046_v9  ;;  %v1175_v54 = vrot.slane %v1161_v26, %v17103_v19  ;;  %v1176_v28 = vcombine.high %v1168_v43, %v1168_v43  ;;  %v13142_v50 = vrot.slane %v1168_v43, 9 }
 0x146   :  { %v4048_v20 = vsel %vm4024_vm7, %v3623_v31, %v4047_v46  ;;  %v1126_v35 = vcombine.high %v1124_v0, %v1124_v0  ;;  %v13131_v55 = vrot.slane %v1125_v51, 9  ;;  %v13132_v2 = vrot.slane %v1124_v0, 9  ;;  %v17391_v31 = vpop.f32.mrb[8].mxu1 }
 0x147   :  { %v4049_v47 = vsel %vm4026_vm8, %v3627_v57, %v4048_v20  ;;  %v3021_v44 = vmax.f32 %v1143_v61, %v13137_v53  ;;  %v1177_v22 = vcombine.high %v1175_v54, %v1175_v54  ;;  %v13143_v5 = vrot.slane %v1176_v28, 9  ;;  %v17394_v53 = vpop.f32.mrb[9].mxu1 }
 0x148   :  { %v4050_v59 = vsel %vm4028_vm9, %v3631_v18, %v4049_v47  ;;  %v13133_v24 = vrot.slane %v1126_v35, 9  ;;  %v3014_v17 = vmax.f32 %v1117_v34, %v13130_v12  ;;  %v3015_v3 = vmax.f32 %v1125_v51, %v13131_v55 }
 0x149   :  { %4155 = vst.msk [vmem:[#allocation2 + $0x41] sm:$0xff] %vm3334_vm1, %v4050_v59  ;;  %v13144_v25 = vrot.slane %v1175_v54, 9  ;;  %v13145_v29 = vrot.slane %v1177_v22, 9  ;;  %v3026_v26 = vmax.f32 %v1168_v43, %v13142_v50  ;;  %v3027_v45 = vmax.f32 %v1176_v28, %v13143_v5 }
 0x14a   :  { %v3016_v9 = vmax.f32 %v1124_v0, %v13132_v2  ;;  %v1144_v46 = vcombine.high %v728_v60, %v728_v60  ;;  %v1151_v57 = vrot.slane %v728_v60, %v17103_v19  ;;  %v1195_v61 = vcombine.high %v731_v49, %v731_v49 }
 0x14b   :  { %v3028_v20 = vmax.f32 %v1175_v54, %v13144_v25  ;;  %v3029_v18 = vmax.f32 %v1177_v22, %v13145_v29  ;;  %v3242_v34 = vmax.f32 %v17363_v32, %v3026_v26  ;;  %v3243_v51 = vmax.f32 %v17365_v40, %v3027_v45 }
 0x14c   :  { %v1158_v12 = vrot.slane %v1144_v46, %v17103_v19  ;;  %v1159_v55 = vcombine.high %v1151_v57, %v1151_v57  ;;  %v13138_v43 = vrot.slane %v1151_v57, 9  ;;  %v1202_v28 = vrot.slane %v731_v49, %v17103_v19 }
 0x14d   :  { %v3017_v50 = vmax.f32 %v1126_v35, %v13133_v24  ;;  %v3244_v0 = vmax.f32 %v3020_v15, %v3028_v20  ;;  %v3245_v2 = vmax.f32 %v3021_v44, %v3029_v18  ;;  %v3651_v60 = vrot.slane %v3242_v34, %v17112_v39  ;;  %v17404_v15 = vpop.f32.mrb[38].mxu0 }
 0x14e   :  { %v1160_v47 = vcombine.high %v1158_v12, %v1158_v12  ;;  %v13139_v5 = vrot.slane %v1159_v55, 9  ;;  %v13140_v59 = vrot.slane %v1158_v12, 9  ;;  %v3022_v54 = vmax.f32 %v1151_v57, %v13138_v43 }
 0x14f   :  { %v3655_v22 = vrot.slane %v3243_v51, %v17112_v39  ;;  %v3659_v32 = vrot.slane %v3244_v0, %v17112_v39  ;;  %v1209_v40 = vrot.slane %v1195_v61, %v17103_v19  ;;  %v1210_v25 = vcombine.high %v1202_v28, %v1202_v28 }
 0x150   :  { %v13141_v29 = vrot.slane %v1160_v47, 9  ;;  %v3023_v26 = vmax.f32 %v1159_v55, %v13139_v5  ;;  %v3024_v45 = vmax.f32 %v1158_v12, %v13140_v59  ;;  %v3238_v49 = vmax.f32 %v3014_v17, %v3022_v54  ;;  %v4179_v35 = vld [vmem:[#allocation2 + $0x40] sm:$0xff] }
 0x151   :  { %v1211_v44 = vcombine.high %v1209_v40, %v1209_v40  ;;  %v13150_v24 = vrot.slane %v1202_v28, 9  ;;  %v13151_v46 = vrot.slane %v1210_v25, 9  ;;  %v13152_v20 = vrot.slane %v1209_v40, 9  ;;  %14712 = vmatprep.mubr.msk.f32.mxu1 %vm3334_vm1, %v4179_v35 }
 0x152   :  { %v3663_v57 = vrot.slane %v3245_v2, %v17112_v39  ;;  %v3025_v18 = vmax.f32 %v1160_v47, %v13141_v29  ;;  %v3239_v34 = vmax.f32 %v3015_v3, %v3023_v26  ;;  %v3240_v51 = vmax.f32 %v3016_v9, %v3024_v45 }
 0x153   :  { %v3635_v61 = vrot.slane %v3238_v49, %v17112_v39  ;;  %v13153_v43 = vrot.slane %v1211_v44, 9  ;;  %v17409_v55 = vmax.f32 %v1202_v28, %v13150_v24  ;;  %v17411_v17 = vmax.f32 %v1210_v25, %v13151_v46 }
 0x154   :  { %v3241_v12 = vmax.f32 %v3017_v50, %v3025_v18  ;;  %v3639_v0 = vrot.slane %v3239_v34, %v17112_v39  ;;  %v3643_v5 = vrot.slane %v3240_v51, %v17112_v39  ;;  %v492_v59 = vadd.f32 %v17100_v16, %v17210_v33  ;;  %v17438_v51 = vpop.f32.mrb[39].mxu0 }
 0x155   :  { %v17417_v54 = vmax.f32 %v1209_v40, %v13152_v20  ;;  %v507_v3 = vadd.f32 %v17216_v37, %v17100_v16  ;;  %v502_v9 = vadd.f32 %v17100_v16, %v17219_v48  ;;  %v517_v28 = vadd.f32 %v17232_v13, %v17100_v16 }
 0x156   :  { %v3647_v50 = vrot.slane %v3241_v12, %v17112_v39  ;;  %v4051_v2 = vsel %vm4016_vm3, %v3639_v0, %v3635_v61  ;;  %v17427_v47 = vmax.f32 %v1211_v44, %v13153_v43  ;;  %v730_v25 = vmax.f32 %v492_v59, 0.0 }
 0x157   :  { %v4052_v33 = vsel %vm4018_vm4, %v3643_v5, %v4051_v2  ;;  %v733_v40 = vmax.f32 %v507_v3, 0.0  ;;  %v732_v29 = vmax.f32 %v502_v9, 0.0  ;;  %v512_v37 = vadd.f32 %v17100_v16, %v17236_v11 }
 0x158   :  { %v4053_v26 = vsel %vm4020_vm5, %v3647_v50, %v4052_v33  ;;  %v1178_v48 = vcombine.high %v730_v25, %v730_v25  ;;  %v1185_v45 = vrot.slane %v730_v25, %v17103_v19  ;;  %v735_v13 = vmax.f32 %v517_v28, 0.0 }
 0x159   :  { %v4054_v49 = vsel %vm4022_vm6, %v3651_v60, %v4053_v26  ;;  %v1229_v35 = vcombine.high %v733_v40, %v733_v40  ;;  %v1236_v44 = vrot.slane %v733_v40, %v17103_v19  ;;  %v1212_v24 = vcombine.high %v732_v29, %v732_v29 }
 0x15a   :  { %v4055_v46 = vsel %vm4024_vm7, %v3655_v22, %v4054_v49  ;;  %v1192_v20 = vrot.slane %v1178_v48, %v17103_v19  ;;  %v1193_v18 = vcombine.high %v1185_v45, %v1185_v45  ;;  %v13146_v34 = vrot.slane %v1185_v45, 9 }
 0x15b   :  { %v4056_v16 = vsel %vm4026_vm8, %v3659_v32, %v4055_v46  ;;  %v1243_v11 = vrot.slane %v1229_v35, %v17103_v19  ;;  %v1244_v61 = vcombine.high %v1236_v44, %v1236_v44  ;;  %v13158_v43 = vrot.slane %v1236_v44, 9  ;;  %v17447_v46 = vpop.f32.mrb[10].mxu1 }
 0x15c   :  { %v4057_v60 = vsel %vm4028_vm9, %v3663_v57, %v4056_v16  ;;  %v1194_v12 = vcombine.high %v1192_v20, %v1192_v20  ;;  %v13147_v0 = vrot.slane %v1193_v18, 9  ;;  %v13148_v5 = vrot.slane %v1192_v20, 9 }
 0x15d   :  { %4156 = vst.msk [vmem:[#allocation2 + $0x51] sm:$0xff] %vm3334_vm1, %v4057_v60  ;;  %v1245_v22 = vcombine.high %v1243_v11, %v1243_v11  ;;  %v13159_v59 = vrot.slane %v1244_v61, 9  ;;  %v13160_v3 = vrot.slane %v1243_v11, 9  ;;  %v734_v9 = vmax.f32 %v512_v37, 0.0 }
 0x15e   :  { %v13149_v28 = vrot.slane %v1194_v12, 9  ;;  %v3030_v50 = vmax.f32 %v1185_v45, %v13146_v34  ;;  %v3031_v2 = vmax.f32 %v1193_v18, %v13147_v0  ;;  %v3042_v25 = vmax.f32 %v1236_v44, %v13158_v43  ;;  %v17451_v44 = vpop.f32.mrb[40].mxu0 }
 0x15f   :  { %v13161_v32 = vrot.slane %v1245_v22, 9  ;;  %v3043_v33 = vmax.f32 %v1244_v61, %v13159_v59  ;;  %v3044_v40 = vmax.f32 %v1243_v11, %v13160_v3  ;;  %v1219_v26 = vrot.slane %v732_v29, %v17103_v19 }
 0x160   :  { %v3032_v48 = vmax.f32 %v1192_v20, %v13148_v5  ;;  %v3250_v57 = vmax.f32 %v17409_v55, %v3042_v25  ;;  %v1226_v49 = vrot.slane %v1212_v24, %v17103_v19  ;;  %v1263_v35 = vcombine.high %v735_v13, %v735_v13 }
 0x161   :  { %v3045_v16 = vmax.f32 %v1245_v22, %v13161_v32  ;;  %v3251_v37 = vmax.f32 %v17411_v17, %v3043_v33  ;;  %v3252_v45 = vmax.f32 %v17417_v54, %v3044_v40  ;;  %v1227_v18 = vcombine.high %v1219_v26, %v1219_v26 }
 0x162   :  { %v3033_v34 = vmax.f32 %v1194_v12, %v13149_v28  ;;  %v1228_v11 = vcombine.high %v1226_v49, %v1226_v49  ;;  %v13154_v61 = vrot.slane %v1219_v26, 9  ;;  %v13156_v29 = vrot.slane %v1226_v49, 9 }
 0x163   :  { %v3253_v20 = vmax.f32 %v17427_v47, %v3045_v16  ;;  %v3683_v55 = vrot.slane %v3250_v57, %v17112_v39  ;;  %v3687_v24 = vrot.slane %v3251_v37, %v17112_v39  ;;  %v13155_v43 = vrot.slane %v1227_v18, 9 }
 0x164   :  { %v13157_v60 = vrot.slane %v1228_v11, 9  ;;  %v3038_v0 = vmax.f32 %v1219_v26, %v13154_v61  ;;  %v3040_v5 = vmax.f32 %v1226_v49, %v13156_v29  ;;  %v1270_v17 = vrot.slane %v735_v13, %v17103_v19  ;;  %v4180_v54 = vld [vmem:[#allocation2 + $0x50] sm:$0xff] }
 0x165   :  { %v3691_v22 = vrot.slane %v3252_v45, %v17112_v39  ;;  %v3039_v59 = vmax.f32 %v1227_v18, %v13155_v43  ;;  %v1277_v12 = vrot.slane %v1263_v35, %v17103_v19  ;;  %v1246_v3 = vcombine.high %v734_v9, %v734_v9  ;;  %14713 = vmatmul.mubr.msk.f32.gmra.mrb[22].mxu1 %vm3334_vm1, %v4180_v54  ;;  %v17479_v43 = vld [vmem:[%s19895_s2] ss:$0 sm:$0xff] }
 0x166   :  { %v3041_v47 = vmax.f32 %v1228_v11, %v13157_v60  ;;  %v3246_v28 = vmax.f32 %v3030_v50, %v3038_v0  ;;  %v3248_v25 = vmax.f32 %v3032_v48, %v3040_v5  ;;  %v1278_v32 = vcombine.high %v1270_v17, %v1270_v17  ;;  %v17466_v50 = vpop.f32.mrb[11].mxu1 }
 0x167   :  { %v3247_v33 = vmax.f32 %v3031_v2, %v3039_v59  ;;  %v1279_v40 = vcombine.high %v1277_v12, %v1277_v12  ;;  %v13166_v57 = vrot.slane %v1270_v17, 9  ;;  %v13168_v26 = vrot.slane %v1277_v12, 9 }
 0x168   :  { %v3695_v49 = vrot.slane %v3253_v20, %v17112_v39  ;;  %v3249_v13 = vmax.f32 %v3033_v34, %v3041_v47  ;;  %v3675_v16 = vrot.slane %v3248_v25, %v17112_v39  ;;  %v13167_v37 = vrot.slane %v1278_v32, 9 }
 0x169   :  { %v3667_v45 = vrot.slane %v3246_v28, %v17112_v39  ;;  %v3671_v35 = vrot.slane %v3247_v33, %v17112_v39  ;;  %v13169_v18 = vrot.slane %v1279_v40, 9  ;;  %v17464_v61 = vmax.f32 %v1270_v17, %v13166_v57 }
 0x16a   :  { %v3679_v2 = vrot.slane %v3249_v13, %v17112_v39  ;;  %v17469_v48 = vmax.f32 %v1277_v12, %v13168_v26  ;;  %v1253_v11 = vrot.slane %v734_v9, %v17103_v19  ;;  %v1260_v34 = vrot.slane %v1246_v3, %v17103_v19 }
 0x16b   :  { %v4058_v29 = vsel %vm4016_vm3, %v3671_v35, %v3667_v45  ;;  %v17474_v20 = vmax.f32 %v1278_v32, %v13167_v37  ;;  %v527_v60 = vadd.f32 %v17479_v43, %v17250_v30  ;;  %v522_v0 = vadd.f32 %v17479_v43, %v17254_v41  ;;  %v17490_v30 = vpop.f32.mrb[41].mxu0 }
 0x16c   :  { %v4059_v5 = vsel %vm4018_vm4, %v3675_v16, %v4058_v29  ;;  %v1261_v9 = vcombine.high %v1253_v11, %v1253_v11  ;;  %v1262_v17 = vcombine.high %v1260_v34, %v1260_v34  ;;  %v13162_v54 = vrot.slane %v1253_v11, 9  ;;  %19919 = vst [vmem:[#allocation9_spill] sm:$0xff] %v17490_v30 }
 0x16d   :  { %v4060_v59 = vsel %vm4020_vm5, %v3679_v2, %v4059_v5  ;;  %v13164_v12 = vrot.slane %v1260_v34, 9  ;;  %v737_v3 = vmax.f32 %v527_v60, 0.0  ;;  %v736_v47 = vmax.f32 %v522_v0, 0.0 }
 0x16e   :  { %v4061_v28 = vsel %vm4022_vm6, %v3683_v55, %v4060_v59  ;;  %v17488_v25 = vmax.f32 %v1279_v40, %v13169_v18  ;;  %v13163_v32 = vrot.slane %v1261_v9, 9  ;;  %v13165_v33 = vrot.slane %v1262_v17, 9 }
 0x16f   :  { %v4062_v41 = vsel %vm4024_vm7, %v3687_v24, %v4061_v28  ;;  %v3046_v57 = vmax.f32 %v1253_v11, %v13162_v54  ;;  %v1297_v26 = vcombine.high %v737_v3, %v737_v3  ;;  %v1304_v13 = vrot.slane %v737_v3, %v17103_v19 }
 0x170   :  { %v4063_v16 = vsel %vm4026_vm8, %v3691_v22, %v4062_v41  ;;  %v3047_v37 = vmax.f32 %v1261_v9, %v13163_v32  ;;  %v3048_v45 = vmax.f32 %v1260_v34, %v13164_v12  ;;  %v1280_v35 = vcombine.high %v736_v47, %v736_v47  ;;  %v17502_v22 = vpop.f32.mrb[12].mxu1 }
 0x171   :  { %v4064_v2 = vsel %vm4028_vm9, %v3695_v49, %v4063_v16  ;;  %v1311_v55 = vrot.slane %v1297_v26, %v17103_v19  ;;  %v1312_v40 = vcombine.high %v1304_v13, %v1304_v13  ;;  %v13174_v18 = vrot.slane %v1304_v13, 9  ;;  %19920 = vst [vmem:[#allocation10_spill] sm:$0xff] %v17502_v22  ;;  %v17504_v9 = vpop.f32.mrb[13].mxu1 }
 0x172   :  { %4157 = vst.msk [vmem:[#allocation2 + $0x61] sm:$0xff] %vm3334_vm1, %v4064_v2  ;;  %v3049_v29 = vmax.f32 %v1262_v17, %v13165_v33  ;;  %v1287_v24 = vrot.slane %v736_v47, %v17103_v19  ;;  %v1294_v11 = vrot.slane %v1280_v35, %v17103_v19  ;;  %v537_v60 = vadd.f32 %v17479_v43, %v17268_v42 }
 0x173   :  { %v1313_v34 = vcombine.high %v1311_v55, %v1311_v55  ;;  %v13175_v0 = vrot.slane %v1312_v40, 9  ;;  %v13176_v5 = vrot.slane %v1311_v55, 9  ;;  %v3058_v49 = vmax.f32 %v1304_v13, %v13174_v18  ;;  %19921 = vst [vmem:[#allocation11_spill] sm:$0xff] %v17504_v9 }
 0x174   :  { %v1295_v54 = vcombine.high %v1287_v24, %v1287_v24  ;;  %v1296_v59 = vcombine.high %v1294_v11, %v1294_v11  ;;  %v13170_v12 = vrot.slane %v1287_v24, 9  ;;  %v13172_v3 = vrot.slane %v1294_v11, 9 }
 0x175   :  { %v13177_v17 = vrot.slane %v1313_v34, 9  ;;  %v3059_v28 = vmax.f32 %v1312_v40, %v13175_v0  ;;  %v3060_v47 = vmax.f32 %v1311_v55, %v13176_v5  ;;  %v3258_v32 = vmax.f32 %v17464_v61, %v3058_v49  ;;  %v17519_v5 = vpop.f32.mrb[42].mxu0 }
 0x176   :  { %v13171_v33 = vrot.slane %v1295_v54, 9  ;;  %v13173_v41 = vrot.slane %v1296_v59, 9  ;;  %v3054_v42 = vmax.f32 %v1287_v24, %v13170_v12  ;;  %v3056_v26 = vmax.f32 %v1294_v11, %v13172_v3 }
 0x177   :  { %v3061_v16 = vmax.f32 %v1313_v34, %v13177_v17  ;;  %v3259_v35 = vmax.f32 %v17474_v20, %v3059_v28  ;;  %v3260_v13 = vmax.f32 %v17469_v48, %v3060_v47  ;;  %v532_v2 = vadd.f32 %v17479_v43, %v17274_v14 }
 0x178   :  { %v3055_v18 = vmax.f32 %v1295_v54, %v13171_v33  ;;  %v3057_v9 = vmax.f32 %v1296_v59, %v13173_v41  ;;  %v3254_v22 = vmax.f32 %v3046_v57, %v3054_v42  ;;  %v3256_v30 = vmax.f32 %v3048_v45, %v3056_v26 }
 0x179   :  { %v3261_v55 = vmax.f32 %v17488_v25, %v3061_v16  ;;  %v3715_v61 = vrot.slane %v3258_v32, %v17112_v39  ;;  %v3719_v40 = vrot.slane %v3259_v35, %v17112_v39  ;;  %v739_v24 = vmax.f32 %v537_v60, 0.0  ;;  %v4181_v11 = vld [vmem:[#allocation2 + $0x60] sm:$0xff] }
 0x17a   :  { %v3723_v34 = vrot.slane %v3260_v13, %v17112_v39  ;;  %v3255_v20 = vmax.f32 %v3047_v37, %v3055_v18  ;;  %v3257_v0 = vmax.f32 %v3049_v29, %v3057_v9  ;;  %v3699_v48 = vrot.slane %v3254_v22, %v17112_v39  ;;  %14715 = vmatprep.mubr.msk.f32.mxu1 %vm3334_vm1, %v4181_v11  ;;  %v17538_v11 = vpop.f32.mrb[43].mxu0 }
 0x17b   :  { %v3707_v14 = vrot.slane %v3256_v30, %v17112_v39  ;;  %v1331_v57 = vcombine.high %v739_v24, %v739_v24  ;;  %v1338_v45 = vrot.slane %v739_v24, %v17103_v19  ;;  %v738_v25 = vmax.f32 %v532_v2, 0.0  ;;  %19922 = vst [vmem:[#allocation12_spill] sm:$0xff] %v17538_v11 }
 0x17c   :  { %v3703_v49 = vrot.slane %v3255_v20, %v17112_v39  ;;  %v3711_v60 = vrot.slane %v3257_v0, %v17112_v39  ;;  %v547_v37 = vadd.f32 %v17479_v43, %v17285_v36  ;;  %v542_v29 = vadd.f32 %v17479_v43, %v17291_v52 }
 0x17d   :  { %v1345_v22 = vrot.slane %v1331_v57, %v17103_v19  ;;  %v1346_v9 = vcombine.high %v1338_v45, %v1338_v45  ;;  %v13182_v30 = vrot.slane %v1338_v45, 9  ;;  %v1314_v54 = vcombine.high %v738_v25, %v738_v25 }
 0x17e   :  { %v3727_v59 = vrot.slane %v3261_v55, %v17112_v39  ;;  %v4065_v12 = vsel %vm4016_vm3, %v3703_v49, %v3699_v48  ;;  %v1321_v3 = vrot.slane %v738_v25, %v17103_v19  ;;  %v741_v17 = vmax.f32 %v547_v37, 0.0 }
 0x17f   :  { %v4066_v28 = vsel %vm4018_vm4, %v3707_v14, %v4065_v12  ;;  %v1347_v47 = vcombine.high %v1345_v22, %v1345_v22  ;;  %v13183_v32 = vrot.slane %v1346_v9, 9  ;;  %v13184_v36 = vrot.slane %v1345_v22, 9 }
 0x180   :  { %v4067_v33 = vsel %vm4020_vm5, %v3711_v60, %v4066_v28  ;;  %v1328_v52 = vrot.slane %v1314_v54, %v17103_v19  ;;  %v1329_v41 = vcombine.high %v1321_v3, %v1321_v3  ;;  %v740_v42 = vmax.f32 %v542_v29, 0.0 }
 0x181   :  { %v4068_v26 = vsel %vm4022_vm6, %v3715_v61, %v4067_v33  ;;  %v13185_v16 = vrot.slane %v1347_v47, 9  ;;  %v3066_v35 = vmax.f32 %v1338_v45, %v13182_v30  ;;  %v17535_v13 = vmax.f32 %v1346_v9, %v13183_v32 }
 0x182   :  { %v4069_v2 = vsel %vm4024_vm7, %v3719_v40, %v4068_v26  ;;  %v1330_v18 = vcombine.high %v1328_v52, %v1328_v52  ;;  %v13178_v55 = vrot.slane %v1321_v3, 9  ;;  %v13179_v24 = vrot.slane %v1329_v41, 9 }
 0x183   :  { %v4070_v20 = vsel %vm4026_vm8, %v3723_v34, %v4069_v2  ;;  %v3068_v0 = vmax.f32 %v1345_v22, %v13184_v36  ;;  %v13180_v48 = vrot.slane %v1328_v52, 9  ;;  %v1365_v14 = vcombine.high %v741_v17, %v741_v17 }
 0x184   :  { %v4071_v57 = vsel %vm4028_vm9, %v3727_v59, %v4070_v20  ;;  %v17542_v25 = vmax.f32 %v1347_v47, %v13185_v16  ;;  %v13181_v61 = vrot.slane %v1330_v18, 9  ;;  %v3062_v45 = vmax.f32 %v1321_v3, %v13178_v55 }
 0x185   :  { %4158 = vst.msk [vmem:[#allocation2 + $0x71] sm:$0xff] %vm3334_vm1, %v4071_v57  ;;  %v3063_v49 = vmax.f32 %v1329_v41, %v13179_v24  ;;  %v1372_v40 = vrot.slane %v741_v17, %v17103_v19  ;;  %v1379_v60 = vrot.slane %v1365_v14, %v17103_v19  ;;  %v1348_v37 = vcombine.high %v740_v42, %v740_v42 }
 0x186   :  { %v3064_v29 = vmax.f32 %v1328_v52, %v13180_v48  ;;  %v1355_v34 = vrot.slane %v740_v42, %v17103_v19  ;;  %v627_v22 = vadd.f32 %v17479_v43, %v17152_v1  ;;  %v622_v9 = vadd.f32 %v17479_v43, %v17168_v27 }
 0x187   :  { %v1380_v30 = vcombine.high %v1372_v40, %v1372_v40  ;;  %v1381_v54 = vcombine.high %v1379_v60, %v1379_v60  ;;  %v13190_v59 = vrot.slane %v1372_v40, 9  ;;  %v13192_v12 = vrot.slane %v1379_v60, 9 }
 0x188   :  { %v1362_v3 = vrot.slane %v1348_v37, %v17103_v19  ;;  %v1363_v28 = vcombine.high %v1355_v34, %v1355_v34  ;;  %v13186_v17 = vrot.slane %v1355_v34, 9  ;;  %v757_v47 = vmax.f32 %v627_v22, 0.0  ;;  %v17553_v37 = vpop.f32.mrb[44].mxu0 }
 0x189   :  { %v13191_v32 = vrot.slane %v1380_v30, 9  ;;  %v13193_v36 = vrot.slane %v1381_v54, 9  ;;  %v3074_v33 = vmax.f32 %v1372_v40, %v13190_v59  ;;  %v3076_v52 = vmax.f32 %v1379_v60, %v13192_v12 }
 0x18a   :  { %v1364_v41 = vcombine.high %v1362_v3, %v1362_v3  ;;  %v13187_v42 = vrot.slane %v1363_v28, 9  ;;  %v13188_v26 = vrot.slane %v1362_v3, 9  ;;  %v3070_v1 = vmax.f32 %v1355_v34, %v13186_v17 }
 0x18b   :  { %v3075_v16 = vmax.f32 %v1380_v30, %v13191_v32  ;;  %v3077_v2 = vmax.f32 %v1381_v54, %v13193_v36  ;;  %v3266_v27 = vmax.f32 %v3066_v35, %v3074_v33  ;;  %v3268_v55 = vmax.f32 %v3068_v0, %v3076_v52  ;;  %v17559_v0 = vpop.f32.mrb[45].mxu0 }
 0x18c   :  { %v13189_v24 = vrot.slane %v1364_v41, 9  ;;  %v3071_v20 = vmax.f32 %v1363_v28, %v13187_v42  ;;  %v3072_v48 = vmax.f32 %v1362_v3, %v13188_v26  ;;  %v3262_v14 = vmax.f32 %v3062_v45, %v3070_v1  ;;  %v4182_v57 = vld [vmem:[#allocation2 + $0x70] sm:$0xff] }
 0x18d   :  { %v3065_v22 = vmax.f32 %v1330_v18, %v13181_v61  ;;  %v3267_v11 = vmax.f32 %v17535_v13, %v3075_v16  ;;  %v3269_v40 = vmax.f32 %v17542_v25, %v3077_v2  ;;  %14716 = vmatmul.mubr.msk.f32.gmra.mrb[24].mxu1 %vm3334_vm1, %v4182_v57  ;;  %v3747_v60 = vrot.slane %v3266_v27, %v17112_v39 }
 0x18e   :  { %v3073_v34 = vmax.f32 %v1364_v41, %v13189_v24  ;;  %v3263_v30 = vmax.f32 %v3063_v49, %v3071_v20  ;;  %v3264_v35 = vmax.f32 %v3064_v29, %v3072_v48  ;;  %v3755_v54 = vrot.slane %v3268_v55, %v17112_v39 }
 0x18f   :  { %v3731_v45 = vrot.slane %v3262_v14, %v17112_v39  ;;  %v1637_v59 = vcombine.high %v757_v47, %v757_v47  ;;  %v1644_v18 = vrot.slane %v757_v47, %v17103_v19  ;;  %v756_v12 = vmax.f32 %v622_v9, 0.0 }
 0x190   :  { %v3265_v61 = vmax.f32 %v3065_v22, %v3073_v34  ;;  %v3735_v13 = vrot.slane %v3263_v30, %v17112_v39  ;;  %v3739_v25 = vrot.slane %v3264_v35, %v17112_v39  ;;  %v637_v29 = vadd.f32 %v17479_v43, %v17187_v56 }
 0x191   :  { %v1651_v3 = vrot.slane %v1637_v59, %v17103_v19  ;;  %v1652_v28 = vcombine.high %v1644_v18, %v1644_v18  ;;  %v13254_v49 = vrot.slane %v1644_v18, 9  ;;  %v1620_v36 = vcombine.high %v756_v12, %v756_v12 }
 0x192   :  { %v3743_v17 = vrot.slane %v3265_v61, %v17112_v39  ;;  %v4072_v32 = vsel %vm4016_vm3, %v3735_v13, %v3731_v45  ;;  %v1627_v47 = vrot.slane %v756_v12, %v17103_v19  ;;  %v3751_v9 = vrot.slane %v3267_v11, %v17112_v39 }
 0x193   :  { %v4073_v33 = vsel %vm4018_vm4, %v3739_v25, %v4072_v32  ;;  %v1653_v52 = vcombine.high %v1651_v3, %v1651_v3  ;;  %v13255_v41 = vrot.slane %v1652_v28, 9  ;;  %v13256_v42 = vrot.slane %v1651_v3, 9 }
 0x194   :  { %v4074_v26 = vsel %vm4020_vm5, %v3743_v17, %v4073_v33  ;;  %v1634_v1 = vrot.slane %v1620_v36, %v17103_v19  ;;  %v1635_v16 = vcombine.high %v1627_v47, %v1627_v47  ;;  %v3759_v56 = vrot.slane %v3269_v40, %v17112_v39 }
 0x195   :  { %v4075_v2 = vsel %vm4022_vm6, %v3747_v60, %v4074_v26  ;;  %v13257_v27 = vrot.slane %v1653_v52, 9  ;;  %v17578_v55 = vmax.f32 %v1644_v18, %v13254_v49  ;;  %v13250_v48 = vrot.slane %v1627_v47, 9 }
 0x196   :  { %v4076_v24 = vsel %vm4024_vm7, %v3751_v9, %v4075_v2  ;;  %v1636_v20 = vcombine.high %v1634_v1, %v1634_v1  ;;  %v13251_v14 = vrot.slane %v1635_v16, 9  ;;  %v17582_v11 = vmax.f32 %v1652_v28, %v13255_v41 }
 0x197   :  { %v4077_v57 = vsel %vm4026_vm8, %v3755_v54, %v4076_v24  ;;  %v17584_v22 = vmax.f32 %v1651_v3, %v13256_v42  ;;  %v759_v34 = vmax.f32 %v637_v29, 0.0  ;;  %v17587_v40 = vmax.f32 %v1653_v52, %v13257_v27 }
 0x198   :  { %v4078_v30 = vsel %vm4028_vm9, %v3759_v56, %v4077_v57  ;;  %v13252_v60 = vrot.slane %v1634_v1, 9  ;;  %v13253_v35 = vrot.slane %v1636_v20, 9  ;;  %v17590_v45 = vmax.f32 %v1627_v47, %v13250_v48  ;;  %v4183_v56 = vld [vmem:[#allocation2 + $0xa0] sm:$0xff] }
 0x199   :  { %19923 = vst [vmem:[#allocation13_spill] sm:$0xff] %v17587_v40  ;;  %4159 = vst.msk [vmem:[#allocation2 + $0x81] sm:$0xff] %vm3334_vm1, %v4078_v30  ;;  %v1671_v59 = vcombine.high %v759_v34, %v759_v34  ;;  %v1678_v18 = vrot.slane %v759_v34, %v17103_v19  ;;  %v557_v54 = vadd.f32 %v17479_v43, %v17295_v38  ;;  %14718 = vmatprep.mubr.msk.f32.mxu1 %vm3334_vm1, %v4183_v56 }
 0x19a   :  { %19924 = vst [vmem:[#allocation14_spill] sm:$0xff] %v17590_v45  ;;  %v17595_v61 = vmax.f32 %v1635_v16, %v13251_v14  ;;  %v632_v13 = vadd.f32 %v17479_v43, %v17240_v21  ;;  %v552_v25 = vadd.f32 %v17479_v43, %v17298_v23  ;;  %v647_v12 = vadd.f32 %v17479_v43, %v17270_v4 }
 0x19b   :  { %v1685_v3 = vrot.slane %v1671_v59, %v17103_v19  ;;  %v1686_v28 = vcombine.high %v1678_v18, %v1678_v18  ;;  %v13262_v49 = vrot.slane %v1678_v18, 9  ;;  %v743_v29 = vmax.f32 %v557_v54, 0.0 }
 0x19c   :  { %19925 = vst [vmem:[#allocation15_spill] sm:$0xff] %v17595_v61  ;;  %v17604_v17 = vmax.f32 %v1634_v1, %v13252_v60  ;;  %v17606_v32 = vmax.f32 %v1636_v20, %v13253_v35  ;;  %v758_v38 = vmax.f32 %v632_v13, 0.0  ;;  %v742_v36 = vmax.f32 %v552_v25, 0.0 }
 0x19d   :  { %v1687_v47 = vcombine.high %v1685_v3, %v1685_v3  ;;  %v13263_v33 = vrot.slane %v1686_v28, 9  ;;  %v13264_v21 = vrot.slane %v1685_v3, 9  ;;  %v761_v52 = vmax.f32 %v647_v12, 0.0 }
 0x19e   :  { %19926 = vst [vmem:[#allocation16_spill] sm:$0xff] %v17604_v17  ;;  %19927 = vst [vmem:[#allocation17_spill] sm:$0xff] %v17606_v32  ;;  %v1399_v41 = vcombine.high %v743_v29, %v743_v29  ;;  %v1406_v23 = vrot.slane %v743_v29, %v17103_v19  ;;  %v1654_v42 = vcombine.high %v758_v38, %v758_v38 }
 0x19f   :  { %v1661_v4 = vrot.slane %v758_v38, %v17103_v19  ;;  %v13265_v9 = vrot.slane %v1687_v47, 9  ;;  %v17610_v26 = vmax.f32 %v1678_v18, %v13262_v49  ;;  %v1382_v16 = vcombine.high %v742_v36, %v742_v36 }
 0x1a0   :  { %v642_v1 = vadd.f32 %v17479_v43, %v17276_v10  ;;  %v1413_v2 = vrot.slane %v1399_v41, %v17103_v19  ;;  %v1414_v27 = vcombine.high %v1406_v23, %v1406_v23  ;;  %v13198_v24 = vrot.slane %v1406_v23, 9 }
 0x1a1   :  { %v1668_v20 = vrot.slane %v1654_v42, %v17103_v19  ;;  %v17617_v48 = vmax.f32 %v1686_v28, %v13263_v33  ;;  %v1669_v14 = vcombine.high %v1661_v4, %v1661_v4  ;;  %v13258_v57 = vrot.slane %v1661_v4, 9 }
 0x1a2   :  { %v1389_v34 = vrot.slane %v742_v36, %v17103_v19  ;;  %v17620_v30 = vmax.f32 %v1685_v3, %v13264_v21  ;;  %v1415_v60 = vcombine.high %v1413_v2, %v1413_v2  ;;  %v13199_v35 = vrot.slane %v1414_v27, 9 }
 0x1a3   :  { %v13200_v10 = vrot.slane %v1413_v2, 9  ;;  %v17622_v59 = vmax.f32 %v1687_v47, %v13265_v9  ;;  %v1670_v18 = vcombine.high %v1668_v20, %v1668_v20  ;;  %v13259_v54 = vrot.slane %v1669_v14, 9 }
 0x1a4   :  { %v13260_v13 = vrot.slane %v1668_v20, 9  ;;  %v13201_v25 = vrot.slane %v1415_v60, 9  ;;  %v17624_v12 = vmax.f32 %v1406_v23, %v13198_v24  ;;  %v3142_v49 = vmax.f32 %v1661_v4, %v13258_v57 }
 0x1a5   :  { %v1396_v28 = vrot.slane %v1382_v16, %v17103_v19  ;;  %v17627_v29 = vmax.f32 %v1414_v27, %v13199_v35  ;;  %v17629_v38 = vmax.f32 %v1413_v2, %v13200_v10  ;;  %v13261_v3 = vrot.slane %v1670_v18, 9 }
 0x1a6   :  { %v17631_v36 = vcombine.high %v1389_v34, %v1389_v34  ;;  %v3143_v33 = vmax.f32 %v1669_v14, %v13259_v54  ;;  %v13194_v47 = vrot.slane %v1389_v34, 9  ;;  %v17635_v42 = vmax.f32 %v1415_v60, %v13201_v25 }
 0x1a7   :  { %v17633_v21 = vcombine.high %v1396_v28, %v1396_v28  ;;  %v13196_v41 = vrot.slane %v1396_v28, 9  ;;  %v3144_v9 = vmax.f32 %v1668_v20, %v13260_v13  ;;  %v1705_v23 = vcombine.high %v761_v52, %v761_v52 }
 0x1a8   :  { %v1712_v4 = vrot.slane %v761_v52, %v17103_v19  ;;  %v3145_v56 = vmax.f32 %v1670_v18, %v13261_v3  ;;  %v760_v27 = vmax.f32 %v642_v1, 0.0  ;;  %v17640_v24 = vmax.f32 %v1389_v34, %v13194_v47 }
 0x1a9   :  { %v1719_v14 = vrot.slane %v1705_v23, %v17103_v19  ;;  %v17643_v10 = vmax.f32 %v1396_v28, %v13196_v41  ;;  %v567_v52 = vadd.f32 %v17479_v43, %v17316_v63 }
 0x1aa   :  { %v1720_v57 = vcombine.high %v1712_v4, %v1712_v4  ;;  %v13270_v35 = vrot.slane %v1712_v4, 9  ;;  %v1688_v60 = vcombine.high %v760_v27, %v760_v27  ;;  %v1695_v20 = vrot.slane %v760_v27, %v17103_v19 }
 0x1ab   :  { %v1721_v18 = vcombine.high %v1719_v14, %v1719_v14  ;;  %v13272_v13 = vrot.slane %v1719_v14, 9  ;;  %v745_v47 = vmax.f32 %v567_v52, 0.0 }
 0x1ac   :  { %v13271_v54 = vrot.slane %v1720_v57, 9  ;;  %v3154_v25 = vmax.f32 %v1712_v4, %v13270_v35  ;;  %v1702_v1 = vrot.slane %v1688_v60, %v17103_v19  ;;  %v1703_v34 = vcombine.high %v1695_v20, %v1695_v20 }
 0x1ad   :  { %v13266_v3 = vrot.slane %v1695_v20, 9  ;;  %v13273_v23 = vrot.slane %v1721_v18, 9  ;;  %v3156_v16 = vmax.f32 %v1719_v14, %v13272_v13 }
 0x1ae   :  { %v3155_v2 = vmax.f32 %v1720_v57, %v13271_v54  ;;  %v3306_v28 = vmax.f32 %v17610_v26, %v3154_v25  ;;  %v1704_v41 = vcombine.high %v1702_v1, %v1702_v1  ;;  %v13267_v32 = vrot.slane %v1703_v34, 9 }
 0x1af   :  { %v13268_v27 = vrot.slane %v1702_v1, 9  ;;  %v3150_v17 = vmax.f32 %v1695_v20, %v13266_v3  ;;  %v3157_v61 = vmax.f32 %v1721_v18, %v13273_v23  ;;  %v3308_v45 = vmax.f32 %v17620_v30, %v3156_v16 }
 0x1b0   :  { %v3307_v63 = vmax.f32 %v17617_v48, %v3155_v2  ;;  %v3907_v4 = vrot.slane %v3306_v28, %v17112_v39  ;;  %v13269_v35 = vrot.slane %v1704_v41, 9  ;;  %v3151_v60 = vmax.f32 %v1703_v34, %v13267_v32 }
 0x1b1   :  { %v3152_v40 = vmax.f32 %v1702_v1, %v13268_v27  ;;  %v3302_v52 = vmax.f32 %v3142_v49, %v3150_v17  ;;  %v3309_v57 = vmax.f32 %v17622_v59, %v3157_v61  ;;  %v3915_v26 = vrot.slane %v3308_v45, %v17112_v39 }
 0x1b2   :  { %v3911_v14 = vrot.slane %v3307_v63, %v17112_v39  ;;  %v1433_v54 = vcombine.high %v745_v47, %v745_v47  ;;  %v3153_v13 = vmax.f32 %v1704_v41, %v13269_v35  ;;  %v3303_v20 = vmax.f32 %v3143_v33, %v3151_v60 }
 0x1b3   :  { %v3304_v18 = vmax.f32 %v3144_v9, %v3152_v40  ;;  %v3891_v48 = vrot.slane %v3302_v52, %v17112_v39  ;;  %v3919_v30 = vrot.slane %v3309_v57, %v17112_v39  ;;  %v1440_v16 = vrot.slane %v745_v47, %v17103_v19 }
 0x1b4   :  { %v1447_v32 = vrot.slane %v1433_v54, %v17103_v19  ;;  %v562_v17 = vadd.f32 %v17479_v43, %v17334_v7  ;;  %v3305_v61 = vmax.f32 %v3145_v56, %v3153_v13  ;;  %v3895_v59 = vrot.slane %v3303_v20, %v17112_v39 }
 0x1b5   :  { %v3899_v45 = vrot.slane %v3304_v18, %v17112_v39  ;;  %v657_v49 = vadd.f32 %v17479_v43, %v17349_v6  ;;  %v1448_v40 = vcombine.high %v1440_v16, %v1440_v16  ;;  %v13206_v9 = vrot.slane %v1440_v16, 9 }
 0x1b6   :  { %v1449_v33 = vcombine.high %v1447_v32, %v1447_v32  ;;  %v13208_v2 = vrot.slane %v1447_v32, 9  ;;  %v3903_v25 = vrot.slane %v3305_v61, %v17112_v39  ;;  %v4107_v1 = vsel %vm4016_vm3, %v3895_v59, %v3891_v48 }
 0x1b7   :  { %v744_v34 = vmax.f32 %v562_v17, 0.0  ;;  %v763_v3 = vmax.f32 %v657_v49, 0.0  ;;  %v4108_v7 = vsel %vm4018_vm4, %v3899_v45, %v4107_v1  ;;  %v13207_v56 = vrot.slane %v1448_v40, 9 }
 0x1b8   :  { %v13209_v47 = vrot.slane %v1449_v33, 9  ;;  %v3090_v23 = vmax.f32 %v1440_v16, %v13206_v9  ;;  %v4109_v28 = vsel %vm4020_vm5, %v3903_v25, %v4108_v7  ;;  %v3092_v41 = vmax.f32 %v1447_v32, %v13208_v2 }
 0x1b9   :  { %v1416_v27 = vcombine.high %v744_v34, %v744_v34  ;;  %v1423_v6 = vrot.slane %v744_v34, %v17103_v19  ;;  %v4110_v63 = vsel %vm4022_vm6, %v3907_v4, %v4109_v28  ;;  %v3091_v35 = vmax.f32 %v1448_v40, %v13207_v56 }
 0x1ba   :  { %v3093_v60 = vmax.f32 %v1449_v33, %v13209_v47  ;;  %v3274_v52 = vmax.f32 %v17624_v12, %v3090_v23  ;;  %v4111_v57 = vsel %vm4024_vm7, %v3911_v14, %v4110_v63  ;;  %v3276_v54 = vmax.f32 %v17629_v38, %v3092_v41 }
 0x1bb   :  { %v1430_v13 = vrot.slane %v1416_v27, %v17103_v19  ;;  %v1431_v20 = vcombine.high %v1423_v6, %v1423_v6  ;;  %v19928_v18 = vrot.slane %v17631_v36, 9  ;;  %v4112_v16 = vsel %vm4026_vm8, %v3915_v26, %v4111_v57 }
 0x1bc   :  { %v3275_v32 = vmax.f32 %v17627_v29, %v3091_v35  ;;  %v3277_v4 = vmax.f32 %v17635_v42, %v3093_v60  ;;  %v19929_v17 = vrot.slane %v17633_v21, 9  ;;  %v4113_v14 = vsel %vm4028_vm9, %v3919_v30, %v4112_v16 }
 0x1bd   :  { %v3079_v48 = vmax.f32 %v17631_v36, %v19928_v18  ;;  %v1432_v38 = vcombine.high %v1430_v13, %v1430_v13  ;;  %v13202_v61 = vrot.slane %v1423_v6, 9  ;;  %4164 = vst.msk [vmem:[#allocation2 + $0xf1] sm:$0xff] %vm3334_vm1, %v4113_v14  ;;  %v3779_v59 = vrot.slane %v3274_v52, %v17112_v39 }
 0x1be   :  { %v3081_v12 = vmax.f32 %v17633_v21, %v19929_v17  ;;  %v3787_v36 = vrot.slane %v3276_v54, %v17112_v39  ;;  %v13203_v45 = vrot.slane %v1431_v20, 9  ;;  %v13204_v26 = vrot.slane %v1430_v13, 9 }
 0x1bf   :  { %v13205_v49 = vrot.slane %v1432_v38, 9  ;;  %v3086_v29 = vmax.f32 %v1423_v6, %v13202_v61  ;;  %v1739_v40 = vcombine.high %v763_v3, %v763_v3  ;;  %v1746_v42 = vrot.slane %v763_v3, %v17103_v19 }
 0x1c0   :  { %v3087_v33 = vmax.f32 %v1431_v20, %v13203_v45  ;;  %v3088_v9 = vmax.f32 %v1430_v13, %v13204_v26  ;;  %v577_v21 = vadd.f32 %v17479_v43, %v17353_v8  ;;  %v652_v30 = vadd.f32 %v17479_v43, %v17370_v62 }
 0x1c1   :  { %v3089_v2 = vmax.f32 %v1432_v38, %v13205_v49  ;;  %v3270_v25 = vmax.f32 %v17640_v24, %v3086_v29  ;;  %v1753_v1 = vrot.slane %v1739_v40, %v17103_v19  ;;  %v1754_v34 = vcombine.high %v1746_v42, %v1746_v42 }
 0x1c2   :  { %v3271_v7 = vmax.f32 %v3079_v48, %v3087_v33  ;;  %v3272_v56 = vmax.f32 %v17643_v10, %v3088_v9  ;;  %v13278_v47 = vrot.slane %v1746_v42, 9  ;;  %v747_v23 = vmax.f32 %v577_v21, 0.0 }
 0x1c3   :  { %v3783_v3 = vrot.slane %v3275_v32, %v17112_v39  ;;  %v3273_v28 = vmax.f32 %v3081_v12, %v3089_v2  ;;  %v1755_v41 = vcombine.high %v1753_v1, %v1753_v1  ;;  %v13279_v27 = vrot.slane %v1754_v34, 9 }
 0x1c4   :  { %v3791_v8 = vrot.slane %v3277_v4, %v17112_v39  ;;  %v3763_v62 = vrot.slane %v3270_v25, %v17112_v39  ;;  %v3767_v6 = vrot.slane %v3271_v7, %v17112_v39  ;;  %v3771_v24 = vrot.slane %v3272_v56, %v17112_v39 }
 0x1c5   :  { %v3775_v63 = vrot.slane %v3273_v28, %v17112_v39  ;;  %v13280_v35 = vrot.slane %v1753_v1, 9  ;;  %v17703_v60 = vmax.f32 %v1746_v42, %v13278_v47  ;;  %v1467_v10 = vcombine.high %v747_v23, %v747_v23 }
 0x1c6   :  { %v4079_v52 = vsel %vm4016_vm3, %v3767_v6, %v3763_v62  ;;  %v13281_v57 = vrot.slane %v1755_v41, 9  ;;  %v1474_v54 = vrot.slane %v747_v23, %v17103_v19  ;;  %v762_v13 = vmax.f32 %v652_v30, 0.0 }
 0x1c7   :  { %v4080_v20 = vsel %vm4018_vm4, %v3771_v24, %v4079_v52  ;;  %v17708_v18 = vmax.f32 %v1754_v34, %v13279_v27  ;;  %v1481_v48 = vrot.slane %v1467_v10, %v17103_v19  ;;  %v572_v16 = vadd.f32 %v17479_v43, %v17379_v58 }
 0x1c8   :  { %v4081_v32 = vsel %vm4020_vm5, %v3775_v63, %v4080_v20  ;;  %v1482_v4 = vcombine.high %v1474_v54, %v1474_v54  ;;  %v13214_v17 = vrot.slane %v1474_v54, 9  ;;  %v1722_v12 = vcombine.high %v762_v13, %v762_v13 }
 0x1c9   :  { %v4082_v14 = vsel %vm4022_vm6, %v3779_v59, %v4081_v32  ;;  %v1483_v38 = vcombine.high %v1481_v48, %v1481_v48  ;;  %v13216_v61 = vrot.slane %v1481_v48, 9  ;;  %v1729_v45 = vrot.slane %v762_v13, %v17103_v19 }
 0x1ca   :  { %v4083_v26 = vsel %vm4024_vm7, %v3783_v3, %v4082_v14  ;;  %v17717_v49 = vmax.f32 %v1753_v1, %v13280_v35  ;;  %v13215_v29 = vrot.slane %v1482_v4, 9  ;;  %v1736_v40 = vrot.slane %v1722_v12, %v17103_v19 }
 0x1cb   :  { %v4084_v58 = vsel %vm4026_vm8, %v3787_v36, %v4083_v26  ;;  %v17721_v42 = vmax.f32 %v1755_v41, %v13281_v57  ;;  %v13217_v33 = vrot.slane %v1483_v38, 9  ;;  %v1737_v9 = vcombine.high %v1729_v45, %v1729_v45 }
 0x1cc   :  { %v4085_v21 = vsel %vm4028_vm9, %v3791_v8, %v4084_v58  ;;  %v17724_v59 = vmax.f32 %v1474_v54, %v13214_v17  ;;  %v1738_v30 = vcombine.high %v1736_v40, %v1736_v40  ;;  %v13274_v2 = vrot.slane %v1729_v45, 9 }
 0x1cd   :  { %4160 = vst.msk [vmem:[#allocation2 + $0xb1] sm:$0xff] %vm3334_vm1, %v4085_v21  ;;  %v17727_v25 = vmax.f32 %v1481_v48, %v13216_v61  ;;  %v13275_v1 = vrot.slane %v1737_v9, 9  ;;  %v13276_v34 = vrot.slane %v1736_v40, 9  ;;  %v746_v7 = vmax.f32 %v572_v16, 0.0 }
 0x1ce   :  { %v17729_v56 = vmax.f32 %v1482_v4, %v13215_v29  ;;  %v13277_v36 = vrot.slane %v1738_v30, 9  ;;  %v667_v47 = vadd.f32 %v17479_v43, %v17391_v31  ;;  %v662_v23 = vadd.f32 %v17479_v43, %v17394_v53 }
 0x1cf   :  { %v17735_v3 = vmax.f32 %v1483_v38, %v13217_v33  ;;  %v3158_v28 = vmax.f32 %v1729_v45, %v13274_v2  ;;  %v1450_v41 = vcombine.high %v746_v7, %v746_v7  ;;  %v1457_v27 = vrot.slane %v746_v7, %v17103_v19 }
 0x1d0   :  { %v3159_v8 = vmax.f32 %v1737_v9, %v13275_v1  ;;  %v3160_v62 = vmax.f32 %v1736_v40, %v13276_v34  ;;  %v765_v6 = vmax.f32 %v667_v47, 0.0  ;;  %v764_v24 = vmax.f32 %v662_v23, 0.0 }
 0x1d1   :  { %v3161_v63 = vmax.f32 %v1738_v30, %v13277_v36  ;;  %v17739_v35 = vrot.slane %v1450_v41, %v17103_v19  ;;  %v1465_v10 = vcombine.high %v1457_v27, %v1457_v27  ;;  %v13210_v52 = vrot.slane %v1457_v27, 9 }
 0x1d2   :  { %v1773_v31 = vcombine.high %v765_v6, %v765_v6  ;;  %v1780_v57 = vrot.slane %v765_v6, %v17103_v19  ;;  %v1756_v53 = vcombine.high %v764_v24, %v764_v24  ;;  %v1763_v54 = vrot.slane %v764_v24, %v17103_v19 }
 0x1d3   :  { %v17745_v13 = vcombine.high %v17739_v35, %v17739_v35  ;;  %v13211_v20 = vrot.slane %v1465_v10, 9  ;;  %v587_v48 = vadd.f32 %v17479_v43, %v17404_v15  ;;  %v582_v16 = vadd.f32 %v17479_v43, %v17438_v51 }
 0x1d4   :  { %v1787_v32 = vrot.slane %v1773_v31, %v17103_v19  ;;  %v1788_v4 = vcombine.high %v1780_v57, %v1780_v57  ;;  %v13286_v17 = vrot.slane %v1780_v57, 9  ;;  %v1770_v12 = vrot.slane %v1756_v53, %v17103_v19  ;;  %v4184_v14 = vld [vmem:[#allocation2 + $0xb0] sm:$0xff] }
 0x1d5   :  { %v13212_v38 = vrot.slane %v17739_v35, 9  ;;  %v13213_v61 = vrot.slane %v17745_v13, 9  ;;  %v17755_v45 = vmax.f32 %v1457_v27, %v13210_v52  ;;  %v1771_v26 = vcombine.high %v1763_v54, %v1763_v54  ;;  %14719 = vmatmul.mubr.msk.f32.gmra.mrb[26].mxu1 %vm3334_vm1, %v4184_v14 }
 0x1d6   :  { %v1789_v15 = vcombine.high %v1787_v32, %v1787_v32  ;;  %v13287_v29 = vrot.slane %v1788_v4, 9  ;;  %v13288_v40 = vrot.slane %v1787_v32, 9  ;;  %v3170_v51 = vmax.f32 %v1780_v57, %v13286_v17 }
 0x1d7   :  { %v17758_v58 = vmax.f32 %v1465_v10, %v13211_v20  ;;  %v1772_v33 = vcombine.high %v1770_v12, %v1770_v12  ;;  %v13282_v9 = vrot.slane %v1763_v54, 9  ;;  %v13283_v21 = vrot.slane %v1771_v26, 9 }
 0x1d8   :  { %v13289_v30 = vrot.slane %v1789_v15, 9  ;;  %v3171_v2 = vmax.f32 %v1788_v4, %v13287_v29  ;;  %v3172_v1 = vmax.f32 %v1787_v32, %v13288_v40  ;;  %v3314_v34 = vmax.f32 %v17703_v60, %v3170_v51 }
 0x1d9   :  { %v13284_v7 = vrot.slane %v1770_v12, 9  ;;  %v13285_v36 = vrot.slane %v1772_v33, 9  ;;  %v3166_v47 = vmax.f32 %v1763_v54, %v13282_v9  ;;  %v3167_v23 = vmax.f32 %v1771_v26, %v13283_v21 }
 0x1da   :  { %v3173_v41 = vmax.f32 %v1789_v15, %v13289_v30  ;;  %v3315_v27 = vmax.f32 %v17708_v18, %v3171_v2  ;;  %v3316_v6 = vmax.f32 %v17717_v49, %v3172_v1  ;;  %v3939_v24 = vrot.slane %v3314_v34, %v17112_v39 }
 0x1db   :  { %v3168_v10 = vmax.f32 %v1770_v12, %v13284_v7  ;;  %v3169_v52 = vmax.f32 %v1772_v33, %v13285_v36  ;;  %v3310_v31 = vmax.f32 %v3158_v28, %v3166_v47  ;;  %v3311_v57 = vmax.f32 %v3159_v8, %v3167_v23 }
 0x1dc   :  { %v3317_v53 = vmax.f32 %v17721_v42, %v3173_v41  ;;  %v3943_v20 = vrot.slane %v3315_v27, %v17112_v39  ;;  %v3947_v60 = vrot.slane %v3316_v6, %v17112_v39  ;;  %v749_v32 = vmax.f32 %v587_v48, 0.0 }
 0x1dd   :  { %v3312_v54 = vmax.f32 %v3160_v62, %v3168_v10  ;;  %v3313_v4 = vmax.f32 %v3161_v63, %v3169_v52  ;;  %v3923_v17 = vrot.slane %v3310_v31, %v17112_v39  ;;  %v3927_v18 = vrot.slane %v3311_v57, %v17112_v39 }
 0x1de   :  { %v3951_v49 = vrot.slane %v3317_v53, %v17112_v39  ;;  %v1501_v14 = vcombine.high %v749_v32, %v749_v32  ;;  %v1508_v12 = vrot.slane %v749_v32, %v17103_v19  ;;  %v748_v28 = vmax.f32 %v582_v16, 0.0 }
 0x1df   :  { %v3931_v8 = vrot.slane %v3312_v54, %v17112_v39  ;;  %v3935_v42 = vrot.slane %v3313_v4, %v17112_v39  ;;  %v4114_v26 = vsel %vm4016_vm3, %v3927_v18, %v3923_v17  ;;  %v677_v62 = vadd.f32 %v17479_v43, %v17447_v46 }
 0x1e0   :  { %v1515_v63 = vrot.slane %v1501_v14, %v17103_v19  ;;  %v1516_v48 = vcombine.high %v1508_v12, %v1508_v12  ;;  %v13222_v15 = vrot.slane %v1508_v12, 9  ;;  %v1484_v29 = vcombine.high %v748_v28, %v748_v28 }
 0x1e1   :  { %v4115_v40 = vsel %vm4018_vm4, %v3931_v8, %v4114_v26  ;;  %v1491_v51 = vrot.slane %v748_v28, %v17103_v19  ;;  %v767_v33 = vmax.f32 %v677_v62, 0.0  ;;  %v597_v16 = vadd.f32 %v17479_v43, %v17451_v44 }
 0x1e2   :  { %v4116_v9 = vsel %vm4020_vm5, %v3935_v42, %v4115_v40  ;;  %v1517_v21 = vcombine.high %v1515_v63, %v1515_v63  ;;  %v13223_v30 = vrot.slane %v1516_v48, 9  ;;  %v13224_v2 = vrot.slane %v1515_v63, 9 }
 0x1e3   :  { %v4117_v46 = vsel %vm4022_vm6, %v3939_v24, %v4116_v9  ;;  %v3106_v1 = vmax.f32 %v1508_v12, %v13222_v15  ;;  %v1498_v34 = vrot.slane %v1484_v29, %v17103_v19  ;;  %v1499_v7 = vcombine.high %v1491_v51, %v1491_v51 }
 0x1e4   :  { %v4118_v36 = vsel %vm4024_vm7, %v3943_v20, %v4117_v46  ;;  %v13225_v47 = vrot.slane %v1517_v21, 9  ;;  %v3107_v23 = vmax.f32 %v1516_v48, %v13223_v30  ;;  %v3108_v41 = vmax.f32 %v1515_v63, %v13224_v2  ;;  %v17823_v46 = vld [vmem:[%s19895_s2] ss:$0 sm:$0xff] }
 0x1e5   :  { %v4119_v27 = vsel %vm4026_vm8, %v3947_v60, %v4118_v36  ;;  %v3282_v44 = vmax.f32 %v17724_v59, %v3106_v1  ;;  %v1500_v43 = vcombine.high %v1498_v34, %v1498_v34  ;;  %v13218_v6 = vrot.slane %v1491_v51, 9 }
 0x1e6   :  { %v4120_v10 = vsel %vm4028_vm9, %v3951_v49, %v4119_v27  ;;  %v3109_v52 = vmax.f32 %v1517_v21, %v13225_v47  ;;  %v3283_v24 = vmax.f32 %v17729_v56, %v3107_v23  ;;  %v3284_v31 = vmax.f32 %v17727_v25, %v3108_v41  ;;  %v17799_v49 = vpop.f32.mrb[14].mxu1 }
 0x1e7   :  { %v3096_v57 = vmax.f32 %v17739_v35, %v13212_v38  ;;  %4165 = vst.msk [vmem:[#allocation2 + $0x101] sm:$0xff] %vm3334_vm1, %v4120_v10  ;;  %v13219_v53 = vrot.slane %v1499_v7, 9  ;;  %v13220_v20 = vrot.slane %v1498_v34, 9  ;;  %v13221_v60 = vrot.slane %v1500_v43, 9  ;;  %v17804_v28 = vpop.f32.mrb[15].mxu1 }
 0x1e8   :  { %v3097_v59 = vmax.f32 %v17745_v13, %v13213_v61  ;;  %v3285_v32 = vmax.f32 %v17735_v3, %v3109_v52  ;;  %v3811_v54 = vrot.slane %v3282_v44, %v17112_v39  ;;  %v3102_v56 = vmax.f32 %v1491_v51, %v13218_v6  ;;  %v17808_v42 = vpop.f32.mrb[16].mxu1 }
 0x1e9   :  { %v3103_v4 = vmax.f32 %v1499_v7, %v13219_v53  ;;  %v3104_v25 = vmax.f32 %v1498_v34, %v13220_v20  ;;  %v3105_v17 = vmax.f32 %v1500_v43, %v13221_v60  ;;  %v1807_v18 = vcombine.high %v767_v33, %v767_v33  ;;  %v17811_v15 = vpop.f32.mrb[17].mxu1 }
 0x1ea   :  { %v3815_v35 = vrot.slane %v3283_v24, %v17112_v39  ;;  %v3278_v38 = vmax.f32 %v17755_v45, %v3102_v56  ;;  %v1814_v14 = vrot.slane %v767_v33, %v17103_v19  ;;  %v751_v12 = vmax.f32 %v597_v16, 0.0 }
 0x1eb   :  { %v3279_v3 = vmax.f32 %v17758_v58, %v3103_v4  ;;  %v3280_v13 = vmax.f32 %v3096_v57, %v3104_v25  ;;  %v3281_v61 = vmax.f32 %v3097_v59, %v3105_v17  ;;  %v1821_v8 = vrot.slane %v1807_v18, %v17103_v19  ;;  %v19930_v57 = vld [vmem:[#allocation9_spill] sm:$0xff] }
 0x1ec   :  { %v3795_v26 = vrot.slane %v3278_v38, %v17112_v39  ;;  %v1822_v62 = vcombine.high %v1814_v14, %v1814_v14  ;;  %v13294_v63 = vrot.slane %v1814_v14, 9  ;;  %v1535_v48 = vcombine.high %v751_v12, %v751_v12 }
 0x1ed   :  { %v3799_v45 = vrot.slane %v3279_v3, %v17112_v39  ;;  %v3803_v29 = vrot.slane %v3280_v13, %v17112_v39  ;;  %v3807_v40 = vrot.slane %v3281_v61, %v17112_v39  ;;  %v1823_v58 = vcombine.high %v1821_v8, %v1821_v8 }
 0x1ee   :  { %v3819_v51 = vrot.slane %v3284_v31, %v17112_v39  ;;  %v13295_v33 = vrot.slane %v1822_v62, 9  ;;  %v13296_v16 = vrot.slane %v1821_v8, 9  ;;  %v1542_v9 = vrot.slane %v751_v12, %v17103_v19 }
 0x1ef   :  { %v4086_v21 = vsel %vm4016_vm3, %v3799_v45, %v3795_v26  ;;  %v13297_v30 = vrot.slane %v1823_v58, 9  ;;  %v1549_v2 = vrot.slane %v1535_v48, %v17103_v19  ;;  %v672_v1 = vadd.f32 %v17823_v46, %v17466_v50 }
 0x1f0   :  { %v3823_v34 = vrot.slane %v3285_v32, %v17112_v39  ;;  %v4087_v7 = vsel %vm4018_vm4, %v3803_v29, %v4086_v21  ;;  %v17829_v36 = vmax.f32 %v1814_v14, %v13294_v63  ;;  %v1550_v47 = vcombine.high %v1542_v9, %v1542_v9  ;;  %v19932_v14 = vld [vmem:[#allocation11_spill] sm:$0xff] }
 0x1f1   :  { %v4088_v23 = vsel %vm4020_vm5, %v3807_v40, %v4087_v7  ;;  %v17832_v41 = vmax.f32 %v1822_v62, %v13295_v33  ;;  %v1551_v27 = vcombine.high %v1549_v2, %v1549_v2  ;;  %v13230_v44 = vrot.slane %v1542_v9, 9 }
 0x1f2   :  { %v4089_v43 = vsel %vm4022_vm6, %v3811_v54, %v4088_v23  ;;  %v13231_v6 = vrot.slane %v1550_v47, 9  ;;  %v13232_v10 = vrot.slane %v1549_v2, 9  ;;  %v766_v52 = vmax.f32 %v672_v1, 0.0 }
 0x1f3   :  { %v4090_v50 = vsel %vm4024_vm7, %v3815_v35, %v4089_v43  ;;  %v17836_v24 = vmax.f32 %v1821_v8, %v13296_v16  ;;  %v17838_v31 = vmax.f32 %v1823_v58, %v13297_v30  ;;  %v592_v53 = vadd.f32 %v17823_v46, %v19930_v57  ;;  %v19931_v35 = vld [vmem:[#allocation10_spill] sm:$0xff] }
 0x1f4   :  { %v4091_v20 = vsel %vm4026_vm8, %v3819_v51, %v4090_v50  ;;  %v13233_v60 = vrot.slane %v1551_v27, 9  ;;  %v17843_v59 = vmax.f32 %v1542_v9, %v13230_v44  ;;  %v1790_v32 = vcombine.high %v766_v52, %v766_v52 }
 0x1f5   :  { %v4092_v54 = vsel %vm4028_vm9, %v3823_v34, %v4091_v20  ;;  %v17846_v56 = vmax.f32 %v1550_v47, %v13231_v6  ;;  %v1797_v4 = vrot.slane %v766_v52, %v17103_v19  ;;  %v750_v25 = vmax.f32 %v592_v53, 0.0 }
 0x1f6   :  { %4161 = vst.msk [vmem:[#allocation2 + $0xc1] sm:$0xff] %vm3334_vm1, %v4092_v54  ;;  %v17850_v17 = vmax.f32 %v1549_v2, %v13232_v10  ;;  %v1804_v18 = vrot.slane %v1790_v32, %v17103_v19  ;;  %v687_v38 = vadd.f32 %v17823_v46, %v19931_v35  ;;  %v682_v12 = vadd.f32 %v17823_v46, %v19932_v14 }
 0x1f7   :  { %v1805_v3 = vcombine.high %v1797_v4, %v1797_v4  ;;  %v13290_v13 = vrot.slane %v1797_v4, 9  ;;  %v1518_v61 = vcombine.high %v750_v25, %v750_v25  ;;  %v1525_v8 = vrot.slane %v750_v25, %v17103_v19 }
 0x1f8   :  { %v17858_v26 = vmax.f32 %v1551_v27, %v13233_v60  ;;  %v1806_v62 = vcombine.high %v1804_v18, %v1804_v18  ;;  %v13292_v63 = vrot.slane %v1804_v18, 9  ;;  %v769_v48 = vmax.f32 %v687_v38, 0.0 }
 0x1f9   :  { %v13291_v45 = vrot.slane %v1805_v3, 9  ;;  %v1532_v29 = vrot.slane %v1518_v61, %v17103_v19  ;;  %v1533_v40 = vcombine.high %v1525_v8, %v1525_v8  ;;  %v768_v58 = vmax.f32 %v682_v12, 0.0 }
 0x1fa   :  { %v13293_v51 = vrot.slane %v1806_v62, 9  ;;  %v13226_v33 = vrot.slane %v1525_v8, 9  ;;  %v1841_v16 = vcombine.high %v769_v48, %v769_v48  ;;  %v607_v9 = vadd.f32 %v17823_v46, %v17519_v5 }
 0x1fb   :  { %v3174_v21 = vmax.f32 %v1797_v4, %v13290_v13  ;;  %v3176_v30 = vmax.f32 %v1804_v18, %v13292_v63  ;;  %v17863_v2 = vcombine.high %v1532_v29, %v1532_v29  ;;  %v13227_v1 = vrot.slane %v1533_v40, 9 }
 0x1fc   :  { %v3175_v34 = vmax.f32 %v1805_v3, %v13291_v45  ;;  %v13228_v7 = vrot.slane %v1532_v29, 9  ;;  %v1848_v47 = vrot.slane %v769_v48, %v17103_v19  ;;  %v1855_v23 = vrot.slane %v1841_v16, %v17103_v19 }
 0x1fd   :  { %v3177_v27 = vmax.f32 %v1806_v62, %v13293_v51  ;;  %v13229_v44 = vrot.slane %v17863_v2, 9  ;;  %v17868_v43 = vmax.f32 %v1525_v8, %v13226_v33  ;;  %v1824_v6 = vcombine.high %v768_v58, %v768_v58  ;;  %v17870_v10 = vld [vmem:[#allocation2 + $0xc0] sm:$0xff] }
 0x1fe   :  { %v1856_v5 = vcombine.high %v1848_v47, %v1848_v47  ;;  %v1857_v52 = vcombine.high %v1855_v23, %v1855_v23  ;;  %v13302_v50 = vrot.slane %v1848_v47, 9  ;;  %v13304_v57 = vrot.slane %v1855_v23, 9  ;;  %14721 = vmatprep.mubr.msk.f32.mxu1 %vm3334_vm1, %v17870_v10 }
 0x1ff   :  { %v17874_v53 = vmax.f32 %v1533_v40, %v13227_v1  ;;  %v1831_v20 = vrot.slane %v768_v58, %v17103_v19  ;;  %v1838_v60 = vrot.slane %v1824_v6, %v17103_v19  ;;  %v753_v32 = vmax.f32 %v607_v9, 0.0 }
 0x200   :  { %v13303_v54 = vrot.slane %v1856_v5, 9  ;;  %v13305_v4 = vrot.slane %v1857_v52, 9  ;;  %v3186_v25 = vmax.f32 %v1848_v47, %v13302_v50  ;;  %v3188_v18 = vmax.f32 %v1855_v23, %v13304_v57  ;;  %v19933_v57 = vld [vmem:[#allocation12_spill] sm:$0xff] }
 0x201   :  { %v1839_v35 = vcombine.high %v1831_v20, %v1831_v20  ;;  %v1840_v38 = vcombine.high %v1838_v60, %v1838_v60  ;;  %v13298_v14 = vrot.slane %v1831_v20, 9  ;;  %v13300_v12 = vrot.slane %v1838_v60, 9 }
 0x202   :  { %v3187_v3 = vmax.f32 %v1856_v5, %v13303_v54  ;;  %v3189_v13 = vmax.f32 %v1857_v52, %v13305_v4  ;;  %v3322_v61 = vmax.f32 %v17829_v36, %v3186_v25  ;;  %v3324_v8 = vmax.f32 %v17836_v24, %v3188_v18 }
 0x203   :  { %v13299_v62 = vrot.slane %v1839_v35, 9  ;;  %v13301_v63 = vrot.slane %v1840_v38, 9  ;;  %v3182_v48 = vmax.f32 %v1831_v20, %v13298_v14  ;;  %v3184_v45 = vmax.f32 %v1838_v60, %v13300_v12 }
 0x204   :  { %v17880_v40 = vmax.f32 %v1532_v29, %v13228_v7  ;;  %v3323_v58 = vmax.f32 %v17832_v41, %v3187_v3  ;;  %v3325_v51 = vmax.f32 %v17838_v31, %v3189_v13  ;;  %v3971_v33 = vrot.slane %v3322_v61, %v17112_v39 }
 0x205   :  { %v3183_v16 = vmax.f32 %v1839_v35, %v13299_v62  ;;  %v3185_v9 = vmax.f32 %v1840_v38, %v13301_v63  ;;  %v3318_v1 = vmax.f32 %v3174_v21, %v3182_v48  ;;  %v3320_v47 = vmax.f32 %v3176_v30, %v3184_v45 }
 0x206   :  { %v3975_v36 = vrot.slane %v3323_v58, %v17112_v39  ;;  %v3979_v24 = vrot.slane %v3324_v8, %v17112_v39  ;;  %v1569_v23 = vcombine.high %v753_v32, %v753_v32  ;;  %v1576_v6 = vrot.slane %v753_v32, %v17103_v19 }
 0x207   :  { %v3319_v5 = vmax.f32 %v3175_v34, %v3183_v16  ;;  %v3321_v29 = vmax.f32 %v3177_v27, %v3185_v9  ;;  %v3955_v7 = vrot.slane %v3318_v1, %v17112_v39  ;;  %v3963_v41 = vrot.slane %v3320_v47, %v17112_v39 }
 0x208   :  { %v1583_v31 = vrot.slane %v1569_v23, %v17103_v19  ;;  %v1584_v52 = vcombine.high %v1576_v6, %v1576_v6  ;;  %v13238_v50 = vrot.slane %v1576_v6, 9  ;;  %v602_v21 = vadd.f32 %v17823_v46, %v19933_v57 }
 0x209   :  { %v3983_v30 = vrot.slane %v3325_v51, %v17112_v39  ;;  %v3959_v20 = vrot.slane %v3319_v5, %v17112_v39  ;;  %v3967_v60 = vrot.slane %v3321_v29, %v17112_v39  ;;  %v617_v34 = vadd.f32 %v17823_v46, %v17553_v37 }
 0x20a   :  { %v1585_v27 = vcombine.high %v1583_v31, %v1583_v31  ;;  %v13239_v32 = vrot.slane %v1584_v52, 9  ;;  %v13240_v54 = vrot.slane %v1583_v31, 9  ;;  %v3122_v4 = vmax.f32 %v1576_v6, %v13238_v50 }
 0x20b   :  { %v4121_v25 = vsel %vm4016_vm3, %v3959_v20, %v3955_v7  ;;  %v752_v18 = vmax.f32 %v602_v21, 0.0  ;;  %v755_v35 = vmax.f32 %v617_v34, 0.0  ;;  %v612_v38 = vadd.f32 %v17823_v46, %v17559_v0 }
 0x20c   :  { %v4122_v14 = vsel %vm4018_vm4, %v3963_v41, %v4121_v25  ;;  %v13241_v12 = vrot.slane %v1585_v27, 9  ;;  %v3123_v3 = vmax.f32 %v1584_v52, %v13239_v32  ;;  %v3124_v13 = vmax.f32 %v1583_v31, %v13240_v54 }
 0x20d   :  { %v4123_v61 = vsel %vm4020_vm5, %v3967_v60, %v4122_v14  ;;  %v3290_v37 = vmax.f32 %v17843_v59, %v3122_v4  ;;  %v1552_v8 = vcombine.high %v752_v18, %v752_v18  ;;  %v1559_v62 = vrot.slane %v752_v18, %v17103_v19 }
 0x20e   :  { %v4124_v63 = vsel %vm4022_vm6, %v3971_v33, %v4123_v61  ;;  %v3125_v48 = vmax.f32 %v1585_v27, %v13241_v12  ;;  %v3291_v45 = vmax.f32 %v17846_v56, %v3123_v3  ;;  %v3292_v58 = vmax.f32 %v17850_v17, %v3124_v13 }
 0x20f   :  { %v4125_v0 = vsel %vm4024_vm7, %v3975_v36, %v4124_v63  ;;  %v1566_v51 = vrot.slane %v1552_v8, %v17103_v19  ;;  %v1567_v16 = vcombine.high %v1559_v62, %v1559_v62  ;;  %v754_v9 = vmax.f32 %v612_v38, 0.0 }
 0x210   :  { %v3113_v59 = vmax.f32 %v17863_v2, %v13229_v44  ;;  %v4126_v1 = vsel %vm4026_vm8, %v3979_v24, %v4125_v0  ;;  %v3293_v47 = vmax.f32 %v17858_v26, %v3125_v48  ;;  %v3843_v33 = vrot.slane %v3290_v37, %v17112_v39  ;;  %v13339_v0 = vld [vmem:[%s19896_s3 + $0x10] sm:$0xff] }
 0x211   :  { %v4127_v56 = vsel %vm4028_vm9, %v3983_v30, %v4126_v1  ;;  %v1568_v23 = vcombine.high %v1566_v51, %v1566_v51  ;;  %v13234_v17 = vrot.slane %v1559_v62, 9  ;;  %v13235_v6 = vrot.slane %v1567_v16, 9 }
 0x212   :  { %4166 = vst.msk [vmem:[#allocation2 + $0x111] sm:$0xff] %vm3334_vm1, %v4127_v56  ;;  %v3847_v36 = vrot.slane %v3291_v45, %v17112_v39  ;;  %v13236_v5 = vrot.slane %v1566_v51, 9  ;;  %v1603_v29 = vcombine.high %v755_v35, %v755_v35  ;;  %v1610_v7 = vrot.slane %v755_v35, %v17103_v19 }
 0x213   :  { %v13237_v2 = vrot.slane %v1568_v23, 9  ;;  %v3118_v44 = vmax.f32 %v1559_v62, %v13234_v17  ;;  %v3119_v24 = vmax.f32 %v1567_v16, %v13235_v6  ;;  %v1586_v41 = vcombine.high %v754_v9, %v754_v9  ;;  %v19934_v16 = vld [vmem:[#allocation13_spill] sm:$0xff] }
 0x214   :  { %v3120_v26 = vmax.f32 %v1566_v51, %v13236_v5  ;;  %v1617_v31 = vrot.slane %v1603_v29, %v17103_v19  ;;  %v1618_v52 = vcombine.high %v1610_v7, %v1610_v7  ;;  %v13246_v50 = vrot.slane %v1610_v7, 9  ;;  %v13358_v17 = vld [vmem:[%s19896_s3 + $0x28] sm:$0xff] }
 0x215   :  { %v3121_v57 = vmax.f32 %v1568_v23, %v13237_v2  ;;  %v3286_v21 = vmax.f32 %v17868_v43, %v3118_v44  ;;  %v3287_v30 = vmax.f32 %v17874_v53, %v3119_v24  ;;  %v1593_v20 = vrot.slane %v754_v9, %v17103_v19  ;;  %v13357_v23 = vld [vmem:[%s19896_s3 + $0x20] sm:$0xff] }
 0x216   :  { %v3288_v60 = vmax.f32 %v17880_v40, %v3120_v26  ;;  %v1619_v34 = vcombine.high %v1617_v31, %v1617_v31  ;;  %v13247_v27 = vrot.slane %v1618_v52, 9  ;;  %v13248_v32 = vrot.slane %v1617_v31, 9 }
 0x217   :  { %v3289_v54 = vmax.f32 %v3113_v59, %v3121_v57  ;;  %v3827_v4 = vrot.slane %v3286_v21, %v17112_v39  ;;  %v3831_v25 = vrot.slane %v3287_v30, %v17112_v39  ;;  %v3130_v18 = vmax.f32 %v1610_v7, %v13246_v50  ;;  %v19936_v50 = vld [vmem:[#allocation15_spill] sm:$0xff]  ;;  %v19937_v21 = vld [vmem:[#allocation16_spill] sm:$0xff] }
 0x218   :  { %v3835_v35 = vrot.slane %v3288_v60, %v17112_v39  ;;  %v13249_v38 = vrot.slane %v1619_v34, 9  ;;  %v3131_v14 = vmax.f32 %v1618_v52, %v13247_v27  ;;  %v3132_v43 = vmax.f32 %v1617_v31, %v13248_v32  ;;  %v19935_v31 = vld [vmem:[#allocation14_spill] sm:$0xff] }
 0x219   :  { %v3839_v53 = vrot.slane %v3289_v54, %v17112_v39  ;;  %v4093_v12 = vsel %vm4016_vm3, %v3831_v25, %v3827_v4  ;;  %v3298_v40 = vmax.f32 %v3130_v18, %v17578_v55  ;;  %v1600_v3 = vrot.slane %v1586_v41, %v17103_v19  ;;  %v13340_v55 = vld [vmem:[%s19896_s3 + $0x18] sm:$0xff] }
 0x21a   :  { %v4094_v13 = vsel %vm4018_vm4, %v3835_v35, %v4093_v12  ;;  %v3133_v61 = vmax.f32 %v1619_v34, %v13249_v38  ;;  %v3299_v37 = vmax.f32 %v3131_v14, %v17582_v11  ;;  %v3300_v8 = vmax.f32 %v3132_v43, %v17584_v22  ;;  %v19938_v34 = vld [vmem:[#allocation17_spill] sm:$0xff] }
 0x21b   :  { %v3851_v62 = vrot.slane %v3292_v58, %v17112_v39  ;;  %v4095_v63 = vsel %vm4020_vm5, %v3839_v53, %v4094_v13  ;;  %v1601_v48 = vcombine.high %v1593_v20, %v1593_v20  ;;  %v1602_v45 = vcombine.high %v1600_v3, %v1600_v3 }
 0x21c   :  { %v3855_v51 = vrot.slane %v3293_v47, %v17112_v39  ;;  %v4096_v11 = vsel %vm4022_vm6, %v3843_v33, %v4095_v63  ;;  %v3301_v22 = vmax.f32 %v3133_v61, %v19934_v16  ;;  %v3875_v58 = vrot.slane %v3298_v40, %v17112_v39 }
 0x21d   :  { %v4097_v9 = vsel %vm4024_vm7, %v3847_v36, %v4096_v11  ;;  %v13242_v59 = vrot.slane %v1593_v20, 9  ;;  %v13243_v1 = vrot.slane %v1601_v48, 9  ;;  %v13244_v56 = vrot.slane %v1600_v3, 9 }
 0x21e   :  { %v4098_v47 = vsel %vm4026_vm8, %v3851_v62, %v4097_v9  ;;  %v3879_v33 = vrot.slane %v3299_v37, %v17112_v39  ;;  %v13245_v6 = vrot.slane %v1602_v45, 9  ;;  %v15728_v5 = vpack.c.bf16 %v13340_v55, %v13339_v0 }
 0x21f   :  { %v4099_v29 = vsel %vm4028_vm9, %v3855_v51, %v4098_v47  ;;  %v3126_v36 = vmax.f32 %v1593_v20, %v13242_v59  ;;  %v3127_v7 = vmax.f32 %v1601_v48, %v13243_v1  ;;  %v3128_v2 = vmax.f32 %v1600_v3, %v13244_v56 }
 0x220   :  { %4162 = vst.msk [vmem:[#allocation2 + $0xd1] sm:$0xff] %vm3334_vm1, %v4099_v29  ;;  %v3883_v44 = vrot.slane %v3300_v8, %v17112_v39  ;;  %v3129_v24 = vmax.f32 %v1602_v45, %v13245_v6  ;;  %15729 = vmatprep.subr.bf16.mxu1 %v15728_v5  ;;  %v17959_v41 = vpack.c.bf16 %v13358_v17, %v13357_v23 }
 0x221   :  { %v697_v26 = vadd.f32 %v17823_v46, %v17799_v49  ;;  %v3294_v52 = vmax.f32 %v3126_v36, %v19935_v31  ;;  %v3295_v57 = vmax.f32 %v3127_v7, %v19936_v50  ;;  %v3296_v30 = vmax.f32 %v3128_v2, %v19937_v21  ;;  %15731 = vmatpush3.bf16.msra.mxu1 %v15728_v5 }
 0x222   :  { %v692_v20 = vadd.f32 %v17823_v46, %v17804_v28  ;;  %v3887_v60 = vrot.slane %v3301_v22, %v17112_v39  ;;  %v3297_v27 = vmax.f32 %v3129_v24, %v19938_v34  ;;  %15733 = vmatprep.subr.bf16.mxu1 %v17959_v41  ;;  %v707_v49 = vadd.f32 %v17823_v46, %v17808_v42 }
 0x223   :  { %v771_v32 = vmax.f32 %v697_v26, 0.0  ;;  %v3859_v54 = vrot.slane %v3294_v52, %v17112_v39  ;;  %v3863_v4 = vrot.slane %v3295_v57, %v17112_v39  ;;  %v3867_v25 = vrot.slane %v3296_v30, %v17112_v39 }
 0x224   :  { %v770_v18 = vmax.f32 %v692_v20, 0.0  ;;  %v3871_v35 = vrot.slane %v3297_v27, %v17112_v39  ;;  %v702_v14 = vadd.f32 %v17823_v46, %v17811_v15  ;;  %v773_v12 = vmax.f32 %v707_v49, 0.0 }
 0x225   :  { %v1875_v28 = vcombine.high %v771_v32, %v771_v32  ;;  %v1882_v38 = vrot.slane %v771_v32, %v17103_v19  ;;  %v4100_v43 = vsel %vm4016_vm3, %v3863_v4, %v3859_v54 }
 0x226   :  { %v1858_v53 = vcombine.high %v770_v18, %v770_v18  ;;  %v1865_v42 = vrot.slane %v770_v18, %v17103_v19  ;;  %v4101_v40 = vsel %vm4018_vm4, %v3867_v25, %v4100_v43  ;;  %v772_v16 = vmax.f32 %v702_v14, 0.0 }
 0x227   :  { %v1889_v3 = vrot.slane %v1875_v28, %v17103_v19  ;;  %v1890_v13 = vcombine.high %v1882_v38, %v1882_v38  ;;  %v13310_v61 = vrot.slane %v1882_v38, 9  ;;  %v4102_v37 = vsel %vm4020_vm5, %v3871_v35, %v4101_v40  ;;  %v17985_v8 = vld [vmem:[#allocation2 + $0xd0] sm:$0xff] }
 0x228   :  { %v1872_v62 = vrot.slane %v1858_v53, %v17103_v19  ;;  %v1873_v63 = vcombine.high %v1865_v42, %v1865_v42  ;;  %v13306_v15 = vrot.slane %v1865_v42, 9  ;;  %v4103_v46 = vsel %vm4022_vm6, %v3875_v58, %v4102_v37  ;;  %14722 = vmatmul.mubr.msk.f32.gmra.mrb[28].mxu1 %vm3334_vm1, %v17985_v8  ;;  %v18003_v53 = vld [vmem:[#allocation2 + $0xf0] sm:$0xff] }
 0x229   :  { %v1891_v48 = vcombine.high %v1889_v3, %v1889_v3  ;;  %v13311_v45 = vrot.slane %v1890_v13, 9  ;;  %v13312_v0 = vrot.slane %v1889_v3, 9  ;;  %v4104_v55 = vsel %vm4024_vm7, %v3879_v33, %v4103_v46 }
 0x22a   :  { %v1874_v51 = vcombine.high %v1872_v62, %v1872_v62  ;;  %v13307_v11 = vrot.slane %v1873_v63, 9  ;;  %v4105_v22 = vsel %vm4026_vm8, %v3883_v44, %v4104_v55  ;;  %v3194_v59 = vmax.f32 %v1882_v38, %v13310_v61  ;;  %v13375_v55 = vld [vmem:[%s19896_s3 + $0x30] sm:$0xff] }
 0x22b   :  { %v13313_v9 = vrot.slane %v1891_v48, 9  ;;  %v4106_v1 = vsel %vm4028_vm9, %v3887_v60, %v4105_v22  ;;  %v3195_v56 = vmax.f32 %v1890_v13, %v13311_v45  ;;  %v13308_v23 = vrot.slane %v1872_v62, 9 }
 0x22c   :  { %v13309_v58 = vrot.slane %v1874_v51, 9  ;;  %4163 = vst.msk [vmem:[#allocation2 + $0xe1] sm:$0xff] %vm3334_vm1, %v4106_v1  ;;  %v3196_v17 = vmax.f32 %v1889_v3, %v13312_v0  ;;  %v3190_v47 = vmax.f32 %v1865_v42, %v13306_v15  ;;  %v1909_v6 = vcombine.high %v773_v12, %v773_v12  ;;  %v18007_v3 = vld [vmem:[#allocation2 + $0x100] sm:$0xff]  ;;  %v18014_v0 = vld [vmem:[#allocation2 + $0x110] sm:$0xff] }
 0x22d   :  { %v1916_v5 = vrot.slane %v773_v12, %v17103_v19  ;;  %v3197_v33 = vmax.f32 %v1891_v48, %v13313_v9  ;;  %v3191_v29 = vmax.f32 %v1873_v63, %v13307_v11  ;;  %v1892_v36 = vcombine.high %v772_v16, %v772_v16  ;;  %v4402_v15 = vld [vmem:[#allocation2 + $0x1] sm:$0xff] }
 0x22e   :  { %v1899_v7 = vrot.slane %v772_v16, %v17103_v19  ;;  %v3192_v2 = vmax.f32 %v1872_v62, %v13308_v23  ;;  %v1923_v44 = vrot.slane %v1909_v6, %v17103_v19  ;;  %v3193_v31 = vmax.f32 %v1874_v51, %v13309_v58  ;;  %v13376_v51 = vld [vmem:[%s19896_s3 + $0x38] sm:$0xff]  ;;  %v18038_v6 = vld [vmem:[#allocation2 + $0x21] sm:$0xff] }
 0x22f   :  { %v1924_v24 = vcombine.high %v1916_v5, %v1916_v5  ;;  %v13318_v26 = vrot.slane %v1916_v5, 9  ;;  %v1906_v52 = vrot.slane %v1892_v36, %v17103_v19  ;;  %v18046_v36 = vld [vmem:[#allocation2 + $0x31] sm:$0xff] }
 0x230   :  { %v1907_v50 = vcombine.high %v1899_v7, %v1899_v7  ;;  %v13314_v57 = vrot.slane %v1899_v7, 9  ;;  %v1925_v21 = vcombine.high %v1923_v44, %v1923_v44  ;;  %v13320_v20 = vrot.slane %v1923_v44, 9 }
 0x231   :  { %v13319_v30 = vrot.slane %v1924_v24, 9  ;;  %v3202_v60 = vmax.f32 %v1916_v5, %v13318_v26  ;;  %v1908_v34 = vcombine.high %v1906_v52, %v1906_v52  ;;  %v13316_v32 = vrot.slane %v1906_v52, 9  ;;  %v18068_v26 = vld [vmem:[#allocation2 + $0xb1] sm:$0xff] }
 0x232   :  { %v13315_v27 = vrot.slane %v1907_v50, 9  ;;  %v3198_v49 = vmax.f32 %v1899_v7, %v13314_v57  ;;  %v13321_v54 = vrot.slane %v1925_v21, 9  ;;  %v3204_v25 = vmax.f32 %v1923_v44, %v13320_v20  ;;  %v18051_v7 = vld [vmem:[#allocation2 + $0x41] sm:$0xff]  ;;  %v18084_v57 = vld [vmem:[#allocation2 + $0xf1] sm:$0xff] }
 0x233   :  { %v3203_v4 = vmax.f32 %v1924_v24, %v13319_v30  ;;  %v3330_v18 = vmax.f32 %v3194_v59, %v3202_v60  ;;  %v17999_v35 = vld [vmem:[#allocation2 + $0xe0] sm:$0xff]  ;;  %v13317_v28 = vrot.slane %v1908_v34, 9  ;;  %v3200_v14 = vmax.f32 %v1906_v52, %v13316_v32  ;;  %v18063_v24 = vld [vmem:[#allocation2 + $0x71] sm:$0xff] }
 0x234   :  { %v3199_v38 = vmax.f32 %v1907_v50, %v13315_v27  ;;  %v3326_v43 = vmax.f32 %v3190_v47, %v3198_v49  ;;  %14724 = vmatprep.mubr.msk.f32.mxu1 %vm3334_vm1, %v17999_v35  ;;  %v3205_v42 = vmax.f32 %v1925_v21, %v13321_v54  ;;  %v3332_v40 = vmax.f32 %v3196_v17, %v3204_v25  ;;  %v18033_v17 = vld [vmem:[#allocation2 + $0x11] sm:$0xff]  ;;  %v4410_v44 = vld [vmem:[#allocation2 + $0xa1] sm:$0xff] }
 0x235   :  { %v3331_v12 = vmax.f32 %v3195_v56, %v3203_v4  ;;  %14725 = vmatmul.mubr.msk.f32.gmra.mrb[30].mxu1 %vm3334_vm1, %v18003_v53  ;;  %v3201_v13 = vmax.f32 %v1908_v34, %v13317_v28  ;;  %v3328_v37 = vmax.f32 %v3192_v2, %v3200_v14  ;;  %v4003_v11 = vrot.slane %v3330_v18, %v17112_v39  ;;  %v18059_v2 = vld [vmem:[#allocation2 + $0x61] sm:$0xff]  ;;  %v18076_v52 = vld [vmem:[#allocation2 + $0xd1] sm:$0xff] }
 0x236   :  { %v3327_v61 = vmax.f32 %v3191_v29, %v3199_v38  ;;  %v3987_v62 = vrot.slane %v3326_v43, %v17112_v39  ;;  %14727 = vmatprep.mubr.msk.f32.mxu1 %vm3334_vm1, %v18007_v3  ;;  %v3333_v63 = vmax.f32 %v3197_v33, %v3205_v42  ;;  %v4011_v59 = vrot.slane %v3332_v40, %v17112_v39  ;;  %v18080_v50 = vld [vmem:[#allocation2 + $0xe1] sm:$0xff]  ;;  %v18092_v20 = vld [vmem:[#allocation2 + $0x111] sm:$0xff] }
 0x237   :  { %v3329_v46 = vmax.f32 %v3193_v31, %v3201_v13  ;;  %v3995_v45 = vrot.slane %v3328_v37, %v17112_v39  ;;  %v4007_v16 = vrot.slane %v3331_v12, %v17112_v39  ;;  %v15736_v56 = vpack.c.bf16 %v13376_v51, %v13375_v55  ;;  %v18072_v31 = vld [vmem:[#allocation2 + $0xc1] sm:$0xff]  ;;  %v18103_v32 = vld [vmem:[#allocation2 + $0x12] sm:$0xff] }
 0x238   :  { %v3991_v48 = vrot.slane %v3327_v61, %v17112_v39  ;;  %v4015_v23 = vrot.slane %v3333_v63, %v17112_v39  ;;  %v18088_v21 = vld [vmem:[#allocation2 + $0x101] sm:$0xff]  ;;  %v18111_v54 = vld [vmem:[#allocation2 + $0x32] sm:$0xff] }
 0x239   :  { %14728 = vmatmul.mubr.msk.f32.gmra.mrb[32].mxu1 %vm3334_vm1, %v18014_v0  ;;  %v3999_v22 = vrot.slane %v3329_v46, %v17112_v39  ;;  %v4630_v30 = vld [vmem:[#allocation2 + $0x2] sm:$0xff]  ;;  %v18119_v25 = vld [vmem:[#allocation2 + $0x52] sm:$0xff] }
 0x23a   :  { %v4128_v9 = vsel %vm4016_vm3, %v3991_v48, %v3987_v62  ;;  %14734 = vmatprep.mubr.msk.f32.mxu1 %vm3334_vm1, %v4402_v15  ;;  %v13393_v60 = vld [vmem:[%s19896_s3 + $0x40] sm:$0xff]  ;;  %v13394_v34 = vld [vmem:[%s19896_s3 + $0x48] sm:$0xff]  ;;  %v18127_v38 = vld [vmem:[#allocation2 + $0x72] sm:$0xff] }
 0x23b   :  { %v4129_v1 = vsel %vm4018_vm4, %v3995_v45, %v4128_v9  ;;  %v15740_v27 = vpack.c.bf16 %v13394_v34, %v13393_v60  ;;  %v18107_v49 = vld [vmem:[#allocation2 + $0x22] sm:$0xff]  ;;  %v18132_v14 = vld [vmem:[#allocation2 + $0xb2] sm:$0xff] }
 0x23c   :  { %v4130_v58 = vsel %vm4020_vm5, %v3999_v22, %v4129_v1  ;;  %v18115_v4 = vld [vmem:[#allocation2 + $0x42] sm:$0xff]  ;;  %v18140_v42 = vld [vmem:[#allocation2 + $0xd2] sm:$0xff] }
 0x23d   :  { %v4131_v47 = vsel %vm4022_vm6, %v4003_v11, %v4130_v58  ;;  %14735 = vmatmul.mubr.msk.f32.vlgmr.msra.gmra.mrb[18].mxu1 %vm3334_vm1, %v18033_v17  ;;  %v18123_v18 = vld [vmem:[#allocation2 + $0x62] sm:$0xff]  ;;  %v18148_v40 = vld [vmem:[#allocation2 + $0xf2] sm:$0xff] }
 0x23e   :  { %v4132_v5 = vsel %vm4024_vm7, %v4007_v16, %v4131_v47  ;;  %15735 = vmatpush3.bf16.msra.mxu1 %v17959_v41  ;;  %14737 = vmatprep.mubr.msk.f32.mxu1 %vm3334_vm1, %v18038_v6  ;;  %v18055_v41 = vld [vmem:[#allocation2 + $0x51] sm:$0xff]  ;;  %v4638_v28 = vld [vmem:[#allocation2 + $0xa2] sm:$0xff] }
 0x23f   :  { %v4133_v33 = vsel %vm4026_vm8, %v4011_v59, %v4132_v5  ;;  %15737 = vmatprep.subr.bf16.mxu1 %v15736_v56  ;;  %v18136_v43 = vld [vmem:[#allocation2 + $0xc2] sm:$0xff]  ;;  %v18156_v61 = vld [vmem:[#allocation2 + $0x112] sm:$0xff] }
 0x240   :  { %v4134_v29 = vsel %vm4028_vm9, %v4015_v23, %v4133_v33  ;;  %v18144_v12 = vld [vmem:[#allocation2 + $0xe2] sm:$0xff]  ;;  %v13411_v37 = vld [vmem:[%s19896_s3 + $0x50] sm:$0xff]  ;;  %v13412_v62 = vld [vmem:[%s19896_s3 + $0x58] sm:$0xff] }
 0x241   :  { %4167 = vst.msk [vmem:[#allocation2 + $0x121] sm:$0xff] %vm3334_vm1, %v4134_v29  ;;  %14738 = vmatmul.mubr.msk.f32.gmra.mrb[20].mxu1 %vm3334_vm1, %v18046_v36  ;;  %v18152_v13 = vld [vmem:[#allocation2 + $0x102] sm:$0xff]  ;;  %v4858_v63 = vld [vmem:[#allocation2 + $0x10] sm:$0xff]  ;;  %v15744_v15 = vpack.c.bf16 %v13412_v62, %v13411_v37  ;;  %v13448_v47 = vld [vmem:[%s19896_s3 + $0x78] sm:$0xff] }
 0x242   :  { %14740 = vmatprep.mubr.msk.f32.mxu1 %vm3334_vm1, %v18051_v7  ;;  %v18167_v46 = vld [vmem:[#allocation2 + $0x20] sm:$0xff]  ;;  %v18171_v48 = vld [vmem:[#allocation2 + $0x30] sm:$0xff]  ;;  %v13430_v1 = vld [vmem:[%s19896_s3 + $0x68] sm:$0xff] }
 0x243   :  { %v18175_v45 = vld [vmem:[#allocation2 + $0x40] sm:$0xff]  ;;  %v18179_v55 = vld [vmem:[#allocation2 + $0x50] sm:$0xff]  ;;  %v6325_v33 = vld [vmem:[%s19898_s5 + $0x8] sm:$0xff] }
 0x244   :  { %v16580_v51 = vld [vmem:[#allocation2 + $0x60] sm:$0xff]  ;;  %v18184_v11 = vld [vmem:[#allocation2 + $0x70] sm:$0xff] }
 0x245   :  { %14741 = vmatmul.mubr.msk.f32.gmra.mrb[22].mxu1 %vm3334_vm1, %v18055_v41  ;;  %v18188_v16 = vld [vmem:[#allocation2 + $0x80] sm:$0xff]  ;;  %v16582_v22 = vld [vmem:[#allocation2 + $0xb0] sm:$0xff] }
 0x246   :  { %14743 = vmatprep.mubr.msk.f32.mxu1 %vm3334_vm1, %v18059_v2  ;;  %v13429_v59 = vld [vmem:[%s19896_s3 + $0x60] sm:$0xff]  ;;  %v6326_v29 = vld [vmem:[%s19898_s5 + $0x10] sm:$0xff] }
 0x247   :  { %v18229_v23 = vld [vmem:[#allocation2 + $0x81] sm:$0xff]  ;;  %v5550_v62 = vld [vmem:[#allocation2 + $0x90] sm:$0xff] }
 0x248   :  { %v18205_v9 = vld [vmem:[#allocation2 + $0x120] sm:$0xff] }
 0x249   :  { %14744 = vmatmul.mubr.msk.f32.gmra.mrb[24].mxu1 %vm3334_vm1, %v18063_v24  ;;  %v18247_v58 = vld [vmem:[#allocation2 + $0x121] sm:$0xff] }
 0x24a   :  { %14746 = vmatprep.mubr.msk.f32.mxu1 %vm3334_vm1, %v4410_v44  ;;  %v6324_v5 = vld [vmem:[%s19898_s5] sm:$0xff] }
 0x24b   :  { %v15760_v44 = vpack.c.bf16 %v6325_v33, %v6324_v5  ;;  %v5321_v34 = vld [vmem:[#allocation2 + $0x82] sm:$0xff] }
 0x24c   :  { %v5547_v37 = vld [vmem:[#allocation2 + $0x60] sm:$0xff] }
 0x24d   :  { %14747 = vmatmul.mubr.msk.f32.gmra.mrb[26].mxu1 %vm3334_vm1, %v18068_v26  ;;  %15761 = vmatprep.subr.bf16.mxu0 %v15760_v44 }
 0x24e   :  { %14749 = vmatprep.mubr.msk.f32.mxu1 %vm3334_vm1, %v18072_v31  ;;  %15763 = vmatpush3.bf16.msra.mxu0 %v15760_v44 }
 0x251   :  { %14750 = vmatmul.mubr.msk.f32.gmra.mrb[28].mxu1 %vm3334_vm1, %v18076_v52 }
 0x252   :  { %14752 = vmatprep.mubr.msk.f32.mxu1 %vm3334_vm1, %v18080_v50 }
 0x255   :  { %14753 = vmatmul.mubr.msk.f32.gmra.mrb[30].mxu1 %vm3334_vm1, %v18084_v57 }
 0x256   :  { %14755 = vmatprep.mubr.msk.f32.mxu1 %vm3334_vm1, %v18088_v21 }
 0x259   :  { %14756 = vmatmul.mubr.msk.f32.gmra.mrb[32].mxu1 %vm3334_vm1, %v18092_v20 }
 0x25a   :  { %14762 = vmatprep.mubr.msk.f32.mxu1 %vm3334_vm1, %v4630_v30 }
 0x25d   :  { %14763 = vmatmul.mubr.msk.f32.vlgmr.msra.gmra.mrb[18].mxu1 %vm3334_vm1, %v18103_v32 }
 0x25e   :  { %15739 = vmatpush3.bf16.msra.mxu1 %v15736_v56  ;;  %14765 = vmatprep.mubr.msk.f32.mxu1 %vm3334_vm1, %v18107_v49  ;;  %v15748_v56 = vpack.c.bf16 %v13430_v1, %v13429_v59 }
 0x25f   :  { %15741 = vmatprep.subr.bf16.mxu1 %v15740_v27 }
 0x261   :  { %14766 = vmatmul.mubr.msk.f32.gmra.mrb[20].mxu1 %vm3334_vm1, %v18111_v54 }
 0x262   :  { %14768 = vmatprep.mubr.msk.f32.mxu1 %vm3334_vm1, %v18115_v4 }
 0x265   :  { %14769 = vmatmul.mubr.msk.f32.gmra.mrb[22].mxu1 %vm3334_vm1, %v18119_v25 }
 0x266   :  { %14771 = vmatprep.mubr.msk.f32.mxu1 %vm3334_vm1, %v18123_v18 }
 0x269   :  { %14772 = vmatmul.mubr.msk.f32.gmra.mrb[24].mxu1 %vm3334_vm1, %v18127_v38 }
 0x26a   :  { %14774 = vmatprep.mubr.msk.f32.mxu1 %vm3334_vm1, %v4638_v28  ;;  %v13466_v28 = vld [vmem:[%s19896_s3 + $0x88] sm:$0xff] }
 0x26d   :  { %14775 = vmatmul.mubr.msk.f32.gmra.mrb[26].mxu1 %vm3334_vm1, %v18132_v14 }
 0x26e   :  { %14777 = vmatprep.mubr.msk.f32.mxu1 %vm3334_vm1, %v18136_v43 }
 0x271   :  { %14778 = vmatmul.mubr.msk.f32.gmra.mrb[28].mxu1 %vm3334_vm1, %v18140_v42 }
 0x272   :  { %14780 = vmatprep.mubr.msk.f32.mxu1 %vm3334_vm1, %v18144_v12 }
 0x275   :  { %14781 = vmatmul.mubr.msk.f32.gmra.mrb[30].mxu1 %vm3334_vm1, %v18148_v40 }
 0x276   :  { %14783 = vmatprep.mubr.msk.f32.mxu1 %vm3334_vm1, %v18152_v13 }
 0x279   :  { %14784 = vmatmul.mubr.msk.f32.gmra.mrb[32].mxu1 %vm3334_vm1, %v18156_v61 }
 0x27a   :  { %14790 = vmatprep.mubr.msk.f32.mxu1 %vm3334_vm1, %v4858_v63  ;;  %v5558_v63 = vld [vmem:[#allocation2 + $0x130] sm:$0xff] }
 0x27d   :  { %14791 = vmatmul.mubr.msk.f32.vlgmr.msra.gmra.mrb[18].mxu1 %vm3334_vm1, %v18167_v46 }
 0x27e   :  { %15743 = vmatpush3.bf16.msra.mxu1 %v15740_v27  ;;  %14793 = vmatprep.mubr.msk.f32.mxu1 %vm3334_vm1, %v18171_v48  ;;  %v5329_v27 = vld [vmem:[#allocation2 + $0x122] sm:$0xff] }
 0x27f   :  { %15745 = vmatprep.subr.bf16.mxu1 %v15744_v15 }
 0x281   :  { %14794 = vmatmul.mubr.msk.f32.gmra.mrb[20].mxu1 %vm3334_vm1, %v18175_v45 }
 0x282   :  { %14796 = vmatprep.mubr.msk.f32.mxu1 %vm3334_vm1, %v18179_v55 }
 0x285   :  { %14797 = vmatmul.mubr.msk.f32.gmra.mrb[22].mxu1 %vm3334_vm1, %v16580_v51  ;;  %v13520_v51 = vld [vmem:[%s19898_s5 + $0x40] sm:$0xff] }
 0x286   :  { %14799 = vmatprep.mubr.msk.f32.mxu1 %vm3334_vm1, %v18184_v11 }
 0x289   :  { %14800 = vmatmul.mubr.msk.f32.gmra.mrb[24].mxu1 %vm3334_vm1, %v18188_v16 }
 0x28a   :  { %14802 = vmatprep.mubr.msk.f32.mxu1 %vm3334_vm1, %v16582_v22 }
 0x28d   :  { %14803 = vmatmul.mubr.msk.f32.gmra.mrb[26].mxu1 %vm3334_vm1, %v17870_v10 }
 0x28e   :  { %14805 = vmatprep.mubr.msk.f32.mxu1 %vm3334_vm1, %v17985_v8 }
 0x291   :  { %14806 = vmatmul.mubr.msk.f32.gmra.mrb[28].mxu1 %vm3334_vm1, %v17999_v35 }
 0x292   :  { %14808 = vmatprep.mubr.msk.f32.mxu1 %vm3334_vm1, %v18003_v53 }
 0x295   :  { %14809 = vmatmul.mubr.msk.f32.gmra.mrb[30].mxu1 %vm3334_vm1, %v18007_v3 }
 0x296   :  { %14811 = vmatprep.mubr.msk.f32.mxu1 %vm3334_vm1, %v18014_v0 }
 0x299   :  { %14812 = vmatmul.mubr.msk.f32.gmra.mrb[32].mxu1 %vm3334_vm1, %v18205_v9 }
 0x29a   :  { %14818 = vmatprep.mubr.msk.f32.mxu1 %vm3334_vm1, %v18033_v17  ;;  %v13447_v17 = vld [vmem:[%s19896_s3 + $0x70] sm:$0xff] }
 0x29b   :  { %v15752_v30 = vpack.c.bf16 %v13448_v47, %v13447_v17 }
 0x29d   :  { %14819 = vmatmul.mubr.msk.f32.vlgmr.msra.gmra.mrb[18].mxu1 %vm3334_vm1, %v18038_v6 }
 0x29e   :  { %15747 = vmatpush3.bf16.msra.mxu1 %v15744_v15  ;;  %14821 = vmatprep.mubr.msk.f32.mxu1 %vm3334_vm1, %v18046_v36 }
 0x29f   :  { %15749 = vmatprep.subr.bf16.mxu1 %v15748_v56 }
 0x2a1   :  { %14822 = vmatmul.mubr.msk.f32.gmra.mrb[20].mxu1 %vm3334_vm1, %v18051_v7 }
 0x2a2   :  { %14824 = vmatprep.mubr.msk.f32.mxu1 %vm3334_vm1, %v18055_v41 }
 0x2a5   :  { %14825 = vmatmul.mubr.msk.f32.gmra.mrb[22].mxu1 %vm3334_vm1, %v18059_v2 }
 0x2a6   :  { %14827 = vmatprep.mubr.msk.f32.mxu1 %vm3334_vm1, %v18063_v24 }
 0x2a9   :  { %14828 = vmatmul.mubr.msk.f32.gmra.mrb[24].mxu1 %vm3334_vm1, %v18229_v23 }
 0x2aa   :  { %14830 = vmatprep.mubr.msk.f32.mxu1 %vm3334_vm1, %v18068_v26  ;;  %v6327_v26 = vld [vmem:[%s19898_s5 + $0x18] sm:$0xff] }
 0x2ab   :  { %v15764_v60 = vpack.c.bf16 %v6327_v26, %v6326_v29 }
 0x2ad   :  { %14831 = vmatmul.mubr.msk.f32.gmra.mrb[26].mxu1 %vm3334_vm1, %v18072_v31  ;;  %15765 = vmatprep.subr.bf16.mxu0 %v15764_v60 }
 0x2ae   :  { %14833 = vmatprep.mubr.msk.f32.mxu1 %vm3334_vm1, %v18076_v52  ;;  %15767 = vmatpush3.bf16.msra.mxu0 %v15764_v60 }
 0x2b1   :  { %14834 = vmatmul.mubr.msk.f32.gmra.mrb[28].mxu1 %vm3334_vm1, %v18080_v50 }
 0x2b2   :  { %14836 = vmatprep.mubr.msk.f32.mxu1 %vm3334_vm1, %v18084_v57 }
 0x2b5   :  { %14837 = vmatmul.mubr.msk.f32.gmra.mrb[30].mxu1 %vm3334_vm1, %v18088_v21 }
 0x2b6   :  { %14839 = vmatprep.mubr.msk.f32.mxu1 %vm3334_vm1, %v18092_v20 }
 0x2b9   :  { %14840 = vmatmul.mubr.msk.f32.gmra.mrb[32].mxu1 %vm3334_vm1, %v18247_v58 }
 0x2ba   :  { %14846 = vmatprep.mubr.msk.f32.mxu1 %vm3334_vm1, %v18103_v32  ;;  %v13465_v32 = vld [vmem:[%s19896_s3 + $0x80] sm:$0xff] }
 0x2bd   :  { %14847 = vmatmul.mubr.msk.f32.vlgmr.msra.gmra.mrb[18].mxu1 %vm3334_vm1, %v18107_v49 }
 0x2be   :  { %15751 = vmatpush3.bf16.msra.mxu1 %v15748_v56  ;;  %14849 = vmatprep.mubr.msk.f32.mxu1 %vm3334_vm1, %v18111_v54 }
 0x2bf   :  { %15753 = vmatprep.subr.bf16.mxu1 %v15752_v30 }
 0x2c1   :  { %14850 = vmatmul.mubr.msk.f32.gmra.mrb[20].mxu1 %vm3334_vm1, %v18115_v4 }
 0x2c2   :  { %14852 = vmatprep.mubr.msk.f32.mxu1 %vm3334_vm1, %v18119_v25 }
 0x2c5   :  { %14853 = vmatmul.mubr.msk.f32.gmra.mrb[22].mxu1 %vm3334_vm1, %v18123_v18 }
 0x2c6   :  { %14855 = vmatprep.mubr.msk.f32.mxu1 %vm3334_vm1, %v18127_v38 }
 0x2c9   :  { %14856 = vmatmul.mubr.msk.f32.gmra.mrb[24].mxu1 %vm3334_vm1, %v5321_v34 }
 0x2ca   :  { %14858 = vmatprep.mubr.msk.f32.mxu1 %vm3334_vm1, %v18132_v14  ;;  %v15756_v14 = vpack.c.bf16 %v13466_v28, %v13465_v32 }
 0x2cd   :  { %14859 = vmatmul.mubr.msk.f32.gmra.mrb[26].mxu1 %vm3334_vm1, %v18136_v43 }
 0x2ce   :  { %14861 = vmatprep.mubr.msk.f32.mxu1 %vm3334_vm1, %v18140_v42 }
 0x2d1   :  { %14862 = vmatmul.mubr.msk.f32.gmra.mrb[28].mxu1 %vm3334_vm1, %v18144_v12 }
 0x2d2   :  { %14864 = vmatprep.mubr.msk.f32.mxu1 %vm3334_vm1, %v18148_v40 }
 0x2d5   :  { %14865 = vmatmul.mubr.msk.f32.gmra.mrb[30].mxu1 %vm3334_vm1, %v18152_v13 }
 0x2d6   :  { %14867 = vmatprep.mubr.msk.f32.mxu1 %vm3334_vm1, %v18156_v61 }
 0x2d9   :  { %14868 = vmatmul.mubr.msk.f32.gmra.mrb[32].mxu1 %vm3334_vm1, %v5329_v27 }
 0x2da   :  { %14874 = vmatprep.mubr.msk.f32.mxu1 %vm3334_vm1, %v18167_v46 }
 0x2dd   :  { %14875 = vmatmul.mubr.msk.f32.vlgmr.msra.gmra.mrb[18].mxu1 %vm3334_vm1, %v18171_v48 }
 0x2de   :  { %15755 = vmatpush3.bf16.msra.mxu1 %v15752_v30  ;;  %14877 = vmatprep.mubr.msk.f32.mxu1 %vm3334_vm1, %v18175_v45 }
 0x2df   :  { %15757 = vmatprep.subr.bf16.mxu1 %v15756_v14 }
 0x2e1   :  { %14878 = vmatmul.mubr.msk.f32.gmra.mrb[20].mxu1 %vm3334_vm1, %v18179_v55 }
 0x2e2   :  { %14880 = vmatprep.mubr.msk.f32.mxu1 %vm3334_vm1, %v5547_v37  ;;  %v6316_v37 = vld [vmem:[#allocation3 + $0xa0] sm:$0xff] }
 0x2e5   :  { %14881 = vmatmul.mubr.msk.f32.gmra.mrb[22].mxu1 %vm3334_vm1, %v18184_v11  ;;  %v13521_v11 = vld [vmem:[%s19898_s5 + $0x48] sm:$0xff] }
 0x2e6   :  { %14883 = vmatprep.mubr.msk.f32.mxu1 %vm3334_vm1, %v18188_v16  ;;  %v18478_v56 = vpack.c.bf16 %v13521_v11, %v13520_v51 }
 0x2e9   :  { %14884 = vmatmul.mubr.msk.f32.gmra.mrb[24].mxu1 %vm3334_vm1, %v5550_v62 }
 0x2ea   :  { %14886 = vmatprep.mubr.msk.f32.mxu1 %vm3334_vm1, %v17870_v10  ;;  %v5778_v10 = vld [vmem:[#allocation2 + $0x91] sm:$0xff] }
 0x2ed   :  { %14887 = vmatmul.mubr.msk.f32.gmra.mrb[26].mxu1 %vm3334_vm1, %v17985_v8  ;;  %v5786_v8 = vld [vmem:[#allocation2 + $0x131] sm:$0xff] }
 0x2ee   :  { %14889 = vmatprep.mubr.msk.f32.mxu1 %vm3334_vm1, %v17999_v35  ;;  %v6006_v35 = vld [vmem:[#allocation2 + $0x92] sm:$0xff] }
 0x2f1   :  { %14890 = vmatmul.mubr.msk.f32.gmra.mrb[28].mxu1 %vm3334_vm1, %v18003_v53  ;;  %v6014_v53 = vld [vmem:[#allocation2 + $0x132] sm:$0xff] }
 0x2f2   :  { %14892 = vmatprep.mubr.msk.f32.mxu1 %vm3334_vm1, %v18007_v3  ;;  %v19939_v3 = vmov 0.0  }
 0x2f3   :  { %6249 = vst.msk [vmem:[#allocation3 + $0x28] sm:$0x3] %vm6244_vm10, %v19939_v3  ;;  %6245 = vst.msk [vmem:[#allocation3 + $0x8] sm:$0x3] %vm6244_vm10, %v19939_v3 }
 0x2f4   :  { %6247 = vst.msk [vmem:[#allocation3 + $0x18] sm:$0x3] %vm6244_vm10, %v19939_v3  ;;  %6251 = vst.msk [vmem:[#allocation3 + $0x38] sm:$0x3] %vm6244_vm10, %v19939_v3 }
 0x2f5   :  { %14893 = vmatmul.mubr.msk.f32.gmra.mrb[30].mxu1 %vm3334_vm1, %v18014_v0  ;;  %6253 = vst.msk [vmem:[#allocation3 + $0x48] sm:$0x3] %vm6244_vm10, %v19939_v3  ;;  %6255 = vst.msk [vmem:[#allocation3 + $0x58] sm:$0x3] %vm6244_vm10, %v19939_v3  ;;  %v6308_v0 = vld [vmem:[#allocation3] sm:$0xff] }
 0x2f6   :  { %14895 = vmatprep.mubr.msk.f32.mxu1 %vm3334_vm1, %v18205_v9  ;;  %6257 = vst.msk [vmem:[#allocation3 + $0x68] sm:$0x3] %vm6244_vm10, %v19939_v3  ;;  %6259 = vst.msk [vmem:[#allocation3 + $0x78] sm:$0x3] %vm6244_vm10, %v19939_v3  ;;  %14962 = vmatprep.mubr.msk.f32.mxu0 %vm132_vm0, %v6308_v0 }
 0x2f7   :  { %6261 = vst.msk [vmem:[#allocation3 + $0x88] sm:$0x3] %vm6244_vm10, %v19939_v3  ;;  %6263 = vst.msk [vmem:[#allocation3 + $0x98] sm:$0x3] %vm6244_vm10, %v19939_v3 }
 0x2f8   :  { %6265 = vst.msk [vmem:[#allocation3 + $0xa8] sm:$0x3] %vm6244_vm10, %v19939_v3  ;;  %6267 = vst.msk [vmem:[#allocation3 + $0xb8] sm:$0x3] %vm6244_vm10, %v19939_v3 }
 0x2f9   :  { %14896 = vmatmul.mubr.msk.f32.gmra.mrb[32].mxu1 %vm3334_vm1, %v5558_v63  ;;  %6269 = vst.msk [vmem:[#allocation3 + $0xc8] sm:$0x3] %vm6244_vm10, %v19939_v3  ;;  %6271 = vst.msk [vmem:[#allocation3 + $0xd8] sm:$0x3] %vm6244_vm10, %v19939_v3 }
 0x2fa   :  { %14902 = vmatprep.mubr.msk.f32.mxu1 %vm3334_vm1, %v18038_v6  ;;  %6273 = vst.msk [vmem:[#allocation3 + $0xe8] sm:$0x3] %vm6244_vm10, %v19939_v3  ;;  %6275 = vst.msk [vmem:[#allocation3 + $0xf8] sm:$0x3] %vm6244_vm10, %v19939_v3  ;;  %v13500_v6 = vld [vmem:[%s19898_s5 + $0x20] sm:$0xff] }
 0x2fb   :  { %6277 = vst.msk [vmem:[#allocation3 + $0x108] sm:$0x3] %vm6244_vm10, %v19939_v3  ;;  %6279 = vst.msk [vmem:[#allocation3 + $0x118] sm:$0x3] %vm6244_vm10, %v19939_v3 }
 0x2fc   :  { %6281 = vst.msk [vmem:[#allocation3 + $0x128] sm:$0x3] %vm6244_vm10, %v19939_v3  ;;  %6283 = vst.msk [vmem:[#allocation3 + $0x138] sm:$0x3] %vm6244_vm10, %v19939_v3 }
 0x2fd   :  { %14903 = vmatmul.mubr.msk.f32.vlgmr.msra.gmra.mrb[18].mxu1 %vm3334_vm1, %v18046_v36  ;;  %v13501_v36 = vld [vmem:[%s19898_s5 + $0x28] sm:$0xff]  ;;  %9036 = vst.msk [vmem:[#allocation4 + $0x8] sm:$0x3f] %vm9034_vm11, %v19939_v3  ;;  %9035 = vst.msk [vmem:[#allocation4] sm:$0x3f] %vm9034_vm11, %v19939_v3 }
 0x2fe   :  { %15759 = vmatpush3.bf16.msra.mxu1 %v15756_v14  ;;  %14905 = vmatprep.mubr.msk.f32.mxu1 %vm3334_vm1, %v18051_v7  ;;  %v15768_v7 = vpack.c.bf16 %v13501_v36, %v13500_v6  ;;  %9037 = vst.msk [vmem:[#allocation4 + $0x10] sm:$0x3f] %vm9034_vm11, %v19939_v3  ;;  %9038 = vst.msk [vmem:[#allocation4 + $0x18] sm:$0x3f] %vm9034_vm11, %v19939_v3 }
 0x2ff   :  { %9039 = vst.msk [vmem:[#allocation4 + $0x20] sm:$0x3f] %vm9034_vm11, %v19939_v3  ;;  %9040 = vst.msk [vmem:[#allocation4 + $0x28] sm:$0x3f] %vm9034_vm11, %v19939_v3 }
 0x300   :  { %15769 = vmatprep.subr.bf16.mxu0 %v15768_v7  ;;  %9041 = vst.msk [vmem:[#allocation4 + $0x30] sm:$0x3f] %vm9034_vm11, %v19939_v3  ;;  %9042 = vst.msk [vmem:[#allocation4 + $0x38] sm:$0x3f] %vm9034_vm11, %v19939_v3 }
 0x301   :  { %14906 = vmatmul.mubr.msk.f32.gmra.mrb[20].mxu1 %vm3334_vm1, %v18055_v41  ;;  %v18442_v41 = vld [vmem:[%s19897_s4] ss:$0 sm:$0xff]  ;;  %9043 = vst.msk [vmem:[#allocation4 + $0x40] sm:$0x3f] %vm9034_vm11, %v19939_v3  ;;  %9044 = vst.msk [vmem:[#allocation4 + $0x48] sm:$0x3f] %vm9034_vm11, %v19939_v3 }
 0x302   :  { %14908 = vmatprep.mubr.msk.f32.mxu1 %vm3334_vm1, %v18059_v2  ;;  %9045 = vst.msk [vmem:[#allocation4 + $0x50] sm:$0x3f] %vm9034_vm11, %v19939_v3  ;;  %9046 = vst.msk [vmem:[#allocation4 + $0x58] sm:$0x3f] %vm9034_vm11, %v19939_v3 }
 0x303   :  { %10370 = vst.msk [vmem:[#allocation5] sm:$0x3f] %vm9034_vm11, %v19939_v3  ;;  %10371 = vst.msk [vmem:[#allocation5 + $0x8] sm:$0x3f] %vm9034_vm11, %v19939_v3 }
 0x304   :  { %10372 = vst.msk [vmem:[#allocation5 + $0x10] sm:$0x3f] %vm9034_vm11, %v19939_v3  ;;  %10373 = vst.msk [vmem:[#allocation5 + $0x18] sm:$0x3f] %vm9034_vm11, %v19939_v3 }
 0x305   :  { %14909 = vmatmul.mubr.msk.f32.gmra.mrb[22].mxu1 %vm3334_vm1, %v18063_v24  ;;  %10374 = vst.msk [vmem:[#allocation5 + $0x20] sm:$0x3f] %vm9034_vm11, %v19939_v3  ;;  %10375 = vst.msk [vmem:[#allocation5 + $0x28] sm:$0x3f] %vm9034_vm11, %v19939_v3 }
 0x306   :  { %14911 = vmatprep.mubr.msk.f32.mxu1 %vm3334_vm1, %v18229_v23  ;;  %10376 = vst.msk [vmem:[#allocation5 + $0x30] sm:$0x3f] %vm9034_vm11, %v19939_v3  ;;  %10377 = vst.msk [vmem:[#allocation5 + $0x38] sm:$0x3f] %vm9034_vm11, %v19939_v3 }
 0x307   :  { %10378 = vst.msk [vmem:[#allocation5 + $0x40] sm:$0x3f] %vm9034_vm11, %v19939_v3  ;;  %10379 = vst.msk [vmem:[#allocation5 + $0x48] sm:$0x3f] %vm9034_vm11, %v19939_v3 }
 0x308   :  { %10380 = vst.msk [vmem:[#allocation5 + $0x50] sm:$0x3f] %vm9034_vm11, %v19939_v3  ;;  %10381 = vst.msk [vmem:[#allocation5 + $0x58] sm:$0x3f] %vm9034_vm11, %v19939_v3 }
 0x309   :  { %14912 = vmatmul.mubr.msk.f32.gmra.mrb[24].mxu1 %vm3334_vm1, %v5778_v10 }
 0x30a   :  { %14914 = vmatprep.mubr.msk.f32.mxu1 %vm3334_vm1, %v18072_v31 }
 0x30d   :  { %14915 = vmatmul.mubr.msk.f32.gmra.mrb[26].mxu1 %vm3334_vm1, %v18076_v52 }
 0x30e   :  { %14917 = vmatprep.mubr.msk.f32.mxu1 %vm3334_vm1, %v18080_v50 }
 0x311   :  { %14918 = vmatmul.mubr.msk.f32.gmra.mrb[28].mxu1 %vm3334_vm1, %v18084_v57 }
 0x312   :  { %14920 = vmatprep.mubr.msk.f32.mxu1 %vm3334_vm1, %v18088_v21 }
 0x315   :  { %14921 = vmatmul.mubr.msk.f32.gmra.mrb[30].mxu1 %vm3334_vm1, %v18092_v20 }
 0x316   :  { %14923 = vmatprep.mubr.msk.f32.mxu1 %vm3334_vm1, %v18247_v58 }
 0x319   :  { %14924 = vmatmul.mubr.msk.f32.gmra.mrb[32].mxu1 %vm3334_vm1, %v5786_v8 }
 0x31a   :  { %14930 = vmatprep.mubr.msk.f32.mxu1 %vm3334_vm1, %v18107_v49 }
 0x31d   :  { %14931 = vmatmul.mubr.msk.f32.vlgmr.msra.gmra.mrb[18].mxu1 %vm3334_vm1, %v18111_v54 }
 0x31e   :  { %14933 = vmatprep.mubr.msk.f32.mxu1 %vm3334_vm1, %v18115_v4 }
 0x321   :  { %14934 = vmatmul.mubr.msk.f32.gmra.mrb[20].mxu1 %vm3334_vm1, %v18119_v25 }
 0x322   :  { %14936 = vmatprep.mubr.msk.f32.mxu1 %vm3334_vm1, %v18123_v18 }
 0x325   :  { %14937 = vmatmul.mubr.msk.f32.gmra.mrb[22].mxu1 %vm3334_vm1, %v18127_v38 }
 0x326   :  { %14939 = vmatprep.mubr.msk.f32.mxu1 %vm3334_vm1, %v5321_v34 }
 0x329   :  { %14940 = vmatmul.mubr.msk.f32.gmra.mrb[24].mxu1 %vm3334_vm1, %v6006_v35 }
 0x32a   :  { %14942 = vmatprep.mubr.msk.f32.mxu1 %vm3334_vm1, %v18136_v43 }
 0x32d   :  { %14943 = vmatmul.mubr.msk.f32.gmra.mrb[26].mxu1 %vm3334_vm1, %v18140_v42  ;;  %v13502_v42 = vld [vmem:[%s19898_s5 + $0x30] sm:$0xff] }
 0x32e   :  { %14945 = vmatprep.mubr.msk.f32.mxu1 %vm3334_vm1, %v18144_v12  ;;  %v13503_v12 = vld [vmem:[%s19898_s5 + $0x38] sm:$0xff] }
 0x32f   :  { %v15772_v46 = vpack.c.bf16 %v13503_v12, %v13502_v42 }
 0x331   :  { %14946 = vmatmul.mubr.msk.f32.gmra.mrb[28].mxu1 %vm3334_vm1, %v18148_v40 }
 0x332   :  { %14948 = vmatprep.mubr.msk.f32.mxu1 %vm3334_vm1, %v18152_v13 }
 0x335   :  { %14949 = vmatmul.mubr.msk.f32.gmra.mrb[30].mxu1 %vm3334_vm1, %v18156_v61 }
 0x336   :  { %14951 = vmatprep.mubr.msk.f32.mxu1 %vm3334_vm1, %v5329_v27 }
 0x339   :  { %14952 = vmatmul.mubr.msk.f32.gmra.mrb[32].mxu1 %vm3334_vm1, %v6014_v53 }
 0x3f0   :  { %v14932_v2 = vpop.f32.mrb[18].mxu1 }
 0x3f1   :  { %v16106_v24 = vadd.f32 %v14932_v2, %v18442_v41  ;;  %v6132_v31 = vpop.f32.mrb[19].mxu1 }
 0x3f2   :  { %v16107_v52 = vadd.f32 %v18442_v41, %v6132_v31 }
 0x3f3   :  { %v6228_v50 = vmax.f32 %v16106_v24, 0.0 }
 0x3f4   :  { %v6227_v57 = vmax.f32 %v16107_v52, 0.0  ;;  %v14935_v21 = vpop.f32.mrb[20].mxu1 }
 0x3f5   :  { %6286 = vst.msk [vmem:[#allocation3 + $0x21] sm:$0xff] %vm132_vm0, %v6228_v50  ;;  %v16108_v20 = vadd.f32 %v14935_v21, %v18442_v41  ;;  %v6142_v49 = vpop.f32.mrb[21].mxu1 }
 0x3f6   :  { %6285 = vst.msk [vmem:[#allocation3 + $0x11] sm:$0xff] %vm132_vm0, %v6227_v57  ;;  %v16109_v54 = vadd.f32 %v18442_v41, %v6142_v49 }
 0x3f7   :  { %v6230_v4 = vmax.f32 %v16108_v20, 0.0  ;;  %v6537_v20 = vld [vmem:[#allocation3 + $0x1] sm:$0xff] }
 0x3f8   :  { %v6229_v25 = vmax.f32 %v16109_v54, 0.0  ;;  %v14938_v18 = vpop.f32.mrb[22].mxu1  ;;  %v13522_v54 = vld [vmem:[%s19898_s5 + $0x50] sm:$0xff] }
 0x3f9   :  { %6288 = vst.msk [vmem:[#allocation3 + $0x41] sm:$0xff] %vm132_vm0, %v6230_v4  ;;  %v16110_v38 = vadd.f32 %v14938_v18, %v18442_v41  ;;  %v6152_v43 = vpop.f32.mrb[23].mxu1  ;;  %v13523_v4 = vld [vmem:[%s19898_s5 + $0x58] sm:$0xff] }
 0x3fa   :  { %6287 = vst.msk [vmem:[#allocation3 + $0x31] sm:$0xff] %vm132_vm0, %v6229_v25  ;;  %v16111_v40 = vadd.f32 %v18442_v41, %v6152_v43  ;;  %v15780_v25 = vpack.c.bf16 %v13523_v4, %v13522_v54  ;;  %v13541_v43 = vld [vmem:[%s19898_s5 + $0x68] sm:$0xff] }
 0x3fb   :  { %v6232_v13 = vmax.f32 %v16110_v38, 0.0  ;;  %v13540_v38 = vld [vmem:[%s19898_s5 + $0x60] sm:$0xff]  ;;  %v13581_v54 = vld [vmem:[%s19898_s5 + $0xa8] sm:$0xff] }
 0x3fc   :  { %v6231_v61 = vmax.f32 %v16111_v40, 0.0  ;;  %v14941_v15 = vpop.f32.mrb[24].mxu1  ;;  %v18474_v22 = vld [vmem:[#allocation3 + $0x20] sm:$0xff]  ;;  %v15784_v12 = vpack.c.bf16 %v13541_v43, %v13540_v38  ;;  %v13583_v38 = vld [vmem:[%s19898_s5 + $0xb8] sm:$0xff] }
 0x3fd   :  { %6290 = vst.msk [vmem:[#allocation3 + $0x61] sm:$0xff] %vm132_vm0, %v6232_v13  ;;  %v16112_v48 = vadd.f32 %v14941_v15, %v18442_v41  ;;  %v6162_v45 = vpop.f32.mrb[25].mxu1  ;;  %v18462_v55 = vld [vmem:[#allocation3 + $0x10] sm:$0xff]  ;;  %v18565_v42 = vld [vmem:[#allocation3 + $0x21] sm:$0xff] }
 0x3fe   :  { %6289 = vst.msk [vmem:[#allocation3 + $0x51] sm:$0xff] %vm132_vm0, %v6231_v61  ;;  %v16113_v16 = vadd.f32 %v18442_v41, %v6162_v45  ;;  %14963 = vmatmul.mubr.msk.f32.vlgmr.msra.gmra.mrb[46].mxu0 %vm132_vm0, %v18462_v55  ;;  %v18555_v18 = vld [vmem:[#allocation3 + $0x11] sm:$0xff] }
 0x3ff   :  { %v6234_v9 = vmax.f32 %v16112_v48, 0.0  ;;  %15771 = vmatpush3.bf16.msra.mxu0 %v15768_v7  ;;  %14965 = vmatprep.mubr.msk.f32.mxu0 %vm132_vm0, %v18474_v22 }
 0x400   :  { %v6233_v59 = vmax.f32 %v16113_v16, 0.0  ;;  %v14944_v1 = vpop.f32.mrb[26].mxu1  ;;  %15773 = vmatprep.subr.bf16.mxu0 %v15772_v46  ;;  %v18488_v5 = vld [vmem:[#allocation3 + $0x40] sm:$0xff] }
 0x401   :  { %6292 = vst.msk [vmem:[#allocation3 + $0x81] sm:$0xff] %vm132_vm0, %v6234_v9  ;;  %v16114_v23 = vadd.f32 %v14944_v1, %v18442_v41  ;;  %v6172_v58 = vpop.f32.mrb[27].mxu1  ;;  %v18482_v17 = vld [vmem:[#allocation3 + $0x30] sm:$0xff]  ;;  %v18574_v13 = vld [vmem:[#allocation3 + $0x41] sm:$0xff] }
 0x402   :  { %6291 = vst.msk [vmem:[#allocation3 + $0x71] sm:$0xff] %vm132_vm0, %v6233_v59  ;;  %v16115_v47 = vadd.f32 %v18442_v41, %v6172_v58  ;;  %14966 = vmatmul.mubr.msk.f32.gmra.mrb[48].mxu0 %vm132_vm0, %v18482_v17  ;;  %v18570_v40 = vld [vmem:[#allocation3 + $0x31] sm:$0xff]  ;;  %v6767_v1 = vld [vmem:[#allocation3 + $0x2] sm:$0xff] }
 0x403   :  { %v6236_v33 = vmax.f32 %v16114_v23, 0.0  ;;  %14968 = vmatprep.mubr.msk.f32.mxu0 %vm132_vm0, %v18488_v5  ;;  %15775 = vmatpush3.bf16.msra.mxu0 %v15772_v46  ;;  %v6545_v46 = vld [vmem:[#allocation3 + $0xa1] sm:$0xff]  ;;  %v13542_v23 = vld [vmem:[%s19898_s5 + $0x70] sm:$0xff]  ;;  %v13543_v58 = vld [vmem:[%s19898_s5 + $0x78] sm:$0xff] }
 0x404   :  { %v6235_v29 = vmax.f32 %v16115_v47, 0.0  ;;  %v14947_v44 = vpop.f32.mrb[28].mxu1  ;;  %15777 = vmatprep.subr.bf16.mxu0 %v18478_v56  ;;  %v18501_v27 = vld [vmem:[#allocation3 + $0x60] sm:$0xff]  ;;  %v15788_v47 = vpack.c.bf16 %v13543_v58, %v13542_v23  ;;  %v13603_v58 = vld [vmem:[%s19898_s5 + $0xd8] sm:$0xff] }
 0x405   :  { %6294 = vst.msk [vmem:[#allocation3 + $0xc1] sm:$0xff] %vm132_vm0, %v6236_v33  ;;  %v16116_v26 = vadd.f32 %v14947_v44, %v18442_v41  ;;  %v6182_v30 = vpop.f32.mrb[29].mxu1  ;;  %v18495_v60 = vld [vmem:[#allocation3 + $0x50] sm:$0xff]  ;;  %v18582_v15 = vld [vmem:[#allocation3 + $0x61] sm:$0xff] }
 0x406   :  { %6293 = vst.msk [vmem:[#allocation3 + $0xb1] sm:$0xff] %vm132_vm0, %v6235_v29  ;;  %v16117_v34 = vadd.f32 %v18442_v41, %v6182_v30  ;;  %14969 = vmatmul.mubr.msk.f32.gmra.mrb[50].mxu0 %vm132_vm0, %v18495_v60  ;;  %v18578_v61 = vld [vmem:[#allocation3 + $0x51] sm:$0xff]  ;;  %v13560_v29 = vld [vmem:[%s19898_s5 + $0x80] sm:$0xff]  ;;  %v13561_v44 = vld [vmem:[%s19898_s5 + $0x88] sm:$0xff] }
 0x407   :  { %v6238_v32 = vmax.f32 %v16116_v26, 0.0  ;;  %14971 = vmatprep.mubr.msk.f32.mxu0 %vm132_vm0, %v18501_v27  ;;  %v18626_v33 = vld [vmem:[#allocation3 + $0x12] sm:$0xff]  ;;  %v18636_v26 = vld [vmem:[#allocation3 + $0x22] sm:$0xff]  ;;  %v15792_v30 = vpack.c.bf16 %v13561_v44, %v13560_v29 }
 0x408   :  { %v6237_v28 = vmax.f32 %v16117_v34, 0.0  ;;  %v14950_v14 = vpop.f32.mrb[30].mxu1  ;;  %v18640_v34 = vld [vmem:[#allocation3 + $0x32] sm:$0xff]  ;;  %v13620_v29 = vld [vmem:[%s19898_s5 + $0xe0] sm:$0xff]  ;;  %v13621_v44 = vld [vmem:[%s19898_s5 + $0xe8] sm:$0xff] }
 0x409   :  { %6296 = vst.msk [vmem:[#allocation3 + $0xe1] sm:$0xff] %vm132_vm0, %v6238_v32  ;;  %v16118_v62 = vadd.f32 %v14950_v14, %v18442_v41  ;;  %v6192_v63 = vpop.f32.mrb[31].mxu1  ;;  %v18507_v10 = vld [vmem:[#allocation3 + $0x70] sm:$0xff]  ;;  %v18644_v32 = vld [vmem:[#allocation3 + $0x42] sm:$0xff] }
 0x40a   :  { %6295 = vst.msk [vmem:[#allocation3 + $0xd1] sm:$0xff] %vm132_vm0, %v6237_v28  ;;  %v16119_v8 = vadd.f32 %v18442_v41, %v6192_v63  ;;  %14972 = vmatmul.mubr.msk.f32.gmra.mrb[52].mxu0 %vm132_vm0, %v18507_v10  ;;  %v18586_v48 = vld [vmem:[#allocation3 + $0x71] sm:$0xff]  ;;  %v18652_v14 = vld [vmem:[#allocation3 + $0x62] sm:$0xff] }
 0x40b   :  { %v6240_v35 = vmax.f32 %v16118_v62, 0.0  ;;  %14974 = vmatprep.mubr.msk.f32.mxu0 %vm132_vm0, %v6316_v37  ;;  %v18648_v28 = vld [vmem:[#allocation3 + $0x52] sm:$0xff]  ;;  %v6775_v37 = vld [vmem:[#allocation3 + $0xa2] sm:$0xff] }
 0x40c   :  { %v6239_v53 = vmax.f32 %v16119_v8, 0.0  ;;  %v14953_v0 = vpop.f32.mrb[32].mxu1  ;;  %v18522_v24 = vld [vmem:[#allocation3 + $0xc0] sm:$0xff]  ;;  %v18656_v62 = vld [vmem:[#allocation3 + $0x72] sm:$0xff] }
 0x40d   :  { %6298 = vst.msk [vmem:[#allocation3 + $0x101] sm:$0xff] %vm132_vm0, %v6240_v35  ;;  %v16120_v6 = vadd.f32 %v14953_v0, %v18442_v41  ;;  %v6202_v36 = vpop.f32.mrb[33].mxu1  ;;  %v18516_v7 = vld [vmem:[#allocation3 + $0xb0] sm:$0xff]  ;;  %v18595_v51 = vld [vmem:[#allocation3 + $0xc1] sm:$0xff] }
 0x40e   :  { %6297 = vst.msk [vmem:[#allocation3 + $0xf1] sm:$0xff] %vm132_vm0, %v6239_v53  ;;  %v16121_v2 = vadd.f32 %v18442_v41, %v6202_v36  ;;  %14975 = vmatmul.mubr.msk.f32.gmra.mrb[54].mxu0 %vm132_vm0, %v18516_v7  ;;  %v18591_v45 = vld [vmem:[#allocation3 + $0xb1] sm:$0xff]  ;;  %v18665_v8 = vld [vmem:[#allocation3 + $0xc2] sm:$0xff] }
 0x40f   :  { %v6242_v31 = vmax.f32 %v16120_v6, 0.0  ;;  %14977 = vmatprep.mubr.msk.f32.mxu0 %vm132_vm0, %v18522_v24  ;;  %v18661_v63 = vld [vmem:[#allocation3 + $0xb2] sm:$0xff] }
 0x410   :  { %v6241_v52 = vmax.f32 %v16121_v2, 0.0  ;;  %v18532_v41 = vld [vmem:[#allocation3 + $0xe0] sm:$0xff]  ;;  %v13562_v2 = vld [vmem:[%s19898_s5 + $0x90] sm:$0xff] }
 0x411   :  { %6300 = vst.msk [vmem:[#allocation3 + $0x121] sm:$0xff] %vm132_vm0, %v6242_v31  ;;  %v18527_v50 = vld [vmem:[#allocation3 + $0xd0] sm:$0xff]  ;;  %v18603_v16 = vld [vmem:[#allocation3 + $0xe1] sm:$0xff]  ;;  %v13563_v31 = vld [vmem:[%s19898_s5 + $0x98] sm:$0xff] }
 0x412   :  { %6299 = vst.msk [vmem:[#allocation3 + $0x111] sm:$0xff] %vm132_vm0, %v6241_v52  ;;  %14978 = vmatmul.mubr.msk.f32.gmra.mrb[56].mxu0 %vm132_vm0, %v18527_v50  ;;  %v18599_v11 = vld [vmem:[#allocation3 + $0xd1] sm:$0xff]  ;;  %v18673_v53 = vld [vmem:[#allocation3 + $0xe2] sm:$0xff]  ;;  %v15796_v52 = vpack.c.bf16 %v13563_v31, %v13562_v2 }
 0x413   :  { %14980 = vmatprep.mubr.msk.f32.mxu0 %vm132_vm0, %v18532_v41  ;;  %v18669_v35 = vld [vmem:[#allocation3 + $0xd2] sm:$0xff] }
 0x414   :  { %v18540_v21 = vld [vmem:[#allocation3 + $0x100] sm:$0xff]  ;;  %v13623_v2 = vld [vmem:[%s19898_s5 + $0xf8] sm:$0xff] }
 0x415   :  { %v18536_v57 = vld [vmem:[#allocation3 + $0xf0] sm:$0xff]  ;;  %v18611_v59 = vld [vmem:[#allocation3 + $0x101] sm:$0xff] }
 0x416   :  { %14981 = vmatmul.mubr.msk.f32.gmra.mrb[58].mxu0 %vm132_vm0, %v18536_v57  ;;  %v18607_v9 = vld [vmem:[#allocation3 + $0xf1] sm:$0xff]  ;;  %v18681_v6 = vld [vmem:[#allocation3 + $0x102] sm:$0xff] }
 0x417   :  { %14983 = vmatprep.mubr.msk.f32.mxu0 %vm132_vm0, %v18540_v21  ;;  %v18677_v0 = vld [vmem:[#allocation3 + $0xf2] sm:$0xff] }
 0x418   :  { %v18781_v23 = vld [vmem:[#allocation3 + $0x121] sm:$0xff] }
 0x419   :  { %v18544_v49 = vld [vmem:[#allocation3 + $0x110] sm:$0xff] }
 0x41a   :  { %14984 = vmatmul.mubr.msk.f32.gmra.mrb[60].mxu0 %vm132_vm0, %v18544_v49  ;;  %v18685_v36 = vld [vmem:[#allocation3 + $0x112] sm:$0xff] }
 0x41b   :  { %14994 = vmatprep.mubr.msk.f32.mxu0 %vm132_vm0, %v6537_v20  ;;  %v13580_v20 = vld [vmem:[%s19898_s5 + $0xa0] sm:$0xff] }
 0x41c   :  { %v15800_v4 = vpack.c.bf16 %v13581_v54, %v13580_v20  ;;  %v13641_v20 = vld [vmem:[%s19898_s5 + $0x108] sm:$0xff] }
 0x41e   :  { %14995 = vmatmul.mubr.msk.f32.vlgmr.msra.gmra.mrb[46].mxu0 %vm132_vm0, %v18555_v18 }
 0x41f   :  { %15779 = vmatpush3.bf16.msra.mxu0 %v18478_v56  ;;  %14997 = vmatprep.mubr.msk.f32.mxu0 %vm132_vm0, %v18565_v42  ;;  %v18615_v56 = vld [vmem:[#allocation3 + $0x111] sm:$0xff] }
 0x420   :  { %15781 = vmatprep.subr.bf16.mxu0 %v15780_v25 }
 0x422   :  { %14998 = vmatmul.mubr.msk.f32.gmra.mrb[48].mxu0 %vm132_vm0, %v18570_v40 }
 0x423   :  { %15000 = vmatprep.mubr.msk.f32.mxu0 %vm132_vm0, %v18574_v13  ;;  %15783 = vmatpush3.bf16.msra.mxu0 %v15780_v25  ;;  %v18733_v25 = vld [vmem:[#allocation3 + $0x120] sm:$0xff] }
 0x424   :  { %15785 = vmatprep.subr.bf16.mxu0 %v15784_v12 }
 0x426   :  { %15001 = vmatmul.mubr.msk.f32.gmra.mrb[50].mxu0 %vm132_vm0, %v18578_v61 }
 0x427   :  { %15003 = vmatprep.mubr.msk.f32.mxu0 %vm132_vm0, %v18582_v15 }
 0x42a   :  { %15004 = vmatmul.mubr.msk.f32.gmra.mrb[52].mxu0 %vm132_vm0, %v18586_v48 }
 0x42b   :  { %15006 = vmatprep.mubr.msk.f32.mxu0 %vm132_vm0, %v6545_v46  ;;  %v13601_v46 = vld [vmem:[%s19898_s5 + $0xc8] sm:$0xff] }
 0x42e   :  { %15007 = vmatmul.mubr.msk.f32.gmra.mrb[54].mxu0 %vm132_vm0, %v18591_v45 }
 0x42f   :  { %15009 = vmatprep.mubr.msk.f32.mxu0 %vm132_vm0, %v18595_v51 }
 0x432   :  { %15010 = vmatmul.mubr.msk.f32.gmra.mrb[56].mxu0 %vm132_vm0, %v18599_v11 }
 0x433   :  { %15012 = vmatprep.mubr.msk.f32.mxu0 %vm132_vm0, %v18603_v16 }
 0x436   :  { %15013 = vmatmul.mubr.msk.f32.gmra.mrb[58].mxu0 %vm132_vm0, %v18607_v9 }
 0x437   :  { %15015 = vmatprep.mubr.msk.f32.mxu0 %vm132_vm0, %v18611_v59 }
 0x43a   :  { %15016 = vmatmul.mubr.msk.f32.gmra.mrb[60].mxu0 %vm132_vm0, %v18615_v56 }
 0x43b   :  { %15026 = vmatprep.mubr.msk.f32.mxu0 %vm132_vm0, %v6767_v1 }
 0x43e   :  { %15027 = vmatmul.mubr.msk.f32.vlgmr.msra.gmra.mrb[46].mxu0 %vm132_vm0, %v18626_v33 }
 0x43f   :  { %15787 = vmatpush3.bf16.msra.mxu0 %v15784_v12  ;;  %15029 = vmatprep.mubr.msk.f32.mxu0 %vm132_vm0, %v18636_v26  ;;  %v13600_v12 = vld [vmem:[%s19898_s5 + $0xc0] sm:$0xff] }
 0x440   :  { %15789 = vmatprep.subr.bf16.mxu0 %v15788_v47  ;;  %v15808_v1 = vpack.c.bf16 %v13601_v46, %v13600_v12 }
 0x442   :  { %15030 = vmatmul.mubr.msk.f32.gmra.mrb[48].mxu0 %vm132_vm0, %v18640_v34 }
 0x443   :  { %15032 = vmatprep.mubr.msk.f32.mxu0 %vm132_vm0, %v18644_v32  ;;  %15791 = vmatpush3.bf16.msra.mxu0 %v15788_v47 }
 0x444   :  { %15793 = vmatprep.subr.bf16.mxu0 %v15792_v30 }
 0x446   :  { %15033 = vmatmul.mubr.msk.f32.gmra.mrb[50].mxu0 %vm132_vm0, %v18648_v28 }
 0x447   :  { %15035 = vmatprep.mubr.msk.f32.mxu0 %vm132_vm0, %v18652_v14 }
 0x44a   :  { %15036 = vmatmul.mubr.msk.f32.gmra.mrb[52].mxu0 %vm132_vm0, %v18656_v62 }
 0x44b   :  { %15038 = vmatprep.mubr.msk.f32.mxu0 %vm132_vm0, %v6775_v37  ;;  %v18829_v37 = vld [vmem:[#allocation3 + $0x122] sm:$0xff] }
 0x44e   :  { %15039 = vmatmul.mubr.msk.f32.gmra.mrb[54].mxu0 %vm132_vm0, %v18661_v63 }
 0x44f   :  { %15041 = vmatprep.mubr.msk.f32.mxu0 %vm132_vm0, %v18665_v8 }
 0x452   :  { %15042 = vmatmul.mubr.msk.f32.gmra.mrb[56].mxu0 %vm132_vm0, %v18669_v35 }
 0x453   :  { %15044 = vmatprep.mubr.msk.f32.mxu0 %vm132_vm0, %v18673_v53 }
 0x456   :  { %15045 = vmatmul.mubr.msk.f32.gmra.mrb[58].mxu0 %vm132_vm0, %v18677_v0 }
 0x457   :  { %15047 = vmatprep.mubr.msk.f32.mxu0 %vm132_vm0, %v18681_v6 }
 0x45a   :  { %15048 = vmatmul.mubr.msk.f32.gmra.mrb[60].mxu0 %vm132_vm0, %v18685_v36 }
 0x45b   :  { %15058 = vmatprep.mubr.msk.f32.mxu0 %vm132_vm0, %v18462_v55  ;;  %v18715_v55 = vld [vmem:[#allocation3 + $0x80] sm:$0xff] }
 0x45e   :  { %15059 = vmatmul.mubr.msk.f32.vlgmr.msra.gmra.mrb[46].mxu0 %vm132_vm0, %v18474_v22 }
 0x45f   :  { %15795 = vmatpush3.bf16.msra.mxu0 %v15792_v30  ;;  %15061 = vmatprep.mubr.msk.f32.mxu0 %vm132_vm0, %v18482_v17  ;;  %v15816_v30 = vpack.c.bf16 %v13621_v44, %v13620_v29 }
 0x460   :  { %15797 = vmatprep.subr.bf16.mxu0 %v15796_v52 }
 0x462   :  { %15062 = vmatmul.mubr.msk.f32.gmra.mrb[48].mxu0 %vm132_vm0, %v18488_v5 }
 0x463   :  { %15064 = vmatprep.mubr.msk.f32.mxu0 %vm132_vm0, %v18495_v60  ;;  %15799 = vmatpush3.bf16.msra.mxu0 %v15796_v52  ;;  %v13640_v52 = vld [vmem:[%s19898_s5 + $0x100] sm:$0xff] }
 0x464   :  { %15801 = vmatprep.subr.bf16.mxu0 %v15800_v4  ;;  %v15824_v54 = vpack.c.bf16 %v13641_v20, %v13640_v52 }
 0x466   :  { %15065 = vmatmul.mubr.msk.f32.gmra.mrb[50].mxu0 %vm132_vm0, %v18501_v27 }
 0x467   :  { %15067 = vmatprep.mubr.msk.f32.mxu0 %vm132_vm0, %v18507_v10 }
 0x46a   :  { %15068 = vmatmul.mubr.msk.f32.gmra.mrb[52].mxu0 %vm132_vm0, %v18715_v55 }
 0x46b   :  { %15070 = vmatprep.mubr.msk.f32.mxu0 %vm132_vm0, %v18516_v7  ;;  %v13582_v7 = vld [vmem:[%s19898_s5 + $0xb0] sm:$0xff] }
 0x46c   :  { %v15804_v43 = vpack.c.bf16 %v13583_v38, %v13582_v7 }
 0x46e   :  { %15071 = vmatmul.mubr.msk.f32.gmra.mrb[54].mxu0 %vm132_vm0, %v18522_v24 }
 0x46f   :  { %15073 = vmatprep.mubr.msk.f32.mxu0 %vm132_vm0, %v18527_v50 }
 0x472   :  { %15074 = vmatmul.mubr.msk.f32.gmra.mrb[56].mxu0 %vm132_vm0, %v18532_v41 }
 0x473   :  { %15076 = vmatprep.mubr.msk.f32.mxu0 %vm132_vm0, %v18536_v57 }
 0x476   :  { %15077 = vmatmul.mubr.msk.f32.gmra.mrb[58].mxu0 %vm132_vm0, %v18540_v21 }
 0x477   :  { %15079 = vmatprep.mubr.msk.f32.mxu0 %vm132_vm0, %v18544_v49 }
 0x47a   :  { %15080 = vmatmul.mubr.msk.f32.gmra.mrb[60].mxu0 %vm132_vm0, %v18733_v25 }
 0x47b   :  { %15090 = vmatprep.mubr.msk.f32.mxu0 %vm132_vm0, %v18555_v18  ;;  %v18763_v18 = vld [vmem:[#allocation3 + $0x81] sm:$0xff] }
 0x47e   :  { %15091 = vmatmul.mubr.msk.f32.vlgmr.msra.gmra.mrb[46].mxu0 %vm132_vm0, %v18565_v42 }
 0x47f   :  { %15803 = vmatpush3.bf16.msra.mxu0 %v15800_v4  ;;  %15093 = vmatprep.mubr.msk.f32.mxu0 %vm132_vm0, %v18570_v40 }
 0x480   :  { %15805 = vmatprep.subr.bf16.mxu0 %v15804_v43 }
 0x482   :  { %15094 = vmatmul.mubr.msk.f32.gmra.mrb[48].mxu0 %vm132_vm0, %v18574_v13 }
 0x483   :  { %15096 = vmatprep.mubr.msk.f32.mxu0 %vm132_vm0, %v18578_v61  ;;  %15807 = vmatpush3.bf16.msra.mxu0 %v15804_v43 }
 0x484   :  { %15809 = vmatprep.subr.bf16.mxu0 %v15808_v1 }
 0x486   :  { %15097 = vmatmul.mubr.msk.f32.gmra.mrb[50].mxu0 %vm132_vm0, %v18582_v15 }
 0x487   :  { %15099 = vmatprep.mubr.msk.f32.mxu0 %vm132_vm0, %v18586_v48 }
 0x48a   :  { %15100 = vmatmul.mubr.msk.f32.gmra.mrb[52].mxu0 %vm132_vm0, %v18763_v18 }
 0x48b   :  { %15102 = vmatprep.mubr.msk.f32.mxu0 %vm132_vm0, %v18591_v45  ;;  %v13602_v45 = vld [vmem:[%s19898_s5 + $0xd0] sm:$0xff] }
 0x48c   :  { %v15812_v47 = vpack.c.bf16 %v13603_v58, %v13602_v45 }
 0x48e   :  { %15103 = vmatmul.mubr.msk.f32.gmra.mrb[54].mxu0 %vm132_vm0, %v18595_v51 }
 0x48f   :  { %15105 = vmatprep.mubr.msk.f32.mxu0 %vm132_vm0, %v18599_v11 }
 0x492   :  { %15106 = vmatmul.mubr.msk.f32.gmra.mrb[56].mxu0 %vm132_vm0, %v18603_v16 }
 0x493   :  { %15108 = vmatprep.mubr.msk.f32.mxu0 %vm132_vm0, %v18607_v9 }
 0x496   :  { %15109 = vmatmul.mubr.msk.f32.gmra.mrb[58].mxu0 %vm132_vm0, %v18611_v59 }
 0x497   :  { %15111 = vmatprep.mubr.msk.f32.mxu0 %vm132_vm0, %v18615_v56 }
 0x49a   :  { %15112 = vmatmul.mubr.msk.f32.gmra.mrb[60].mxu0 %vm132_vm0, %v18781_v23 }
 0x49b   :  { %15122 = vmatprep.mubr.msk.f32.mxu0 %vm132_vm0, %v18626_v33  ;;  %v18811_v33 = vld [vmem:[#allocation3 + $0x82] sm:$0xff] }
 0x49e   :  { %15123 = vmatmul.mubr.msk.f32.vlgmr.msra.gmra.mrb[46].mxu0 %vm132_vm0, %v18636_v26 }
 0x49f   :  { %15811 = vmatpush3.bf16.msra.mxu0 %v15808_v1  ;;  %15125 = vmatprep.mubr.msk.f32.mxu0 %vm132_vm0, %v18640_v34 }
 0x4a0   :  { %15813 = vmatprep.subr.bf16.mxu0 %v15812_v47 }
 0x4a2   :  { %15126 = vmatmul.mubr.msk.f32.gmra.mrb[48].mxu0 %vm132_vm0, %v18644_v32 }
 0x4a3   :  { %15128 = vmatprep.mubr.msk.f32.mxu0 %vm132_vm0, %v18648_v28  ;;  %15815 = vmatpush3.bf16.msra.mxu0 %v15812_v47 }
 0x4a4   :  { %15817 = vmatprep.subr.bf16.mxu0 %v15816_v30 }
 0x4a6   :  { %15129 = vmatmul.mubr.msk.f32.gmra.mrb[50].mxu0 %vm132_vm0, %v18652_v14 }
 0x4a7   :  { %15131 = vmatprep.mubr.msk.f32.mxu0 %vm132_vm0, %v18656_v62 }
 0x4aa   :  { %15132 = vmatmul.mubr.msk.f32.gmra.mrb[52].mxu0 %vm132_vm0, %v18811_v33 }
 0x4ab   :  { %15134 = vmatprep.mubr.msk.f32.mxu0 %vm132_vm0, %v18661_v63  ;;  %v13622_v63 = vld [vmem:[%s19898_s5 + $0xf0] sm:$0xff] }
 0x4ac   :  { %v15820_v31 = vpack.c.bf16 %v13623_v2, %v13622_v63 }
 0x4ae   :  { %15135 = vmatmul.mubr.msk.f32.gmra.mrb[54].mxu0 %vm132_vm0, %v18665_v8 }
 0x4af   :  { %15137 = vmatprep.mubr.msk.f32.mxu0 %vm132_vm0, %v18669_v35 }
 0x4b2   :  { %15138 = vmatmul.mubr.msk.f32.gmra.mrb[56].mxu0 %vm132_vm0, %v18673_v53 }
 0x4b3   :  { %15140 = vmatprep.mubr.msk.f32.mxu0 %vm132_vm0, %v18677_v0 }
 0x4b6   :  { %15141 = vmatmul.mubr.msk.f32.gmra.mrb[58].mxu0 %vm132_vm0, %v18681_v6 }
 0x4b7   :  { %15143 = vmatprep.mubr.msk.f32.mxu0 %vm132_vm0, %v18685_v36 }
 0x4ba   :  { %15144 = vmatmul.mubr.msk.f32.gmra.mrb[60].mxu0 %vm132_vm0, %v18829_v37 }
 0x4bb   :  { %15154 = vmatprep.mubr.msk.f32.mxu0 %vm132_vm0, %v18474_v22  ;;  %v7695_v22 = vld [vmem:[#allocation3 + $0x90] sm:$0xff] }
 0x4be   :  { %15155 = vmatmul.mubr.msk.f32.vlgmr.msra.gmra.mrb[46].mxu0 %vm132_vm0, %v18482_v17  ;;  %v7703_v17 = vld [vmem:[#allocation3 + $0x130] sm:$0xff] }
 0x4bf   :  { %15819 = vmatpush3.bf16.msra.mxu0 %v15816_v30  ;;  %15157 = vmatprep.mubr.msk.f32.mxu0 %vm132_vm0, %v18488_v5  ;;  %v13642_v5 = vld [vmem:[%s19898_s5 + $0x110] sm:$0xff] }
 0x4c0   :  { %15821 = vmatprep.subr.bf16.mxu0 %v15820_v31 }
 0x4c2   :  { %15158 = vmatmul.mubr.msk.f32.gmra.mrb[48].mxu0 %vm132_vm0, %v18495_v60  ;;  %v13643_v60 = vld [vmem:[%s19898_s5 + $0x118] sm:$0xff] }
 0x4c3   :  { %15160 = vmatprep.mubr.msk.f32.mxu0 %vm132_vm0, %v18501_v27  ;;  %15823 = vmatpush3.bf16.msra.mxu0 %v15820_v31  ;;  %v15828_v27 = vpack.c.bf16 %v13643_v60, %v13642_v5 }
 0x4c4   :  { %15825 = vmatprep.subr.bf16.mxu0 %v15824_v54 }
 0x4c6   :  { %15161 = vmatmul.mubr.msk.f32.gmra.mrb[50].mxu0 %vm132_vm0, %v18507_v10  ;;  %v7925_v10 = vld [vmem:[#allocation3 + $0x91] sm:$0xff] }
 0x4c7   :  { %15163 = vmatprep.mubr.msk.f32.mxu0 %vm132_vm0, %v18715_v55 }
 0x4ca   :  { %15164 = vmatmul.mubr.msk.f32.gmra.mrb[52].mxu0 %vm132_vm0, %v7695_v22 }
 0x4cb   :  { %15166 = vmatprep.mubr.msk.f32.mxu0 %vm132_vm0, %v18522_v24  ;;  %v7933_v24 = vld [vmem:[#allocation3 + $0x131] sm:$0xff] }
 0x4ce   :  { %15167 = vmatmul.mubr.msk.f32.gmra.mrb[54].mxu0 %vm132_vm0, %v18527_v50  ;;  %v8155_v50 = vld [vmem:[#allocation3 + $0x92] sm:$0xff] }
 0x4cf   :  { %15169 = vmatprep.mubr.msk.f32.mxu0 %vm132_vm0, %v18532_v41  ;;  %v8163_v41 = vld [vmem:[#allocation3 + $0x132] sm:$0xff] }
 0x4d2   :  { %15170 = vmatmul.mubr.msk.f32.gmra.mrb[56].mxu0 %vm132_vm0, %v18536_v57  ;;  %v9264_v57 = vld [vmem:[%s19900_s7] sm:$0xff] }
 0x4d3   :  { %15172 = vmatprep.mubr.msk.f32.mxu0 %vm132_vm0, %v18540_v21  ;;  %v9265_v21 = vld [vmem:[%s19900_s7 + $0x8] sm:$0xff] }
 0x4d6   :  { %15173 = vmatmul.mubr.msk.f32.gmra.mrb[58].mxu0 %vm132_vm0, %v18544_v49  ;;  %v15832_v49 = vpack.c.bf16 %v9265_v21, %v9264_v57 }
 0x4d7   :  { %15175 = vmatprep.mubr.msk.f32.mxu0 %vm132_vm0, %v18733_v25 }
 0x4d8   :  { %15833 = vmatprep.subr.bf16.mxu1 %v15832_v49 }
 0x4d9   :  { %15835 = vmatpush3.bf16.msra.mxu1 %v15832_v49 }
 0x4da   :  { %15176 = vmatmul.mubr.msk.f32.gmra.mrb[60].mxu0 %vm132_vm0, %v7703_v17 }
 0x4db   :  { %15186 = vmatprep.mubr.msk.f32.mxu0 %vm132_vm0, %v18565_v42  ;;  %v9266_v42 = vld [vmem:[%s19900_s7 + $0x10] sm:$0xff] }
 0x4de   :  { %15187 = vmatmul.mubr.msk.f32.vlgmr.msra.gmra.mrb[46].mxu0 %vm132_vm0, %v18570_v40  ;;  %v9267_v40 = vld [vmem:[%s19900_s7 + $0x18] sm:$0xff] }
 0x4df   :  { %15827 = vmatpush3.bf16.msra.mxu0 %v15824_v54  ;;  %15189 = vmatprep.mubr.msk.f32.mxu0 %vm132_vm0, %v18574_v13  ;;  %v15836_v13 = vpack.c.bf16 %v9267_v40, %v9266_v42 }
 0x4e0   :  { %15829 = vmatprep.subr.bf16.mxu0 %v15828_v27 }
 0x4e1   :  { %15837 = vmatprep.subr.bf16.mxu1 %v15836_v13 }
 0x4e2   :  { %15190 = vmatmul.mubr.msk.f32.gmra.mrb[48].mxu0 %vm132_vm0, %v18578_v61  ;;  %15839 = vmatpush3.bf16.msra.mxu1 %v15836_v13  ;;  %v13729_v61 = vld [vmem:[%s19900_s7 + $0x20] sm:$0xff] }
 0x4e3   :  { %15192 = vmatprep.mubr.msk.f32.mxu0 %vm132_vm0, %v18582_v15  ;;  %15831 = vmatpush3.bf16.msra.mxu0 %v15828_v27  ;;  %v13730_v15 = vld [vmem:[%s19900_s7 + $0x28] sm:$0xff] }
 0x4e6   :  { %15193 = vmatmul.mubr.msk.f32.gmra.mrb[50].mxu0 %vm132_vm0, %v18586_v48  ;;  %v19007_v48 = vpack.c.bf16 %v13730_v15, %v13729_v61 }
 0x4e7   :  { %15195 = vmatprep.mubr.msk.f32.mxu0 %vm132_vm0, %v18763_v18 }
 0x4e8   :  { %15841 = vmatprep.subr.bf16.mxu1 %v19007_v48 }
 0x4ea   :  { %15196 = vmatmul.mubr.msk.f32.gmra.mrb[52].mxu0 %vm132_vm0, %v7925_v10 }
 0x4eb   :  { %15198 = vmatprep.mubr.msk.f32.mxu0 %vm132_vm0, %v18595_v51  ;;  %v19013_v51 = vld [vmem:[%s19899_s6] ss:$0 sm:$0xff] }
 0x4ee   :  { %15199 = vmatmul.mubr.msk.f32.gmra.mrb[54].mxu0 %vm132_vm0, %v18599_v11 }
 0x4ef   :  { %15201 = vmatprep.mubr.msk.f32.mxu0 %vm132_vm0, %v18603_v16 }
 0x4f2   :  { %15202 = vmatmul.mubr.msk.f32.gmra.mrb[56].mxu0 %vm132_vm0, %v18607_v9 }
 0x4f3   :  { %15204 = vmatprep.mubr.msk.f32.mxu0 %vm132_vm0, %v18611_v59 }
 0x4f6   :  { %15205 = vmatmul.mubr.msk.f32.gmra.mrb[58].mxu0 %vm132_vm0, %v18615_v56  ;;  %v13731_v56 = vld [vmem:[%s19900_s7 + $0x30] sm:$0xff] }
 0x4f7   :  { %15207 = vmatprep.mubr.msk.f32.mxu0 %vm132_vm0, %v18781_v23 }
 0x4fa   :  { %15208 = vmatmul.mubr.msk.f32.gmra.mrb[60].mxu0 %vm132_vm0, %v7933_v24 }
 0x4fb   :  { %15218 = vmatprep.mubr.msk.f32.mxu0 %vm132_vm0, %v18636_v26  ;;  %v13732_v26 = vld [vmem:[%s19900_s7 + $0x38] sm:$0xff] }
 0x4fe   :  { %15219 = vmatmul.mubr.msk.f32.vlgmr.msra.gmra.mrb[46].mxu0 %vm132_vm0, %v18640_v34 }
 0x4ff   :  { %15221 = vmatprep.mubr.msk.f32.mxu0 %vm132_vm0, %v18644_v32  ;;  %v13737_v32 = vld [vmem:[%s19900_s7 + $0x40] sm:$0xff] }
 0x502   :  { %15222 = vmatmul.mubr.msk.f32.gmra.mrb[48].mxu0 %vm132_vm0, %v18648_v28  ;;  %v13738_v28 = vld [vmem:[%s19900_s7 + $0x48] sm:$0xff] }
 0x503   :  { %15224 = vmatprep.mubr.msk.f32.mxu0 %vm132_vm0, %v18652_v14  ;;  %v19035_v25 = vpack.c.bf16 %v13738_v28, %v13737_v32 }
 0x506   :  { %15225 = vmatmul.mubr.msk.f32.gmra.mrb[50].mxu0 %vm132_vm0, %v18656_v62 }
 0x507   :  { %15227 = vmatprep.mubr.msk.f32.mxu0 %vm132_vm0, %v18811_v33 }
 0x50a   :  { %15228 = vmatmul.mubr.msk.f32.gmra.mrb[52].mxu0 %vm132_vm0, %v8155_v50 }
 0x50b   :  { %15230 = vmatprep.mubr.msk.f32.mxu0 %vm132_vm0, %v18665_v8 }
 0x50e   :  { %15231 = vmatmul.mubr.msk.f32.gmra.mrb[54].mxu0 %vm132_vm0, %v18669_v35 }
 0x50f   :  { %15233 = vmatprep.mubr.msk.f32.mxu0 %vm132_vm0, %v18673_v53 }
 0x512   :  { %15234 = vmatmul.mubr.msk.f32.gmra.mrb[56].mxu0 %vm132_vm0, %v18677_v0 }
 0x513   :  { %15236 = vmatprep.mubr.msk.f32.mxu0 %vm132_vm0, %v18681_v6  ;;  %v19031_v6 = vpack.c.bf16 %v13732_v26, %v13731_v56 }
 0x516   :  { %15237 = vmatmul.mubr.msk.f32.gmra.mrb[58].mxu0 %vm132_vm0, %v18685_v36 }
 0x517   :  { %15239 = vmatprep.mubr.msk.f32.mxu0 %vm132_vm0, %v18829_v37 }
 0x51a   :  { %15240 = vmatmul.mubr.msk.f32.gmra.mrb[60].mxu0 %vm132_vm0, %v8163_v41 }
 0x51b   :  { %15502 = vmatprep.mubr.msk.f32.mxu0 %vm16610_vm13, %v19939_v3 }
 0x5d1   :  { %v15220_v11 = vpop.f32.mrb[46].mxu0 }
 0x5d2   :  { %v16122_v16 = vadd.f32 %v15220_v11, %v19013_v51  ;;  %v8283_v9 = vpop.f32.mrb[47].mxu0 }
 0x5d3   :  { %v16123_v59 = vadd.f32 %v19013_v51, %v8283_v9 }
 0x5d4   :  { %v8379_v34 = vmax.f32 %v16122_v16, 0.0 }
 0x5d5   :  { %v8378_v14 = vmax.f32 %v16123_v59, 0.0  ;;  %v15223_v62 = vpop.f32.mrb[48].mxu0 }
 0x5d6   :  { %v8427_v8 = vcombine.high %v8379_v34, %v8379_v34  ;;  %v8434_v35 = vrot.slane %v8379_v34, %v17103_v19  ;;  %v16124_v53 = vadd.f32 %v15223_v62, %v19013_v51  ;;  %v8293_v0 = vpop.f32.mrb[49].mxu0 }
 0x5d7   :  { %v8410_v36 = vcombine.high %v8378_v14, %v8378_v14  ;;  %v8417_v4 = vrot.slane %v8378_v14, %v17103_v19  ;;  %v16125_v55 = vadd.f32 %v19013_v51, %v8293_v0 }
 0x5d8   :  { %v8441_v7 = vrot.slane %v8427_v8, %v17103_v19  ;;  %v8442_v38 = vcombine.high %v8434_v35, %v8434_v35  ;;  %v13664_v43 = vrot.slane %v8434_v35, 9  ;;  %v8381_v12 = vmax.f32 %v16124_v53, 0.0 }
 0x5d9   :  { %v8424_v46 = vrot.slane %v8410_v36, %v17103_v19  ;;  %v8425_v1 = vcombine.high %v8417_v4, %v8417_v4  ;;  %v13660_v18 = vrot.slane %v8417_v4, 9  ;;  %v8380_v23 = vmax.f32 %v16125_v55, 0.0  ;;  %v15226_v45 = vpop.f32.mrb[50].mxu0 }
 0x5da   :  { %v8443_v58 = vcombine.high %v8441_v7, %v8441_v7  ;;  %v13665_v47 = vrot.slane %v8442_v38, 9  ;;  %v13666_v29 = vrot.slane %v8441_v7, 9  ;;  %v8942_v44 = vmax.f32 %v8434_v35, %v13664_v43  ;;  %v8303_v30 = vpop.f32.mrb[51].mxu0 }
 0x5db   :  { %v8426_v33 = vcombine.high %v8424_v46, %v8424_v46  ;;  %v13661_v37 = vrot.slane %v8425_v1, 9  ;;  %v13662_v63 = vrot.slane %v8424_v46, 9  ;;  %v8938_v2 = vmax.f32 %v8417_v4, %v13660_v18 }
 0x5dc   :  { %v13667_v31 = vrot.slane %v8443_v58, 9  ;;  %v8943_v52 = vmax.f32 %v8442_v38, %v13665_v47  ;;  %v8944_v20 = vmax.f32 %v8441_v7, %v13666_v29  ;;  %v8461_v54 = vcombine.high %v8381_v12, %v8381_v12 }
 0x5dd   :  { %v13663_v22 = vrot.slane %v8426_v33, 9  ;;  %v8939_v17 = vmax.f32 %v8425_v1, %v13661_v37  ;;  %v8940_v5 = vmax.f32 %v8424_v46, %v13662_v63  ;;  %v9002_v60 = vmax.f32 %v8938_v2, %v8942_v44  ;;  %v15229_v27 = vpop.f32.mrb[52].mxu0 }
 0x5de   :  { %v8945_v10 = vmax.f32 %v8443_v58, %v13667_v31  ;;  %v8468_v24 = vrot.slane %v8381_v12, %v17103_v19  ;;  %v8475_v50 = vrot.slane %v8461_v54, %v17103_v19  ;;  %v8444_v41 = vcombine.high %v8380_v23, %v8380_v23  ;;  %v8313_v57 = vpop.f32.mrb[53].mxu0 }
 0x5df   :  { %v8941_v21 = vmax.f32 %v8426_v33, %v13663_v22  ;;  %v9003_v49 = vmax.f32 %v8939_v17, %v8943_v52  ;;  %v9004_v42 = vmax.f32 %v8940_v5, %v8944_v20  ;;  %v9082_v40 = vrot.slane %v9002_v60, %v17112_v39 }
 0x5e0   :  { %v8476_v13 = vcombine.high %v8468_v24, %v8468_v24  ;;  %v8477_v61 = vcombine.high %v8475_v50, %v8475_v50  ;;  %v13672_v15 = vrot.slane %v8468_v24, 9  ;;  %v13674_v11 = vrot.slane %v8475_v50, 9 }
 0x5e1   :  { %v9005_v16 = vmax.f32 %v8941_v21, %v8945_v10  ;;  %v9086_v9 = vrot.slane %v9003_v49, %v17112_v39  ;;  %v9090_v59 = vrot.slane %v9004_v42, %v17112_v39  ;;  %v8451_v56 = vrot.slane %v8380_v23, %v17103_v19  ;;  %v19045_v26 = vpop.f32.mrb[54].mxu0 }
 0x5e2   :  { %v13673_v34 = vrot.slane %v8476_v13, 9  ;;  %v13675_v32 = vrot.slane %v8477_v61, 9  ;;  %v8950_v28 = vmax.f32 %v8468_v24, %v13672_v15  ;;  %v8952_v14 = vmax.f32 %v8475_v50, %v13674_v11  ;;  %v19047_v62 = vpop.f32.mrb[55].mxu0 }
 0x5e3   :  { %v9094_v8 = vrot.slane %v9005_v16, %v17112_v39  ;;  %v9207_v35 = vsel %vm4016_vm3, %v9086_v9, %v9082_v40  ;;  %v8458_v53 = vrot.slane %v8444_v41, %v17103_v19  ;;  %v8459_v0 = vcombine.high %v8451_v56, %v8451_v56 }
 0x5e4   :  { %v9208_v36 = vsel %vm4018_vm4, %v9090_v59, %v9207_v35  ;;  %v8951_v4 = vmax.f32 %v8476_v13, %v13673_v34  ;;  %v8953_v55 = vmax.f32 %v8477_v61, %v13675_v32  ;;  %v13668_v7 = vrot.slane %v8451_v56, 9 }
 0x5e5   :  { %v9209_v38 = vsel %vm4020_vm5, %v9094_v8, %v9208_v36  ;;  %v8460_v43 = vcombine.high %v8458_v53, %v8458_v53  ;;  %v13669_v12 = vrot.slane %v8459_v0, 9  ;;  %v13670_v46 = vrot.slane %v8458_v53, 9  ;;  %v19054_v1 = vpop.f32.mrb[56].mxu0 }
 0x5e6   :  { %9241 = vst.msk [vmem:[#allocation4 + $0x9] sm:$0xf] %vm9240_vm12, %v9209_v38  ;;  %v8946_v18 = vmax.f32 %v8451_v56, %v13668_v7  ;;  %v16126_v23 = vadd.f32 %v15226_v45, %v19013_v51  ;;  %v16127_v58 = vadd.f32 %v19013_v51, %v8303_v30  ;;  %v16128_v47 = vadd.f32 %v15229_v27, %v19013_v51  ;;  %v19060_v29 = vpop.f32.mrb[57].mxu0 }
 0x5e7   :  { %v13671_v44 = vrot.slane %v8460_v43, 9  ;;  %v8947_v33 = vmax.f32 %v8459_v0, %v13669_v12  ;;  %v8948_v37 = vmax.f32 %v8458_v53, %v13670_v46  ;;  %v16129_v63 = vadd.f32 %v19013_v51, %v8313_v57 }
 0x5e8   :  { %v9006_v2 = vmax.f32 %v8946_v18, %v8950_v28  ;;  %v8383_v31 = vmax.f32 %v16126_v23, 0.0  ;;  %v8382_v52 = vmax.f32 %v16127_v58, 0.0  ;;  %v8385_v20 = vmax.f32 %v16128_v47, 0.0 }
 0x5e9   :  { %v8949_v54 = vmax.f32 %v8460_v43, %v13671_v44  ;;  %v9007_v22 = vmax.f32 %v8947_v33, %v8951_v4  ;;  %v9008_v17 = vmax.f32 %v8948_v37, %v8952_v14  ;;  %v19063_v5 = vmax.f32 %v16129_v63, 0.0  ;;  %v19065_v45 = vpop.f32.mrb[58].mxu0 }
 0x5ea   :  { %v9098_v30 = vrot.slane %v9006_v2, %v17112_v39  ;;  %v8495_v60 = vcombine.high %v8383_v31, %v8383_v31  ;;  %v8502_v27 = vrot.slane %v8383_v31, %v17103_v19  ;;  %v8478_v10 = vcombine.high %v8382_v52, %v8382_v52  ;;  %v19069_v24 = vpop.f32.mrb[59].mxu0 }
 0x5eb   :  { %v9009_v50 = vmax.f32 %v8949_v54, %v8953_v55  ;;  %v9102_v41 = vrot.slane %v9007_v22, %v17112_v39  ;;  %v9106_v57 = vrot.slane %v9008_v17, %v17112_v39  ;;  %v8485_v21 = vrot.slane %v8382_v52, %v17103_v19 }
 0x5ec   :  { %v8509_v49 = vrot.slane %v8495_v60, %v17103_v19  ;;  %v8510_v42 = vcombine.high %v8502_v27, %v8502_v27  ;;  %v13680_v40 = vrot.slane %v8502_v27, 9  ;;  %v8492_v13 = vrot.slane %v8478_v10, %v17103_v19 }
 0x5ed   :  { %v9110_v61 = vrot.slane %v9009_v50, %v17112_v39  ;;  %v9210_v15 = vsel %vm4016_vm3, %v9102_v41, %v9098_v30  ;;  %v8493_v11 = vcombine.high %v8485_v21, %v8485_v21  ;;  %v13676_v16 = vrot.slane %v8485_v21, 9  ;;  %v19078_v9 = vpop.f32.mrb[60].mxu0  ;;  %v16502_v59 = vld [vmem:[#allocation4] ss:$8 sps:$4 sm:$0xff]  }
 0x5ee   :  { %v9211_v56 = vsel %vm4018_vm4, %v9106_v57, %v9210_v15  ;;  %v8511_v34 = vcombine.high %v8509_v49, %v8509_v49  ;;  %v13681_v32 = vrot.slane %v8510_v42, 9  ;;  %v13682_v28 = vrot.slane %v8509_v49, 9  ;;  %v19081_v14 = vpop.f32.mrb[61].mxu0  ;;  %15250 = vmatprep.mubr.msk.f32.mxu1 %vm132_vm0, %v16502_v59 }
 0x5ef   :  { %v9212_v8 = vsel %vm4020_vm5, %v9110_v61, %v9211_v56  ;;  %v8958_v35 = vmax.f32 %v8502_v27, %v13680_v40  ;;  %v8494_v53 = vcombine.high %v8492_v13, %v8492_v13  ;;  %v13677_v0 = vrot.slane %v8493_v11, 9 }
 0x5f0   :  { %9242 = vst.msk [vmem:[#allocation4 + $0x11] sm:$0xf] %vm9240_vm12, %v9212_v8  ;;  %v13683_v36 = vrot.slane %v8511_v34, 9  ;;  %v8959_v4 = vmax.f32 %v8510_v42, %v13681_v32  ;;  %v8960_v55 = vmax.f32 %v8509_v49, %v13682_v28  ;;  %v13678_v7 = vrot.slane %v8492_v13, 9 }
 0x5f1   :  { %v13679_v38 = vrot.slane %v8494_v53, 9  ;;  %v8954_v43 = vmax.f32 %v8485_v21, %v13676_v16  ;;  %v8955_v12 = vmax.f32 %v8493_v11, %v13677_v0  ;;  %v8529_v46 = vcombine.high %v8385_v20, %v8385_v20 }
 0x5f2   :  { %v8961_v18 = vmax.f32 %v8511_v34, %v13683_v36  ;;  %v8956_v23 = vmax.f32 %v8492_v13, %v13678_v7  ;;  %v8536_v58 = vrot.slane %v8385_v20, %v17103_v19  ;;  %v8512_v47 = vcombine.high %v19063_v5, %v19063_v5 }
 0x5f3   :  { %v8957_v44 = vmax.f32 %v8494_v53, %v13679_v38  ;;  %v9010_v33 = vmax.f32 %v8954_v43, %v8958_v35  ;;  %v9011_v37 = vmax.f32 %v8955_v12, %v8959_v4  ;;  %v8543_v63 = vrot.slane %v8529_v46, %v17103_v19 }
 0x5f4   :  { %v9012_v2 = vmax.f32 %v8956_v23, %v8960_v55  ;;  %v8544_v31 = vcombine.high %v8536_v58, %v8536_v58  ;;  %v13688_v52 = vrot.slane %v8536_v58, 9  ;;  %v8519_v54 = vrot.slane %v19063_v5, %v17103_v19 }
 0x5f5   :  { %v9013_v22 = vmax.f32 %v8957_v44, %v8961_v18  ;;  %v9114_v17 = vrot.slane %v9010_v33, %v17112_v39  ;;  %v9118_v30 = vrot.slane %v9011_v37, %v17112_v39  ;;  %v8545_v20 = vcombine.high %v8543_v63, %v8543_v63 }
 0x5f6   :  { %v9122_v60 = vrot.slane %v9012_v2, %v17112_v39  ;;  %v13689_v27 = vrot.slane %v8544_v31, 9  ;;  %v13690_v10 = vrot.slane %v8543_v63, 9  ;;  %v8966_v50 = vmax.f32 %v8536_v58, %v13688_v52 }
 0x5f7   :  { %v9126_v41 = vrot.slane %v9013_v22, %v17112_v39  ;;  %v9213_v57 = vsel %vm4016_vm3, %v9118_v30, %v9114_v17  ;;  %v13691_v21 = vrot.slane %v8545_v20, 9  ;;  %v8526_v49 = vrot.slane %v8512_v47, %v17103_v19 }
 0x5f8   :  { %v9214_v5 = vsel %vm4018_vm4, %v9122_v60, %v9213_v57  ;;  %v8967_v42 = vmax.f32 %v8544_v31, %v13689_v27  ;;  %v8968_v40 = vmax.f32 %v8543_v63, %v13690_v10  ;;  %v8527_v13 = vcombine.high %v8519_v54, %v8519_v54 }
 0x5f9   :  { %v9215_v61 = vsel %vm4020_vm5, %v9126_v41, %v9214_v5  ;;  %v8969_v15 = vmax.f32 %v8545_v20, %v13691_v21  ;;  %v8528_v11 = vcombine.high %v8526_v49, %v8526_v49  ;;  %v13684_v16 = vrot.slane %v8519_v54, 9 }
 0x5fa   :  { %9243 = vst.msk [vmem:[#allocation4 + $0x19] sm:$0xf] %vm9240_vm12, %v9215_v61  ;;  %v13685_v59 = vrot.slane %v8527_v13, 9  ;;  %v13686_v56 = vrot.slane %v8526_v49, 9  ;;  %v16130_v34 = vadd.f32 %v19045_v26, %v19013_v51  ;;  %v16131_v32 = vadd.f32 %v19013_v51, %v19047_v62 }
 0x5fb   :  { %v13687_v28 = vrot.slane %v8528_v11, 9  ;;  %v8962_v8 = vmax.f32 %v8519_v54, %v13684_v16  ;;  %v16132_v35 = vadd.f32 %v19054_v1, %v19013_v51  ;;  %v16133_v53 = vadd.f32 %v19013_v51, %v19060_v29 }
 0x5fc   :  { %v8963_v0 = vmax.f32 %v8527_v13, %v13685_v59  ;;  %v8964_v36 = vmax.f32 %v8526_v49, %v13686_v56  ;;  %v8387_v4 = vmax.f32 %v16130_v34, 0.0  ;;  %v8386_v55 = vmax.f32 %v16131_v32, 0.0 }
 0x5fd   :  { %v8965_v7 = vmax.f32 %v8528_v11, %v13687_v28  ;;  %v9014_v38 = vmax.f32 %v8962_v8, %v8966_v50  ;;  %v8389_v43 = vmax.f32 %v16132_v35, 0.0  ;;  %v19109_v12 = vmax.f32 %v16133_v53, 0.0 }
 0x5fe   :  { %v9015_v26 = vmax.f32 %v8963_v0, %v8967_v42  ;;  %v9016_v46 = vmax.f32 %v8964_v36, %v8968_v40  ;;  %v8563_v62 = vcombine.high %v8387_v4, %v8387_v4  ;;  %v8570_v18 = vrot.slane %v8387_v4, %v17103_v19 }
 0x5ff   :  { %v9017_v23 = vmax.f32 %v8965_v7, %v8969_v15  ;;  %v9130_v1 = vrot.slane %v9014_v38, %v17112_v39  ;;  %v8546_v58 = vcombine.high %v8386_v55, %v8386_v55  ;;  %v8553_v29 = vrot.slane %v8386_v55, %v17103_v19 }
 0x600   :  { %v9134_v47 = vrot.slane %v9015_v26, %v17112_v39  ;;  %v9138_v44 = vrot.slane %v9016_v46, %v17112_v39  ;;  %v8577_v33 = vrot.slane %v8563_v62, %v17103_v19  ;;  %v8578_v37 = vcombine.high %v8570_v18, %v8570_v18 }
 0x601   :  { %v9142_v63 = vrot.slane %v9017_v23, %v17112_v39  ;;  %v13696_v2 = vrot.slane %v8570_v18, 9  ;;  %v8560_v31 = vrot.slane %v8546_v58, %v17103_v19  ;;  %v8561_v52 = vcombine.high %v8553_v29, %v8553_v29  ;;  %v16503_v54 = vld [vmem:[#allocation4 + $0x10] ss:$8 sps:$4 sm:$0xff]  }
 0x602   :  { %v9216_v22 = vsel %vm4016_vm3, %v9134_v47, %v9130_v1  ;;  %v8579_v17 = vcombine.high %v8577_v33, %v8577_v33  ;;  %v13697_v30 = vrot.slane %v8578_v37, 9  ;;  %v13698_v20 = vrot.slane %v8577_v33, 9  ;;  %15251 = vmatmul.mubr.msk.f32.vlgmr.msra.gmra.mrb[34].mxu1 %vm132_vm0, %v16503_v54 }
 0x603   :  { %v9217_v60 = vsel %vm4018_vm4, %v9138_v44, %v9216_v22  ;;  %v8974_v27 = vmax.f32 %v8570_v18, %v13696_v2  ;;  %v8562_v10 = vcombine.high %v8560_v31, %v8560_v31  ;;  %v13692_v50 = vrot.slane %v8553_v29, 9  ;;  %15843 = vmatpush3.bf16.msra.mxu1 %v19007_v48 }
 0x604   :  { %v9218_v41 = vsel %vm4020_vm5, %v9142_v63, %v9217_v60  ;;  %v13699_v57 = vrot.slane %v8579_v17, 9  ;;  %v8975_v21 = vmax.f32 %v8578_v37, %v13697_v30  ;;  %v8976_v49 = vmax.f32 %v8577_v33, %v13698_v20  ;;  %15845 = vmatprep.subr.bf16.mxu1 %v19031_v6 }
 0x605   :  { %9244 = vst.msk [vmem:[#allocation4 + $0x21] sm:$0xf] %vm9240_vm12, %v9218_v41  ;;  %v13693_v5 = vrot.slane %v8561_v52, 9  ;;  %v13694_v42 = vrot.slane %v8560_v31, 9  ;;  %v13695_v40 = vrot.slane %v8562_v10, 9  ;;  %v8970_v13 = vmax.f32 %v8553_v29, %v13692_v50 }
 0x606   :  { %v8977_v61 = vmax.f32 %v8579_v17, %v13699_v57  ;;  %v8597_v15 = vcombine.high %v8389_v43, %v8389_v43  ;;  %v8604_v11 = vrot.slane %v8389_v43, %v17103_v19  ;;  %v8580_v16 = vcombine.high %v19109_v12, %v19109_v12 }
 0x607   :  { %v8971_v59 = vmax.f32 %v8561_v52, %v13693_v5  ;;  %v8972_v56 = vmax.f32 %v8560_v31, %v13694_v42  ;;  %v8973_v34 = vmax.f32 %v8562_v10, %v13695_v40  ;;  %v9018_v32 = vmax.f32 %v8970_v13, %v8974_v27  ;;  %15847 = vmatpush3.bf16.msra.mxu1 %v19031_v6 }
 0x608   :  { %v8611_v48 = vrot.slane %v8597_v15, %v17103_v19  ;;  %v8612_v28 = vcombine.high %v8604_v11, %v8604_v11  ;;  %v13704_v8 = vrot.slane %v8604_v11, 9  ;;  %v8587_v35 = vrot.slane %v19109_v12, %v17103_v19  ;;  %15849 = vmatprep.subr.bf16.mxu1 %v19035_v25 }
 0x609   :  { %v9019_v53 = vmax.f32 %v8971_v59, %v8975_v21  ;;  %v9020_v0 = vmax.f32 %v8972_v56, %v8976_v49  ;;  %v9021_v36 = vmax.f32 %v8973_v34, %v8977_v61  ;;  %v9146_v4 = vrot.slane %v9018_v32, %v17112_v39 }
 0x60a   :  { %v8613_v55 = vcombine.high %v8611_v48, %v8611_v48  ;;  %v13705_v7 = vrot.slane %v8612_v28, 9  ;;  %v13706_v38 = vrot.slane %v8611_v48, 9  ;;  %v8982_v43 = vmax.f32 %v8604_v11, %v13704_v8 }
 0x60b   :  { %v9150_v26 = vrot.slane %v9019_v53, %v17112_v39  ;;  %v9154_v46 = vrot.slane %v9020_v0, %v17112_v39  ;;  %v9158_v62 = vrot.slane %v9021_v36, %v17112_v39  ;;  %v8594_v12 = vrot.slane %v8580_v16, %v17103_v19 }
 0x60c   :  { %v13707_v6 = vrot.slane %v8613_v55, 9  ;;  %v8983_v18 = vmax.f32 %v8612_v28, %v13705_v7  ;;  %v8984_v23 = vmax.f32 %v8611_v48, %v13706_v38  ;;  %v8595_v1 = vcombine.high %v8587_v35, %v8587_v35 }
 0x60d   :  { %v9219_v58 = vsel %vm4016_vm3, %v9150_v26, %v9146_v4  ;;  %v8596_v29 = vcombine.high %v8594_v12, %v8594_v12  ;;  %v13700_v47 = vrot.slane %v8587_v35, 9  ;;  %v13702_v44 = vrot.slane %v8594_v12, 9 }
 0x60e   :  { %v9220_v33 = vsel %vm4018_vm4, %v9154_v46, %v9219_v58  ;;  %v8985_v37 = vmax.f32 %v8613_v55, %v13707_v6  ;;  %v13701_v63 = vrot.slane %v8595_v1, 9  ;;  %v16134_v2 = vadd.f32 %v19065_v45, %v19013_v51 }
 0x60f   :  { %v9221_v31 = vsel %vm4020_vm5, %v9158_v62, %v9220_v33  ;;  %v13703_v52 = vrot.slane %v8596_v29, 9  ;;  %v8978_v54 = vmax.f32 %v8587_v35, %v13700_v47  ;;  %v8980_v22 = vmax.f32 %v8594_v12, %v13702_v44 }
 0x610   :  { %9245 = vst.msk [vmem:[#allocation4 + $0x39] sm:$0xf] %vm9240_vm12, %v9221_v31  ;;  %v8979_v17 = vmax.f32 %v8595_v1, %v13701_v63  ;;  %v8391_v30 = vmax.f32 %v16134_v2, 0.0  ;;  %v16135_v20 = vadd.f32 %v19013_v51, %v19069_v24  ;;  %v16136_v60 = vadd.f32 %v19078_v9, %v19013_v51 }
 0x611   :  { %v8981_v27 = vmax.f32 %v8596_v29, %v13703_v52  ;;  %v9022_v10 = vmax.f32 %v8978_v54, %v8982_v43  ;;  %v9024_v50 = vmax.f32 %v8980_v22, %v8984_v23  ;;  %v16137_v45 = vadd.f32 %v19013_v51, %v19081_v14 }
 0x612   :  { %v9023_v41 = vmax.f32 %v8979_v17, %v8983_v18  ;;  %v8631_v57 = vcombine.high %v8391_v30, %v8391_v30  ;;  %v8638_v21 = vrot.slane %v8391_v30, %v17103_v19  ;;  %v8390_v49 = vmax.f32 %v16135_v20, 0.0 }
 0x613   :  { %v9025_v5 = vmax.f32 %v8981_v27, %v8985_v37  ;;  %v9162_v42 = vrot.slane %v9022_v10, %v17112_v39  ;;  %v9170_v40 = vrot.slane %v9024_v50, %v17112_v39  ;;  %v8393_v24 = vmax.f32 %v16136_v60, 0.0 }
 0x614   :  { %v9166_v13 = vrot.slane %v9023_v41, %v17112_v39  ;;  %v8645_v9 = vrot.slane %v8631_v57, %v17103_v19  ;;  %v8646_v61 = vcombine.high %v8638_v21, %v8638_v21  ;;  %v13712_v15 = vrot.slane %v8638_v21, 9 }
 0x615   :  { %v9174_v11 = vrot.slane %v9025_v5, %v17112_v39  ;;  %v8614_v51 = vcombine.high %v8390_v49, %v8390_v49  ;;  %v8621_v14 = vrot.slane %v8390_v49, %v17103_v19  ;;  %v8665_v16 = vcombine.high %v8393_v24, %v8393_v24 }
 0x616   :  { %v9222_v59 = vsel %vm4016_vm3, %v9166_v13, %v9162_v42  ;;  %v8647_v56 = vcombine.high %v8645_v9, %v8645_v9  ;;  %v13713_v34 = vrot.slane %v8646_v61, 9  ;;  %v13714_v32 = vrot.slane %v8645_v9, 9 }
 0x617   :  { %v9223_v48 = vsel %vm4018_vm4, %v9170_v40, %v9222_v59  ;;  %v8990_v28 = vmax.f32 %v8638_v21, %v13712_v15  ;;  %v8628_v8 = vrot.slane %v8614_v51, %v17103_v19  ;;  %v8629_v35 = vcombine.high %v8621_v14, %v8621_v14  ;;  %v16504_v53 = vld [vmem:[#allocation4 + $0x30] ss:$8 sps:$4 sm:$0xff]  }
 0x618   :  { %v9224_v0 = vsel %vm4020_vm5, %v9174_v11, %v9223_v48  ;;  %v13715_v36 = vrot.slane %v8647_v56, 9  ;;  %v8991_v4 = vmax.f32 %v8646_v61, %v13713_v34  ;;  %v8992_v55 = vmax.f32 %v8645_v9, %v13714_v32  ;;  %15253 = vmatprep.mubr.msk.f32.mxu1 %vm132_vm0, %v16504_v53 }
 0x619   :  { %9246 = vst.msk [vmem:[#allocation4 + $0x41] sm:$0xf] %vm9240_vm12, %v9224_v0  ;;  %v8630_v7 = vcombine.high %v8628_v8, %v8628_v8  ;;  %v13708_v38 = vrot.slane %v8621_v14, 9  ;;  %v13709_v43 = vrot.slane %v8629_v35, 9  ;;  %v13710_v26 = vrot.slane %v8628_v8, 9 }
 0x61a   :  { %v8993_v46 = vmax.f32 %v8647_v56, %v13715_v36  ;;  %v8672_v62 = vrot.slane %v8393_v24, %v17103_v19  ;;  %v8679_v12 = vrot.slane %v8665_v16, %v17103_v19  ;;  %v8392_v44 = vmax.f32 %v16137_v45, 0.0  ;;  %v16506_v36 = vld [vmem:[#allocation4 + $0x1] ss:$8 sps:$4 sm:$0xff]  }
 0x61b   :  { %v13711_v6 = vrot.slane %v8630_v7, 9  ;;  %v8986_v18 = vmax.f32 %v8621_v14, %v13708_v38  ;;  %v8987_v23 = vmax.f32 %v8629_v35, %v13709_v43  ;;  %v8988_v1 = vmax.f32 %v8628_v8, %v13710_v26  ;;  %v13739_v8 = vld [vmem:[%s19900_s7 + $0x50] sm:$0xff]  ;;  %v13745_v26 = vld [vmem:[%s19900_s7 + $0x60] sm:$0xff] }
 0x61c   :  { %v8680_v58 = vcombine.high %v8672_v62, %v8672_v62  ;;  %v8681_v29 = vcombine.high %v8679_v12, %v8679_v12  ;;  %v13720_v47 = vrot.slane %v8672_v62, 9  ;;  %v13722_v52 = vrot.slane %v8679_v12, 9  ;;  %v16507_v38 = vld [vmem:[#allocation4 + $0x11] ss:$8 sps:$4 sm:$0xff]  }
 0x61d   :  { %v8989_v33 = vmax.f32 %v8630_v7, %v13711_v6  ;;  %v9026_v37 = vmax.f32 %v8986_v18, %v8990_v28  ;;  %v9027_v63 = vmax.f32 %v8987_v23, %v8991_v4  ;;  %v9028_v2 = vmax.f32 %v8988_v1, %v8992_v55  ;;  %v13740_v4 = vld [vmem:[%s19900_s7 + $0x58] sm:$0xff]  ;;  %v16510_v6 = vld [vmem:[#allocation4 + $0x2] ss:$8 sps:$4 sm:$0xff]   ;;  %v13747_v18 = vld [vmem:[%s19900_s7 + $0x70] sm:$0xff] }
 0x61e   :  { %v13721_v31 = vrot.slane %v8680_v58, 9  ;;  %v8648_v20 = vcombine.high %v8392_v44, %v8392_v44  ;;  %v8655_v60 = vrot.slane %v8392_v44, %v17103_v19  ;;  %v13723_v50 = vrot.slane %v8681_v29, 9  ;;  %v13748_v23 = vld [vmem:[%s19900_s7 + $0x78] sm:$0xff] }
 0x61f   :  { %v9029_v54 = vmax.f32 %v8989_v33, %v8993_v46  ;;  %v9178_v22 = vrot.slane %v9026_v37, %v17112_v39  ;;  %v9182_v17 = vrot.slane %v9027_v63, %v17112_v39  ;;  %v9186_v30 = vrot.slane %v9028_v2, %v17112_v39  ;;  %v13746_v46 = vld [vmem:[%s19900_s7 + $0x68] sm:$0xff]  ;;  %v16511_v1 = vld [vmem:[#allocation4 + $0x12] ss:$8 sps:$4 sm:$0xff]  }
 0x620   :  { %v8998_v45 = vmax.f32 %v8672_v62, %v13720_v47  ;;  %v8662_v57 = vrot.slane %v8648_v20, %v17103_v19  ;;  %v8663_v21 = vcombine.high %v8655_v60, %v8655_v60  ;;  %v13716_v49 = vrot.slane %v8655_v60, 9  ;;  %v16512_v47 = vld [vmem:[#allocation4 + $0x32] ss:$8 sps:$4 sm:$0xff]  }
 0x621   :  { %v9190_v27 = vrot.slane %v9029_v54, %v17112_v39  ;;  %v9225_v10 = vsel %vm4016_vm3, %v9182_v17, %v9178_v22  ;;  %v8999_v42 = vmax.f32 %v8680_v58, %v13721_v31  ;;  %v9000_v40 = vmax.f32 %v8679_v12, %v13722_v52  ;;  %v16514_v37 = vld [vmem:[#allocation4 + $0x8] ss:$8 sps:$4 sm:$0xff]   ;;  %v13756_v2 = vld [vmem:[%s19900_s7 + $0x98] sm:$0xff]  ;;  %v13761_v22 = vld [vmem:[%s19900_s7 + $0xa0] sm:$0xff] }
 0x622   :  { %v9226_v41 = vsel %vm4018_vm4, %v9186_v30, %v9225_v10  ;;  %v8664_v24 = vcombine.high %v8662_v57, %v8662_v57  ;;  %v13717_v13 = vrot.slane %v8663_v21, 9  ;;  %v13718_v9 = vrot.slane %v8662_v57, 9  ;;  %v13755_v63 = vld [vmem:[%s19900_s7 + $0x90] sm:$0xff]  ;;  %v16515_v31 = vld [vmem:[#allocation4 + $0x18] ss:$8 sps:$4 sm:$0xff]   ;;  %v13762_v17 = vld [vmem:[%s19900_s7 + $0xa8] sm:$0xff] }
 0x623   :  { %v9227_v5 = vsel %vm4020_vm5, %v9190_v27, %v9226_v41  ;;  %v8994_v61 = vmax.f32 %v8655_v60, %v13716_v49  ;;  %v9001_v15 = vmax.f32 %v8681_v29, %v13723_v50  ;;  %v15852_v43 = vpack.c.bf16 %v13740_v4, %v13739_v8  ;;  %v13754_v29 = vld [vmem:[%s19900_s7 + $0x88] sm:$0xff]  ;;  %v16516_v54 = vld [vmem:[#allocation4 + $0x38] ss:$8 sps:$4 sm:$0xff]   ;;  %v13763_v27 = vld [vmem:[%s19900_s7 + $0xb0] sm:$0xff] }
 0x624   :  { %9247 = vst.msk [vmem:[#allocation4 + $0x49] sm:$0xf] %vm9240_vm12, %v9227_v5  ;;  %v13719_v11 = vrot.slane %v8664_v24, 9  ;;  %v8995_v51 = vmax.f32 %v8663_v21, %v13717_v13  ;;  %v8996_v14 = vmax.f32 %v8662_v57, %v13718_v9  ;;  %v15856_v12 = vpack.c.bf16 %v13746_v46, %v13745_v26  ;;  %v16518_v60 = vld [vmem:[#allocation4 + $0x9] ss:$8 sps:$4 sm:$0xff]   ;;  %v13764_v10 = vld [vmem:[%s19900_s7 + $0xb8] sm:$0xff] }
 0x625   :  { %v9030_v16 = vmax.f32 %v8994_v61, %v8998_v45  ;;  %v15860_v58 = vpack.c.bf16 %v13748_v23, %v13747_v18  ;;  %v15868_v52 = vpack.c.bf16 %v13756_v2, %v13755_v63  ;;  %v15872_v20 = vpack.c.bf16 %v13762_v17, %v13761_v22  ;;  %v16519_v50 = vld [vmem:[#allocation4 + $0x19] ss:$8 sps:$4 sm:$0xff]   ;;  %v13770_v21 = vld [vmem:[%s19900_s7 + $0xc8] sm:$0xff] }
 0x626   :  { %v8997_v59 = vmax.f32 %v8664_v24, %v13719_v11  ;;  %v9031_v56 = vmax.f32 %v8995_v51, %v8999_v42  ;;  %v9032_v19 = vmax.f32 %v8996_v14, %v9000_v40  ;;  %v15876_v45 = vpack.c.bf16 %v13764_v10, %v13763_v27  ;;  %v16520_v41 = vld [vmem:[#allocation4 + $0x39] ss:$8 sps:$4 sm:$0xff]   ;;  %v16522_v42 = vld [vmem:[#allocation4 + $0xa] ss:$8 sps:$4 sm:$0xff]  }
 0x627   :  { %v9194_v32 = vrot.slane %v9030_v16, %v17112_v39  ;;  %v13769_v57 = vld [vmem:[%s19900_s7 + $0xc0] sm:$0xff]  ;;  %v13771_v40 = vld [vmem:[%s19900_s7 + $0xd0] sm:$0xff]  ;;  %v13772_v24 = vld [vmem:[%s19900_s7 + $0xd8] sm:$0xff] }
 0x628   :  { %v9033_v34 = vmax.f32 %v8997_v59, %v9001_v15  ;;  %v9198_v48 = vrot.slane %v9031_v56, %v17112_v39  ;;  %v9202_v28 = vrot.slane %v9032_v19, %v17112_v39  ;;  %v15880_v5 = vpack.c.bf16 %v13770_v21, %v13769_v57  ;;  %v16523_v13 = vld [vmem:[#allocation4 + $0x1a] ss:$8 sps:$4 sm:$0xff]   ;;  %v13778_v11 = vld [vmem:[%s19900_s7 + $0xe8] sm:$0xff]  ;;  %v13779_v59 = vld [vmem:[%s19900_s7 + $0xf0] sm:$0xff] }
 0x629   :  { %v15884_v9 = vpack.c.bf16 %v13772_v24, %v13771_v40  ;;  %v16524_v61 = vld [vmem:[#allocation4 + $0x3a] ss:$8 sps:$4 sm:$0xff]   ;;  %v13800_v40 = vld [vmem:[%s19902_s9 + $0x30] sm:$0xff] }
 0x62a   :  { %v9206_v53 = vrot.slane %v9033_v34, %v17112_v39  ;;  %v9228_v0 = vsel %vm4016_vm3, %v9198_v48, %v9194_v32  ;;  %v16508_v39 = vld [vmem:[#allocation4 + $0x31] ss:$8 sps:$4 sm:$0xff]   ;;  %v13777_v15 = vld [vmem:[%s19900_s7 + $0xe0] sm:$0xff] }
 0x62b   :  { %v16505_v35 = vld [vmem:[#allocation4 + $0x40] ss:$8 sps:$4 sm:$0xff]   ;;  %v9229_v55 = vsel %vm4018_vm4, %v9202_v28, %v9228_v0  ;;  %v15888_v14 = vpack.c.bf16 %v13778_v11, %v13777_v15  ;;  %v16526_v16 = vld [vmem:[#allocation4 + $0x10] ss:$8 sps:$4 sm:$0xff]  }
 0x62c   :  { %15254 = vmatmul.mubr.msk.f32.gmra.mrb[36].mxu1 %vm132_vm0, %v16505_v35  ;;  %v9230_v7 = vsel %vm4020_vm5, %v9206_v53, %v9229_v55  ;;  %v16509_v62 = vld [vmem:[#allocation4 + $0x41] ss:$8 sps:$4 sm:$0xff]   ;;  %v13780_v56 = vld [vmem:[%s19900_s7 + $0xf8] sm:$0xff]  ;;  %v13787_v0 = vld [vmem:[%s19900_s7 + $0x110] sm:$0xff] }
 0x62d   :  { %15264 = vmatprep.mubr.msk.f32.mxu1 %vm132_vm0, %v16506_v36  ;;  %9248 = vst.msk [vmem:[#allocation4 + $0x51] sm:$0xf] %vm9240_vm12, %v9230_v7  ;;  %v16513_v44 = vld [vmem:[#allocation4 + $0x42] ss:$8 sps:$4 sm:$0xff]   ;;  %v15892_v34 = vpack.c.bf16 %v13780_v56, %v13779_v59  ;;  %v16530_v53 = vld [vmem:[#allocation4 + $0x11] ss:$8 sps:$4 sm:$0xff]  }
 0x62e   :  { %v16527_v19 = vld [vmem:[#allocation4 + $0x20] ss:$8 sps:$4 sm:$0xff]   ;;  %v13788_v36 = vld [vmem:[%s19900_s7 + $0x118] sm:$0xff] }
 0x62f   :  { %v16528_v32 = vld [vmem:[#allocation4 + $0x40] ss:$8 sps:$4 sm:$0xff]   ;;  %v15900_v55 = vpack.c.bf16 %v13788_v36, %v13787_v0  ;;  %v10409_v23 = vld [vmem:[%s19902_s9 + $0x18] sm:$0xff] }
 0x630   :  { %15265 = vmatmul.mubr.msk.f32.vlgmr.msra.gmra.mrb[34].mxu1 %vm132_vm0, %v16507_v38  ;;  %v13785_v48 = vld [vmem:[%s19900_s7 + $0x100] sm:$0xff]  ;;  %v13786_v28 = vld [vmem:[%s19900_s7 + $0x108] sm:$0xff]  ;;  %v11510_v2 = vld [vmem:[%s19904_s11 + $0x18] sm:$0xff] }
 0x631   :  { %15851 = vmatpush3.bf16.msra.mxu1 %v19035_v25  ;;  %15267 = vmatprep.mubr.msk.f32.mxu1 %vm132_vm0, %v16508_v39  ;;  %v13753_v25 = vld [vmem:[%s19900_s7 + $0x80] sm:$0xff]  ;;  %v15896_v35 = vpack.c.bf16 %v13786_v28, %v13785_v48  ;;  %v13801_v24 = vld [vmem:[%s19902_s9 + $0x38] sm:$0xff]  ;;  %v13807_v11 = vld [vmem:[%s19902_s9 + $0x48] sm:$0xff] }
 0x632   :  { %15853 = vmatprep.subr.bf16.mxu1 %v15852_v43  ;;  %v15864_v33 = vpack.c.bf16 %v13754_v29, %v13753_v25  ;;  %v16531_v4 = vld [vmem:[#allocation4 + $0x21] ss:$8 sps:$4 sm:$0xff]   ;;  %v15916_v15 = vpack.c.bf16 %v13801_v24, %v13800_v40  ;;  %v13849_v40 = vld [vmem:[%s19902_s9 + $0xf8] sm:$0xff] }
 0x633   :  { %v16532_v7 = vld [vmem:[#allocation4 + $0x41] ss:$8 sps:$4 sm:$0xff]  }
 0x634   :  { %15268 = vmatmul.mubr.msk.f32.gmra.mrb[36].mxu1 %vm132_vm0, %v16509_v62  ;;  %v16517_v30 = vld [vmem:[#allocation4 + $0x48] ss:$8 sps:$4 sm:$0xff]   ;;  %v10406_v62 = vld [vmem:[%s19902_s9] sm:$0xff] }
 0x635   :  { %15855 = vmatpush3.bf16.msra.mxu1 %v15852_v43  ;;  %15278 = vmatprep.mubr.msk.f32.mxu1 %vm132_vm0, %v16510_v6  ;;  %v16521_v49 = vld [vmem:[#allocation4 + $0x49] ss:$8 sps:$4 sm:$0xff]  }
 0x636   :  { %15857 = vmatprep.subr.bf16.mxu1 %v15856_v12  ;;  %v16525_v51 = vld [vmem:[#allocation4 + $0x4a] ss:$8 sps:$4 sm:$0xff]  }
 0x637   :  { %v16529_v8 = vld [vmem:[#allocation4 + $0x50] ss:$8 sps:$4 sm:$0xff]   ;;  %v16535_v39 = vld [vmem:[#allocation4 + $0x22] ss:$8 sps:$4 sm:$0xff]  }
 0x638   :  { %15279 = vmatmul.mubr.msk.f32.vlgmr.msra.gmra.mrb[34].mxu1 %vm132_vm0, %v16511_v1  ;;  %v16533_v38 = vld [vmem:[#allocation4 + $0x51] ss:$8 sps:$4 sm:$0xff]   ;;  %v16536_v26 = vld [vmem:[#allocation4 + $0x42] ss:$8 sps:$4 sm:$0xff]  }
 0x639   :  { %15859 = vmatpush3.bf16.msra.mxu1 %v15856_v12  ;;  %15281 = vmatprep.mubr.msk.f32.mxu1 %vm132_vm0, %v16512_v47  ;;  %v16534_v43 = vld [vmem:[#allocation4 + $0x12] ss:$8 sps:$4 sm:$0xff]   ;;  %v10407_v12 = vld [vmem:[%s19902_s9 + $0x8] sm:$0xff]  ;;  %v13798_v1 = vld [vmem:[%s19902_s9 + $0x20] sm:$0xff] }
 0x63a   :  { %15861 = vmatprep.subr.bf16.mxu1 %v15860_v58  ;;  %v16537_v46 = vld [vmem:[#allocation4 + $0x52] ss:$8 sps:$4 sm:$0xff]   ;;  %v15904_v18 = vpack.c.bf16 %v10407_v12, %v10406_v62  ;;  %v11507_v47 = vld [vmem:[%s19904_s11] sm:$0xff] }
 0x63b   :  { %v10408_v6 = vld [vmem:[%s19902_s9 + $0x10] sm:$0xff] }
 0x63c   :  { %15282 = vmatmul.mubr.msk.f32.gmra.mrb[36].mxu1 %vm132_vm0, %v16513_v44  ;;  %v15908_v25 = vpack.c.bf16 %v10409_v23, %v10408_v6  ;;  %v11508_v44 = vld [vmem:[%s19904_s11 + $0x8] sm:$0xff] }
 0x63d   :  { %15863 = vmatpush3.bf16.msra.mxu1 %v15860_v58  ;;  %15292 = vmatprep.mubr.msk.f32.mxu1 %vm132_vm0, %v16514_v37  ;;  %v13799_v58 = vld [vmem:[%s19902_s9 + $0x28] sm:$0xff]  ;;  %v16609_v37 = vmov 0.0|0.0   ;;  %v15977_v63 = vpack.c.bf16 %v11508_v44, %v11507_v47 }
 0x63e   :  { %15865 = vmatprep.subr.bf16.mxu1 %v15864_v33  ;;  %v15912_v29 = vpack.c.bf16 %v13799_v58, %v13798_v1  ;;  %15976 = vmatprep.subr.bf16.mxu0 %v16609_v37  ;;  %v13831_v23 = vld [vmem:[%s19902_s9 + $0xa8] sm:$0xff] }
 0x63f   :  { %15978 = vmatpush3.bf16.msra.mxu0 %v15977_v63  ;;  %v13833_v63 = vld [vmem:[%s19902_s9 + $0xb8] sm:$0xff] }
 0x640   :  { %15293 = vmatmul.mubr.msk.f32.vlgmr.msra.gmra.mrb[34].mxu1 %vm132_vm0, %v16515_v31  ;;  %15979 = vmatprep.subr.bf16.mxu0 %v16609_v37 }
 0x641   :  { %15867 = vmatpush3.bf16.msra.mxu1 %v15864_v33  ;;  %15295 = vmatprep.mubr.msk.f32.mxu1 %vm132_vm0, %v16516_v54  ;;  %v11509_v33 = vld [vmem:[%s19904_s11 + $0x10] sm:$0xff] }
 0x642   :  { %15869 = vmatprep.subr.bf16.mxu1 %v15868_v52  ;;  %v15980_v31 = vpack.c.bf16 %v11510_v2, %v11509_v33  ;;  %v13832_v33 = vld [vmem:[%s19902_s9 + $0xb0] sm:$0xff] }
 0x644   :  { %15296 = vmatmul.mubr.msk.f32.gmra.mrb[36].mxu1 %vm132_vm0, %v16517_v30  ;;  %15981 = vmatpush3.bf16.msra.mxu0 %v15980_v31  ;;  %v15948_v31 = vpack.c.bf16 %v13833_v63, %v13832_v33 }
 0x645   :  { %15871 = vmatpush3.bf16.msra.mxu1 %v15868_v52  ;;  %15306 = vmatprep.mubr.msk.f32.mxu1 %vm132_vm0, %v16518_v60  ;;  %v13724_v52 = vld [vmem:[%s19901_s8] ss:$0 sm:$0xff] }
 0x646   :  { %15873 = vmatprep.subr.bf16.mxu1 %v15872_v20  ;;  %15982 = vmatprep.subr.bf16.mxu0 %v16609_v37 }
 0x648   :  { %15307 = vmatmul.mubr.msk.f32.vlgmr.msra.gmra.mrb[34].mxu1 %vm132_vm0, %v16519_v50 }
 0x649   :  { %15875 = vmatpush3.bf16.msra.mxu1 %v15872_v20  ;;  %15309 = vmatprep.mubr.msk.f32.mxu1 %vm132_vm0, %v16520_v41 }
 0x64a   :  { %15877 = vmatprep.subr.bf16.mxu1 %v15876_v45 }
 0x64c   :  { %15310 = vmatmul.mubr.msk.f32.gmra.mrb[36].mxu1 %vm132_vm0, %v16521_v49 }
 0x64d   :  { %15879 = vmatpush3.bf16.msra.mxu1 %v15876_v45  ;;  %15320 = vmatprep.mubr.msk.f32.mxu1 %vm132_vm0, %v16522_v42 }
 0x64e   :  { %15881 = vmatprep.subr.bf16.mxu1 %v15880_v5 }
 0x650   :  { %15321 = vmatmul.mubr.msk.f32.vlgmr.msra.gmra.mrb[34].mxu1 %vm132_vm0, %v16523_v13 }
 0x651   :  { %15883 = vmatpush3.bf16.msra.mxu1 %v15880_v5  ;;  %15323 = vmatprep.mubr.msk.f32.mxu1 %vm132_vm0, %v16524_v61 }
 0x652   :  { %15885 = vmatprep.subr.bf16.mxu1 %v15884_v9 }
 0x654   :  { %15324 = vmatmul.mubr.msk.f32.gmra.mrb[36].mxu1 %vm132_vm0, %v16525_v51 }
 0x655   :  { %15887 = vmatpush3.bf16.msra.mxu1 %v15884_v9  ;;  %15334 = vmatprep.mubr.msk.f32.mxu1 %vm132_vm0, %v16526_v16  ;;  %v13806_v9 = vld [vmem:[%s19902_s9 + $0x40] sm:$0xff] }
 0x656   :  { %15889 = vmatprep.subr.bf16.mxu1 %v15888_v14  ;;  %v15920_v59 = vpack.c.bf16 %v13807_v11, %v13806_v9 }
 0x658   :  { %15335 = vmatmul.mubr.msk.f32.vlgmr.msra.gmra.mrb[34].mxu1 %vm132_vm0, %v16527_v19  ;;  %v13809_v19 = vld [vmem:[%s19902_s9 + $0x58] sm:$0xff] }
 0x659   :  { %15891 = vmatpush3.bf16.msra.mxu1 %v15888_v14  ;;  %15337 = vmatprep.mubr.msk.f32.mxu1 %vm132_vm0, %v16528_v32  ;;  %v13808_v14 = vld [vmem:[%s19902_s9 + $0x50] sm:$0xff]  ;;  %v13815_v32 = vld [vmem:[%s19902_s9 + $0x68] sm:$0xff] }
 0x65a   :  { %15893 = vmatprep.subr.bf16.mxu1 %v15892_v34  ;;  %v15924_v28 = vpack.c.bf16 %v13809_v19, %v13808_v14 }
 0x65c   :  { %15338 = vmatmul.mubr.msk.f32.gmra.mrb[36].mxu1 %vm132_vm0, %v16529_v8 }
 0x65d   :  { %15895 = vmatpush3.bf16.msra.mxu1 %v15892_v34  ;;  %15348 = vmatprep.mubr.msk.f32.mxu1 %vm132_vm0, %v16530_v53  ;;  %v13814_v34 = vld [vmem:[%s19902_s9 + $0x60] sm:$0xff]  ;;  %v13817_v53 = vld [vmem:[%s19902_s9 + $0x78] sm:$0xff] }
 0x65e   :  { %15897 = vmatprep.subr.bf16.mxu1 %v15896_v35  ;;  %v15928_v36 = vpack.c.bf16 %v13815_v32, %v13814_v34 }
 0x660   :  { %15349 = vmatmul.mubr.msk.f32.vlgmr.msra.gmra.mrb[34].mxu1 %vm132_vm0, %v16531_v4 }
 0x661   :  { %15899 = vmatpush3.bf16.msra.mxu1 %v15896_v35  ;;  %15351 = vmatprep.mubr.msk.f32.mxu1 %vm132_vm0, %v16532_v7  ;;  %v13816_v35 = vld [vmem:[%s19902_s9 + $0x70] sm:$0xff]  ;;  %v13823_v7 = vld [vmem:[%s19902_s9 + $0x88] sm:$0xff] }
 0x662   :  { %15901 = vmatprep.subr.bf16.mxu1 %v15900_v55 }
 0x664   :  { %15352 = vmatmul.mubr.msk.f32.gmra.mrb[36].mxu1 %vm132_vm0, %v16533_v38 }
 0x665   :  { %15903 = vmatpush3.bf16.msra.mxu1 %v15900_v55  ;;  %15362 = vmatprep.mubr.msk.f32.mxu1 %vm132_vm0, %v16534_v43  ;;  %v13822_v55 = vld [vmem:[%s19902_s9 + $0x80] sm:$0xff]  ;;  %v15932_v43 = vpack.c.bf16 %v13817_v53, %v13816_v35 }
 0x666   :  { %15905 = vmatprep.subr.bf16.mxu1 %v15904_v18  ;;  %v15936_v12 = vpack.c.bf16 %v13823_v7, %v13822_v55  ;;  %v13793_v53 = vld [vmem:[%s19903_s10] ss:$0 sm:$0xff]  ;;  %v13865_v7 = vld [vmem:[%s19904_s11 + $0x28] sm:$0xff] }
 0x668   :  { %15363 = vmatmul.mubr.msk.f32.vlgmr.msra.gmra.mrb[34].mxu1 %vm132_vm0, %v16535_v39 }
 0x669   :  { %15365 = vmatprep.mubr.msk.f32.mxu1 %vm132_vm0, %v16536_v26  ;;  %15907 = vmatpush3.bf16.msra.mxu1 %v15904_v18  ;;  %v13824_v26 = vld [vmem:[%s19902_s9 + $0x90] sm:$0xff]  ;;  %v13830_v18 = vld [vmem:[%s19902_s9 + $0xa0] sm:$0xff] }
 0x66a   :  { %15909 = vmatprep.subr.bf16.mxu1 %v15908_v25  ;;  %v15944_v47 = vpack.c.bf16 %v13831_v23, %v13830_v18 }
 0x66c   :  { %15366 = vmatmul.mubr.msk.f32.gmra.mrb[36].mxu1 %vm132_vm0, %v16537_v46  ;;  %v13825_v46 = vld [vmem:[%s19902_s9 + $0x98] sm:$0xff] }
 0x66d   :  { %15911 = vmatpush3.bf16.msra.mxu1 %v15908_v25  ;;  %v15940_v1 = vpack.c.bf16 %v13825_v46, %v13824_v26 }
 0x66e   :  { %15913 = vmatprep.subr.bf16.mxu1 %v15912_v29 }
 0x73b   :  { %v15364_v54 = vpop.f32.mrb[34].mxu1 }
 0x73c   :  { %v16138_v22 = vadd.f32 %v15364_v54, %v13724_v52  ;;  %v10331_v17 = vpop.f32.mrb[35].mxu1  ;;  %v13838_v54 = vld [vmem:[%s19902_s9 + $0xc0] sm:$0xff] }
 0x73d   :  { %v16139_v30 = vadd.f32 %v13724_v52, %v10331_v17 }
 0x73e   :  { %v10355_v20 = vmax.f32 %v16138_v22, 0.0  ;;  %v13839_v22 = vld [vmem:[%s19902_s9 + $0xc8] sm:$0xff] }
 0x73f   :  { %v10354_v60 = vmax.f32 %v16139_v30, 0.0  ;;  %v15367_v27 = vpop.f32.mrb[36].mxu1  ;;  %v15952_v30 = vpack.c.bf16 %v13839_v22, %v13838_v54 }
 0x740   :  { %v10363_v10 = vcombine.high %v10355_v20, %v10355_v20  ;;  %10385 = vst.msk [vmem:[#allocation5 + $0x19] sm:$0xf] %vm9240_vm12, %v10355_v20  ;;  %v16140_v50 = vadd.f32 %v15367_v27, %v13724_v52  ;;  %v10341_v45 = vpop.f32.mrb[37].mxu1  ;;  %v13841_v27 = vld [vmem:[%s19902_s9 + $0xd8] sm:$0xff] }
 0x741   :  { %v10362_v41 = vcombine.high %v10354_v60, %v10354_v60  ;;  %10383 = vst.msk [vmem:[#allocation5 + $0x9] sm:$0xf] %vm9240_vm12, %v10354_v60  ;;  %v16141_v57 = vadd.f32 %v13724_v52, %v10341_v45  ;;  %v13840_v60 = vld [vmem:[%s19902_s9 + $0xd0] sm:$0xff] }
 0x742   :  { %10386 = vst.msk [vmem:[#allocation5 + $0x21] sm:$0xf] %vm9240_vm12, %v10363_v10  ;;  %v10357_v21 = vmax.f32 %v16140_v50, 0.0  ;;  %v15956_v50 = vpack.c.bf16 %v13841_v27, %v13840_v60 }
 0x743   :  { %10384 = vst.msk [vmem:[#allocation5 + $0x11] sm:$0xf] %vm9240_vm12, %v10362_v41  ;;  %v10356_v49 = vmax.f32 %v16141_v57, 0.0  ;;  %v13846_v41 = vld [vmem:[%s19902_s9 + $0xe0] sm:$0xff]  ;;  %v13847_v57 = vld [vmem:[%s19902_s9 + $0xe8] sm:$0xff] }
 0x744   :  { %v10365_v5 = vcombine.high %v10357_v21, %v10357_v21  ;;  %10389 = vst.msk [vmem:[#allocation5 + $0x49] sm:$0xf] %vm9240_vm12, %v10357_v21 }
 0x745   :  { %v10364_v42 = vcombine.high %v10356_v49, %v10356_v49  ;;  %10387 = vst.msk [vmem:[#allocation5 + $0x39] sm:$0xf] %vm9240_vm12, %v10356_v49  ;;  %v15960_v49 = vpack.c.bf16 %v13847_v57, %v13846_v41 }
 0x746   :  { %10390 = vst.msk [vmem:[#allocation5 + $0x51] sm:$0xf] %vm9240_vm12, %v10365_v5 }
 0x747   :  { %10388 = vst.msk [vmem:[#allocation5 + $0x41] sm:$0xf] %vm9240_vm12, %v10364_v42  ;;  %v13848_v42 = vld [vmem:[%s19902_s9 + $0xf0] sm:$0xff] }
 0x748   :  { %v16538_v13 = vld [vmem:[#allocation5] ss:$8 sps:$4 sm:$0xff]  }
 0x749   :  { %15376 = vmatprep.mubr.msk.f32.mxu1 %vm132_vm0, %v16538_v13  ;;  %v16542_v56 = vld [vmem:[#allocation5 + $0x1] ss:$8 sps:$4 sm:$0xff]   ;;  %v15964_v13 = vpack.c.bf16 %v13849_v40, %v13848_v42 }
 0x74a   :  { %v16539_v61 = vld [vmem:[#allocation5 + $0x10] ss:$8 sps:$4 sm:$0xff]   ;;  %v16546_v4 = vld [vmem:[#allocation5 + $0x2] ss:$8 sps:$4 sm:$0xff]  }
 0x74b   :  { %15377 = vmatmul.mubr.msk.f32.vlgmr.msra.gmra.mrb[38].mxu1 %vm132_vm0, %v16539_v61  ;;  %v16543_v48 = vld [vmem:[#allocation5 + $0x11] ss:$8 sps:$4 sm:$0xff]   ;;  %v16563_v24 = vld [vmem:[#allocation5 + $0x20] ss:$8 sps:$4 sm:$0xff]  }
 0x74c   :  { %v16540_v51 = vld [vmem:[#allocation5 + $0x30] ss:$8 sps:$4 sm:$0xff]   ;;  %15915 = vmatpush3.bf16.msra.mxu1 %v15912_v29  ;;  %v13854_v61 = vld [vmem:[%s19902_s9 + $0x100] sm:$0xff] }
 0x74d   :  { %15379 = vmatprep.mubr.msk.f32.mxu1 %vm132_vm0, %v16540_v51  ;;  %15917 = vmatprep.subr.bf16.mxu1 %v15916_v15  ;;  %v16544_v8 = vld [vmem:[#allocation5 + $0x31] ss:$8 sps:$4 sm:$0xff]  }
 0x74e   :  { %v16541_v16 = vld [vmem:[#allocation5 + $0x40] ss:$8 sps:$4 sm:$0xff]   ;;  %v16547_v38 = vld [vmem:[#allocation5 + $0x12] ss:$8 sps:$4 sm:$0xff]  }
 0x74f   :  { %15380 = vmatmul.mubr.msk.f32.gmra.mrb[40].mxu1 %vm132_vm0, %v16541_v16  ;;  %v16545_v0 = vld [vmem:[#allocation5 + $0x41] ss:$8 sps:$4 sm:$0xff]   ;;  %v16548_v39 = vld [vmem:[#allocation5 + $0x32] ss:$8 sps:$4 sm:$0xff]  }
 0x750   :  { %15919 = vmatpush3.bf16.msra.mxu1 %v15916_v15  ;;  %15390 = vmatprep.mubr.msk.f32.mxu1 %vm132_vm0, %v16542_v56  ;;  %v16549_v62 = vld [vmem:[#allocation5 + $0x42] ss:$8 sps:$4 sm:$0xff]   ;;  %v16562_v5 = vld [vmem:[#allocation5 + $0x10] ss:$8 sps:$4 sm:$0xff]  }
 0x751   :  { %15921 = vmatprep.subr.bf16.mxu1 %v15920_v59  ;;  %v16550_v6 = vld [vmem:[#allocation5 + $0x8] ss:$8 sps:$4 sm:$0xff]   ;;  %v16551_v25 = vld [vmem:[#allocation5 + $0x18] ss:$8 sps:$4 sm:$0xff]  }
 0x752   :  { %v16552_v58 = vld [vmem:[#allocation5 + $0x38] ss:$8 sps:$4 sm:$0xff]   ;;  %v16553_v29 = vld [vmem:[#allocation5 + $0x48] ss:$8 sps:$4 sm:$0xff]  }
 0x753   :  { %15391 = vmatmul.mubr.msk.f32.vlgmr.msra.gmra.mrb[38].mxu1 %vm132_vm0, %v16543_v48  ;;  %v16554_v44 = vld [vmem:[#allocation5 + $0x9] ss:$8 sps:$4 sm:$0xff]   ;;  %v16555_v2 = vld [vmem:[#allocation5 + $0x19] ss:$8 sps:$4 sm:$0xff]  }
 0x754   :  { %15923 = vmatpush3.bf16.msra.mxu1 %v15920_v59  ;;  %15393 = vmatprep.mubr.msk.f32.mxu1 %vm132_vm0, %v16544_v8  ;;  %v16556_v52 = vld [vmem:[#allocation5 + $0x39] ss:$8 sps:$4 sm:$0xff]   ;;  %v16557_v17 = vld [vmem:[#allocation5 + $0x49] ss:$8 sps:$4 sm:$0xff]  }
 0x755   :  { %15925 = vmatprep.subr.bf16.mxu1 %v15924_v28  ;;  %v16558_v20 = vld [vmem:[#allocation5 + $0xa] ss:$8 sps:$4 sm:$0xff]   ;;  %v16559_v10 = vld [vmem:[#allocation5 + $0x1a] ss:$8 sps:$4 sm:$0xff]  }
 0x756   :  { %v16560_v45 = vld [vmem:[#allocation5 + $0x3a] ss:$8 sps:$4 sm:$0xff]   ;;  %v16561_v21 = vld [vmem:[#allocation5 + $0x4a] ss:$8 sps:$4 sm:$0xff]  }
 0x757   :  { %15394 = vmatmul.mubr.msk.f32.gmra.mrb[40].mxu1 %vm132_vm0, %v16545_v0  ;;  %v16564_v9 = vld [vmem:[#allocation5 + $0x40] ss:$8 sps:$4 sm:$0xff]   ;;  %v16565_v11 = vld [vmem:[#allocation5 + $0x50] ss:$8 sps:$4 sm:$0xff]  }
 0x758   :  { %15927 = vmatpush3.bf16.msra.mxu1 %v15924_v28  ;;  %15404 = vmatprep.mubr.msk.f32.mxu1 %vm132_vm0, %v16546_v4  ;;  %v13855_v15 = vld [vmem:[%s19902_s9 + $0x108] sm:$0xff]  ;;  %v16566_v14 = vld [vmem:[#allocation5 + $0x11] ss:$8 sps:$4 sm:$0xff]  }
 0x759   :  { %15929 = vmatprep.subr.bf16.mxu1 %v15928_v36  ;;  %v15968_v51 = vpack.c.bf16 %v13855_v15, %v13854_v61  ;;  %v13856_v16 = vld [vmem:[%s19902_s9 + $0x110] sm:$0xff]  ;;  %v13857_v59 = vld [vmem:[%s19902_s9 + $0x118] sm:$0xff]  ;;  %v16567_v56 = vld [vmem:[#allocation5 + $0x21] ss:$8 sps:$4 sm:$0xff]  }
 0x75a   :  { %v15972_v19 = vpack.c.bf16 %v13857_v59, %v13856_v16  ;;  %v16568_v34 = vld [vmem:[#allocation5 + $0x41] ss:$8 sps:$4 sm:$0xff]   ;;  %v16569_v32 = vld [vmem:[#allocation5 + $0x51] ss:$8 sps:$4 sm:$0xff]  }
 0x75b   :  { %15405 = vmatmul.mubr.msk.f32.vlgmr.msra.gmra.mrb[38].mxu1 %vm132_vm0, %v16547_v38  ;;  %v16570_v48 = vld [vmem:[#allocation5 + $0x12] ss:$8 sps:$4 sm:$0xff]   ;;  %v16571_v28 = vld [vmem:[#allocation5 + $0x22] ss:$8 sps:$4 sm:$0xff]  }
 0x75c   :  { %15931 = vmatpush3.bf16.msra.mxu1 %v15928_v36  ;;  %15407 = vmatprep.mubr.msk.f32.mxu1 %vm132_vm0, %v16548_v39  ;;  %v16572_v8 = vld [vmem:[#allocation5 + $0x42] ss:$8 sps:$4 sm:$0xff]   ;;  %v16573_v35 = vld [vmem:[#allocation5 + $0x52] ss:$8 sps:$4 sm:$0xff]  }
 0x75d   :  { %15933 = vmatprep.subr.bf16.mxu1 %v15932_v43  ;;  %v13864_v36 = vld [vmem:[%s19904_s11 + $0x20] sm:$0xff]  ;;  %v19483_v38 = vld [vmem:[%s19904_s11 + $0x30] sm:$0xff]  ;;  %v12803_v16 = vld [vmem:[%s19906_s13 + $0x8] sm:$0xff] }
 0x75f   :  { %15408 = vmatmul.mubr.msk.f32.gmra.mrb[40].mxu1 %vm132_vm0, %v16549_v62 }
 0x760   :  { %15935 = vmatpush3.bf16.msra.mxu1 %v15932_v43  ;;  %15418 = vmatprep.mubr.msk.f32.mxu1 %vm132_vm0, %v16550_v6  ;;  %v19488_v43 = vld [vmem:[%s19904_s11 + $0x38] sm:$0xff] }
 0x761   :  { %15937 = vmatprep.subr.bf16.mxu1 %v15936_v12  ;;  %v15986_v6 = vpack.c.bf16 %v19488_v43, %v19483_v38 }
 0x763   :  { %15419 = vmatmul.mubr.msk.f32.vlgmr.msra.gmra.mrb[38].mxu1 %vm132_vm0, %v16551_v25 }
 0x764   :  { %15939 = vmatpush3.bf16.msra.mxu1 %v15936_v12  ;;  %15421 = vmatprep.mubr.msk.f32.mxu1 %vm132_vm0, %v16552_v58  ;;  %v15983_v12 = vpack.c.bf16 %v13865_v7, %v13864_v36  ;;  %v12805_v7 = vld [vmem:[%s19906_s13 + $0x18] sm:$0xff] }
 0x765   :  { %15941 = vmatprep.subr.bf16.mxu1 %v15940_v1 }
 0x767   :  { %15422 = vmatmul.mubr.msk.f32.gmra.mrb[40].mxu1 %vm132_vm0, %v16553_v29 }
 0x768   :  { %15943 = vmatpush3.bf16.msra.mxu1 %v15940_v1  ;;  %15432 = vmatprep.mubr.msk.f32.mxu1 %vm132_vm0, %v16554_v44 }
 0x769   :  { %15945 = vmatprep.subr.bf16.mxu1 %v15944_v47 }
 0x76b   :  { %15433 = vmatmul.mubr.msk.f32.vlgmr.msra.gmra.mrb[38].mxu1 %vm132_vm0, %v16555_v2 }
 0x76c   :  { %15947 = vmatpush3.bf16.msra.mxu1 %v15944_v47  ;;  %15435 = vmatprep.mubr.msk.f32.mxu1 %vm132_vm0, %v16556_v52 }
 0x76d   :  { %15949 = vmatprep.subr.bf16.mxu1 %v15948_v31 }
 0x76f   :  { %15436 = vmatmul.mubr.msk.f32.gmra.mrb[40].mxu1 %vm132_vm0, %v16557_v17 }
 0x770   :  { %15951 = vmatpush3.bf16.msra.mxu1 %v15948_v31  ;;  %15446 = vmatprep.mubr.msk.f32.mxu1 %vm132_vm0, %v16558_v20 }
 0x771   :  { %15953 = vmatprep.subr.bf16.mxu1 %v15952_v30 }
 0x773   :  { %15447 = vmatmul.mubr.msk.f32.vlgmr.msra.gmra.mrb[38].mxu1 %vm132_vm0, %v16559_v10 }
 0x774   :  { %15955 = vmatpush3.bf16.msra.mxu1 %v15952_v30  ;;  %15449 = vmatprep.mubr.msk.f32.mxu1 %vm132_vm0, %v16560_v45 }
 0x775   :  { %15957 = vmatprep.subr.bf16.mxu1 %v15956_v50 }
 0x777   :  { %15450 = vmatmul.mubr.msk.f32.gmra.mrb[40].mxu1 %vm132_vm0, %v16561_v21 }
 0x778   :  { %15959 = vmatpush3.bf16.msra.mxu1 %v15956_v50  ;;  %15460 = vmatprep.mubr.msk.f32.mxu1 %vm132_vm0, %v16562_v5 }
 0x779   :  { %15961 = vmatprep.subr.bf16.mxu1 %v15960_v49 }
 0x77b   :  { %15461 = vmatmul.mubr.msk.f32.vlgmr.msra.gmra.mrb[38].mxu1 %vm132_vm0, %v16563_v24 }
 0x77c   :  { %15963 = vmatpush3.bf16.msra.mxu1 %v15960_v49  ;;  %15463 = vmatprep.mubr.msk.f32.mxu1 %vm132_vm0, %v16564_v9 }
 0x77d   :  { %15965 = vmatprep.subr.bf16.mxu1 %v15964_v13 }
 0x77f   :  { %15464 = vmatmul.mubr.msk.f32.gmra.mrb[40].mxu1 %vm132_vm0, %v16565_v11 }
 0x780   :  { %15967 = vmatpush3.bf16.msra.mxu1 %v15964_v13  ;;  %15474 = vmatprep.mubr.msk.f32.mxu1 %vm132_vm0, %v16566_v14  ;;  %v12802_v14 = vld [vmem:[%s19906_s13] sm:$0xff] }
 0x781   :  { %15969 = vmatprep.subr.bf16.mxu1 %v15968_v51 }
 0x783   :  { %15475 = vmatmul.mubr.msk.f32.vlgmr.msra.gmra.mrb[38].mxu1 %vm132_vm0, %v16567_v56 }
 0x784   :  { %15971 = vmatpush3.bf16.msra.mxu1 %v15968_v51  ;;  %15477 = vmatprep.mubr.msk.f32.mxu1 %vm132_vm0, %v16568_v34 }
 0x785   :  { %15973 = vmatprep.subr.bf16.mxu1 %v15972_v19 }
 0x787   :  { %15478 = vmatmul.mubr.msk.f32.gmra.mrb[40].mxu1 %vm132_vm0, %v16569_v32  ;;  %v13869_v32 = vld [vmem:[%s19904_s11 + $0x40] sm:$0xff] }
 0x788   :  { %15975 = vmatpush3.bf16.msra.mxu1 %v15972_v19  ;;  %15488 = vmatprep.mubr.msk.f32.mxu1 %vm132_vm0, %v16570_v48  ;;  %v13870_v48 = vld [vmem:[%s19904_s11 + $0x48] sm:$0xff] }
 0x789   :  { %16072 = vmatprep.subr.bf16.mxu1 %v16609_v37 }
 0x78b   :  { %15489 = vmatmul.mubr.msk.f32.vlgmr.msra.gmra.mrb[38].mxu1 %vm132_vm0, %v16571_v28 }
 0x78c   :  { %15491 = vmatprep.mubr.msk.f32.mxu1 %vm132_vm0, %v16572_v8 }
 0x78f   :  { %15492 = vmatmul.mubr.msk.f32.gmra.mrb[40].mxu1 %vm132_vm0, %v16573_v35 }
 0x790   :  { %15702 = vmatprep.mubr.msk.f32.mxu1 %vm16610_vm13, %v19939_v3 }
 0x85e   :  { %v15490_v0 = vpop.f32.mrb[38].mxu1 }
 0x85f   :  { %v16142_v4 = vadd.f32 %v15490_v0, %v13793_v53  ;;  %v11473_v55 = vpop.f32.mrb[39].mxu1 }
 0x860   :  { %v16143_v39 = vadd.f32 %v13793_v53, %v11473_v55  ;;  %v12804_v55 = vld [vmem:[%s19906_s13 + $0x10] sm:$0xff] }
 0x861   :  { %v19490_v26 = vmax.f32 %v16142_v4, 0.0  ;;  %v16073_v4 = vpack.c.bf16 %v12803_v16, %v12802_v14  ;;  %v13889_v16 = vld [vmem:[%s19904_s11 + $0xc0] sm:$0xff] }
 0x862   :  { %v11496_v46 = vmax.f32 %v16143_v39, 0.0  ;;  %v15493_v62 = vpop.f32.mrb[40].mxu1  ;;  %v15989_v39 = vpack.c.bf16 %v13870_v48, %v13869_v32  ;;  %v13892_v32 = vld [vmem:[%s19904_s11 + $0xd8] sm:$0xff] }
 0x863   :  { %v16144_v18 = vadd.f32 %v15493_v62, %v13793_v53  ;;  %v11483_v23 = vpop.f32.mrb[41].mxu1  ;;  %v12241_v25 = vrot.slane %v19490_v26, 1  ;;  %v12321_v1 = vrot.slane %v19490_v26, 2  ;;  %v12402_v58 = vrot.slane %v19490_v26, 3  ;;  %16074 = vmatpush3.bf16.msra.mxu1 %v16073_v4 }
 0x864   :  { %v16145_v29 = vadd.f32 %v13793_v53, %v11483_v23  ;;  %v11593_v47 = vrot.slane %v11496_v46, 1  ;;  %v11673_v44 = vrot.slane %v11496_v46, 2  ;;  %v11754_v33 = vrot.slane %v11496_v46, 3  ;;  %16075 = vmatprep.subr.bf16.mxu1 %v16609_v37  ;;  %v13874_v23 = vld [vmem:[%s19904_s11 + $0x60] sm:$0xff] }
 0x865   :  { %v11499_v63 = vmax.f32 %v16144_v18, 0.0  ;;  %v11835_v2 = vrot.slane %v11496_v46, 4  ;;  %v11916_v31 = vrot.slane %v11496_v46, 5  ;;  %v11997_v52 = vrot.slane %v11496_v46, 6 }
 0x866   :  { %v11498_v54 = vmax.f32 %v16145_v29, 0.0  ;;  %v12078_v22 = vrot.slane %v11496_v46, 7  ;;  %v12483_v17 = vrot.slane %v19490_v26, 4  ;;  %v12564_v30 = vrot.slane %v19490_v26, 5  ;;  %v12809_v29 = vld [vmem:[%s19906_s13 + $0x38] sm:$0xff] }
 0x867   :  { %v12161_v20 = vrot.slane %v11499_v63, 7  ;;  %v19500_v60 = vsel %vm4016_vm3, %v11499_v63, %v12241_v25  ;;  %v12322_v27 = vrot.slane %v11499_v63, 1  ;;  %v12403_v10 = vrot.slane %v11499_v63, 2  ;;  %v13875_v25 = vld [vmem:[%s19904_s11 + $0x68] sm:$0xff] }
 0x868   :  { %v11513_v50 = vrot.slane %v11498_v54, 7  ;;  %v11594_v45 = vsel %vm4016_vm3, %v11498_v54, %v11593_v47  ;;  %v11674_v41 = vrot.slane %v11498_v54, 1  ;;  %v11755_v57 = vrot.slane %v11498_v54, 2 }
 0x869   :  { %v11836_v21 = vrot.slane %v11498_v54, 3  ;;  %v11917_v49 = vrot.slane %v11498_v54, 4  ;;  %v11998_v5 = vrot.slane %v11498_v54, 5  ;;  %v12079_v42 = vrot.slane %v11498_v54, 6  ;;  %v13879_v54 = vld [vmem:[%s19904_s11 + $0x80] sm:$0xff] }
 0x86a   :  { %v11514_v40 = vsel %vm4016_vm3, %v11513_v50, %v11496_v46  ;;  %v11675_v24 = vsel %vm4016_vm3, %v11674_v41, %v11673_v44  ;;  %v19506_v13 = vsel %vm4016_vm3, %v11755_v57, %v11754_v33  ;;  %v19510_v9 = vsel %vm4016_vm3, %v12161_v20, %v19490_v26  ;;  %v13872_v46 = vld [vmem:[%s19904_s11 + $0x58] sm:$0xff]  ;;  %v13876_v44 = vld [vmem:[%s19904_s11 + $0x70] sm:$0xff]  ;;  %v12814_v41 = vld [vmem:[%s19906_s13 + $0x60] sm:$0xff] }
 0x86b   :  { %15503 = vmatmul.mubr.msk.f32.vlgmr.msra.gmra.mrb[62].mxu0 %vm132_vm0, %v11514_v40  ;;  %v19514_v61 = vsel %vm4016_vm3, %v11836_v21, %v11835_v2  ;;  %v19517_v15 = vsel %vm4016_vm3, %v11917_v49, %v11916_v31  ;;  %v19520_v11 = vsel %vm4016_vm3, %v11998_v5, %v11997_v52  ;;  %v19523_v51 = vsel %vm4016_vm3, %v12079_v42, %v12078_v22  ;;  %v13877_v33 = vld [vmem:[%s19904_s11 + $0x78] sm:$0xff]  ;;  %v12810_v2 = vld [vmem:[%s19906_s13 + $0x40] sm:$0xff]  ;;  %v12811_v31 = vld [vmem:[%s19906_s13 + $0x48] sm:$0xff] }
 0x86c   :  { %15984 = vmatpush3.bf16.msra.mxu0 %v15983_v12  ;;  %15513 = vmatprep.mubr.msk.f32.mxu0 %vm16610_vm13, %v19939_v3  ;;  %v19534_v59 = vsel %vm4016_vm3, %v12322_v27, %v12321_v1  ;;  %v19537_v56 = vsel %vm4016_vm3, %v12403_v10, %v12402_v58  ;;  %v12484_v19 = vrot.slane %v11499_v63, 3  ;;  %v12565_v34 = vrot.slane %v11499_v63, 4  ;;  %v12806_v12 = vld [vmem:[%s19906_s13 + $0x20] sm:$0xff]  ;;  %v12808_v58 = vld [vmem:[%s19906_s13 + $0x30] sm:$0xff]  ;;  %v13880_v22 = vld [vmem:[%s19904_s11 + $0x88] sm:$0xff] }
 0x86d   :  { %15985 = vmatprep.subr.bf16.mxu0 %v16609_v37  ;;  %v12645_v28 = vrot.slane %v19490_v26, 6  ;;  %v12646_v8 = vrot.slane %v11499_v63, 5  ;;  %v12726_v35 = vrot.slane %v19490_v26, 7  ;;  %v12727_v53 = vrot.slane %v11499_v63, 6  ;;  %v13871_v26 = vld [vmem:[%s19904_s11 + $0x50] sm:$0xff]  ;;  %v12813_v20 = vld [vmem:[%s19906_s13 + $0x58] sm:$0xff] }
 0x86e   :  { %v19549_v0 = vsel %vm4016_vm3, %v12484_v19, %v12483_v17  ;;  %v19552_v36 = vsel %vm4016_vm3, %v12565_v34, %v12564_v30  ;;  %v16076_v62 = vpack.c.bf16 %v12805_v7, %v12804_v55  ;;  %v15992_v18 = vpack.c.bf16 %v13872_v46, %v13871_v26  ;;  %v12812_v30 = vld [vmem:[%s19906_s13 + $0x50] sm:$0xff]  ;;  %v13882_v50 = vld [vmem:[%s19904_s11 + $0x98] sm:$0xff]  ;;  %v12815_v57 = vld [vmem:[%s19906_s13 + $0x68] sm:$0xff] }
 0x86f   :  { %v19561_v38 = vsel %vm4016_vm3, %v12646_v8, %v12645_v28  ;;  %v19564_v43 = vsel %vm4016_vm3, %v12727_v53, %v12726_v35  ;;  %v15995_v47 = vpack.c.bf16 %v13875_v25, %v13874_v23  ;;  %v16082_v63 = vpack.c.bf16 %v12809_v29, %v12808_v58  ;;  %v13881_v10 = vld [vmem:[%s19904_s11 + $0x90] sm:$0xff]  ;;  %v13884_v49 = vld [vmem:[%s19904_s11 + $0xa0] sm:$0xff]  ;;  %v13885_v5 = vld [vmem:[%s19904_s11 + $0xa8] sm:$0xff] }
 0x870   :  { %15987 = vmatpush3.bf16.msra.mxu0 %v15986_v6  ;;  %v12807_v6 = vld [vmem:[%s19906_s13 + $0x28] sm:$0xff]  ;;  %16077 = vmatpush3.bf16.msra.mxu1 %v16076_v62  ;;  %v15998_v52 = vpack.c.bf16 %v13877_v33, %v13876_v44  ;;  %v16085_v17 = vpack.c.bf16 %v12811_v31, %v12810_v2  ;;  %v16001_v27 = vpack.c.bf16 %v13880_v22, %v13879_v54  ;;  %v13894_v28 = vld [vmem:[%s19904_s11 + $0xe0] sm:$0xff]  ;;  %v13897_v53 = vld [vmem:[%s19904_s11 + $0xf8] sm:$0xff] }
 0x871   :  { %15988 = vmatprep.subr.bf16.mxu0 %v16609_v37  ;;  %v16079_v1 = vpack.c.bf16 %v12807_v6, %v12806_v12  ;;  %16078 = vmatprep.subr.bf16.mxu1 %v16609_v37  ;;  %v16004_v21 = vpack.c.bf16 %v13882_v50, %v13881_v10  ;;  %v16091_v42 = vpack.c.bf16 %v12815_v57, %v12814_v41  ;;  %v13890_v19 = vld [vmem:[%s19904_s11 + $0xc8] sm:$0xff]  ;;  %v13899_v55 = vld [vmem:[%s19904_s11 + $0x100] sm:$0xff]  ;;  %v13902_v26 = vld [vmem:[%s19904_s11 + $0x118] sm:$0xff] }
 0x872   :  { %v16007_v40 = vpack.c.bf16 %v13885_v5, %v13884_v49  ;;  %v16013_v34 = vpack.c.bf16 %v13890_v19, %v13889_v16  ;;  %v13895_v8 = vld [vmem:[%s19904_s11 + $0xe8] sm:$0xff]  ;;  %v13904_v62 = vld [vmem:[%s19904_s11 + $0x120] sm:$0xff]  ;;  %v13912_v29 = vld [vmem:[%s19904_s11 + $0x158] sm:$0xff] }
 0x873   :  { %15514 = vmatmul.mubr.msk.f32.vlgmr.msra.gmra.mrb[62].mxu0 %vm132_vm0, %v11594_v45  ;;  %v16088_v45 = vpack.c.bf16 %v12813_v20, %v12812_v30  ;;  %v16019_v35 = vpack.c.bf16 %v13895_v8, %v13894_v28  ;;  %v13900_v7 = vld [vmem:[%s19904_s11 + $0x108] sm:$0xff]  ;;  %v13909_v25 = vld [vmem:[%s19904_s11 + $0x140] sm:$0xff]  ;;  %v13917_v2 = vld [vmem:[%s19904_s11 + $0x178] sm:$0xff] }
 0x874   :  { %15990 = vmatpush3.bf16.msra.mxu0 %v15989_v39  ;;  %15524 = vmatprep.mubr.msk.f32.mxu0 %vm16610_vm13, %v19939_v3  ;;  %v16025_v39 = vpack.c.bf16 %v13900_v7, %v13899_v55  ;;  %v13905_v12 = vld [vmem:[%s19904_s11 + $0x128] sm:$0xff]  ;;  %v13914_v44 = vld [vmem:[%s19904_s11 + $0x160] sm:$0xff]  ;;  %v13927_v50 = vld [vmem:[%s19904_s11 + $0x1b8] sm:$0xff] }
 0x875   :  { %15991 = vmatprep.subr.bf16.mxu0 %v16609_v37  ;;  %16080 = vmatpush3.bf16.msra.mxu1 %v16079_v1  ;;  %v16031_v6 = vpack.c.bf16 %v13905_v12, %v13904_v62  ;;  %v13910_v1 = vld [vmem:[%s19904_s11 + $0x148] sm:$0xff]  ;;  %v13924_v20 = vld [vmem:[%s19904_s11 + $0x1a0] sm:$0xff]  ;;  %v13932_v49 = vld [vmem:[%s19904_s11 + $0x1d8] sm:$0xff] }
 0x876   :  { %16081 = vmatprep.subr.bf16.mxu1 %v16609_v37  ;;  %v16037_v58 = vpack.c.bf16 %v13910_v1, %v13909_v25  ;;  %v13915_v33 = vld [vmem:[%s19904_s11 + $0x168] sm:$0xff]  ;;  %v13929_v41 = vld [vmem:[%s19904_s11 + $0x1c0] sm:$0xff]  ;;  %v12816_v16 = vld [vmem:[%s19906_s13 + $0x70] sm:$0xff] }
 0x877   :  { %v13920_v54 = vld [vmem:[%s19904_s11 + $0x188] sm:$0xff]  ;;  %v12817_v19 = vld [vmem:[%s19906_s13 + $0x78] sm:$0xff] }
 0x878   :  { %15993 = vmatpush3.bf16.msra.mxu0 %v15992_v18  ;;  %v13907_v18 = vld [vmem:[%s19904_s11 + $0x138] sm:$0xff]  ;;  %v13930_v57 = vld [vmem:[%s19904_s11 + $0x1c8] sm:$0xff] }
 0x879   :  { %15994 = vmatprep.subr.bf16.mxu0 %v16609_v37  ;;  %16083 = vmatpush3.bf16.msra.mxu1 %v16082_v63  ;;  %v16043_v63 = vpack.c.bf16 %v13915_v33, %v13914_v44 }
 0x87a   :  { %16084 = vmatprep.subr.bf16.mxu1 %v16609_v37 }
 0x87b   :  { %15525 = vmatmul.mubr.msk.f32.vlgmr.msra.gmra.mrb[62].mxu0 %vm132_vm0, %v11675_v24  ;;  %v13886_v24 = vld [vmem:[%s19904_s11 + $0xb0] sm:$0xff] }
 0x87c   :  { %15996 = vmatpush3.bf16.msra.mxu0 %v15995_v47  ;;  %15535 = vmatprep.mubr.msk.f32.mxu0 %vm16610_vm13, %v19939_v3 }
 0x87d   :  { %15997 = vmatprep.subr.bf16.mxu0 %v16609_v37  ;;  %16086 = vmatpush3.bf16.msra.mxu1 %v16085_v17  ;;  %v13922_v17 = vld [vmem:[%s19904_s11 + $0x198] sm:$0xff] }
 0x87e   :  { %16087 = vmatprep.subr.bf16.mxu1 %v16609_v37 }
 0x880   :  { %15999 = vmatpush3.bf16.msra.mxu0 %v15998_v52  ;;  %v13919_v52 = vld [vmem:[%s19904_s11 + $0x180] sm:$0xff] }
 0x881   :  { %16000 = vmatprep.subr.bf16.mxu0 %v16609_v37  ;;  %16089 = vmatpush3.bf16.msra.mxu1 %v16088_v45  ;;  %v16049_v22 = vpack.c.bf16 %v13920_v54, %v13919_v52 }
 0x882   :  { %16090 = vmatprep.subr.bf16.mxu1 %v16609_v37 }
 0x883   :  { %15536 = vmatmul.mubr.msk.f32.vlgmr.msra.gmra.mrb[62].mxu0 %vm132_vm0, %v19506_v13  ;;  %v13887_v13 = vld [vmem:[%s19904_s11 + $0xb8] sm:$0xff] }
 0x884   :  { %16002 = vmatpush3.bf16.msra.mxu0 %v16001_v27  ;;  %15546 = vmatprep.mubr.msk.f32.mxu0 %vm16610_vm13, %v19939_v3  ;;  %v16010_v14 = vpack.c.bf16 %v13887_v13, %v13886_v24  ;;  %v13925_v27 = vld [vmem:[%s19904_s11 + $0x1a8] sm:$0xff]  ;;  %v13937_v13 = vld [vmem:[%s19904_s11 + $0x1f8] sm:$0xff] }
 0x885   :  { %16003 = vmatprep.subr.bf16.mxu0 %v16609_v37  ;;  %16092 = vmatpush3.bf16.msra.mxu1 %v16091_v42  ;;  %v16055_v10 = vpack.c.bf16 %v13925_v27, %v13924_v20  ;;  %v13934_v42 = vld [vmem:[%s19904_s11 + $0x1e0] sm:$0xff] }
 0x886   :  { %16093 = vmatprep.subr.bf16.mxu1 %v16609_v37 }
 0x888   :  { %16005 = vmatpush3.bf16.msra.mxu0 %v16004_v21  ;;  %v16061_v21 = vpack.c.bf16 %v13930_v57, %v13929_v41 }
 0x889   :  { %16006 = vmatprep.subr.bf16.mxu0 %v16609_v37 }
 0x88b   :  { %15547 = vmatmul.mubr.msk.f32.vlgmr.msra.gmra.mrb[62].mxu0 %vm132_vm0, %v19514_v61  ;;  %v13891_v61 = vld [vmem:[%s19904_s11 + $0xd0] sm:$0xff] }
 0x88c   :  { %16008 = vmatpush3.bf16.msra.mxu0 %v16007_v40  ;;  %15557 = vmatprep.mubr.msk.f32.mxu0 %vm16610_vm13, %v19939_v3  ;;  %v16016_v48 = vpack.c.bf16 %v13892_v32, %v13891_v61  ;;  %v13935_v40 = vld [vmem:[%s19904_s11 + $0x1e8] sm:$0xff]  ;;  %v13862_v61 = vld [vmem:[%s19905_s12] ss:$0 sm:$0xff] }
 0x88d   :  { %16009 = vmatprep.subr.bf16.mxu0 %v16609_v37  ;;  %v16067_v24 = vpack.c.bf16 %v13935_v40, %v13934_v42 }
 0x890   :  { %16011 = vmatpush3.bf16.msra.mxu0 %v16010_v14 }
 0x891   :  { %16012 = vmatprep.subr.bf16.mxu0 %v16609_v37 }
 0x893   :  { %15558 = vmatmul.mubr.msk.f32.vlgmr.msra.gmra.mrb[62].mxu0 %vm132_vm0, %v19517_v15  ;;  %v13896_v15 = vld [vmem:[%s19904_s11 + $0xf0] sm:$0xff] }
 0x894   :  { %16014 = vmatpush3.bf16.msra.mxu0 %v16013_v34  ;;  %15568 = vmatprep.mubr.msk.f32.mxu0 %vm16610_vm13, %v19939_v3  ;;  %v16022_v4 = vpack.c.bf16 %v13897_v53, %v13896_v15  ;;  %v12895_v34 = vld [vmem:[%s19908_s15] sm:$0xff]  ;;  %v12898_v15 = vld [vmem:[%s19908_s15 + $0x18] sm:$0xff] }
 0x895   :  { %16015 = vmatprep.subr.bf16.mxu0 %v16609_v37 }
 0x898   :  { %16017 = vmatpush3.bf16.msra.mxu0 %v16016_v48 }
 0x899   :  { %16018 = vmatprep.subr.bf16.mxu0 %v16609_v37 }
 0x89b   :  { %15569 = vmatmul.mubr.msk.f32.vlgmr.msra.gmra.mrb[62].mxu0 %vm132_vm0, %v19520_v11  ;;  %v13901_v11 = vld [vmem:[%s19904_s11 + $0x110] sm:$0xff] }
 0x89c   :  { %16020 = vmatpush3.bf16.msra.mxu0 %v16019_v35  ;;  %15579 = vmatprep.mubr.msk.f32.mxu0 %vm16610_vm13, %v19939_v3  ;;  %v16028_v46 = vpack.c.bf16 %v13902_v26, %v13901_v11  ;;  %v12897_v35 = vld [vmem:[%s19908_s15 + $0x10] sm:$0xff] }
 0x89d   :  { %16021 = vmatprep.subr.bf16.mxu0 %v16609_v37  ;;  %v16100_v53 = vpack.c.bf16 %v12898_v15, %v12897_v35 }
 0x8a0   :  { %16023 = vmatpush3.bf16.msra.mxu0 %v16022_v4  ;;  %v13939_v4 = vld [vmem:[%s19907_s14] ss:$0 sm:$0xff] }
 0x8a1   :  { %16024 = vmatprep.subr.bf16.mxu0 %v16609_v37 }
 0x8a3   :  { %15580 = vmatmul.mubr.msk.f32.vlgmr.msra.gmra.mrb[62].mxu0 %vm132_vm0, %v19523_v51  ;;  %v13906_v51 = vld [vmem:[%s19904_s11 + $0x130] sm:$0xff] }
 0x8a4   :  { %16026 = vmatpush3.bf16.msra.mxu0 %v16025_v39  ;;  %15590 = vmatprep.mubr.msk.f32.mxu0 %vm16610_vm13, %v19939_v3  ;;  %v16034_v23 = vpack.c.bf16 %v13907_v18, %v13906_v51 }
 0x8a5   :  { %16027 = vmatprep.subr.bf16.mxu0 %v16609_v37 }
 0x8a8   :  { %16029 = vmatpush3.bf16.msra.mxu0 %v16028_v46 }
 0x8a9   :  { %16030 = vmatprep.subr.bf16.mxu0 %v16609_v37 }
 0x8ab   :  { %15591 = vmatmul.mubr.msk.f32.vlgmr.msra.gmra.mrb[62].mxu0 %vm132_vm0, %v19510_v9  ;;  %v13911_v9 = vld [vmem:[%s19904_s11 + $0x150] sm:$0xff] }
 0x8ac   :  { %16032 = vmatpush3.bf16.msra.mxu0 %v16031_v6  ;;  %15601 = vmatprep.mubr.msk.f32.mxu0 %vm16610_vm13, %v19939_v3  ;;  %v16040_v47 = vpack.c.bf16 %v13912_v29, %v13911_v9 }
 0x8ad   :  { %16033 = vmatprep.subr.bf16.mxu0 %v16609_v37 }
 0x8b0   :  { %16035 = vmatpush3.bf16.msra.mxu0 %v16034_v23 }
 0x8b1   :  { %16036 = vmatprep.subr.bf16.mxu0 %v16609_v37 }
 0x8b3   :  { %15602 = vmatmul.mubr.msk.f32.vlgmr.msra.gmra.mrb[62].mxu0 %vm132_vm0, %v19500_v60  ;;  %v13916_v60 = vld [vmem:[%s19904_s11 + $0x170] sm:$0xff] }
 0x8b4   :  { %16038 = vmatpush3.bf16.msra.mxu0 %v16037_v58  ;;  %15612 = vmatprep.mubr.msk.f32.mxu0 %vm16610_vm13, %v19939_v3  ;;  %v16046_v31 = vpack.c.bf16 %v13917_v2, %v13916_v60 }
 0x8b5   :  { %16039 = vmatprep.subr.bf16.mxu0 %v16609_v37 }
 0x8b8   :  { %16041 = vmatpush3.bf16.msra.mxu0 %v16040_v47 }
 0x8b9   :  { %16042 = vmatprep.subr.bf16.mxu0 %v16609_v37 }
 0x8bb   :  { %15613 = vmatmul.mubr.msk.f32.vlgmr.msra.gmra.mrb[62].mxu0 %vm132_vm0, %v19534_v59  ;;  %v13921_v59 = vld [vmem:[%s19904_s11 + $0x190] sm:$0xff] }
 0x8bc   :  { %16044 = vmatpush3.bf16.msra.mxu0 %v16043_v63  ;;  %15623 = vmatprep.mubr.msk.f32.mxu0 %vm16610_vm13, %v19939_v3  ;;  %v16052_v30 = vpack.c.bf16 %v13922_v17, %v13921_v59 }
 0x8bd   :  { %16045 = vmatprep.subr.bf16.mxu0 %v16609_v37 }
 0x8c0   :  { %16047 = vmatpush3.bf16.msra.mxu0 %v16046_v31 }
 0x8c1   :  { %16048 = vmatprep.subr.bf16.mxu0 %v16609_v37 }
 0x8c3   :  { %15624 = vmatmul.mubr.msk.f32.vlgmr.msra.gmra.mrb[62].mxu0 %vm132_vm0, %v19537_v56  ;;  %v13926_v56 = vld [vmem:[%s19904_s11 + $0x1b0] sm:$0xff] }
 0x8c4   :  { %16050 = vmatpush3.bf16.msra.mxu0 %v16049_v22  ;;  %15634 = vmatprep.mubr.msk.f32.mxu0 %vm16610_vm13, %v19939_v3  ;;  %v16058_v45 = vpack.c.bf16 %v13927_v50, %v13926_v56 }
 0x8c5   :  { %16051 = vmatprep.subr.bf16.mxu0 %v16609_v37 }
 0x8c8   :  { %16053 = vmatpush3.bf16.msra.mxu0 %v16052_v30 }
 0x8c9   :  { %16054 = vmatprep.subr.bf16.mxu0 %v16609_v37 }
 0x8cb   :  { %15635 = vmatmul.mubr.msk.f32.vlgmr.msra.gmra.mrb[62].mxu0 %vm132_vm0, %v19549_v0  ;;  %v13931_v0 = vld [vmem:[%s19904_s11 + $0x1d0] sm:$0xff] }
 0x8cc   :  { %16056 = vmatpush3.bf16.msra.mxu0 %v16055_v10  ;;  %15645 = vmatprep.mubr.msk.f32.mxu0 %vm16610_vm13, %v19939_v3  ;;  %v16064_v5 = vpack.c.bf16 %v13932_v49, %v13931_v0 }
 0x8cd   :  { %16057 = vmatprep.subr.bf16.mxu0 %v16609_v37 }
 0x8d0   :  { %16059 = vmatpush3.bf16.msra.mxu0 %v16058_v45 }
 0x8d1   :  { %16060 = vmatprep.subr.bf16.mxu0 %v16609_v37 }
 0x8d3   :  { %15646 = vmatmul.mubr.msk.f32.vlgmr.msra.gmra.mrb[62].mxu0 %vm132_vm0, %v19552_v36  ;;  %v13936_v36 = vld [vmem:[%s19904_s11 + $0x1f0] sm:$0xff] }
 0x8d4   :  { %16062 = vmatpush3.bf16.msra.mxu0 %v16061_v21  ;;  %15656 = vmatprep.mubr.msk.f32.mxu0 %vm16610_vm13, %v19939_v3  ;;  %v16070_v14 = vpack.c.bf16 %v13937_v13, %v13936_v36 }
 0x8d5   :  { %16063 = vmatprep.subr.bf16.mxu0 %v16609_v37 }
 0x8d8   :  { %16065 = vmatpush3.bf16.msra.mxu0 %v16064_v5 }
 0x8d9   :  { %16066 = vmatprep.subr.bf16.mxu0 %v16609_v37 }
 0x8db   :  { %15657 = vmatmul.mubr.msk.f32.vlgmr.msra.gmra.mrb[62].mxu0 %vm132_vm0, %v19561_v38  ;;  %v16094_v38 = vpack.c.bf16 %v12817_v19, %v12816_v16 }
 0x8dc   :  { %16068 = vmatpush3.bf16.msra.mxu0 %v16067_v24  ;;  %15667 = vmatprep.mubr.msk.f32.mxu0 %vm16610_vm13, %v19939_v3 }
 0x8dd   :  { %16069 = vmatprep.subr.bf16.mxu0 %v16609_v37  ;;  %16095 = vmatpush3.bf16.msra.mxu1 %v16094_v38 }
 0x8de   :  { %16096 = vmatprep.subr.bf16.mxu1 %v16609_v37 }
 0x8e0   :  { %16071 = vmatpush3.bf16.msra.mxu0 %v16070_v14 }
 0x8e3   :  { %15668 = vmatmul.mubr.msk.f32.vlgmr.msra.gmra.mrb[62].mxu0 %vm132_vm0, %v19564_v43  ;;  %v12896_v43 = vld [vmem:[%s19908_s15 + $0x8] sm:$0xff]  ;;  %s16611_s15 = smov [#allocation6]  }
 0x8e4   :  { %v16097_v48 = vpack.c.bf16 %v12896_v43, %v12895_v34  ;;  %s12993_s14 = sshll.u32 %s16611_s15, 4  ;;  %s12994_s14 = int_to_ptr.vmem [resolvable:$true] %s12993_s14 }
 0x8e5   :  { %s16583_s21 = scalar_lea.vmem %s12994_s14, 32  ;;  %p16588_p1 = scmp.lt.s32.totalorder %s12994_s14, %s12994_s14 }
 0x8e6   :  { %p16584_p0 = scmp.ne.s32.totalorder %s12994_s14, %s16583_s21  ;;  %p16589_p2 = scmp.lt.s32.totalorder %s16583_s21, %s16583_s21 }
 0x8e8   :  { %p16590_p3 = por %p16589_p2, %p16588_p1 }
 0x8ea   :  { %p16591_p4 = pnand %p16590_p3, %p16584_p0 }
 0x9b6   :  { %v12797_v32 = vpop.f32.mrb[62].mxu0 }
 0x9b7   :  { %v16146_v28 = vadd.f32 %v13862_v61, %v12797_v32  ;;  %v15669_v8 = vpop.f32.mrb[63].mxu0 }
 0x9b9   :  { %15703 = vmatmul.mubr.f32.vlgmr.msra.gmra.mrb[42].mxu1 %v16146_v28 }
 0x9ba   :  { %16098 = vmatpush3.bf16.msra.mxu1 %v16097_v48  ;;  %15713 = vmatprep.mubr.msk.f32.mxu1 %vm16610_vm13, %v19939_v3  ;;  %v13940_v3 = vld [vmem:[%s19909_s16] ss:$0 sm:$0xff] }
 0x9bb   :  { %16099 = vmatprep.subr.bf16.mxu1 %v16609_v37 }
 0x9be   :  { %16101 = vmatpush3.bf16.msra.mxu1 %v16100_v53 }
 0xa8c   :  { %v12891_v55 = vpop.f32.mrb[42].mxu1 }
 0xa8d   :  { %v12892_v7 = vadd.f32 %v13939_v4, %v12891_v55  ;;  %v15704_v39 = vpop.f32.mrb[43].mxu1 }
 0xa8f   :  { %15714 = vmatmul.mubr.msk.f32.vlgmr.msra.gmra.mrb[44].mxu1 %vm132_vm0, %v12892_v7 }
 0xb62   :  { %v12975_v37 = vpop.f32.mrb[44].mxu1 }
 0xb63   :  { %v12976_v11 = vadd.f32 %v13940_v3, %v12975_v37  ;;  %v15715_v26 = vpop.f32.mrb[45].mxu1 }
 0xb65   :  { %v12979_v46 = vsub.f32 0.0, %v12976_v11 }
 0xb67   :  { %v12980_v62 = vmul.f32 1.442695, %v12979_v46 }
 0xb69   :  { %16574 = vpow2.f32 %v12980_v62 }
 0xb73   :  { %v16575_v12 = vpop.eup %16574 }
 0xb74   :  { %v12982_v6 = vadd.f32 1.0, %v16575_v12 }
 0xb76   :  { %16576 = vrcp.f32 %v12982_v6 }
 0xb80   :  { %v16577_v51 = vpop.eup %16576 }
 0xb81   :  { %12986 = vst.msk [vmem:[#allocation6] sm:$0x3] %vm12985_vm14, %v16577_v51 }
 0xb82   :  { %16594 = shalt.err (!%p16591_p4)
}
 0xb83   :  { %s16595_s22 = scalar_lea.hbm %s19910_s17, 32 }
 0xb84   :  { %p16596_p5 = scmp.ne.s32.totalorder %s19910_s17, %s16595_s22  ;;  %p16599_p6 = scmp.lt.u32.totalorder %s16595_s22, %s19910_s17 }
 0xb86   :  { %p16601_p7 = pnand %p16599_p6, %p16596_p5 }
 0xb88   :  { %16604 = shalt.err (!%p16601_p7)
}
 0xb89   :  { %12996 = dma.vmem_to_hbm [thread:$0]  %s12994_s14, 32, %s19910_s17, [#allocation7]  }
 0xb8a   :  { %16605 = dma.done.wait [#allocation7], 32  }
 0xb8b   :  { %16606 = vsyncadd [#allocation7], 4294967264 }
 0xb8c   :  { %13000 = vsyncpa [#allocation7], 1 }

</bundles_post_ra>
